<compile_context>
chip_gen: v7x
topology: tpu7x:2x2x1
jax: 0.10.0
libtpu: 0.0.40
codegen_flags: <defaults>
</compile_context>

<pallas_src>
import numpy as np
import jax
import jax.numpy as jnp
from jax.experimental import pallas as pl
from jax.experimental.pallas import tpu as pltpu


# --- padded-grid geometry for the fused stage-2 conv -----------------------
# Stage-1 pooled output (14x14) is embedded at grid positions (gh, gw) in
# 1..14 of a zero-padded 16x16 grid, flattened row-major, and placed at rows
# MARGIN + gh*16 + gw of a (PBUF, 128) slice of the f1 VMEM buffer.  A 3x3
# conv tap (dh, dw) is then the static row window [MARGIN + 16*dh + dw, +256).
GRID = 16                      # padded spatial grid side (14 + 2 halo)
PGRID = GRID * GRID            # 256 rows on the padded grid
MARGIN = 31                    # top margin rows (>= 17; interior stores 16-aligned)
PBUF = MARGIN + PGRID + 17     # 304 buffer rows (bottom margin = 17)


# ---------------------------------------------------------------------------
# Kernels
# ---------------------------------------------------------------------------

def conv_stages_kernel(p1_ref, w1_ref, s1_ref, b1_ref,
                       w2_ref, s2_ref, b2_ref, pool2_ref,
                       o_ref, f1_ref):
    """conv1+BN+ReLU+pool -> conv2+BN+ReLU+pool for one nb-element block."""
    nb = o_ref.shape[0]

    # Halo / margin rows of the padded grids must be zero for conv2 padding;
    # zero the whole buffer every step (cheap, and safe under megacore where
    # program_id(0)==0 only runs on one core).
    f1_ref[...] = jnp.zeros(f1_ref.shape, f1_ref.dtype)

    # ---- stage 1: conv1 as one batched im2col matmul + folded BN + ReLU ----
    y1 = jnp.dot(p1_ref[...], w1_ref[...],
                 preferred_element_type=jnp.float32)           # (nb*784, 128)
    y1 = jnp.maximum(y1 * s1_ref[...] + b1_ref[...], 0.0)

    # ---- avgpool 28->14 on the VPU (pool members are blocked along rows) ---
    # row layout per element: member*196 + (oh*14 + ow), member = di*2 + dj.
    for n in range(nb):
        b0 = n * 784
        pooled = 0.25 * (y1[b0:b0 + 196] + y1[b0 + 196:b0 + 392]
                         + y1[b0 + 392:b0 + 588] + y1[b0 + 588:b0 + 784])
        pooled = pooled.astype(jnp.bfloat16)                   # (196, 128)
        # scatter the 14 interior row-blocks onto the zero-padded grid
        for oh in range(14):
            dst = MARGIN + (oh + 1) * GRID + 1                 # 16-row aligned
            f1_ref[n, dst:dst + 14, :] = pooled[oh * 14:(oh + 1) * 14, :]

    # ---- stage 2: in-VMEM im2col (9 shifted row windows), batched matmul ---
    taps = []
    for t in range(9):
        dh, dw = t // 3 - 1, t % 3 - 1
        start = MARGIN + dh * GRID + dw
        taps.append(f1_ref[:, start:start + PGRID, :].reshape(nb * PGRID, 128))
    patches2 = jnp.concatenate(taps, axis=1)                   # (nb*256, 1152)

    y2 = jnp.dot(patches2, w2_ref[...],
                 preferred_element_type=jnp.float32)           # (nb*256, 128)
    y2 = jnp.maximum(y2 * s2_ref[...] + b2_ref[...], 0.0)
    y2 = y2.astype(jnp.bfloat16)

    # ---- avgpool 14->7 (tiny) as a per-element matmul over the grid rows ---
    pool2 = pool2_ref[...]                                     # (49, 256) bf16
    for n in range(nb):
        f2 = jnp.dot(pool2, y2[n * PGRID:(n + 1) * PGRID, :],
                     preferred_element_type=jnp.float32)       # (49, 128)
        o_ref[n] = f2.astype(o_ref.dtype)


def fc_kernel(x_ref, w1_ref, b1_ref, w2_ref, b2_ref, o_ref):
    """One (M-tile, hidden-slice) step; partial fc2 products accumulate
    in-kernel into the VMEM-resident output block."""
    j = pl.program_id(1)
    h = jnp.dot(x_ref[...], w1_ref[...], preferred_element_type=jnp.float32)
    h = jnp.maximum(h + b1_ref[...], 0.0)                      # (TM, Hh) f32
    part = jnp.dot(h.astype(jnp.bfloat16), w2_ref[...],
                   preferred_element_type=jnp.float32)         # (TM, 128) f32

    @pl.when(j == 0)
    def _():
        o_ref[...] = part + b2_ref[...]

    @pl.when(j != 0)
    def _():
        o_ref[...] = o_ref[...] + part


# ---------------------------------------------------------------------------
# Pallas wrappers
# ---------------------------------------------------------------------------

def _pick_nb(n):
    """Batch elements per conv grid step; keep the grid length >= 2."""
    for d in (4, 2, 1):
        if n % d == 0 and n // d >= 2:
            return d
    return 1


def _pick_tm(n):
    """fc M-tile size (bounds VMEM; keeps output lane-dense per tile)."""
    if n % 8 == 0:
        for tm in (256, 128, 64, 32, 16, 8):
            if n % tm == 0:
                return tm
    return n


def conv_stages(p1, w1, s1, b1, w2, s2, b2, pool2):
    n = p1.shape[0] // 784
    nb = _pick_nb(n)
    flops = 2 * n * (784 * 9 * 128 + PGRID * 1152 * 128 + 49 * PGRID * 128)
    bytes_acc = (n * (784 * 9 + 49 * 128) * 2
                 + (9 * 128 + 1152 * 128 + 49 * PGRID) * 2 + 4 * 128 * 4)
    return pl.pallas_call(
        conv_stages_kernel,
        out_shape=jax.ShapeDtypeStruct((n, 49, 128), jnp.bfloat16),
        grid_spec=pltpu.PrefetchScalarGridSpec(
            num_scalar_prefetch=0,
            grid=(n // nb,),
            in_specs=[
                pl.BlockSpec((nb * 784, 9), lambda i: (i, 0)),
                pl.BlockSpec((9, 128), lambda i: (0, 0)),
                pl.BlockSpec((1, 128), lambda i: (0, 0)),
                pl.BlockSpec((1, 128), lambda i: (0, 0)),
                pl.BlockSpec((9 * 128, 128), lambda i: (0, 0)),
                pl.BlockSpec((1, 128), lambda i: (0, 0)),
                pl.BlockSpec((1, 128), lambda i: (0, 0)),
                pl.BlockSpec((49, PGRID), lambda i: (0, 0)),
            ],
            out_specs=pl.BlockSpec((nb, 49, 128), lambda i: (i, 0, 0)),
            scratch_shapes=[pltpu.VMEM((nb, PBUF, 128), jnp.bfloat16)],
        ),
        compiler_params=pltpu.CompilerParams(
            dimension_semantics=("parallel",),
            vmem_limit_bytes=32 * 1024 * 1024),
        cost_estimate=pl.CostEstimate(flops=flops, transcendentals=0,
                                      bytes_accessed=bytes_acc),
    )(p1, w1, s1, b1, w2, s2, b2, pool2)


def fc_head(x, w1p, b1, w2p, b2p):
    """Linear(6272,1024)+ReLU+Linear(1024,10 padded to 128); M-tiled with the
    hidden split as an inner accumulating grid axis."""
    n, k = x.shape
    h = w1p.shape[1]
    n_split = 2
    hh = h // n_split
    tm = _pick_tm(n)
    flops = 2 * n * (k * h + h * 128)
    bytes_acc = n * k * 2 + k * h * 2 + h * 128 * 2 + n * 128 * 4
    return pl.pallas_call(
        fc_kernel,
        out_shape=jax.ShapeDtypeStruct((n, 128), jnp.float32),
        grid_spec=pltpu.PrefetchScalarGridSpec(
            num_scalar_prefetch=0,
            grid=(n // tm, n_split),
            in_specs=[
                pl.BlockSpec((tm, k), lambda m, j: (m, 0)),     # activations
                pl.BlockSpec((k, hh), lambda m, j: (0, j)),     # fc1 W slice
                pl.BlockSpec((1, hh), lambda m, j: (0, j)),     # fc1 b slice
                pl.BlockSpec((hh, 128), lambda m, j: (j, 0)),   # fc2 W slice (padded)
                pl.BlockSpec((1, 128), lambda m, j: (0, 0)),    # fc2 b (padded)
            ],
            out_specs=pl.BlockSpec((tm, 128), lambda m, j: (m, 0)),
        ),
        compiler_params=pltpu.CompilerParams(
            dimension_semantics=("parallel", "arbitrary"),
            vmem_limit_bytes=32 * 1024 * 1024),
        cost_estimate=pl.CostEstimate(flops=flops, transcendentals=0,
                                      bytes_accessed=bytes_acc),
    )(x, w1p, b1, w2p, b2p)


# ---------------------------------------------------------------------------
# Glue: pool-ordered im2col, pool2 matrix, one-time parameter packing
# ---------------------------------------------------------------------------

def im2col_pool_order(x_nhwc):
    """(N,28,28,1) -> (N*784, 9) with per-element row index
    (di*2+dj)*196 + oh*14 + ow  <->  pixel (2*oh+di, 2*ow+dj), tap = kh*3+kw.
    (The blocked member order lets the kernel do the 2x2 avgpool with three
    contiguous-slice adds instead of an MXU matmul.)"""
    n = x_nhwc.shape[0]
    xp = jnp.pad(x_nhwc, ((0, 0), (1, 1), (1, 1), (0, 0)))
    taps = [xp[:, kh:kh + 28, kw:kw + 28, 0]
            for kh in range(3) for kw in range(3)]
    t = jnp.stack(taps, axis=-1)                               # (N,28,28,9)
    t = t.reshape(n, 14, 2, 14, 2, 9).transpose(0, 2, 4, 1, 3, 5)
    return t.reshape(n * 784, 9)


def pool2_padded_matrix():
    """(49, PGRID): avgpool 14x14 -> 7x7 reading the conv2 output that lives
    on the padded 16x16 grid (only interior positions (h+1, w+1) are read)."""
    m = np.zeros((49, PGRID), np.float32)
    for oh in range(7):
        for ow in range(7):
            for di in range(2):
                for dj in range(2):
                    h, w = 2 * oh + di, 2 * ow + dj
                    m[oh * 7 + ow, (h + 1) * GRID + (w + 1)] = 0.25
    return m


def fold_bn(conv_bias, gamma, beta, mean, var, eps=1e-5):
    scale = gamma / jnp.sqrt(var + eps)
    bias = beta + (conv_bias - mean) * scale
    return (scale.reshape(1, -1).astype(jnp.float32),
            bias.reshape(1, -1).astype(jnp.float32))


def pack_params(p):
    """One-time packing into kernel layout/dtype (outside the jitted forward)."""
    bf16 = jnp.bfloat16
    # conv weights -> im2col column matrices (row index = tap*Cin + cin)
    w1_col = jnp.transpose(p["w_conv1"], (2, 3, 1, 0)).reshape(9, 128).astype(bf16)
    w2_col = jnp.transpose(p["w_conv2"], (2, 3, 1, 0)).reshape(9 * 128, 128).astype(bf16)
    s1, b1 = fold_bn(p["b_conv1"], p["bn1_gamma"], p["bn1_beta"],
                     p["bn1_mean"], p["bn1_var"])
    s2, b2 = fold_bn(p["b_conv2"], p["bn2_gamma"], p["bn2_beta"],
                     p["bn2_mean"], p["bn2_var"])
    # fc1: PyTorch weight (1024, 6272) indexes inputs as c*49 + hw (NCHW
    # flatten).  Kernel feature layout is hw*128 + c, so permute the rows once.
    w1t = jnp.transpose(p["w_fc1"])                            # (6272, 1024)
    idx = np.arange(7 * 7 * 128)
    perm = (idx % 128) * 49 + (idx // 128)
    w_fc1p = jnp.take(w1t, jnp.asarray(perm), axis=0).astype(bf16)
    b_fc1 = p["b_fc1"].reshape(1, -1).astype(jnp.float32)
    # fc2: zero-pad the 10 outputs to 128 lanes (sliced back outside).
    w_fc2p = jnp.zeros((1024, 128), bf16).at[:, :10].set(
        jnp.transpose(p["w_fc2"]).astype(bf16))
    b_fc2p = jnp.zeros((1, 128), jnp.float32).at[0, :10].set(
        p["b_fc2"].astype(jnp.float32))
    return {
        "w1_col": w1_col, "s1": s1, "b1": b1,
        "w2_col": w2_col, "s2": s2, "b2": b2,
        "pool2": jnp.asarray(pool2_padded_matrix(), bf16),
        "w_fc1p": w_fc1p, "b_fc1": b_fc1,
        "w_fc2p": w_fc2p, "b_fc2p": b_fc2p,
    }


def init_params(key):
    ks = jax.random.split(key, 16)
    p = {}
    # conv1: Conv2d(1, 128, 3, padding=1)
    p["w_conv1"] = 0.1 * jax.random.normal(ks[0], (128, 1, 3, 3), jnp.float32)
    p["b_conv1"] = 0.05 * jax.random.normal(ks[1], (128,), jnp.float32)
    p["bn1_gamma"] = 1.0 + 0.1 * jax.random.normal(ks[2], (128,), jnp.float32)
    p["bn1_beta"] = 0.1 * jax.random.normal(ks[3], (128,), jnp.float32)
    p["bn1_mean"] = 0.05 * jax.random.normal(ks[4], (128,), jnp.float32)
    p["bn1_var"] = 1.0 + 0.1 * jax.random.uniform(ks[5], (128,), jnp.float32)
    # conv2: Conv2d(128, 128, 3, padding=1)
    p["w_conv2"] = 0.03 * jax.random.normal(ks[6], (128, 128, 3, 3), jnp.float32)
    p["b_conv2"] = 0.05 * jax.random.normal(ks[7], (128,), jnp.float32)
    p["bn2_gamma"] = 1.0 + 0.1 * jax.random.normal(ks[8], (128,), jnp.float32)
    p["bn2_beta"] = 0.1 * jax.random.normal(ks[9], (128,), jnp.float32)
    p["bn2_mean"] = 0.05 * jax.random.normal(ks[10], (128,), jnp.float32)
    p["bn2_var"] = 1.0 + 0.1 * jax.random.uniform(ks[11], (128,), jnp.float32)
    # fc1: Linear(6272, 1024), fc2: Linear(1024, 10)  (PyTorch weight is (out,in))
    p["w_fc1"] = 0.02 * jax.random.normal(ks[12], (1024, 7 * 7 * 128), jnp.float32)
    p["b_fc1"] = 0.05 * jax.random.normal(ks[13], (1024,), jnp.float32)
    p["w_fc2"] = 0.02 * jax.random.normal(ks[14], (10, 1024), jnp.float32)
    p["b_fc2"] = 0.05 * jax.random.normal(ks[15], (10,), jnp.float32)
    return p


def mnist_convnet_forward(x, pk):
    """x: (N, 1, 28, 28) float32 (NCHW, as in PyTorch). Returns (N, 10) f32.
    bf16 matmul operands => small deviation from an f32 PyTorch reference."""
    n = x.shape[0]
    x_nhwc = jnp.transpose(x, (0, 2, 3, 1))                    # (N,28,28,1)
    p1 = im2col_pool_order(x_nhwc).astype(jnp.bfloat16)        # (N*784, 9)
    f2 = conv_stages(p1, pk["w1_col"], pk["s1"], pk["b1"],
                     pk["w2_col"], pk["s2"], pk["b2"], pk["pool2"])  # (N,49,128)
    flat = f2.reshape(n, 7 * 7 * 128)        # contiguous; fc1 rows pre-permuted
    out = fc_head(flat, pk["w_fc1p"], pk["b_fc1"], pk["w_fc2p"], pk["b_fc2p"])
    return out[:, :10]                                          # drop lane padding


# ---------------------------------------------------------------------------
# Main
# ---------------------------------------------------------------------------

if __name__ == "__main__":
    key = jax.random.PRNGKey(0)
    k_x, k_p = jax.random.split(key)

    # MNIST-shaped input (28x28 is required by the Linear(7*7*128, 1024) head)
    x = jax.random.normal(k_x, (2, 1, 28, 28), jnp.float32)
    params = init_params(k_p)
    packed = pack_params(params)        # one-time pack, outside jit

    fwd = jax.jit(mnist_convnet_forward)
    out = fwd(x, packed)
    out = jax.block_until_ready(out)

    assert out.shape == (2, 10), out.shape
    assert bool(jnp.all(jnp.isfinite(out)))
    print("KERNEL_OK")
</pallas_src>

<mosaic_0001>
module attributes {stable_mosaic.version = 11 : i64} {
  func.func @conv_stages_kernel(%arg0: i32, %arg1: memref<784x9xbf16, #tpu.memory_space<vmem>>, %arg2: memref<9x128xbf16, #tpu.memory_space<vmem>>, %arg3: memref<1x128xf32, #tpu.memory_space<vmem>>, %arg4: memref<1x128xf32, #tpu.memory_space<vmem>>, %arg5: memref<1152x128xbf16, #tpu.memory_space<vmem>>, %arg6: memref<1x128xf32, #tpu.memory_space<vmem>>, %arg7: memref<1x128xf32, #tpu.memory_space<vmem>>, %arg8: memref<49x256xbf16, #tpu.memory_space<vmem>>, %arg9: memref<1x49x128xbf16, #tpu.memory_space<vmem>>, %arg10: memref<1x304x128xbf16, #tpu.memory_space<vmem>>) attributes {dimension_semantics = [#tpu.dimension_semantics<parallel>], iteration_bounds = array<i64: 2>, scalar_prefetch = 0 : i64, scratch_operands = 1 : i64, tpu.core_type = #tpu.core_type<tc>, window_params = [{transform_indices = @transform_0, window_bounds = array<i64: 784, 9>}, {pipeline_mode = #tpu.pipeline_mode<synchronous>, transform_indices = @transform_1, window_bounds = array<i64: 9, 128>}, {pipeline_mode = #tpu.pipeline_mode<synchronous>, transform_indices = @transform_2, window_bounds = array<i64: 1, 128>}, {pipeline_mode = #tpu.pipeline_mode<synchronous>, transform_indices = @transform_3, window_bounds = array<i64: 1, 128>}, {pipeline_mode = #tpu.pipeline_mode<synchronous>, transform_indices = @transform_4, window_bounds = array<i64: 1152, 128>}, {pipeline_mode = #tpu.pipeline_mode<synchronous>, transform_indices = @transform_5, window_bounds = array<i64: 1, 128>}, {pipeline_mode = #tpu.pipeline_mode<synchronous>, transform_indices = @transform_6, window_bounds = array<i64: 1, 128>}, {pipeline_mode = #tpu.pipeline_mode<synchronous>, transform_indices = @transform_7, window_bounds = array<i64: 49, 256>}, {transform_indices = @transform_8, window_bounds = array<i64: 1, 49, 128>}]} {
    %cst = arith.constant 0.000000e+00 : bf16
    %0 = vector.broadcast %cst : bf16 to vector<1x304x128xbf16>
    %c0 = arith.constant 0 : index
    %c0_0 = arith.constant 0 : index
    %c0_1 = arith.constant 0 : index
    %1 = vector.load %arg10[%c0, %c0_0, %c0_1] : memref<1x304x128xbf16, #tpu.memory_space<vmem>>, vector<1x304x128xbf16>
    tpu.vector_store %arg10[%c0, %c0_0, %c0_1], %0 {strides = array<i32>} : memref<1x304x128xbf16, #tpu.memory_space<vmem>>, vector<1x304x128xbf16>,
    %c0_2 = arith.constant 0 : index
    %c0_3 = arith.constant 0 : index
    %2 = vector.load %arg1[%c0_2, %c0_3] : memref<784x9xbf16, #tpu.memory_space<vmem>>, vector<784x9xbf16>
    %c0_4 = arith.constant 0 : index
    %c0_5 = arith.constant 0 : index
    %3 = vector.load %arg2[%c0_4, %c0_5] : memref<9x128xbf16, #tpu.memory_space<vmem>>, vector<9x128xbf16>
    %cst_6 = arith.constant dense<0.000000e+00> : vector<784x128xf32>
    %4 = tpu.matmul %2, %3, %cst_6 {dimension_numbers = #tpu.dot_dimension_numbers<[1], [0], [0], [1], [0, 0, 1, 1], [], []>} : vector<784x9xbf16>, vector<9x128xbf16>, vector<784x128xf32> -> vector<784x128xf32>
    %c0_7 = arith.constant 0 : index
    %c0_8 = arith.constant 0 : index
    %5 = vector.load %arg3[%c0_7, %c0_8] : memref<1x128xf32, #tpu.memory_space<vmem>>, vector<1x128xf32>
    %6 = vector.broadcast %5 : vector<1x128xf32> to vector<784x128xf32>
    %7 = arith.mulf %4, %6 : vector<784x128xf32>
    %c0_9 = arith.constant 0 : index
    %c0_10 = arith.constant 0 : index
    %8 = vector.load %arg4[%c0_9, %c0_10] : memref<1x128xf32, #tpu.memory_space<vmem>>, vector<1x128xf32>
    %9 = vector.broadcast %8 : vector<1x128xf32> to vector<784x128xf32>
    %10 = arith.addf %7, %9 : vector<784x128xf32>
    %cst_11 = arith.constant 0.000000e+00 : f32
    %11 = vector.broadcast %cst_11 : f32 to vector<784x128xf32>
    %12 = arith.maximumf %10, %11 : vector<784x128xf32>
    %13 = vector.extract_strided_slice %12 {offsets = [0, 0], sizes = [196, 128], strides = [1, 1]} : vector<784x128xf32> to vector<196x128xf32>
    %14 = vector.extract_strided_slice %12 {offsets = [196, 0], sizes = [196, 128], strides = [1, 1]} : vector<784x128xf32> to vector<196x128xf32>
    %15 = arith.addf %13, %14 : vector<196x128xf32>
    %16 = vector.extract_strided_slice %12 {offsets = [392, 0], sizes = [196, 128], strides = [1, 1]} : vector<784x128xf32> to vector<196x128xf32>
    %17 = arith.addf %15, %16 : vector<196x128xf32>
    %18 = vector.extract_strided_slice %12 {offsets = [588, 0], sizes = [196, 128], strides = [1, 1]} : vector<784x128xf32> to vector<196x128xf32>
    %19 = arith.addf %17, %18 : vector<196x128xf32>
    %cst_12 = arith.constant 2.500000e-01 : f32
    %20 = vector.broadcast %cst_12 : f32 to vector<196x128xf32>
    %21 = arith.mulf %20, %19 : vector<196x128xf32>
    %22 = arith.truncf %21 : vector<196x128xf32> to vector<196x128xbf16>
    %23 = vector.extract_strided_slice %22 {offsets = [0, 0], sizes = [14, 128], strides = [1, 1]} : vector<196x128xbf16> to vector<14x128xbf16>
    %c0_13 = arith.constant 0 : index
    %c48 = arith.constant 48 : index
    %c0_14 = arith.constant 0 : index
    %24 = vector.load %arg10[%c0_13, %c48, %c0_14] : memref<1x304x128xbf16, #tpu.memory_space<vmem>>, vector<1x14x128xbf16>
    %25 = vector.shape_cast %24 : vector<1x14x128xbf16> to vector<14x128xbf16>
    %26 = vector.shape_cast %23 : vector<14x128xbf16> to vector<1x14x128xbf16>
    tpu.vector_store %arg10[%c0_13, %c48, %c0_14], %26 {strides = array<i32>} : memref<1x304x128xbf16, #tpu.memory_space<vmem>>, vector<1x14x128xbf16>,
    %27 = vector.extract_strided_slice %22 {offsets = [14, 0], sizes = [14, 128], strides = [1, 1]} : vector<196x128xbf16> to vector<14x128xbf16>
    %c0_15 = arith.constant 0 : index
    %c64 = arith.constant 64 : index
    %c0_16 = arith.constant 0 : index
    %28 = vector.load %arg10[%c0_15, %c64, %c0_16] : memref<1x304x128xbf16, #tpu.memory_space<vmem>>, vector<1x14x128xbf16>
    %29 = vector.shape_cast %28 : vector<1x14x128xbf16> to vector<14x128xbf16>
    %30 = vector.shape_cast %27 : vector<14x128xbf16> to vector<1x14x128xbf16>
    tpu.vector_store %arg10[%c0_15, %c64, %c0_16], %30 {strides = array<i32>} : memref<1x304x128xbf16, #tpu.memory_space<vmem>>, vector<1x14x128xbf16>,
    %31 = vector.extract_strided_slice %22 {offsets = [28, 0], sizes = [14, 128], strides = [1, 1]} : vector<196x128xbf16> to vector<14x128xbf16>
    %c0_17 = arith.constant 0 : index
    %c80 = arith.constant 80 : index
    %c0_18 = arith.constant 0 : index
    %32 = vector.load %arg10[%c0_17, %c80, %c0_18] : memref<1x304x128xbf16, #tpu.memory_space<vmem>>, vector<1x14x128xbf16>
    %33 = vector.shape_cast %32 : vector<1x14x128xbf16> to vector<14x128xbf16>
    %34 = vector.shape_cast %31 : vector<14x128xbf16> to vector<1x14x128xbf16>
    tpu.vector_store %arg10[%c0_17, %c80, %c0_18], %34 {strides = array<i32>} : memref<1x304x128xbf16, #tpu.memory_space<vmem>>, vector<1x14x128xbf16>,
    %35 = vector.extract_strided_slice %22 {offsets = [42, 0], sizes = [14, 128], strides = [1, 1]} : vector<196x128xbf16> to vector<14x128xbf16>
    %c0_19 = arith.constant 0 : index
    %c96 = arith.constant 96 : index
    %c0_20 = arith.constant 0 : index
    %36 = vector.load %arg10[%c0_19, %c96, %c0_20] : memref<1x304x128xbf16, #tpu.memory_space<vmem>>, vector<1x14x128xbf16>
    %37 = vector.shape_cast %36 : vector<1x14x128xbf16> to vector<14x128xbf16>
    %38 = vector.shape_cast %35 : vector<14x128xbf16> to vector<1x14x128xbf16>
    tpu.vector_store %arg10[%c0_19, %c96, %c0_20], %38 {strides = array<i32>} : memref<1x304x128xbf16, #tpu.memory_space<vmem>>, vector<1x14x128xbf16>,
    %39 = vector.extract_strided_slice %22 {offsets = [56, 0], sizes = [14, 128], strides = [1, 1]} : vector<196x128xbf16> to vector<14x128xbf16>
    %c0_21 = arith.constant 0 : index
    %c112 = arith.constant 112 : index
    %c0_22 = arith.constant 0 : index
    %40 = vector.load %arg10[%c0_21, %c112, %c0_22] : memref<1x304x128xbf16, #tpu.memory_space<vmem>>, vector<1x14x128xbf16>
    %41 = vector.shape_cast %40 : vector<1x14x128xbf16> to vector<14x128xbf16>
    %42 = vector.shape_cast %39 : vector<14x128xbf16> to vector<1x14x128xbf16>
    tpu.vector_store %arg10[%c0_21, %c112, %c0_22], %42 {strides = array<i32>} : memref<1x304x128xbf16, #tpu.memory_space<vmem>>, vector<1x14x128xbf16>,
    %43 = vector.extract_strided_slice %22 {offsets = [70, 0], sizes = [14, 128], strides = [1, 1]} : vector<196x128xbf16> to vector<14x128xbf16>
    %c0_23 = arith.constant 0 : index
    %c128 = arith.constant 128 : index
    %c0_24 = arith.constant 0 : index
    %44 = vector.load %arg10[%c0_23, %c128, %c0_24] : memref<1x304x128xbf16, #tpu.memory_space<vmem>>, vector<1x14x128xbf16>
    %45 = vector.shape_cast %44 : vector<1x14x128xbf16> to vector<14x128xbf16>
    %46 = vector.shape_cast %43 : vector<14x128xbf16> to vector<1x14x128xbf16>
    tpu.vector_store %arg10[%c0_23, %c128, %c0_24], %46 {strides = array<i32>} : memref<1x304x128xbf16, #tpu.memory_space<vmem>>, vector<1x14x128xbf16>,
    %47 = vector.extract_strided_slice %22 {offsets = [84, 0], sizes = [14, 128], strides = [1, 1]} : vector<196x128xbf16> to vector<14x128xbf16>
    %c0_25 = arith.constant 0 : index
    %c144 = arith.constant 144 : index
    %c0_26 = arith.constant 0 : index
    %48 = vector.load %arg10[%c0_25, %c144, %c0_26] : memref<1x304x128xbf16, #tpu.memory_space<vmem>>, vector<1x14x128xbf16>
    %49 = vector.shape_cast %48 : vector<1x14x128xbf16> to vector<14x128xbf16>
    %50 = vector.shape_cast %47 : vector<14x128xbf16> to vector<1x14x128xbf16>
    tpu.vector_store %arg10[%c0_25, %c144, %c0_26], %50 {strides = array<i32>} : memref<1x304x128xbf16, #tpu.memory_space<vmem>>, vector<1x14x128xbf16>,
    %51 = vector.extract_strided_slice %22 {offsets = [98, 0], sizes = [14, 128], strides = [1, 1]} : vector<196x128xbf16> to vector<14x128xbf16>
    %c0_27 = arith.constant 0 : index
    %c160 = arith.constant 160 : index
    %c0_28 = arith.constant 0 : index
    %52 = vector.load %arg10[%c0_27, %c160, %c0_28] : memref<1x304x128xbf16, #tpu.memory_space<vmem>>, vector<1x14x128xbf16>
    %53 = vector.shape_cast %52 : vector<1x14x128xbf16> to vector<14x128xbf16>
    %54 = vector.shape_cast %51 : vector<14x128xbf16> to vector<1x14x128xbf16>
    tpu.vector_store %arg10[%c0_27, %c160, %c0_28], %54 {strides = array<i32>} : memref<1x304x128xbf16, #tpu.memory_space<vmem>>, vector<1x14x128xbf16>,
    %55 = vector.extract_strided_slice %22 {offsets = [112, 0], sizes = [14, 128], strides = [1, 1]} : vector<196x128xbf16> to vector<14x128xbf16>
    %c0_29 = arith.constant 0 : index
    %c176 = arith.constant 176 : index
    %c0_30 = arith.constant 0 : index
    %56 = vector.load %arg10[%c0_29, %c176, %c0_30] : memref<1x304x128xbf16, #tpu.memory_space<vmem>>, vector<1x14x128xbf16>
    %57 = vector.shape_cast %56 : vector<1x14x128xbf16> to vector<14x128xbf16>
    %58 = vector.shape_cast %55 : vector<14x128xbf16> to vector<1x14x128xbf16>
    tpu.vector_store %arg10[%c0_29, %c176, %c0_30], %58 {strides = array<i32>} : memref<1x304x128xbf16, #tpu.memory_space<vmem>>, vector<1x14x128xbf16>,
    %59 = vector.extract_strided_slice %22 {offsets = [126, 0], sizes = [14, 128], strides = [1, 1]} : vector<196x128xbf16> to vector<14x128xbf16>
    %c0_31 = arith.constant 0 : index
    %c192 = arith.constant 192 : index
    %c0_32 = arith.constant 0 : index
    %60 = vector.load %arg10[%c0_31, %c192, %c0_32] : memref<1x304x128xbf16, #tpu.memory_space<vmem>>, vector<1x14x128xbf16>
    %61 = vector.shape_cast %60 : vector<1x14x128xbf16> to vector<14x128xbf16>
    %62 = vector.shape_cast %59 : vector<14x128xbf16> to vector<1x14x128xbf16>
    tpu.vector_store %arg10[%c0_31, %c192, %c0_32], %62 {strides = array<i32>} : memref<1x304x128xbf16, #tpu.memory_space<vmem>>, vector<1x14x128xbf16>,
    %63 = vector.extract_strided_slice %22 {offsets = [140, 0], sizes = [14, 128], strides = [1, 1]} : vector<196x128xbf16> to vector<14x128xbf16>
    %c0_33 = arith.constant 0 : index
    %c208 = arith.constant 208 : index
    %c0_34 = arith.constant 0 : index
    %64 = vector.load %arg10[%c0_33, %c208, %c0_34] : memref<1x304x128xbf16, #tpu.memory_space<vmem>>, vector<1x14x128xbf16>
    %65 = vector.shape_cast %64 : vector<1x14x128xbf16> to vector<14x128xbf16>
    %66 = vector.shape_cast %63 : vector<14x128xbf16> to vector<1x14x128xbf16>
    tpu.vector_store %arg10[%c0_33, %c208, %c0_34], %66 {strides = array<i32>} : memref<1x304x128xbf16, #tpu.memory_space<vmem>>, vector<1x14x128xbf16>,
    %67 = vector.extract_strided_slice %22 {offsets = [154, 0], sizes = [14, 128], strides = [1, 1]} : vector<196x128xbf16> to vector<14x128xbf16>
    %c0_35 = arith.constant 0 : index
    %c224 = arith.constant 224 : index
    %c0_36 = arith.constant 0 : index
    %68 = vector.load %arg10[%c0_35, %c224, %c0_36] : memref<1x304x128xbf16, #tpu.memory_space<vmem>>, vector<1x14x128xbf16>
    %69 = vector.shape_cast %68 : vector<1x14x128xbf16> to vector<14x128xbf16>
    %70 = vector.shape_cast %67 : vector<14x128xbf16> to vector<1x14x128xbf16>
    tpu.vector_store %arg10[%c0_35, %c224, %c0_36], %70 {strides = array<i32>} : memref<1x304x128xbf16, #tpu.memory_space<vmem>>, vector<1x14x128xbf16>,
    %71 = vector.extract_strided_slice %22 {offsets = [168, 0], sizes = [14, 128], strides = [1, 1]} : vector<196x128xbf16> to vector<14x128xbf16>
    %c0_37 = arith.constant 0 : index
    %c240 = arith.constant 240 : index
    %c0_38 = arith.constant 0 : index
    %72 = vector.load %arg10[%c0_37, %c240, %c0_38] : memref<1x304x128xbf16, #tpu.memory_space<vmem>>, vector<1x14x128xbf16>
    %73 = vector.shape_cast %72 : vector<1x14x128xbf16> to vector<14x128xbf16>
    %74 = vector.shape_cast %71 : vector<14x128xbf16> to vector<1x14x128xbf16>
    tpu.vector_store %arg10[%c0_37, %c240, %c0_38], %74 {strides = array<i32>} : memref<1x304x128xbf16, #tpu.memory_space<vmem>>, vector<1x14x128xbf16>,
    %75 = vector.extract_strided_slice %22 {offsets = [182, 0], sizes = [14, 128], strides = [1, 1]} : vector<196x128xbf16> to vector<14x128xbf16>
    %c0_39 = arith.constant 0 : index
    %c256 = arith.constant 256 : index
    %c0_40 = arith.constant 0 : index
    %76 = vector.load %arg10[%c0_39, %c256, %c0_40] : memref<1x304x128xbf16, #tpu.memory_space<vmem>>, vector<1x14x128xbf16>
    %77 = vector.shape_cast %76 : vector<1x14x128xbf16> to vector<14x128xbf16>
    %78 = vector.shape_cast %75 : vector<14x128xbf16> to vector<1x14x128xbf16>
    tpu.vector_store %arg10[%c0_39, %c256, %c0_40], %78 {strides = array<i32>} : memref<1x304x128xbf16, #tpu.memory_space<vmem>>, vector<1x14x128xbf16>,
    %c0_41 = arith.constant 0 : index
    %c14 = arith.constant 14 : index
    %c0_42 = arith.constant 0 : index
    %79 = vector.load %arg10[%c0_41, %c14, %c0_42] : memref<1x304x128xbf16, #tpu.memory_space<vmem>>, vector<1x256x128xbf16>
    %80 = vector.shape_cast %79 : vector<1x256x128xbf16> to vector<256x128xbf16>
    %c0_43 = arith.constant 0 : index
    %c15 = arith.constant 15 : index
    %c0_44 = arith.constant 0 : index
    %81 = vector.load %arg10[%c0_43, %c15, %c0_44] : memref<1x304x128xbf16, #tpu.memory_space<vmem>>, vector<1x256x128xbf16>
    %82 = vector.shape_cast %81 : vector<1x256x128xbf16> to vector<256x128xbf16>
    %c0_45 = arith.constant 0 : index
    %c16 = arith.constant 16 : index
    %c0_46 = arith.constant 0 : index
    %83 = vector.load %arg10[%c0_45, %c16, %c0_46] : memref<1x304x128xbf16, #tpu.memory_space<vmem>>, vector<1x256x128xbf16>
    %84 = vector.shape_cast %83 : vector<1x256x128xbf16> to vector<256x128xbf16>
    %c0_47 = arith.constant 0 : index
    %c30 = arith.constant 30 : index
    %c0_48 = arith.constant 0 : index
    %85 = vector.load %arg10[%c0_47, %c30, %c0_48] : memref<1x304x128xbf16, #tpu.memory_space<vmem>>, vector<1x256x128xbf16>
    %86 = vector.shape_cast %85 : vector<1x256x128xbf16> to vector<256x128xbf16>
    %c0_49 = arith.constant 0 : index
    %c31 = arith.constant 31 : index
    %c0_50 = arith.constant 0 : index
    %87 = vector.load %arg10[%c0_49, %c31, %c0_50] : memref<1x304x128xbf16, #tpu.memory_space<vmem>>, vector<1x256x128xbf16>
    %88 = vector.shape_cast %87 : vector<1x256x128xbf16> to vector<256x128xbf16>
    %c0_51 = arith.constant 0 : index
    %c32 = arith.constant 32 : index
    %c0_52 = arith.constant 0 : index
    %89 = vector.load %arg10[%c0_51, %c32, %c0_52] : memref<1x304x128xbf16, #tpu.memory_space<vmem>>, vector<1x256x128xbf16>
    %90 = vector.shape_cast %89 : vector<1x256x128xbf16> to vector<256x128xbf16>
    %c0_53 = arith.constant 0 : index
    %c46 = arith.constant 46 : index
    %c0_54 = arith.constant 0 : index
    %91 = vector.load %arg10[%c0_53, %c46, %c0_54] : memref<1x304x128xbf16, #tpu.memory_space<vmem>>, vector<1x256x128xbf16>
    %92 = vector.shape_cast %91 : vector<1x256x128xbf16> to vector<256x128xbf16>
    %c0_55 = arith.constant 0 : index
    %c47 = arith.constant 47 : index
    %c0_56 = arith.constant 0 : index
    %93 = vector.load %arg10[%c0_55, %c47, %c0_56] : memref<1x304x128xbf16, #tpu.memory_space<vmem>>, vector<1x256x128xbf16>
    %94 = vector.shape_cast %93 : vector<1x256x128xbf16> to vector<256x128xbf16>
    %c0_57 = arith.constant 0 : index
    %c48_58 = arith.constant 48 : index
    %c0_59 = arith.constant 0 : index
    %95 = vector.load %arg10[%c0_57, %c48_58, %c0_59] : memref<1x304x128xbf16, #tpu.memory_space<vmem>>, vector<1x256x128xbf16>
    %96 = vector.shape_cast %95 : vector<1x256x128xbf16> to vector<256x128xbf16>
    %97 = tpu.concatenate %80, %82, %84, %86, %88, %90, %92, %94, %96 in 1 : vector<256x128xbf16>, vector<256x128xbf16>, vector<256x128xbf16>, vector<256x128xbf16>, vector<256x128xbf16>, vector<256x128xbf16>, vector<256x128xbf16>, vector<256x128xbf16>, vector<256x128xbf16> -> vector<256x1152xbf16>
    %c0_60 = arith.constant 0 : index
    %c0_61 = arith.constant 0 : index
    %98 = vector.load %arg5[%c0_60, %c0_61] : memref<1152x128xbf16, #tpu.memory_space<vmem>>, vector<1152x128xbf16>
    %cst_62 = arith.constant dense<0.000000e+00> : vector<256x128xf32>
    %99 = tpu.matmul %97, %98, %cst_62 {dimension_numbers = #tpu.dot_dimension_numbers<[1], [0], [0], [1], [0, 0, 1, 1], [], []>} : vector<256x1152xbf16>, vector<1152x128xbf16>, vector<256x128xf32> -> vector<256x128xf32>
    %c0_63 = arith.constant 0 : index
    %c0_64 = arith.constant 0 : index
    %100 = vector.load %arg6[%c0_63, %c0_64] : memref<1x128xf32, #tpu.memory_space<vmem>>, vector<1x128xf32>
    %101 = vector.broadcast %100 : vector<1x128xf32> to vector<256x128xf32>
    %102 = arith.mulf %99, %101 : vector<256x128xf32>
    %c0_65 = arith.constant 0 : index
    %c0_66 = arith.constant 0 : index
    %103 = vector.load %arg7[%c0_65, %c0_66] : memref<1x128xf32, #tpu.memory_space<vmem>>, vector<1x128xf32>
    %104 = vector.broadcast %103 : vector<1x128xf32> to vector<256x128xf32>
    %105 = arith.addf %102, %104 : vector<256x128xf32>
    %cst_67 = arith.constant 0.000000e+00 : f32
    %106 = vector.broadcast %cst_67 : f32 to vector<256x128xf32>
    %107 = arith.maximumf %105, %106 : vector<256x128xf32>
    %108 = arith.truncf %107 : vector<256x128xf32> to vector<256x128xbf16>
    %c0_68 = arith.constant 0 : index
    %c0_69 = arith.constant 0 : index
    %109 = vector.load %arg8[%c0_68, %c0_69] : memref<49x256xbf16, #tpu.memory_space<vmem>>, vector<49x256xbf16>
    %cst_70 = arith.constant dense<0.000000e+00> : vector<49x128xf32>
    %110 = tpu.matmul %109, %108, %cst_70 {dimension_numbers = #tpu.dot_dimension_numbers<[1], [0], [0], [1], [0, 0, 1, 1], [], []>} : vector<49x256xbf16>, vector<256x128xbf16>, vector<49x128xf32> -> vector<49x128xf32>
    %111 = arith.truncf %110 : vector<49x128xf32> to vector<49x128xbf16>
    %c0_71 = arith.constant 0 : index
    %c0_72 = arith.constant 0 : index
    %c0_73 = arith.constant 0 : index
    %112 = vector.load %arg9[%c0_71, %c0_72, %c0_73] : memref<1x49x128xbf16, #tpu.memory_space<vmem>>, vector<1x49x128xbf16>
    %113 = vector.shape_cast %112 : vector<1x49x128xbf16> to vector<49x128xbf16>
    %114 = vector.shape_cast %111 : vector<49x128xbf16> to vector<1x49x128xbf16>
    tpu.vector_store %arg9[%c0_71, %c0_72, %c0_73], %114 {strides = array<i32>} : memref<1x49x128xbf16, #tpu.memory_space<vmem>>, vector<1x49x128xbf16>,
    return
  }
  func.func @transform_0(%arg0: i32) -> (i32, i32) {
    %c0_i32 = arith.constant 0 : i32
    %c0_i32_0 = arith.constant 0 : i32
    return %arg0, %c0_i32 : i32, i32
  }
  func.func @transform_1(%arg0: i32) -> (i32, i32) {
    %c0_i32 = arith.constant 0 : i32
    %c0_i32_0 = arith.constant 0 : i32
    %c0_i32_1 = arith.constant 0 : i32
    return %c0_i32, %c0_i32_0 : i32, i32
  }
  func.func @transform_2(%arg0: i32) -> (i32, i32) {
    %c0_i32 = arith.constant 0 : i32
    %c0_i32_0 = arith.constant 0 : i32
    %c0_i32_1 = arith.constant 0 : i32
    return %c0_i32, %c0_i32_0 : i32, i32
  }
  func.func @transform_3(%arg0: i32) -> (i32, i32) {
    %c0_i32 = arith.constant 0 : i32
    %c0_i32_0 = arith.constant 0 : i32
    %c0_i32_1 = arith.constant 0 : i32
    return %c0_i32, %c0_i32_0 : i32, i32
  }
  func.func @transform_4(%arg0: i32) -> (i32, i32) {
    %c0_i32 = arith.constant 0 : i32
    %c0_i32_0 = arith.constant 0 : i32
    %c0_i32_1 = arith.constant 0 : i32
    return %c0_i32, %c0_i32_0 : i32, i32
  }
  func.func @transform_5(%arg0: i32) -> (i32, i32) {
    %c0_i32 = arith.constant 0 : i32
    %c0_i32_0 = arith.constant 0 : i32
    %c0_i32_1 = arith.constant 0 : i32
    return %c0_i32, %c0_i32_0 : i32, i32
  }
  func.func @transform_6(%arg0: i32) -> (i32, i32) {
    %c0_i32 = arith.constant 0 : i32
    %c0_i32_0 = arith.constant 0 : i32
    %c0_i32_1 = arith.constant 0 : i32
    return %c0_i32, %c0_i32_0 : i32, i32
  }
  func.func @transform_7(%arg0: i32) -> (i32, i32) {
    %c0_i32 = arith.constant 0 : i32
    %c0_i32_0 = arith.constant 0 : i32
    %c0_i32_1 = arith.constant 0 : i32
    return %c0_i32, %c0_i32_0 : i32, i32
  }
  func.func @transform_8(%arg0: i32) -> (i32, i32, i32) {
    %c0_i32 = arith.constant 0 : i32
    %c0_i32_0 = arith.constant 0 : i32
    %c0_i32_1 = arith.constant 0 : i32
    return %arg0, %c0_i32, %c0_i32_0 : i32, i32, i32
  }
}

module attributes {stable_mosaic.version = 11 : i64} {
  func.func @fc_kernel(%arg0: i32, %arg1: i32, %arg2: memref<2x6272xbf16, #tpu.memory_space<vmem>>, %arg3: memref<6272x512xbf16, #tpu.memory_space<vmem>>, %arg4: memref<1x512xf32, #tpu.memory_space<vmem>>, %arg5: memref<512x128xbf16, #tpu.memory_space<vmem>>, %arg6: memref<1x128xf32, #tpu.memory_space<vmem>>, %arg7: memref<2x128xf32, #tpu.memory_space<vmem>>) attributes {dimension_semantics = [#tpu.dimension_semantics<parallel>, #tpu.dimension_semantics<arbitrary>], iteration_bounds = array<i64: 1, 2>, scalar_prefetch = 0 : i64, scratch_operands = 0 : i64, tpu.core_type = #tpu.core_type<tc>, window_params = [{transform_indices = @transform_0, window_bounds = array<i64: 2, 6272>}, {transform_indices = @transform_1, window_bounds = array<i64: 6272, 512>}, {transform_indices = @transform_2, window_bounds = array<i64: 1, 512>}, {transform_indices = @transform_3, window_bounds = array<i64: 512, 128>}, {pipeline_mode = #tpu.pipeline_mode<synchronous>, transform_indices = @transform_4, window_bounds = array<i64: 1, 128>}, {transform_indices = @transform_5, window_bounds = array<i64: 2, 128>}]} {
    %c0 = arith.constant 0 : index
    %c0_0 = arith.constant 0 : index
    %0 = vector.load %arg2[%c0, %c0_0] : memref<2x6272xbf16, #tpu.memory_space<vmem>>, vector<2x6272xbf16>
    %c0_1 = arith.constant 0 : index
    %c0_2 = arith.constant 0 : index
    %1 = vector.load %arg3[%c0_1, %c0_2] : memref<6272x512xbf16, #tpu.memory_space<vmem>>, vector<6272x512xbf16>
    %cst = arith.constant dense<0.000000e+00> : vector<2x512xf32>
    %2 = tpu.matmul %0, %1, %cst {dimension_numbers = #tpu.dot_dimension_numbers<[1], [0], [0], [1], [0, 0, 1, 1], [], []>} : vector<2x6272xbf16>, vector<6272x512xbf16>, vector<2x512xf32> -> vector<2x512xf32>
    %c0_3 = arith.constant 0 : index
    %c0_4 = arith.constant 0 : index
    %3 = vector.load %arg4[%c0_3, %c0_4] : memref<1x512xf32, #tpu.memory_space<vmem>>, vector<1x512xf32>
    %4 = vector.broadcast %3 : vector<1x512xf32> to vector<2x512xf32>
    %5 = arith.addf %2, %4 : vector<2x512xf32>
    %cst_5 = arith.constant 0.000000e+00 : f32
    %6 = vector.broadcast %cst_5 : f32 to vector<2x512xf32>
    %7 = arith.maximumf %5, %6 : vector<2x512xf32>
    %8 = arith.truncf %7 : vector<2x512xf32> to vector<2x512xbf16>
    %c0_6 = arith.constant 0 : index
    %c0_7 = arith.constant 0 : index
    %9 = vector.load %arg5[%c0_6, %c0_7] : memref<512x128xbf16, #tpu.memory_space<vmem>>, vector<512x128xbf16>
    %cst_8 = arith.constant dense<0.000000e+00> : vector<2x128xf32>
    %10 = tpu.matmul %8, %9, %cst_8 {dimension_numbers = #tpu.dot_dimension_numbers<[1], [0], [0], [1], [0, 0, 1, 1], [], []>} : vector<2x512xbf16>, vector<512x128xbf16>, vector<2x128xf32> -> vector<2x128xf32>
    %c0_i32 = arith.constant 0 : i32
    %11 = arith.cmpi eq, %arg1, %c0_i32 : i32
    %12 = arith.extui %11 : i1 to i32
    %c0_i32_9 = arith.constant 0 : i32
    %13 = arith.cmpi ne, %12, %c0_i32_9 : i32
    scf.if %13 {
      %c0_12 = arith.constant 0 : index
      %c0_13 = arith.constant 0 : index
      %17 = vector.load %arg6[%c0_12, %c0_13] : memref<1x128xf32, #tpu.memory_space<vmem>>, vector<1x128xf32>
      %18 = vector.broadcast %17 : vector<1x128xf32> to vector<2x128xf32>
      %19 = arith.addf %10, %18 : vector<2x128xf32>
      %c0_14 = arith.constant 0 : index
      %c0_15 = arith.constant 0 : index
      %20 = vector.load %arg7[%c0_14, %c0_15] : memref<2x128xf32, #tpu.memory_space<vmem>>, vector<2x128xf32>
      tpu.vector_store %arg7[%c0_14, %c0_15], %19 {strides = array<i32>} : memref<2x128xf32, #tpu.memory_space<vmem>>, vector<2x128xf32>,
    } else {
    }
    %c0_i32_10 = arith.constant 0 : i32
    %14 = arith.cmpi ne, %arg1, %c0_i32_10 : i32
    %15 = arith.extui %14 : i1 to i32
    %c0_i32_11 = arith.constant 0 : i32
    %16 = arith.cmpi ne, %15, %c0_i32_11 : i32
    scf.if %16 {
      %c0_12 = arith.constant 0 : index
      %c0_13 = arith.constant 0 : index
      %17 = vector.load %arg7[%c0_12, %c0_13] : memref<2x128xf32, #tpu.memory_space<vmem>>, vector<2x128xf32>
      %18 = arith.addf %17, %10 : vector<2x128xf32>
      %c0_14 = arith.constant 0 : index
      %c0_15 = arith.constant 0 : index
      %19 = vector.load %arg7[%c0_14, %c0_15] : memref<2x128xf32, #tpu.memory_space<vmem>>, vector<2x128xf32>
      tpu.vector_store %arg7[%c0_14, %c0_15], %18 {strides = array<i32>} : memref<2x128xf32, #tpu.memory_space<vmem>>, vector<2x128xf32>,
    } else {
    }
    return
  }
  func.func @transform_0(%arg0: i32, %arg1: i32) -> (i32, i32) {
    %c0_i32 = arith.constant 0 : i32
    %c0_i32_0 = arith.constant 0 : i32
    return %arg0, %c0_i32 : i32, i32
  }
  func.func @transform_1(%arg0: i32, %arg1: i32) -> (i32, i32) {
    %c0_i32 = arith.constant 0 : i32
    %c0_i32_0 = arith.constant 0 : i32
    return %c0_i32, %arg1 : i32, i32
  }
  func.func @transform_2(%arg0: i32, %arg1: i32) -> (i32, i32) {
    %c0_i32 = arith.constant 0 : i32
    %c0_i32_0 = arith.constant 0 : i32
    return %c0_i32, %arg1 : i32, i32
  }
  func.func @transform_3(%arg0: i32, %arg1: i32) -> (i32, i32) {
    %c0_i32 = arith.constant 0 : i32
    %c0_i32_0 = arith.constant 0 : i32
    return %arg1, %c0_i32 : i32, i32
  }
  func.func @transform_4(%arg0: i32, %arg1: i32) -> (i32, i32) {
    %c0_i32 = arith.constant 0 : i32
    %c0_i32_0 = arith.constant 0 : i32
    %c0_i32_1 = arith.constant 0 : i32
    return %c0_i32, %c0_i32_0 : i32, i32
  }
  func.func @transform_5(%arg0: i32, %arg1: i32) -> (i32, i32) {
    %c0_i32 = arith.constant 0 : i32
    %c0_i32_0 = arith.constant 0 : i32
    return %arg0, %c0_i32 : i32, i32
  }
}

</mosaic_0001>

<bundles_post_ra>
// kernel: mnist_convnet_forward.2
= control target key start
LH: loop header
LB: loop body
LE: loop exit
PB: predicated region body
PF: predicated region fallthrough
CT: control target
= control target key end

     0   :  { %13 = vsyncpa [#allocation4], 0  ;;  %s8124_s0 = inlined_call_operand.vmem [shape: bf16[1568,9], index: 0, kind: input, shape index: {}]   ;;  %s8125_s1 = inlined_call_operand.hbm [shape: bf16[9,128], index: 1, kind: input, shape index: {}]   ;;  %s8126_s2 = inlined_call_operand.hbm [shape: f32[1,128], index: 2, kind: input, shape index: {}]   ;;  %s8127_s3 = inlined_call_operand.hbm [shape: f32[1,128], index: 3, kind: input, shape index: {}]   ;;  %s8128_s4 = inlined_call_operand.hbm [shape: bf16[1152,128], index: 4, kind: input, shape index: {}]   ;;  %s8129_s5 = inlined_call_operand.hbm [shape: f32[1,128], index: 5, kind: input, shape index: {}]   ;;  %s8130_s6 = inlined_call_operand.hbm [shape: f32[1,128], index: 6, kind: input, shape index: {}]   ;;  %s8131_s7 = inlined_call_operand.hbm [shape: bf16[49,256], index: 7, kind: input, shape index: {}]   ;;  %s8132_s8 = inlined_call_operand.vmem [shape: bf16[2,49,128], index: 8, kind: output, shape index: {}]  }
   0x1   :  { %14 = vsyncpa [#allocation6], 0 }
   0x2   :  { %15 = vsyncpa [#allocation9], 0 }
   0x3   :  { %16 = vsyncpa [#allocation12], 0  ;;  %s6118_s27 = smov 0  }
   0x4 LB: > { %s6058_s28 = smov [#allocation5]   ;;  %s6124_s30 = sadd.s32 4294967295, %s6056_s27   ;;  %s6056_s27 = sphi %s6118_s27, %s22_s27  }
   0x5   : > { %s252_s29 = sshll.u32 %s6058_s28, 4  ;;  %p4570_p0 = scmp.ge.s32.totalorder %s6056_s27, 1  ;;  %s6129_s29 = int_to_ptr.vmem [resolvable:$true] %s252_s29 }
   0x6   : > { %p226_p1 = scmp.lt.s32.totalorder %s6056_s27, 3  ;;  %p8133_p2 = scmp.eq.s32.totalorder %s6124_s30, 0 }
   0x7   : > { %s6059_s10 = smov [#allocation8]   ;;  %s6060_s13 = smov [#allocation11]  }
   0x8   : > { %p6131_p3 = pnand %p4570_p0, %p226_p1  ;;  %s273_s11 = sshll.u32 %s6059_s10, 4  ;;  %s6137_s11 = int_to_ptr.vmem [resolvable:$true] %s273_s11 }
   0x9   : > { %s298_s14 = sshll.u32 %s6060_s13, 4  ;;  %s6061_s15 = smov [#allocation3]   ;;  %s6145_s14 = int_to_ptr.vmem [resolvable:$true] %s298_s14 }
   0xa   : > { %s8143_s9 = scalar_select %p6131_p3, 1, 0 }
   0xb   : > { %p5642_p4 = pneg %p6131_p3  ;;  %s6147_s16 = sshll.u32 %s6061_s15, 4  ;;  %s239_s16 = int_to_ptr.vmem [resolvable:$true] %s6147_s16 }
   0xc   : > { %s5838_s19 = scalar_lea.hbm %s8126_s2, 16 }
   0xd   : > { %p6141_p5 = pnand %p8133_p2, %p5642_p4  ;;  %p5839_p6 = scmp.ne.s32.totalorder %s8126_s2, %s5838_s19 }
   0xe   : > { %p5845_p10 = scmp.lt.u32.totalorder %s5838_s19, %s8126_s2 }
   0xf   : > { %p6157_p7 = pneg %p6141_p5 }
  0x11   : > { %p5841_p8 = pnand %p6157_p7, %p5839_p6 }
  0x13   : > { %p5842_p9 = pneg %p5841_p8 }
  0x15   : > { %p5847_p11 = pnand %p5845_p10, %p5842_p9 }
  0x17   : > { %5850 = shalt.err (!%p5847_p11)
}
  0x18   : > { %s5851_s25 = scalar_lea.vmem %s6129_s29, 16  ;;  %s5858_s26 = scalar_lea.vmem %s6129_s29, 32 }
  0x19   : > { %p5852_p12 = scmp.ne.s32.totalorder %s6129_s29, %s5851_s25  ;;  %p5859_p1 = scmp.lt.s32.totalorder %s6129_s29, %s6129_s29 }
  0x1a   : > { %p5860_p4 = scmp.lt.s32.totalorder %s5858_s26, %s5851_s25 }
  0x1b   : > { %p5854_p13 = pnand %p5852_p12, %p6157_p7 }
  0x1c   : > { %p5861_p6 = por %p5860_p4, %p5859_p1 }
  0x1d   : > { %p5855_p0 = pneg %p5854_p13 }
  0x1f   : > { %p5862_p8 = pnand %p5861_p6, %p5855_p0 }
  0x21   : > { %5865 = shalt.err (!%p5862_p8)
}
  0x22   : > { %5648 = dma.hbm_to_vmem [thread:$0]  (!%p6141_p5), %s8126_s2, 16, %s6129_s29, [#allocation6]  }
  0x23   : > { %s5866_s17 = scalar_lea.hbm %s8128_s4, 9216 }
  0x24   : > { %p5867_p9 = scmp.ne.s32.totalorder %s8128_s4, %s5866_s17  ;;  %p5873_p12 = scmp.lt.u32.totalorder %s5866_s17, %s8128_s4 }
  0x26   : > { %p5869_p10 = pnand %p5867_p9, %p6157_p7 }
  0x28   : > { %p5870_p11 = pneg %p5869_p10 }
  0x2a   : > { %p5875_p13 = pnand %p5873_p12, %p5870_p11 }
  0x2c   : > { %5878 = shalt.err (!%p5875_p13)
}
  0x2d   : > { %s5879_s29 = scalar_lea.vmem %s6137_s11, 9216  ;;  %p5887_p6 = scmp.lt.s32.totalorder %s6137_s11, %s6137_s11 }
  0x2e   : > { %p5880_p0 = scmp.ne.s32.totalorder %s6137_s11, %s5879_s29  ;;  %p5888_p8 = scmp.lt.s32.totalorder %s5879_s29, %s5879_s29 }
  0x30   : > { %p5882_p1 = pnand %p5880_p0, %p6157_p7  ;;  %p5889_p9 = por %p5888_p8, %p5887_p6 }
  0x32   : > { %p5883_p4 = pneg %p5882_p1 }
  0x34   : > { %p5890_p10 = pnand %p5889_p9, %p5883_p4 }
  0x36   : > { %5893 = shalt.err (!%p5890_p10)
}
  0x37   : > { %s6062_s23 = smov 64   ;;  %s6063_s24 = smov 4  }
  0x38   : > { %5654 = dma.hbm_to_vmem [thread:$0]  (!%p6141_p5), %s8128_s4, 9216, %s6137_s11, [#allocation9], %s6062_s23, %s6062_s23, %s6063_s24  }
  0x39   : > { %s5894_s13 = scalar_lea.hbm %s8130_s6, 16 }
  0x3a   : > { %p5895_p11 = scmp.ne.s32.totalorder %s8130_s6, %s5894_s13  ;;  %p5901_p0 = scmp.lt.u32.totalorder %s5894_s13, %s8130_s6 }
  0x3c   : > { %p5897_p12 = pnand %p5895_p11, %p6157_p7 }
  0x3e   : > { %p5898_p13 = pneg %p5897_p12 }
  0x40   : > { %p5903_p1 = pnand %p5901_p0, %p5898_p13 }
  0x42   : > { %5906 = shalt.err (!%p5903_p1)
}
  0x43   : > { %s5907_s11 = scalar_lea.vmem %s6145_s14, 16  ;;  %s5914_s20 = scalar_lea.vmem %s6145_s14, 32 }
  0x44   : > { %p5908_p4 = scmp.ne.s32.totalorder %s6145_s14, %s5907_s11  ;;  %p5915_p9 = scmp.lt.s32.totalorder %s6145_s14, %s6145_s14 }
  0x45   : > { %p5916_p10 = scmp.lt.s32.totalorder %s5914_s20, %s5907_s11 }
  0x46   : > { %p5910_p6 = pnand %p5908_p4, %p6157_p7 }
  0x47   : > { %p5917_p11 = por %p5916_p10, %p5915_p9 }
  0x48   : > { %p5911_p8 = pneg %p5910_p6 }
  0x4a   : > { %p5918_p12 = pnand %p5917_p11, %p5911_p8 }
  0x4c   : > { %5921 = shalt.err (!%p5918_p12)
}
  0x4d   : > { %5660 = dma.hbm_to_vmem [thread:$0]  (!%p6141_p5), %s8130_s6, 16, %s6145_s14, [#allocation12]  }
  0x4e   : > { %s5922_s28 = scalar_lea.hbm %s8125_s1, 128 }
  0x4f   : > { %p5923_p13 = scmp.ne.s32.totalorder %s8125_s1, %s5922_s28  ;;  %p5929_p4 = scmp.lt.u32.totalorder %s5922_s28, %s8125_s1 }
  0x51   : > { %p5925_p0 = pnand %p5923_p13, %p6157_p7 }
  0x53   : > { %p5926_p1 = pneg %p5925_p0 }
  0x55   : > { %p5931_p6 = pnand %p5929_p4, %p5926_p1 }
  0x57   : > { %5934 = shalt.err (!%p5931_p6)
}
  0x58   : > { %s5935_s18 = scalar_lea.vmem %s239_s16, 128  ;;  %p5943_p11 = scmp.lt.s32.totalorder %s239_s16, %s239_s16 }
  0x59   : > { %p5936_p8 = scmp.ne.s32.totalorder %s239_s16, %s5935_s18  ;;  %p5944_p12 = scmp.lt.s32.totalorder %s5935_s18, %s5935_s18 }
  0x5b   : > { %p5938_p9 = pnand %p5936_p8, %p6157_p7  ;;  %p5945_p2 = por %p5944_p12, %p5943_p11 }
  0x5d   : > { %p5939_p10 = pneg %p5938_p9 }
  0x5f   : > { %p5946_p3 = pnand %p5945_p2, %p5939_p10 }
  0x61   : > { %5949 = shalt.err (!%p5946_p3)
}
  0x62   : > { %5645 = dma.hbm_to_vmem [thread:$0]  (!%p6141_p5), %s8125_s1, 128, %s239_s16, [#allocation4], %s6062_s23, %s6062_s23, %s6063_s24  }
  0x63   : > { %s6064_s11 = smov [#allocation7]   ;;  %s6065_s21 = smov [#allocation10]  }
  0x64   : > { %s263_s20 = sshll.u32 %s6064_s11, 4  ;;  %s287_s29 = sshll.u32 %s6065_s21, 4  ;;  %s264_s20 = int_to_ptr.vmem [resolvable:$true] %s263_s20  ;;  %s288_s29 = int_to_ptr.vmem [resolvable:$true] %s287_s29 }
  0x65   : > { %s5950_s28 = scalar_lea.hbm %s8127_s3, 16 }
  0x66   : > { %p5951_p2 = scmp.ne.s32.totalorder %s8127_s3, %s5950_s28  ;;  %p5957_p0 = scmp.lt.u32.totalorder %s5950_s28, %s8127_s3 }
  0x68   : > { %p5953_p3 = pnand %p5951_p2, %p6157_p7 }
  0x6a   : > { %p5954_p13 = pneg %p5953_p3 }
  0x6c   : > { %p5959_p1 = pnand %p5957_p0, %p5954_p13 }
  0x6e   : > { %5962 = shalt.err (!%p5959_p1)
}
  0x6f   : > { %s5963_s16 = scalar_lea.vmem %s264_s20, 16  ;;  %s5970_s23 = scalar_lea.vmem %s264_s20, 32 }
  0x70   : > { %p5964_p4 = scmp.ne.s32.totalorder %s264_s20, %s5963_s16  ;;  %p5971_p9 = scmp.lt.s32.totalorder %s264_s20, %s264_s20 }
  0x71   : > { %p5972_p10 = scmp.lt.s32.totalorder %s5970_s23, %s5963_s16 }
  0x72   : > { %p5966_p6 = pnand %p5964_p4, %p6157_p7 }
  0x73   : > { %p5973_p11 = por %p5972_p10, %p5971_p9 }
  0x74   : > { %p5967_p8 = pneg %p5966_p6 }
  0x76   : > { %p5974_p12 = pnand %p5973_p11, %p5967_p8 }
  0x78   : > { %5977 = shalt.err (!%p5974_p12)
}
  0x79   : > { %5651 = dma.hbm_to_vmem [thread:$0]  (!%p6141_p5), %s8127_s3, 16, %s264_s20, [#allocation6]  }
  0x7a   : > { %s5978_s11 = scalar_lea.hbm %s8129_s5, 16 }
  0x7b   : > { %p5979_p2 = scmp.ne.s32.totalorder %s8129_s5, %s5978_s11  ;;  %p5985_p0 = scmp.lt.u32.totalorder %s5978_s11, %s8129_s5 }
  0x7d   : > { %p5981_p3 = pnand %p5979_p2, %p6157_p7 }
  0x7f   : > { %p5982_p13 = pneg %p5981_p3 }
  0x81   : > { %p5987_p1 = pnand %p5985_p0, %p5982_p13 }
  0x83   : > { %5990 = shalt.err (!%p5987_p1)
}
  0x84   : > { %s5991_s10 = scalar_lea.vmem %s288_s29, 16  ;;  %s5998_s20 = scalar_lea.vmem %s288_s29, 32 }
  0x85   : > { %p5992_p4 = scmp.ne.s32.totalorder %s288_s29, %s5991_s10  ;;  %p5999_p9 = scmp.lt.s32.totalorder %s288_s29, %s288_s29 }
  0x86   : > { %p6000_p10 = scmp.lt.s32.totalorder %s5998_s20, %s5991_s10 }
  0x87   : > { %p5994_p6 = pnand %p5992_p4, %p6157_p7 }
  0x88   : > { %p6001_p11 = por %p6000_p10, %p5999_p9 }
  0x89   : > { %p5995_p8 = pneg %p5994_p6 }
  0x8b   : > { %p6002_p12 = pnand %p6001_p11, %p5995_p8 }
  0x8d   : > { %6005 = shalt.err (!%p6002_p12)
}
  0x8e   : > { %5657 = dma.hbm_to_vmem [thread:$0]  (!%p6141_p5), %s8129_s5, 16, %s288_s29, [#allocation9]  }
  0x8f   : > { %s6066_s17 = smov [#allocation13]   ;;  %s6006_s18 = scalar_lea.hbm %s8131_s7, 896 }
  0x90   : > { %s308_s16 = sshll.u32 %s6066_s17, 4  ;;  %p6007_p2 = scmp.ne.s32.totalorder %s8131_s7, %s6006_s18  ;;  %s309_s16 = int_to_ptr.vmem [resolvable:$true] %s308_s16 }
  0x91   : > { %p6013_p0 = scmp.lt.u32.totalorder %s6006_s18, %s8131_s7 }
  0x92   : > { %p6009_p3 = pnand %p6007_p2, %p6157_p7 }
  0x94   : > { %p6010_p13 = pneg %p6009_p3 }
  0x96   : > { %p6015_p1 = pnand %p6013_p0, %p6010_p13 }
  0x98   : > { %6018 = shalt.err (!%p6015_p1)
}
  0x99   : > { %s6019_s29 = scalar_lea.vmem %s309_s16, 896  ;;  %p6027_p9 = scmp.lt.s32.totalorder %s309_s16, %s309_s16 }
  0x9a   : > { %p6020_p4 = scmp.ne.s32.totalorder %s309_s16, %s6019_s29  ;;  %p6028_p10 = scmp.lt.s32.totalorder %s6019_s29, %s6019_s29 }
  0x9c   : > { %p6022_p6 = pnand %p6020_p4, %p6157_p7  ;;  %p6029_p11 = por %p6028_p10, %p6027_p9 }
  0x9e   : > { %p6023_p8 = pneg %p6022_p6 }
  0xa0   : > { %p6030_p12 = pnand %p6029_p11, %p6023_p8 }
  0xa2   : > { %6033 = shalt.err (!%p6030_p12)
}
  0xa3   : > { %s6067_s25 = smov 128   ;;  %s6068_s26 = smov 8  }
  0xa4   : > { %5663 = dma.hbm_to_vmem [thread:$0]  (!%p6141_p5), %s8131_s7, 896, %s309_s16, [#allocation12], %s6067_s25, %s6067_s25, %s6068_s26  }
  0xa5   : > { %p8146_p2 = scmp.ne.s32.totalorder %s8143_s9, 0 }
  0xa7   : > { %333 = sbr.rel (%p8146_p2) target bundleno = 1649 (0x671), region = 52 }
  0xae   : > { %p8147_p3 = scmp.eq.s32.totalorder %s6124_s30, 0 }
  0xb0   : > { %6039 = dma.done.wait (%p8147_p3), [#allocation4], 128   ;;  %p8148_p7 = pmov %p8147_p3 }
  0xb1   : > { %p8149_p13 = pmov %p8147_p3 }
  0xb2   : > { %6041 = vsyncadd (%p8148_p7), [#allocation4], 4294967168 }
  0xb3   : > { %6043 = dma.done.wait (%p8149_p13), [#allocation6], 32   ;;  %p8150_p0 = pmov %p8147_p3 }
  0xb5   : > { %6045 = vsyncadd (%p8150_p0), [#allocation6], 4294967264  ;;  %p8151_p1 = pmov %p8150_p0 }
  0xb6   : > { %p8152_p5 = pmov %p8150_p0 }
  0xb7   : > { %6047 = dma.done.wait (%p8151_p1), [#allocation9], 9232  }
  0xb8   : > { %6049 = vsyncadd (%p8152_p5), [#allocation9], 4294958064  ;;  %p8153_p4 = pmov %p8150_p0 }
  0xb9   : > { %p8154_p6 = pmov %p8150_p0 }
  0xba   : > { %6051 = dma.done.wait (%p8153_p4), [#allocation12], 912  }
  0xbb   : > { %6053 = vsyncadd (%p8154_p6), [#allocation12], 4294966384  ;;  %vm920_vm0 = vcmask 1043456   ;;  %v6069_v0 = vmov 0.0   ;;  %s391_s9 = smul.u32 98, %s6124_s30  ;;  %vm6070_vm1 = vmmov 0  }
  0xbc   : > { %5367 = vmatprep.subr.bf16.mxu0 %v6069_v0  ;;  %5369 = vmatprep.mubr.msk.bf16.mxu0 %vm6070_vm1, %v6069_v0  ;;  %vm921_vm2 = vcmask 1044480   ;;  %v6071_v1 = vmov 65535   ;;  %v5701_v4 = vld [vmem:[#allocation3] sm:$0x1f]   ;;  %vm772_vm3 = vcmask 72704   ;;  %vm1974_vm5 = vcmask 1040384  }
  0xbd   : > { %v922_v2 = vsel %vm920_vm0, 4294967295, %v6071_v1  ;;  %p392_p8 = scmp.lt.s32.totalorder %s391_s9, 195  ;;  %vm2089_vm4 = vsmask.f32 7424  ;;  %vm1981_vm6 = vcmask 1041408   ;;  %vm2237_vm7 = vcmask 1046528  }
  0xbe   : > { %v923_v3 = vsel %vm921_vm2, %v922_v2, 0  ;;  %vm1988_vm8 = vcmask 1042432   ;;  %vm2009_vm9 = vcmask 1045504   ;;  %p397_p9 = scmp.lt.s32.totalorder %s6124_s30, 1  ;;  %vm4439_vm10 = vsmask.f32 256 }
  0xbf   : > { %s8239_s9 = smov (!%p392_p8, %s391_s9), 195  ;;  %v925_v5 = vand.u32 %v5701_v4, %v923_v3  ;;  %vm4440_vm11 = vmand %vm1974_vm5, %vm4439_vm10 }
  0xc0   : > { %s4587_s12 = sshll.u32 %s8239_s9, 2  ;;  %s8241_s30 = smov (!%p397_p9, %s6124_s30), 1 }
  0xc1   : > { %s6332_s13 = scalar_lea.vmem %s8124_s0, %s4587_s12  ;;  %5368 = vmatpush3.bf16.msra.mxu0 %v925_v5  ;;  %s5613_s15 = smul.u32 28, %s8241_s30 }
  0xc2   : > { %v5702_v6 = vld [vmem:[%s6332_s13] sm:$0xff]   ;;  %v5703_v7 = vld [vmem:[%s6332_s13 + $0x8] sm:$0xff]   ;;  %v5704_v8 = vld [vmem:[%s6332_s13 + $0x10] sm:$0xff]  }
  0xc3   : > { %v5705_v9 = vld [vmem:[%s6332_s13 + $0x18] sm:$0xff]   ;;  %v5706_v10 = vld [vmem:[%s6332_s13 + $0x20] sm:$0xff]   ;;  %v5707_v11 = vld [vmem:[%s6332_s13 + $0x28] sm:$0xff]   ;;  %s401_s23 = scalar_lea.vmem %s8132_s8, %s5613_s15 }
  0xc4   : > { %5370 = vmatmul.mubr.msk.bf16.vlgmr.msra.gmra.mrb[0].mxu0 %vm772_vm3, %v5702_v6  ;;  %v5708_v12 = vld [vmem:[%s6332_s13 + $0x30] sm:$0xff]   ;;  %v5709_v13 = vld [vmem:[%s6332_s13 + $0x38] sm:$0xff]   ;;  %v5710_v14 = vld [vmem:[%s6332_s13 + $0x40] sm:$0xff]  }
  0xc5   : > { %5373 = vmatprep.mubr.msk.bf16.mxu0 %vm6070_vm1, %v6069_v0  ;;  %v5711_v15 = vld [vmem:[%s6332_s13 + $0x48] sm:$0xff]   ;;  %v5712_v16 = vld [vmem:[%s6332_s13 + $0x50] sm:$0xff]   ;;  %v5713_v17 = vld [vmem:[%s6332_s13 + $0x58] sm:$0xff]  }
  0xc6   : > { %v5714_v18 = vld [vmem:[%s6332_s13 + $0x60] sm:$0xff]   ;;  %v5715_v19 = vld [vmem:[%s6332_s13 + $0x68] sm:$0xff]   ;;  %v5716_v20 = vld [vmem:[%s6332_s13 + $0x70] sm:$0xff]  }
  0xc7   : > { %v5717_v21 = vld [vmem:[%s6332_s13 + $0x78] sm:$0xff]   ;;  %v5718_v22 = vld [vmem:[%s6332_s13 + $0x80] sm:$0xff]   ;;  %v5719_v23 = vld [vmem:[%s6332_s13 + $0x88] sm:$0xff]  }
  0xc8   : > { %v5720_v24 = vld [vmem:[%s6332_s13 + $0x90] sm:$0xff]   ;;  %v5721_v25 = vld [vmem:[%s6332_s13 + $0x98] sm:$0xff]   ;;  %v5722_v26 = vld [vmem:[%s6332_s13 + $0xa0] sm:$0xff]  }
  0xc9   : > { %v5723_v27 = vld [vmem:[%s6332_s13 + $0xa8] sm:$0xff]   ;;  %v5724_v28 = vld [vmem:[%s6332_s13 + $0xb0] sm:$0xff]   ;;  %v5725_v29 = vld [vmem:[%s6332_s13 + $0xb8] sm:$0xff]  }
  0xca   : > { %v5726_v30 = vld [vmem:[%s6332_s13 + $0xc0] sm:$0xff]   ;;  %v5727_v31 = vld [vmem:[%s6332_s13 + $0xc8] sm:$0xff]   ;;  %v5728_v32 = vld [vmem:[%s6332_s13 + $0xd0] sm:$0xff]  }
  0xcb   : > { %v5729_v35 = vld [vmem:[%s6332_s13 + $0xd8] sm:$0xff]   ;;  %v5730_v40 = vld [vmem:[%s6332_s13 + $0xe0] sm:$0xff]   ;;  %v5731_v45 = vld [vmem:[%s6332_s13 + $0xe8] sm:$0xff]  }
  0xcc   : > { %5374 = vmatmul.mubr.msk.bf16.gmra.mrb[4].mxu0 %vm772_vm3, %v5703_v7  ;;  %v5732_v50 = vld [vmem:[%s6332_s13 + $0xf0] sm:$0xff]   ;;  %v5733_v55 = vld [vmem:[%s6332_s13 + $0xf8] sm:$0xff]   ;;  %v5734_v60 = vld [vmem:[%s6332_s13 + $0x100] sm:$0xff]  }
  0xcd   : > { %5377 = vmatprep.mubr.msk.bf16.mxu0 %vm6070_vm1, %v6069_v0  ;;  %v5735_v2 = vld [vmem:[%s6332_s13 + $0x108] sm:$0xff]   ;;  %v5736_v7 = vld [vmem:[%s6332_s13 + $0x110] sm:$0xff]  }
  0xd4   : > { %5378 = vmatmul.mubr.msk.bf16.gmra.mrb[8].mxu0 %vm772_vm3, %v5704_v8 }
  0xd5   : > { %5381 = vmatprep.mubr.msk.bf16.mxu0 %vm6070_vm1, %v6069_v0 }
  0xdc   : > { %5382 = vmatmul.mubr.msk.bf16.gmra.mrb[12].mxu0 %vm772_vm3, %v5705_v9 }
  0xdd   : > { %5385 = vmatprep.mubr.msk.bf16.mxu0 %vm6070_vm1, %v6069_v0 }
  0xe4   : > { %5386 = vmatmul.mubr.msk.bf16.gmra.mrb[16].mxu0 %vm772_vm3, %v5706_v10 }
  0xe5   : > { %5389 = vmatprep.mubr.msk.bf16.mxu0 %vm6070_vm1, %v6069_v0 }
  0xec   : > { %5390 = vmatmul.mubr.msk.bf16.gmra.mrb[20].mxu0 %vm772_vm3, %v5707_v11 }
  0xed   : > { %5393 = vmatprep.mubr.msk.bf16.mxu0 %vm6070_vm1, %v6069_v0 }
  0xf4   : > { %5394 = vmatmul.mubr.msk.bf16.gmra.mrb[24].mxu0 %vm772_vm3, %v5708_v12  ;;  %v5737_v12 = vld [vmem:[%s6332_s13 + $0x118] sm:$0xff]  }
  0xf5   : > { %5397 = vmatprep.mubr.msk.bf16.mxu0 %vm6070_vm1, %v6069_v0 }
  0xfc   : > { %5398 = vmatmul.mubr.msk.bf16.gmra.mrb[28].mxu0 %vm772_vm3, %v5709_v13 }
  0xfd   : > { %5401 = vmatprep.mubr.msk.bf16.mxu0 %vm6070_vm1, %v6069_v0 }
 0x104   : > { %5402 = vmatmul.mubr.msk.bf16.gmra.mrb[32].mxu0 %vm772_vm3, %v5710_v14 }
 0x105   : > { %5405 = vmatprep.mubr.msk.bf16.mxu0 %vm6070_vm1, %v6069_v0 }
 0x10c   : > { %5406 = vmatmul.mubr.msk.bf16.gmra.mrb[36].mxu0 %vm772_vm3, %v5711_v15 }
 0x10d   : > { %5409 = vmatprep.mubr.msk.bf16.mxu0 %vm6070_vm1, %v6069_v0 }
 0x114   : > { %5410 = vmatmul.mubr.msk.bf16.gmra.mrb[40].mxu0 %vm772_vm3, %v5712_v16 }
 0x115   : > { %5413 = vmatprep.mubr.msk.bf16.mxu0 %vm6070_vm1, %v6069_v0 }
 0x11c   : > { %5414 = vmatmul.mubr.msk.bf16.gmra.mrb[44].mxu0 %vm772_vm3, %v5713_v17  ;;  %v5738_v17 = vld [vmem:[%s6332_s13 + $0x120] sm:$0xff]  }
 0x11d   : > { %5417 = vmatprep.mubr.msk.bf16.mxu0 %vm6070_vm1, %v6069_v0 }
 0x124   : > { %5418 = vmatmul.mubr.msk.bf16.gmra.mrb[48].mxu0 %vm772_vm3, %v5714_v18 }
 0x125   : > { %5421 = vmatprep.mubr.msk.bf16.mxu0 %vm6070_vm1, %v6069_v0 }
 0x12c   : > { %5422 = vmatmul.mubr.msk.bf16.gmra.mrb[52].mxu0 %vm772_vm3, %v5715_v19 }
 0x12d   : > { %5425 = vmatprep.mubr.msk.bf16.mxu0 %vm6070_vm1, %v6069_v0 }
 0x134   : > { %5426 = vmatmul.mubr.msk.bf16.gmra.mrb[56].mxu0 %vm772_vm3, %v5716_v20 }
 0x135   : > { %5429 = vmatprep.mubr.msk.bf16.mxu0 %vm6070_vm1, %v6069_v0 }
 0x13c   : > { %5430 = vmatmul.mubr.msk.bf16.gmra.mrb[60].mxu0 %vm772_vm3, %v5717_v21 }
 0x13d   : > { %5433 = vmatprep.mubr.msk.bf16.mxu0 %vm6070_vm1, %v6069_v0 }
 0x144   : > { %5434 = vmatmul.mubr.msk.bf16.gmra.mrb[64].mxu0 %vm772_vm3, %v5718_v22  ;;  %v5739_v22 = vld [vmem:[%s6332_s13 + $0x128] sm:$0xff]  }
 0x145   : > { %5437 = vmatprep.mubr.msk.bf16.mxu0 %vm6070_vm1, %v6069_v0 }
 0x14c   : > { %5438 = vmatmul.mubr.msk.bf16.gmra.mrb[68].mxu0 %vm772_vm3, %v5719_v23 }
 0x14d   : > { %5441 = vmatprep.mubr.msk.bf16.mxu0 %vm6070_vm1, %v6069_v0 }
 0x154   : > { %5442 = vmatmul.mubr.msk.bf16.gmra.mrb[72].mxu0 %vm772_vm3, %v5720_v24 }
 0x155   : > { %5445 = vmatprep.mubr.msk.bf16.mxu0 %vm6070_vm1, %v6069_v0 }
 0x15c   : > { %5446 = vmatmul.mubr.msk.bf16.gmra.mrb[76].mxu0 %vm772_vm3, %v5721_v25 }
 0x15d   : > { %5449 = vmatprep.mubr.msk.bf16.mxu0 %vm6070_vm1, %v6069_v0 }
 0x164   : > { %5450 = vmatmul.mubr.msk.bf16.gmra.mrb[80].mxu0 %vm772_vm3, %v5722_v26 }
 0x165   : > { %5453 = vmatprep.mubr.msk.bf16.mxu0 %vm6070_vm1, %v6069_v0 }
 0x16c   : > { %5454 = vmatmul.mubr.msk.bf16.gmra.mrb[84].mxu0 %vm772_vm3, %v5723_v27  ;;  %v5740_v27 = vld [vmem:[%s6332_s13 + $0x130] sm:$0xff]  }
 0x16d   : > { %5457 = vmatprep.mubr.msk.bf16.mxu0 %vm6070_vm1, %v6069_v0 }
 0x174   : > { %5458 = vmatmul.mubr.msk.bf16.gmra.mrb[88].mxu0 %vm772_vm3, %v5724_v28 }
 0x175   : > { %5461 = vmatprep.mubr.msk.bf16.mxu0 %vm6070_vm1, %v6069_v0 }
 0x17c   : > { %5462 = vmatmul.mubr.msk.bf16.gmra.mrb[92].mxu0 %vm772_vm3, %v5725_v29 }
 0x17d   : > { %5465 = vmatprep.mubr.msk.bf16.mxu0 %vm6070_vm1, %v6069_v0 }
 0x184   : > { %5466 = vmatmul.mubr.msk.bf16.gmra.mrb[96].mxu0 %vm772_vm3, %v5726_v30  ;;  %v6538_v30 = vld [vmem:[#allocation5] ss:$0 sm:$0xff] }
 0x185   : > { %5469 = vmatprep.mubr.msk.bf16.mxu0 %vm6070_vm1, %v6069_v0 }
 0x18c   : > { %5470 = vmatmul.mubr.msk.bf16.gmra.mrb[100].mxu0 %vm772_vm3, %v5727_v31 }
 0x18d   : > { %5473 = vmatprep.mubr.msk.bf16.mxu0 %vm6070_vm1, %v6069_v0 }
 0x194   : > { %5474 = vmatmul.mubr.msk.bf16.gmra.mrb[104].mxu0 %vm772_vm3, %v5728_v32 }
 0x195   : > { %5477 = vmatprep.mubr.msk.bf16.mxu0 %vm6070_vm1, %v6069_v0 }
 0x197   : > { %v6442_v33 = vpop.f32.mrb[0].mxu0 }
 0x198   : > { %v5371_v34 = vpop.f32.mrb[1].mxu0 }
 0x199   : > { %v6445_v36 = vpop.f32.mrb[2].mxu0 }
 0x19a   : > { %v5372_v37 = vpop.f32.mrb[3].mxu0 }
 0x19b   : > { %v1359_v37 = vmul.f32 %v6538_v30, %v6442_v33 }
 0x19c   : > { %5478 = vmatmul.mubr.msk.bf16.gmra.mrb[108].mxu0 %vm772_vm3, %v5729_v35  ;;  %v5741_v35 = vld [vmem:[%s6332_s13 + $0x138] sm:$0xff]  }
 0x19d   : > { %5481 = vmatprep.mubr.msk.bf16.mxu0 %vm6070_vm1, %v6069_v0 }
 0x19f   : > { %v6450_v38 = vpop.f32.mrb[4].mxu0 }
 0x1a0   : > { %v5375_v39 = vpop.f32.mrb[5].mxu0 }
 0x1a1   : > { %v6453_v41 = vpop.f32.mrb[6].mxu0  ;;  %v6544_v39 = vld [vmem:[#allocation7] ss:$0 sm:$0xff] }
 0x1a2   : > { %v5376_v42 = vpop.f32.mrb[7].mxu0 }
 0x1a4   : > { %5482 = vmatmul.mubr.msk.bf16.gmra.mrb[112].mxu0 %vm772_vm3, %v5730_v40 }
 0x1a5   : > { %5485 = vmatprep.mubr.msk.bf16.mxu0 %vm6070_vm1, %v6069_v0 }
 0x1a7   : > { %v6458_v43 = vpop.f32.mrb[8].mxu0 }
 0x1a8   : > { %v5379_v44 = vpop.f32.mrb[9].mxu0 }
 0x1a9   : > { %v6461_v46 = vpop.f32.mrb[10].mxu0 }
 0x1aa   : > { %v5380_v47 = vpop.f32.mrb[11].mxu0 }
 0x1ac   : > { %5486 = vmatmul.mubr.msk.bf16.gmra.mrb[116].mxu0 %vm772_vm3, %v5731_v45 }
 0x1ad   : > { %5489 = vmatprep.mubr.msk.bf16.mxu0 %vm6070_vm1, %v6069_v0 }
 0x1af   : > { %v6466_v48 = vpop.f32.mrb[12].mxu0 }
 0x1b0   : > { %v5383_v49 = vpop.f32.mrb[13].mxu0 }
 0x1b1   : > { %v6469_v51 = vpop.f32.mrb[14].mxu0 }
 0x1b2   : > { %v5384_v52 = vpop.f32.mrb[15].mxu0 }
 0x1b3   : > { %v1360_v52 = vmul.f32 %v6538_v30, %v6445_v36 }
 0x1b4   : > { %5490 = vmatmul.mubr.msk.bf16.gmra.mrb[120].mxu0 %vm772_vm3, %v5732_v50  ;;  %v1464_v50 = vadd.f32 %v6544_v39, %v1359_v37 }
 0x1b5   : > { %5493 = vmatprep.mubr.msk.bf16.mxu0 %vm6070_vm1, %v6069_v0 }
 0x1b7   : > { %v6474_v53 = vpop.f32.mrb[16].mxu0 }
 0x1b8   : > { %v5387_v54 = vpop.f32.mrb[17].mxu0 }
 0x1b9   : > { %v6477_v56 = vpop.f32.mrb[18].mxu0 }
 0x1ba   : > { %v5388_v57 = vpop.f32.mrb[19].mxu0 }
 0x1bc   : > { %5494 = vmatmul.mubr.msk.bf16.gmra.mrb[124].mxu0 %vm772_vm3, %v5733_v55 }
 0x1bd   : > { %5497 = vmatprep.mubr.msk.bf16.mxu0 %vm6070_vm1, %v6069_v0 }
 0x1bf   : > { %v6482_v58 = vpop.f32.mrb[20].mxu0 }
 0x1c0   : > { %v5391_v59 = vpop.f32.mrb[21].mxu0 }
 0x1c1   : > { %v6485_v61 = vpop.f32.mrb[22].mxu0 }
 0x1c2   : > { %v5392_v62 = vpop.f32.mrb[23].mxu0 }
 0x1c3   : > { %v5742_v62 = vld [vmem:[%s6332_s13 + $0x140] sm:$0xff]  }
 0x1c4   : > { %5498 = vmatmul.mubr.msk.bf16.gmra.mrb[128].mxu0 %vm772_vm3, %v5734_v60 }
 0x1c5   : > { %5501 = vmatprep.mubr.msk.bf16.mxu0 %vm6070_vm1, %v6069_v0 }
 0x1c7   : > { %v6490_v63 = vpop.f32.mrb[24].mxu0 }
 0x1c8   : > { %v5395_v1 = vpop.f32.mrb[25].mxu0 }
 0x1c9   : > { %v6493_v3 = vpop.f32.mrb[26].mxu0  ;;  %v1562_v1 = vmax.f32 %v1464_v50, 0.0 }
 0x1ca   : > { %v5396_v4 = vpop.f32.mrb[27].mxu0 }
 0x1cc   : > { %5502 = vmatmul.mubr.msk.bf16.gmra.mrb[132].mxu0 %vm772_vm3, %v5735_v2  ;;  %v1361_v2 = vmul.f32 %v6538_v30, %v6450_v38 }
 0x1cd   : > { %5505 = vmatprep.mubr.msk.bf16.mxu0 %vm6070_vm1, %v6069_v0 }
 0x1ce   : > { %v1466_v38 = vadd.f32 %v6544_v39, %v1361_v2 }
 0x1cf   : > { %v6498_v5 = vpop.f32.mrb[28].mxu0 }
 0x1d0   : > { %v5399_v6 = vpop.f32.mrb[29].mxu0 }
 0x1d1   : > { %v6501_v8 = vpop.f32.mrb[30].mxu0 }
 0x1d2   : > { %v5400_v9 = vpop.f32.mrb[31].mxu0 }
 0x1d4   : > { %5506 = vmatmul.mubr.msk.bf16.gmra.mrb[136].mxu0 %vm772_vm3, %v5736_v7 }
 0x1d5   : > { %5509 = vmatprep.mubr.msk.bf16.mxu0 %vm6070_vm1, %v6069_v0 }
 0x1d7   : > { %v6506_v10 = vpop.f32.mrb[32].mxu0 }
 0x1d8   : > { %v5403_v11 = vpop.f32.mrb[33].mxu0 }
 0x1d9   : > { %v6509_v13 = vpop.f32.mrb[34].mxu0  ;;  %v1465_v11 = vadd.f32 %v6544_v39, %v1360_v52 }
 0x1da   : > { %v5404_v14 = vpop.f32.mrb[35].mxu0 }
 0x1dc   : > { %5510 = vmatmul.mubr.msk.bf16.gmra.mrb[140].mxu0 %vm772_vm3, %v5737_v12 }
 0x1dd   : > { %5513 = vmatprep.mubr.msk.bf16.mxu0 %vm6070_vm1, %v6069_v0 }
 0x1df   : > { %v6514_v15 = vpop.f32.mrb[36].mxu0 }
 0x1e0   : > { %v5407_v16 = vpop.f32.mrb[37].mxu0 }
 0x1e1   : > { %v6517_v18 = vpop.f32.mrb[38].mxu0 }
 0x1e2   : > { %v5408_v19 = vpop.f32.mrb[39].mxu0 }
 0x1e4   : > { %5514 = vmatmul.mubr.msk.bf16.gmra.mrb[144].mxu0 %vm772_vm3, %v5738_v17 }
 0x1e5   : > { %5517 = vmatprep.mubr.msk.bf16.mxu0 %vm6070_vm1, %v6069_v0 }
 0x1e7   : > { %v6522_v20 = vpop.f32.mrb[40].mxu0 }
 0x1e8   : > { %v5411_v21 = vpop.f32.mrb[41].mxu0 }
 0x1e9   : > { %v6525_v23 = vpop.f32.mrb[42].mxu0  ;;  %v1563_v21 = vmax.f32 %v1465_v11, 0.0 }
 0x1ea   : > { %v5412_v24 = vpop.f32.mrb[43].mxu0 }
 0x1ec   : > { %5518 = vmatmul.mubr.msk.bf16.gmra.mrb[148].mxu0 %vm772_vm3, %v5739_v22  ;;  %v1362_v22 = vmul.f32 %v6538_v30, %v6453_v41 }
 0x1ed   : > { %5521 = vmatprep.mubr.msk.bf16.mxu0 %vm6070_vm1, %v6069_v0 }
 0x1ee   : > { %v1467_v50 = vadd.f32 %v6544_v39, %v1362_v22 }
 0x1ef   : > { %v6530_v25 = vpop.f32.mrb[44].mxu0 }
 0x1f0   : > { %v5415_v26 = vpop.f32.mrb[45].mxu0 }
 0x1f1   : > { %v6533_v28 = vpop.f32.mrb[46].mxu0 }
 0x1f2   : > { %v5416_v29 = vpop.f32.mrb[47].mxu0 }
 0x1f4   : > { %5522 = vmatmul.mubr.msk.bf16.gmra.mrb[152].mxu0 %vm772_vm3, %v5740_v27 }
 0x1f5   : > { %5525 = vmatprep.mubr.msk.bf16.mxu0 %vm6070_vm1, %v6069_v0 }
 0x1f7   : > { %v1057_v31 = vpop.f32.mrb[48].mxu0 }
 0x1f8   : > { %v1383_v32 = vmul.f32 %v6538_v30, %v1057_v31  ;;  %v5419_v34 = vpop.f32.mrb[49].mxu0  ;;  %v5743_v31 = vld [vmem:[%s6332_s13 + $0x148] sm:$0xff]  }
 0x1f9   : > { %v1060_v40 = vpop.f32.mrb[50].mxu0  ;;  %v1564_v34 = vmax.f32 %v1466_v38, 0.0 }
 0x1fa   : > { %v6547_v42 = vadd.f32 %v6544_v39, %v1383_v32  ;;  %v1384_v44 = vmul.f32 %v6538_v30, %v1060_v40  ;;  %v5420_v45 = vpop.f32.mrb[51].mxu0 }
 0x1fc   : > { %v1586_v47 = vmax.f32 %v6547_v42, 0.0  ;;  %v1489_v49 = vadd.f32 %v6544_v39, %v1384_v44  ;;  %5526 = vmatmul.mubr.msk.bf16.gmra.mrb[156].mxu0 %vm772_vm3, %v5741_v35  ;;  %v1363_v35 = vmul.f32 %v6538_v30, %v6458_v43 }
 0x1fd   : > { %5529 = vmatprep.mubr.msk.bf16.mxu0 %vm6070_vm1, %v6069_v0 }
 0x1fe   : > { %v1587_v33 = vmax.f32 %v1489_v49, 0.0  ;;  %v1685_v55 = vrot.slane %v1586_v47, 4  ;;  %v1468_v43 = vadd.f32 %v6544_v39, %v1363_v35 }
 0x1ff   : > { %v1065_v54 = vpop.f32.mrb[52].mxu0 }
 0x200   : > { %v1686_v57 = vrot.slane %v1587_v33, 4  ;;  %v1385_v59 = vmul.f32 %v6538_v30, %v1065_v54  ;;  %v5423_v60 = vpop.f32.mrb[53].mxu0 }
 0x201   : > { %v1068_v4 = vpop.f32.mrb[54].mxu0  ;;  %v1364_v60 = vmul.f32 %v6538_v30, %v6461_v46 }
 0x202   : > { %v1490_v6 = vadd.f32 %v6544_v39, %v1385_v59  ;;  %v1386_v7 = vmul.f32 %v6538_v30, %v1068_v4  ;;  %v5424_v9 = vpop.f32.mrb[55].mxu0  ;;  %v1687_v36 = vsel %vm920_vm0, %v1685_v55, %v1686_v57  ;;  %v1565_v59 = vmax.f32 %v1467_v50, 0.0 }
 0x203   : > { %v6568_v12 = vadd.f32 %v1687_v36, %v1562_v1  ;;  %v1566_v9 = vmax.f32 %v1468_v43, 0.0  ;;  %v1365_v36 = vmul.f32 %v6538_v30, %v6466_v48 }
 0x204   : > { %v1588_v14 = vmax.f32 %v1490_v6, 0.0  ;;  %v1491_v16 = vadd.f32 %v6544_v39, %v1386_v7  ;;  %5530 = vmatmul.mubr.msk.bf16.gmra.mrb[160].mxu0 %vm772_vm3, %v5742_v62  ;;  %v5744_v6 = vld [vmem:[%s6332_s13 + $0x150] sm:$0xff]  }
 0x205   : > { %5533 = vmatprep.mubr.msk.bf16.mxu0 %vm6070_vm1, %v6069_v0  ;;  %v1470_v48 = vadd.f32 %v6544_v39, %v1365_v36 }
 0x206   : > { %v1688_v17 = vrot.slane %v1588_v14, 4  ;;  %v1589_v19 = vmax.f32 %v1491_v16, 0.0 }
 0x207   : > { %v1073_v24 = vpop.f32.mrb[56].mxu0 }
 0x208   : > { %v1690_v26 = vrot.slane %v1589_v19, 4  ;;  %v1387_v27 = vmul.f32 %v6538_v30, %v1073_v24  ;;  %v5427_v29 = vpop.f32.mrb[57].mxu0  ;;  %v1689_v32 = vsel %vm920_vm0, %v1686_v57, %v1688_v17  ;;  %v1469_v19 = vadd.f32 %v6544_v39, %v1364_v60 }
 0x209   : > { %v1076_v37 = vpop.f32.mrb[58].mxu0  ;;  %v6582_v40 = vadd.f32 %v1689_v32, %v1563_v21 }
 0x20a   : > { %v1492_v44 = vadd.f32 %v6544_v39, %v1387_v27  ;;  %v1388_v45 = vmul.f32 %v6538_v30, %v1076_v37  ;;  %v5428_v41 = vpop.f32.mrb[59].mxu0  ;;  %v1691_v49 = vsel %vm920_vm0, %v1688_v17, %v1690_v26  ;;  %v1567_v29 = vmax.f32 %v1469_v19, 0.0 }
 0x20b   : > { %v6588_v33 = vadd.f32 %v1691_v49, %v1564_v34  ;;  %v1568_v41 = vmax.f32 %v1470_v48, 0.0  ;;  %v1367_v49 = vmul.f32 %v6538_v30, %v6474_v53 }
 0x20c   : > { %v1590_v52 = vmax.f32 %v1492_v44, 0.0  ;;  %v1493_v54 = vadd.f32 %v6544_v39, %v1388_v45  ;;  %5534 = vmatmul.mubr.msk.bf16.gmra.mrb[164].mxu0 %vm772_vm3, %v5743_v31  ;;  %v1366_v31 = vmul.f32 %v6538_v30, %v6469_v51  ;;  %v5745_v44 = vld [vmem:[%s6332_s13 + $0x158] sm:$0xff]  }
 0x20d   : > { %5537 = vmatprep.mubr.msk.bf16.mxu0 %vm6070_vm1, %v6069_v0  ;;  %v1472_v53 = vadd.f32 %v6544_v39, %v1367_v49 }
 0x20e   : > { %v1692_v55 = vrot.slane %v1590_v52, 4  ;;  %v1591_v57 = vmax.f32 %v1493_v54, 0.0 }
 0x20f   : > { %v1081_v62 = vpop.f32.mrb[60].mxu0 }
 0x210   : > { %v1694_v1 = vrot.slane %v1591_v57, 4  ;;  %v1389_v2 = vmul.f32 %v6538_v30, %v1081_v62  ;;  %v5431_v4 = vpop.f32.mrb[61].mxu0  ;;  %v1693_v7 = vsel %vm920_vm0, %v1690_v26, %v1692_v55  ;;  %v1471_v57 = vadd.f32 %v6544_v39, %v1366_v31 }
 0x211   : > { %v1084_v11 = vpop.f32.mrb[62].mxu0  ;;  %v6602_v14 = vadd.f32 %v1693_v7, %v1565_v59 }
 0x212   : > { %v1494_v16 = vadd.f32 %v6544_v39, %v1389_v2  ;;  %v1390_v38 = vmul.f32 %v6538_v30, %v1084_v11  ;;  %v5432_v46 = vpop.f32.mrb[63].mxu0  ;;  %v1695_v17 = vsel %vm920_vm0, %v1692_v55, %v1694_v1  ;;  %v1569_v4 = vmax.f32 %v1471_v57, 0.0 }
 0x213   : > { %v6608_v21 = vadd.f32 %v1695_v17, %v1566_v9  ;;  %v1570_v46 = vmax.f32 %v1472_v53, 0.0  ;;  %v1369_v17 = vmul.f32 %v6538_v30, %v6482_v58 }
 0x214   : > { %v1592_v22 = vmax.f32 %v1494_v16, 0.0  ;;  %v1495_v24 = vadd.f32 %v6544_v39, %v1390_v38  ;;  %5538 = vmatmul.mubr.msk.bf16.gmra.mrb[168].mxu0 %vm772_vm3, %v5744_v6  ;;  %v1368_v6 = vmul.f32 %v6538_v30, %v6477_v56  ;;  %v5746_v16 = vld [vmem:[%s6332_s13 + $0x160] sm:$0xff]  }
 0x215   : > { %5541 = vmatprep.mubr.msk.bf16.mxu0 %vm6070_vm1, %v6069_v0  ;;  %v1474_v58 = vadd.f32 %v6544_v39, %v1369_v17 }
 0x216   : > { %v1696_v26 = vrot.slane %v1592_v22, 4  ;;  %v1593_v27 = vmax.f32 %v1495_v24, 0.0 }
 0x217   : > { %v1089_v32 = vpop.f32.mrb[64].mxu0 }
 0x218   : > { %v1698_v34 = vrot.slane %v1593_v27, 4  ;;  %v1391_v35 = vmul.f32 %v6538_v30, %v1089_v32  ;;  %v5435_v37 = vpop.f32.mrb[65].mxu0  ;;  %v1697_v45 = vsel %vm920_vm0, %v1694_v1, %v1696_v26  ;;  %v1473_v27 = vadd.f32 %v6544_v39, %v1368_v6 }
 0x219   : > { %v1092_v50 = vpop.f32.mrb[66].mxu0  ;;  %v6622_v52 = vadd.f32 %v1697_v45, %v1567_v29 }
 0x21a   : > { %v1496_v54 = vadd.f32 %v6544_v39, %v1391_v35  ;;  %v1392_v43 = vmul.f32 %v6538_v30, %v1092_v50  ;;  %v5436_v51 = vpop.f32.mrb[67].mxu0  ;;  %v1699_v55 = vsel %vm920_vm0, %v1696_v26, %v1698_v34  ;;  %v1571_v37 = vmax.f32 %v1473_v27, 0.0 }
 0x21b   : > { %v6628_v59 = vadd.f32 %v1699_v55, %v1568_v41  ;;  %v1572_v51 = vmax.f32 %v1474_v58, 0.0  ;;  %v1371_v55 = vmul.f32 %v6538_v30, %v6490_v63 }
 0x21c   : > { %v1594_v60 = vmax.f32 %v1496_v54, 0.0  ;;  %v1497_v62 = vadd.f32 %v6544_v39, %v1392_v43  ;;  %5542 = vmatmul.mubr.msk.bf16.gmra.mrb[172].mxu0 %vm772_vm3, %v5745_v44  ;;  %v1370_v44 = vmul.f32 %v6538_v30, %v6485_v61  ;;  %v5747_v54 = vld [vmem:[%s6332_s13 + $0x168] sm:$0xff]  }
 0x21d   : > { %5545 = vmatprep.mubr.msk.bf16.mxu0 %vm6070_vm1, %v6069_v0  ;;  %v1476_v63 = vadd.f32 %v6544_v39, %v1371_v55 }
 0x21e   : > { %v1700_v1 = vrot.slane %v1594_v60, 4  ;;  %v1595_v2 = vmax.f32 %v1497_v62, 0.0 }
 0x21f   : > { %v1097_v7 = vpop.f32.mrb[68].mxu0 }
 0x220   : > { %v1702_v9 = vrot.slane %v1595_v2, 4  ;;  %v1393_v36 = vmul.f32 %v6538_v30, %v1097_v7  ;;  %v5439_v11 = vpop.f32.mrb[69].mxu0  ;;  %v1701_v38 = vsel %vm920_vm0, %v1698_v34, %v1700_v1  ;;  %v1475_v2 = vadd.f32 %v6544_v39, %v1370_v44 }
 0x221   : > { %v1100_v19 = vpop.f32.mrb[70].mxu0  ;;  %v6642_v22 = vadd.f32 %v1701_v38, %v1569_v4 }
 0x222   : > { %v1498_v24 = vadd.f32 %v6544_v39, %v1393_v36  ;;  %v1394_v48 = vmul.f32 %v6538_v30, %v1100_v19  ;;  %v5440_v56 = vpop.f32.mrb[71].mxu0  ;;  %v1703_v26 = vsel %vm920_vm0, %v1700_v1, %v1702_v9  ;;  %v1573_v11 = vmax.f32 %v1475_v2, 0.0  ;;  %v5753_v2 = vld [vmem:[#allocation8 + $0x40] sm:$0xff]  }
 0x223   : > { %v6648_v29 = vadd.f32 %v1703_v26, %v1570_v46  ;;  %v1574_v56 = vmax.f32 %v1476_v63, 0.0  ;;  %v1373_v26 = vmul.f32 %v6538_v30, %v6498_v5  ;;  %4855 = vmatprep.subr.bf16.mxu1 %v5753_v2 }
 0x224   : > { %v1596_v31 = vmax.f32 %v1498_v24, 0.0  ;;  %v1499_v32 = vadd.f32 %v6544_v39, %v1394_v48  ;;  %5546 = vmatmul.mubr.msk.bf16.gmra.mrb[176].mxu0 %vm772_vm3, %v5746_v16  ;;  %v1372_v16 = vmul.f32 %v6538_v30, %v6493_v3  ;;  %v5748_v24 = vld [vmem:[%s6332_s13 + $0x170] sm:$0xff]  }
 0x225   : > { %5549 = vmatprep.mubr.msk.bf16.mxu0 %vm6070_vm1, %v6069_v0  ;;  %v1478_v5 = vadd.f32 %v6544_v39, %v1373_v26 }
 0x226   : > { %v1704_v34 = vrot.slane %v1596_v31, 4  ;;  %v1597_v35 = vmax.f32 %v1499_v32, 0.0 }
 0x227   : > { %v1105_v45 = vpop.f32.mrb[72].mxu0 }
 0x228   : > { %v1706_v41 = vrot.slane %v1597_v35, 4  ;;  %v1395_v49 = vmul.f32 %v6538_v30, %v1105_v45  ;;  %v5443_v50 = vpop.f32.mrb[73].mxu0  ;;  %v1705_v43 = vsel %vm920_vm0, %v1702_v9, %v1704_v34  ;;  %v1477_v35 = vadd.f32 %v6544_v39, %v1372_v16 }
 0x229   : > { %v1108_v57 = vpop.f32.mrb[74].mxu0  ;;  %v6662_v60 = vadd.f32 %v1705_v43, %v1571_v37 }
 0x22a   : > { %v1500_v62 = vadd.f32 %v6544_v39, %v1395_v49  ;;  %v1396_v53 = vmul.f32 %v6538_v30, %v1108_v57  ;;  %v5444_v61 = vpop.f32.mrb[75].mxu0  ;;  %v1707_v1 = vsel %vm920_vm0, %v1704_v34, %v1706_v41  ;;  %v1575_v50 = vmax.f32 %v1477_v35, 0.0 }
 0x22b   : > { %v6668_v4 = vadd.f32 %v1707_v1, %v1572_v51  ;;  %v5749_v51 = vld [vmem:[%s6332_s13 + $0x178] sm:$0xff]   ;;  %v5751_v61 = vld [vmem:[#allocation8 + $0x1c0] sm:$0xff]  }
 0x22c   : > { %v1598_v6 = vmax.f32 %v1500_v62, 0.0  ;;  %v1501_v7 = vadd.f32 %v6544_v39, %v1396_v53  ;;  %5550 = vmatmul.mubr.msk.bf16.gmra.mrb[180].mxu0 %vm772_vm3, %v5747_v54  ;;  %v1374_v54 = vmul.f32 %v6538_v30, %v6501_v8  ;;  %v5752_v1 = vld [vmem:[#allocation8 + $0x180] sm:$0xff]   ;;  %5191 = vmatprep.subr.bf16.mxu0 %v5751_v61 }
 0x22d   : > { %5553 = vmatprep.mubr.msk.bf16.mxu0 %vm6070_vm1, %v6069_v0  ;;  %5192 = vmatpush3.bf16.msra.mxu0 %v5752_v1  ;;  %v5759_v1 = vld [vmem:[#allocation8 + $0x58] sm:$0xff]  }
 0x22e   : > { %v1708_v9 = vrot.slane %v1598_v6, 4  ;;  %v1599_v36 = vmax.f32 %v1501_v7, 0.0  ;;  %v1576_v6 = vmax.f32 %v1478_v5, 0.0  ;;  %v1375_v7 = vmul.f32 %v6538_v30, %v6506_v10 }
 0x22f   : > { %v1113_v38 = vpop.f32.mrb[76].mxu0 }
 0x230   : > { %v1710_v46 = vrot.slane %v1599_v36, 4  ;;  %v1397_v17 = vmul.f32 %v6538_v30, %v1113_v38  ;;  %v5447_v19 = vpop.f32.mrb[77].mxu0  ;;  %v1709_v48 = vsel %vm920_vm0, %v1706_v41, %v1708_v9  ;;  %v5754_v36 = vld [vmem:[#allocation8] sm:$0xff]  }
 0x231   : > { %v1116_v27 = vpop.f32.mrb[78].mxu0  ;;  %v6682_v31 = vadd.f32 %v1709_v48, %v1573_v11  ;;  %4856 = vmatpush3.bf16.msra.mxu1 %v5754_v36  ;;  %v1480_v48 = vadd.f32 %v6544_v39, %v1375_v7 }
 0x232   : > { %v1502_v32 = vadd.f32 %v6544_v39, %v1397_v17  ;;  %v1398_v3 = vmul.f32 %v6538_v30, %v1116_v27  ;;  %v5448_v58 = vpop.f32.mrb[79].mxu0  ;;  %v1711_v34 = vsel %vm920_vm0, %v1708_v9, %v1710_v46 }
 0x233   : > { %v6688_v37 = vadd.f32 %v1711_v34, %v1574_v56  ;;  %v5756_v56 = vld [vmem:[#allocation8 + $0x8] sm:$0xff]  }
 0x234   : > { %v1600_v44 = vmax.f32 %v1502_v32, 0.0  ;;  %v1503_v45 = vadd.f32 %v6544_v39, %v1398_v3  ;;  %5554 = vmatmul.mubr.msk.bf16.gmra.mrb[184].mxu0 %vm772_vm3, %v5748_v24  ;;  %v5755_v24 = vld [vmem:[#allocation8 + $0x48] sm:$0xff]   ;;  %v1376_v3 = vmul.f32 %v6538_v30, %v6509_v13 }
 0x235   : > { %5557 = vmatprep.mubr.msk.bf16.mxu0 %vm6070_vm1, %v6069_v0  ;;  %4857 = vmatprep.subr.bf16.mxu1 %v5755_v24  ;;  %v5761_v24 = vld [vmem:[#allocation8 + $0x60] sm:$0xff]  }
 0x236   : > { %v1712_v41 = vrot.slane %v1600_v44, 4  ;;  %v1601_v49 = vmax.f32 %v1503_v45, 0.0  ;;  %4858 = vmatpush3.bf16.msra.mxu1 %v5756_v56  ;;  %v5750_v45 = vld [vmem:[%s6332_s13 + $0x180] sm:$0xff]  }
 0x237   : > { %v1121_v43 = vpop.f32.mrb[80].mxu0 }
 0x238   : > { %v1714_v55 = vrot.slane %v1601_v49, 4  ;;  %v1399_v57 = vmul.f32 %v6538_v30, %v1121_v43  ;;  %v5451_v62 = vpop.f32.mrb[81].mxu0  ;;  %v1713_v53 = vsel %vm920_vm0, %v1710_v46, %v1712_v41  ;;  %v1479_v46 = vadd.f32 %v6544_v39, %v1374_v54  ;;  %v5758_v43 = vld [vmem:[#allocation8 + $0x10] sm:$0xff]  }
 0x239   : > { %v1124_v63 = vpop.f32.mrb[82].mxu0  ;;  %v6702_v9 = vadd.f32 %v1713_v53, %v1575_v50  ;;  %v1578_v49 = vmax.f32 %v1480_v48, 0.0  ;;  %v1481_v53 = vadd.f32 %v6544_v39, %v1376_v3 }
 0x23a   : > { %v1504_v8 = vadd.f32 %v6544_v39, %v1399_v57  ;;  %v1400_v11 = vmul.f32 %v6538_v30, %v1124_v63  ;;  %v5452_v16 = vpop.f32.mrb[83].mxu0  ;;  %v1715_v38 = vsel %vm920_vm0, %v1712_v41, %v1714_v55  ;;  %v1577_v32 = vmax.f32 %v1479_v46, 0.0  ;;  %v5757_v41 = vld [vmem:[#allocation8 + $0x50] sm:$0xff]  }
 0x23b   : > { %v6708_v17 = vadd.f32 %v1715_v38, %v1576_v6  ;;  %4859 = vmatprep.subr.bf16.mxu1 %v5757_v41  ;;  %v5760_v6 = vld [vmem:[#allocation8 + $0x18] sm:$0xff]   ;;  %v1579_v36 = vmax.f32 %v1481_v53, 0.0 }
 0x23c   : > { %v1602_v10 = vmax.f32 %v1504_v8, 0.0  ;;  %v1505_v19 = vadd.f32 %v6544_v39, %v1400_v11  ;;  %5558 = vmatmul.mubr.msk.bf16.gmra.mrb[188].mxu0 %vm772_vm3, %v5749_v51  ;;  %4860 = vmatpush3.bf16.msra.mxu1 %v5758_v43  ;;  %v1378_v8 = vmul.f32 %v6538_v30, %v6517_v18  ;;  %v1379_v11 = vmul.f32 %v6538_v30, %v6522_v20 }
 0x23d   : > { %5561 = vmatprep.mubr.msk.bf16.mxu0 %vm6070_vm1, %v6069_v0  ;;  %v1377_v0 = vmul.f32 %v6538_v30, %v6514_v15  ;;  %4861 = vmatprep.subr.bf16.mxu1 %v5759_v1 }
 0x23e   : > { %v1716_v26 = vrot.slane %v1602_v10, 4  ;;  %v1603_v27 = vmax.f32 %v1505_v19, 0.0 }
 0x23f   : > { %v1129_v58 = vpop.f32.mrb[84].mxu0  ;;  %v1482_v2 = vadd.f32 %v6544_v39, %v1377_v0  ;;  %v5764_v0 = vld [vmem:[#allocation8 + $0x28] sm:$0xff]  }
 0x240   : > { %v1718_v34 = vrot.slane %v1603_v27, 4  ;;  %v1401_v35 = vmul.f32 %v6538_v30, %v1129_v58  ;;  %v5455_v44 = vpop.f32.mrb[85].mxu0  ;;  %v1717_v5 = vsel %vm920_vm0, %v1714_v55, %v1716_v26  ;;  %4862 = vmatpush3.bf16.msra.mxu1 %v5760_v6  ;;  %v5762_v27 = vld [vmem:[#allocation8 + $0x20] sm:$0xff]   ;;  %v1483_v58 = vadd.f32 %v6544_v39, %v1378_v8  ;;  %v5767_v6 = vld [vmem:[#allocation8 + $0x188] sm:$0xff]   ;;  %v5768_v8 = vld [vmem:[#allocation8 + $0x30] sm:$0xff]  }
 0x241   : > { %v1132_v50 = vpop.f32.mrb[86].mxu0  ;;  %v6722_v54 = vadd.f32 %v1717_v5, %v1577_v32  ;;  %v1580_v48 = vmax.f32 %v1482_v2, 0.0  ;;  %4863 = vmatprep.subr.bf16.mxu1 %v5761_v24  ;;  %v5766_v2 = vld [vmem:[#allocation8 + $0x70] sm:$0xff]  }
 0x242   : > { %v1506_v13 = vadd.f32 %v6544_v39, %v1401_v35  ;;  %v1402_v51 = vmul.f32 %v6538_v30, %v1132_v50  ;;  %v5456_v57 = vpop.f32.mrb[87].mxu0  ;;  %v1719_v62 = vsel %vm920_vm0, %v1716_v26, %v1718_v34  ;;  %v1484_v35 = vadd.f32 %v6544_v39, %v1379_v11 }
 0x243   : > { %v6728_v55 = vadd.f32 %v1719_v62, %v1578_v49  ;;  %v5763_v49 = vld [vmem:[#allocation8 + $0x68] sm:$0xff]  }
 0x244   : > { %v1604_v61 = vmax.f32 %v1506_v13, 0.0  ;;  %v1507_v15 = vadd.f32 %v6544_v39, %v1402_v51  ;;  %5562 = vmatmul.mubr.msk.bf16.gmra.mrb[192].mxu0 %vm772_vm3, %v5750_v45  ;;  %4864 = vmatpush3.bf16.msra.mxu1 %v5762_v27  ;;  %v1380_v45 = vmul.f32 %v6538_v30, %v6525_v23  ;;  %v1581_v13 = vmax.f32 %v1483_v58, 0.0  ;;  %v5765_v62 = vld [vmem:[#allocation8 + $0x1c8] sm:$0xff]   ;;  %v5772_v58 = vld [vmem:[#allocation8 + $0x38] sm:$0xff]  }
 0x245   : > { %4865 = vmatprep.subr.bf16.mxu1 %v5763_v49  ;;  %v1582_v51 = vmax.f32 %v1484_v35, 0.0  ;;  %5193 = vmatprep.subr.bf16.mxu0 %v5765_v62 }
 0x246   : > { %v1720_v7 = vrot.slane %v1604_v61, 4  ;;  %v1605_v63 = vmax.f32 %v1507_v15, 0.0  ;;  %v1485_v53 = vadd.f32 %v6544_v39, %v1380_v45  ;;  %5194 = vmatpush3.bf16.msra.mxu0 %v5767_v6 }
 0x247   : > { %v1137_v16 = vpop.f32.mrb[88].mxu0 }
 0x248   : > { %v1722_v38 = vrot.slane %v1605_v63, 4  ;;  %v1403_v46 = vmul.f32 %v6538_v30, %v1137_v16  ;;  %v5459_v10 = vpop.f32.mrb[89].mxu0  ;;  %v1721_v19 = vsel %vm920_vm0, %v1718_v34, %v1720_v7  ;;  %v6072_v34 = vmov 0   ;;  %4866 = vmatpush3.bf16.msra.mxu1 %v5764_v0 }
 0x249   : > { %v1140_v56 = vpop.f32.mrb[90].mxu0  ;;  %v6739_v26 = vadd.f32 %v1721_v19, %v1579_v36  ;;  %406 = vst [vmem:[#allocation2 + $0x18] sm:$0xff] %v6072_v34  ;;  %403 = vst [vmem:[#allocation2] sm:$0xff] %v6072_v34  ;;  %v6778_v11 = vrot.slane %v6072_v34, 1  ;;  %4867 = vmatprep.subr.bf16.mxu1 %v5766_v2  ;;  %v1382_v0 = vmul.f32 %v6538_v30, %v6533_v28 }
 0x24a   : > { %v1508_v32 = vadd.f32 %v6544_v39, %v1403_v46  ;;  %v1404_v18 = vmul.f32 %v6538_v30, %v1140_v56  ;;  %v5460_v3 = vpop.f32.mrb[91].mxu0  ;;  %v1723_v20 = vsel %vm920_vm0, %v1720_v7, %v1722_v38  ;;  %404 = vst [vmem:[#allocation2 + $0x8] sm:$0xff] %v6072_v34  ;;  %405 = vst [vmem:[#allocation2 + $0x10] sm:$0xff] %v6072_v34 }
 0x24b   : > { %v6746_v44 = vadd.f32 %v1723_v20, %v1580_v48  ;;  %407 = vst [vmem:[#allocation2 + $0x20] sm:$0xff] %v6072_v34  ;;  %408 = vst [vmem:[#allocation2 + $0x28] sm:$0xff] %v6072_v34  ;;  %v1381_v7 = vmul.f32 %v6538_v30, %v6530_v25  ;;  %v5769_v25 = vld [vmem:[#allocation8 + $0x1d0] sm:$0xff]   ;;  %v1583_v3 = vmax.f32 %v1485_v53, 0.0  ;;  %v6790_v49 = vrot.slane %v6778_v11, 7 }
 0x24c   : > { %409 = vst [vmem:[#allocation2 + $0x30] sm:$0xff] %v6072_v34  ;;  %410 = vst [vmem:[#allocation2 + $0x38] sm:$0xff] %v6072_v34  ;;  %v1606_v5 = vmax.f32 %v1508_v32, 0.0  ;;  %v1509_v41 = vadd.f32 %v6544_v39, %v1404_v18  ;;  %4868 = vmatpush3.bf16.msra.mxu1 %v5768_v8  ;;  %v5770_v32 = vld [vmem:[#allocation8 + $0x78] sm:$0xff]   ;;  %v5771_v18 = vld [vmem:[#allocation8 + $0x190] sm:$0xff]   ;;  %5195 = vmatprep.subr.bf16.mxu0 %v5769_v25 }
 0x24d   : > { %411 = vst [vmem:[#allocation2 + $0x40] sm:$0xff] %v6072_v34  ;;  %412 = vst [vmem:[#allocation2 + $0x48] sm:$0xff] %v6072_v34  ;;  %v1486_v20 = vadd.f32 %v6544_v39, %v1381_v7  ;;  %4869 = vmatprep.subr.bf16.mxu1 %v5770_v32  ;;  %5196 = vmatpush3.bf16.msra.mxu0 %v5771_v18  ;;  %v5776_v25 = vld [vmem:[#allocation8 + $0x1a0] sm:$0xff]   ;;  %v5777_v18 = vld [vmem:[#allocation8 + $0x1e8] sm:$0xff]  }
 0x24e   : > { %413 = vst [vmem:[#allocation2 + $0x50] sm:$0xff] %v6072_v34  ;;  %414 = vst [vmem:[#allocation2 + $0x58] sm:$0xff] %v6072_v34  ;;  %v1724_v50 = vrot.slane %v1606_v5, 4  ;;  %v1607_v43 = vmax.f32 %v1509_v41, 0.0 }
 0x24f   : > { %415 = vst [vmem:[#allocation2 + $0x60] sm:$0xff] %v6072_v34  ;;  %416 = vst [vmem:[#allocation2 + $0x68] sm:$0xff] %v6072_v34  ;;  %v1145_v57 = vpop.f32.mrb[92].mxu0  ;;  %v1584_v2 = vmax.f32 %v1486_v20, 0.0 }
 0x250   : > { %417 = vst [vmem:[#allocation2 + $0x70] sm:$0xff] %v6072_v34  ;;  %418 = vst [vmem:[#allocation2 + $0x78] sm:$0xff] %v6072_v34  ;;  %v1726_v61 = vrot.slane %v1607_v43, 4  ;;  %v1405_v15 = vmul.f32 %v6538_v30, %v1145_v57  ;;  %v5463_v1 = vpop.f32.mrb[93].mxu0  ;;  %v1725_v23 = vsel %vm920_vm0, %v1722_v38, %v1724_v50  ;;  %v2050_v19 = vld [vmem:[#allocation2] sm:$0x80]  ;;  %4870 = vmatpush3.bf16.msra.mxu1 %v5772_v58 }
 0x251   : > { %419 = vst [vmem:[#allocation2 + $0x80] sm:$0xff] %v6072_v34  ;;  %420 = vst [vmem:[#allocation2 + $0x88] sm:$0xff] %v6072_v34  ;;  %v1148_v63 = vpop.f32.mrb[94].mxu0  ;;  %v6775_v36 = vadd.f32 %v1725_v23, %v1581_v13  ;;  %v2091_v48 = vshrl.u32 %v2050_v19, 16  ;;  %v5773_v43 = vld [vmem:[#allocation8 + $0x1d8] sm:$0xff]   ;;  %v2612_v13 = vrot.slane %v2050_v19, 7 }
 0x252   : > { %421 = vst [vmem:[#allocation2 + $0x90] sm:$0xff] %v6072_v34  ;;  %v1510_v16 = vadd.f32 %v6544_v39, %v1405_v15  ;;  %v1406_v46 = vmul.f32 %v6538_v30, %v1148_v63  ;;  %v5464_v10 = vpop.f32.mrb[95].mxu0  ;;  %v1727_v38 = vsel %vm920_vm0, %v1724_v50, %v1726_v61  ;;  %v5774_v23 = vld [vmem:[#allocation8 + $0x198] sm:$0xff]   ;;  %5197 = vmatprep.subr.bf16.mxu0 %v5773_v43 }
 0x253   : > { %v6783_v24 = vadd.f32 %v1727_v38, %v1582_v51  ;;  %v2097_v35 = vsel %vm2089_vm4, %v2091_v48, %v6778_v11  ;;  %v6795_v51 = vrot.slane %v6072_v34, 7  ;;  %5198 = vmatpush3.bf16.msra.mxu0 %v5774_v23  ;;  %v5775_v10 = vld [vmem:[#allocation8 + $0x1e0] sm:$0xff]   ;;  %v5781_v23 = vld [vmem:[#allocation8 + $0x1f8] sm:$0xff]  }
 0x254   : > { %v1608_v56 = vmax.f32 %v1510_v16, 0.0  ;;  %v1511_v27 = vadd.f32 %v6544_v39, %v1406_v46  ;;  %v2615_v41 = vrot.slane %v2097_v35, 7  ;;  %v1487_v16 = vadd.f32 %v6544_v39, %v1382_v0  ;;  %5199 = vmatprep.subr.bf16.mxu0 %v5775_v10 }
 0x255   : > { %v2614_v34 = vsel %vm1974_vm5, %v2612_v13, %v6795_v51  ;;  %v5779_v13 = vld [vmem:[#allocation8 + $0x1f0] sm:$0xff]  }
 0x256   : > { %v1728_v45 = vrot.slane %v1608_v56, 4  ;;  %v1609_v5 = vmax.f32 %v1511_v27, 0.0  ;;  %v2617_v1 = vsel %vm1974_vm5, %v2615_v41, %v6790_v49  ;;  %v1585_v27 = vmax.f32 %v1487_v16, 0.0 }
 0x257   : > { %v1153_v50 = vpop.f32.mrb[96].mxu0  ;;  %3397 = vmatprep.mubr.bf16.mxu1 %v2617_v1  ;;  %5200 = vmatpush3.bf16.msra.mxu0 %v5776_v25 }
 0x258   : > { %v1730_v57 = vrot.slane %v1609_v5, 4  ;;  %v1407_v62 = vmul.f32 %v6538_v30, %v1153_v50  ;;  %v5467_v53 = vpop.f32.mrb[97].mxu0  ;;  %v1729_v15 = vsel %vm920_vm0, %v1726_v61, %v1728_v45  ;;  %3398 = vmatmul.mubr.bf16.vlgmr.msra.gmra.mrb[0].mxu1 %v2614_v34  ;;  %5201 = vmatprep.subr.bf16.mxu0 %v5777_v18 }
 0x259   : > { %v1156_v28 = vpop.f32.mrb[98].mxu0  ;;  %v6801_v6 = vadd.f32 %v1729_v15, %v1583_v3  ;;  %v5780_v53 = vld [vmem:[#allocation8 + $0x1b0] sm:$0xff]  }
 0x25a   : > { %v1512_v7 = vadd.f32 %v6544_v39, %v1407_v62  ;;  %v1408_v63 = vmul.f32 %v6538_v30, %v1156_v28  ;;  %v5468_v8 = vpop.f32.mrb[99].mxu0  ;;  %v1731_v61 = vsel %vm920_vm0, %v1728_v45, %v1730_v57  ;;  %v5778_v45 = vld [vmem:[#allocation8 + $0x1a8] sm:$0xff]  }
 0x25b   : > { %v6809_v46 = vadd.f32 %v1731_v61, %v1584_v2  ;;  %5202 = vmatpush3.bf16.msra.mxu0 %v5778_v45 }
 0x25c   : > { %v1610_v38 = vmax.f32 %v1512_v7, 0.0  ;;  %v1513_v19 = vadd.f32 %v6544_v39, %v1408_v63  ;;  %5203 = vmatprep.subr.bf16.mxu0 %v5779_v13  ;;  %v5782_v7 = vld [vmem:[#allocation8 + $0x1b8] sm:$0xff]  }
 0x25e   : > { %v6812_v48 = vrot.slane %v1610_v38, 4  ;;  %v1611_v56 = vmax.f32 %v1513_v19, 0.0 }
 0x25f   : > { %v1161_v32 = vpop.f32.mrb[100].mxu0  ;;  %5204 = vmatpush3.bf16.msra.mxu0 %v5780_v53 }
 0x260   : > { %v6815_v3 = vadd.f32 %v6568_v12, %v1611_v56  ;;  %v1409_v20 = vmul.f32 %v6538_v30, %v1161_v32  ;;  %v5471_v58 = vpop.f32.mrb[101].mxu0  ;;  %v1733_v35 = vsel %vm920_vm0, %v1730_v57, %v6812_v48  ;;  %5205 = vmatprep.subr.bf16.mxu0 %v5781_v23 }
 0x261   : > { %v1164_v5 = vpop.f32.mrb[102].mxu0  ;;  %v6820_v41 = vadd.f32 %v1733_v35, %v1585_v27 }
 0x262   : > { %v1514_v0 = vadd.f32 %v6544_v39, %v1409_v20  ;;  %v1410_v50 = vmul.f32 %v6538_v30, %v1164_v5  ;;  %v5472_v43 = vpop.f32.mrb[103].mxu0 }
 0x263   : > { %5206 = vmatpush3.bf16.msra.mxu0 %v5782_v7 }
 0x264   : > { %v1612_v12 = vmax.f32 %v1514_v0, 0.0  ;;  %v1515_v62 = vadd.f32 %v6544_v39, %v1410_v50 }
 0x266   : > { %v6826_v15 = vadd.f32 %v6582_v40, %v1612_v12  ;;  %v1613_v57 = vmax.f32 %v1515_v62, 0.0 }
 0x267   : > { %v1169_v1 = vpop.f32.mrb[104].mxu0 }
 0x268   : > { %v6829_v2 = vadd.f32 %v6588_v33, %v1613_v57  ;;  %v1411_v28 = vmul.f32 %v6538_v30, %v1169_v1  ;;  %v5475_v34 = vpop.f32.mrb[105].mxu0 }
 0x269   : > { %v1172_v63 = vpop.f32.mrb[106].mxu0 }
 0x26a   : > { %v1516_v8 = vadd.f32 %v6544_v39, %v1411_v28  ;;  %v1412_v61 = vmul.f32 %v6538_v30, %v1172_v63  ;;  %v5476_v16 = vpop.f32.mrb[107].mxu0 }
 0x26c   : > { %v1614_v40 = vmax.f32 %v1516_v8, 0.0  ;;  %v1517_v10 = vadd.f32 %v6544_v39, %v1412_v61 }
 0x26e   : > { %v6836_v38 = vadd.f32 %v6602_v14, %v1614_v40  ;;  %v1615_v33 = vmax.f32 %v1517_v10, 0.0 }
 0x26f   : > { %v1177_v19 = vpop.f32.mrb[108].mxu0 }
 0x270   : > { %v6839_v25 = vadd.f32 %v6608_v21, %v1615_v33  ;;  %v1413_v56 = vmul.f32 %v6538_v30, %v1177_v19  ;;  %v5479_v27 = vpop.f32.mrb[109].mxu0 }
 0x271   : > { %v1180_v32 = vpop.f32.mrb[110].mxu0 }
 0x272   : > { %v1518_v18 = vadd.f32 %v6544_v39, %v1413_v56  ;;  %v1414_v20 = vmul.f32 %v6538_v30, %v1180_v32  ;;  %v5480_v58 = vpop.f32.mrb[111].mxu0 }
 0x274   : > { %v1616_v35 = vmax.f32 %v1518_v18, 0.0  ;;  %v1519_v45 = vadd.f32 %v6544_v39, %v1414_v20  ;;  %v5783_v18 = vld [vmem:[#allocation8 + $0xc0] sm:$0xff]  }
 0x275   : > { %v5784_v20 = vld [vmem:[#allocation8 + $0x80] sm:$0xff]   ;;  %4967 = vmatprep.subr.bf16.mxu1 %v5783_v18 }
 0x276   : > { %v6846_v14 = vadd.f32 %v6622_v52, %v1616_v35  ;;  %v1617_v5 = vmax.f32 %v1519_v45, 0.0  ;;  %4968 = vmatpush3.bf16.msra.mxu1 %v5784_v20  ;;  %v6901_v20 = vld [vmem:[#allocation5] ss:$0 sm:$0xff] }
 0x277   : > { %v1185_v0 = vpop.f32.mrb[112].mxu0 }
 0x278   : > { %v6849_v21 = vadd.f32 %v6628_v59, %v1617_v5  ;;  %v1415_v50 = vmul.f32 %v6538_v30, %v1185_v0  ;;  %v5483_v43 = vpop.f32.mrb[113].mxu0 }
 0x279   : > { %v1188_v13 = vpop.f32.mrb[114].mxu0 }
 0x27a   : > { %v1520_v12 = vadd.f32 %v6544_v39, %v1415_v50  ;;  %v1416_v62 = vmul.f32 %v6538_v30, %v1188_v13  ;;  %v5484_v53 = vpop.f32.mrb[115].mxu0 }
 0x27c   : > { %v1618_v57 = vmax.f32 %v1520_v12, 0.0  ;;  %v1521_v1 = vadd.f32 %v6544_v39, %v1416_v62 }
 0x27e   : > { %v6856_v52 = vadd.f32 %v6642_v22, %v1618_v57  ;;  %v1619_v23 = vmax.f32 %v1521_v1, 0.0 }
 0x27f   : > { %v1193_v28 = vpop.f32.mrb[116].mxu0 }
 0x280   : > { %v6859_v59 = vadd.f32 %v6648_v29, %v1619_v23  ;;  %v1417_v34 = vmul.f32 %v6538_v30, %v1193_v28  ;;  %v5487_v7 = vpop.f32.mrb[117].mxu0 }
 0x281   : > { %v1196_v63 = vpop.f32.mrb[118].mxu0 }
 0x282   : > { %v1522_v8 = vadd.f32 %v6544_v39, %v1417_v34  ;;  %v1418_v61 = vmul.f32 %v6538_v30, %v1196_v63  ;;  %v5488_v16 = vpop.f32.mrb[119].mxu0 }
 0x284   : > { %v1620_v40 = vmax.f32 %v1522_v8, 0.0  ;;  %v1523_v10 = vadd.f32 %v6544_v39, %v1418_v61 }
 0x286   : > { %v6866_v22 = vadd.f32 %v6662_v60, %v1620_v40  ;;  %v1621_v33 = vmax.f32 %v1523_v10, 0.0 }
 0x287   : > { %v1201_v19 = vpop.f32.mrb[120].mxu0 }
 0x288   : > { %v6869_v29 = vadd.f32 %v6668_v4, %v1621_v33  ;;  %v1419_v56 = vmul.f32 %v6538_v30, %v1201_v19  ;;  %v5491_v27 = vpop.f32.mrb[121].mxu0 }
 0x289   : > { %v1204_v32 = vpop.f32.mrb[122].mxu0 }
 0x28a   : > { %v1524_v58 = vadd.f32 %v6544_v39, %v1419_v56  ;;  %v1420_v35 = vmul.f32 %v6538_v30, %v1204_v32  ;;  %v5492_v45 = vpop.f32.mrb[123].mxu0  ;;  %v5785_v56 = vld [vmem:[#allocation8 + $0xc8] sm:$0xff]  }
 0x28b   : > { %4969 = vmatprep.subr.bf16.mxu1 %v5785_v56 }
 0x28c   : > { %v1622_v5 = vmax.f32 %v1524_v58, 0.0  ;;  %v1525_v60 = vadd.f32 %v6544_v39, %v1420_v35 }
 0x28e   : > { %v6876_v0 = vadd.f32 %v6682_v31, %v1622_v5  ;;  %v1623_v4 = vmax.f32 %v1525_v60, 0.0 }
 0x28f   : > { %v1209_v50 = vpop.f32.mrb[124].mxu0 }
 0x290   : > { %v6879_v43 = vadd.f32 %v6688_v37, %v1623_v4  ;;  %v1421_v13 = vmul.f32 %v6538_v30, %v1209_v50  ;;  %v5495_v12 = vpop.f32.mrb[125].mxu0  ;;  %v6906_v4 = vld [vmem:[#allocation7] ss:$0 sm:$0xff] }
 0x291   : > { %v1212_v62 = vpop.f32.mrb[126].mxu0 }
 0x292   : > { %v1526_v53 = vadd.f32 %v6544_v39, %v1421_v13  ;;  %v1422_v57 = vmul.f32 %v6538_v30, %v1212_v62  ;;  %v5496_v1 = vpop.f32.mrb[127].mxu0 }
 0x294   : > { %v1624_v23 = vmax.f32 %v1526_v53, 0.0  ;;  %v1527_v28 = vadd.f32 %v6544_v39, %v1422_v57 }
 0x296   : > { %v6886_v31 = vadd.f32 %v6702_v9, %v1624_v23  ;;  %v1625_v34 = vmax.f32 %v1527_v28, 0.0  ;;  %v5786_v9 = vld [vmem:[#allocation8 + $0x88] sm:$0xff]  }
 0x297   : > { %v1217_v7 = vpop.f32.mrb[128].mxu0  ;;  %4970 = vmatpush3.bf16.msra.mxu1 %v5786_v9 }
 0x298   : > { %v6889_v37 = vadd.f32 %v6708_v17, %v1625_v34  ;;  %v1423_v63 = vmul.f32 %v6538_v30, %v1217_v7  ;;  %v5499_v8 = vpop.f32.mrb[129].mxu0 }
 0x299   : > { %v1220_v61 = vpop.f32.mrb[130].mxu0  ;;  %v5789_v8 = vld [vmem:[#allocation8 + $0xd8] sm:$0xff]  }
 0x29a   : > { %v1528_v16 = vadd.f32 %v6544_v39, %v1423_v63  ;;  %v1424_v40 = vmul.f32 %v6538_v30, %v1220_v61  ;;  %v5500_v10 = vpop.f32.mrb[131].mxu0  ;;  %v5787_v63 = vld [vmem:[#allocation8 + $0xd0] sm:$0xff]  }
 0x29b   : > { %4971 = vmatprep.subr.bf16.mxu1 %v5787_v63 }
 0x29c   : > { %v1626_v33 = vmax.f32 %v1528_v16, 0.0  ;;  %v1529_v19 = vadd.f32 %v6544_v39, %v1424_v40  ;;  %v5790_v40 = vld [vmem:[#allocation8 + $0x98] sm:$0xff]  }
 0x29e   : > { %v6896_v27 = vadd.f32 %v6722_v54, %v1626_v33  ;;  %v1627_v32 = vmax.f32 %v1529_v19, 0.0 }
 0x29f   : > { %v1225_v17 = vpop.f32.mrb[132].mxu0 }
 0x2a0   : > { %v6899_v18 = vadd.f32 %v6728_v55, %v1627_v32  ;;  %v1425_v30 = vmul.f32 %v6901_v20, %v1225_v17  ;;  %v5503_v58 = vpop.f32.mrb[133].mxu0 }
 0x2a1   : > { %v1228_v35 = vpop.f32.mrb[134].mxu0 }
 0x2a2   : > { %v1530_v45 = vadd.f32 %v6544_v39, %v1425_v30  ;;  %v1426_v5 = vmul.f32 %v6901_v20, %v1228_v35  ;;  %v5504_v60 = vpop.f32.mrb[135].mxu0 }
 0x2a4   : > { %v1628_v54 = vmax.f32 %v1530_v45, 0.0  ;;  %v1531_v50 = vadd.f32 %v6906_v4, %v1426_v5 }
 0x2a6   : > { %v6910_v13 = vadd.f32 %v6739_v26, %v1628_v54  ;;  %v1629_v55 = vmax.f32 %v1531_v50, 0.0  ;;  %v5788_v26 = vld [vmem:[#allocation8 + $0x90] sm:$0xff]  }
 0x2a7   : > { %v1233_v12 = vpop.f32.mrb[136].mxu0  ;;  %4972 = vmatpush3.bf16.msra.mxu1 %v5788_v26 }
 0x2a8   : > { %v6913_v62 = vadd.f32 %v6746_v44, %v1629_v55  ;;  %v1427_v53 = vmul.f32 %v6901_v20, %v1233_v12  ;;  %v5507_v57 = vpop.f32.mrb[137].mxu0  ;;  %4973 = vmatprep.subr.bf16.mxu1 %v5789_v8 }
 0x2a9   : > { %v1236_v39 = vpop.f32.mrb[138].mxu0 }
 0x2aa   : > { %v1532_v1 = vadd.f32 %v6906_v4, %v1427_v53  ;;  %v1428_v23 = vmul.f32 %v6901_v20, %v1236_v39  ;;  %v5508_v28 = vpop.f32.mrb[139].mxu0  ;;  %v5791_v39 = vld [vmem:[#allocation8 + $0xe0] sm:$0xff]  }
 0x2ab   : > { %4974 = vmatpush3.bf16.msra.mxu1 %v5790_v40 }
 0x2ac   : > { %v1630_v34 = vmax.f32 %v1532_v1, 0.0  ;;  %v1533_v7 = vadd.f32 %v6906_v4, %v1428_v23  ;;  %v5792_v23 = vld [vmem:[#allocation8 + $0xa0] sm:$0xff]   ;;  %4975 = vmatprep.subr.bf16.mxu1 %v5791_v39 }
 0x2ae   : > { %v6920_v61 = vadd.f32 %v6775_v36, %v1630_v34  ;;  %v1631_v44 = vmax.f32 %v1533_v7, 0.0 }
 0x2af   : > { %v1241_v16 = vpop.f32.mrb[140].mxu0  ;;  %4976 = vmatpush3.bf16.msra.mxu1 %v5792_v23 }
 0x2b0   : > { %v6923_v10 = vadd.f32 %v6783_v24, %v1631_v44  ;;  %v1429_v33 = vmul.f32 %v6901_v20, %v1241_v16  ;;  %v5511_v19 = vpop.f32.mrb[141].mxu0 }
 0x2b1   : > { %v1244_v56 = vpop.f32.mrb[142].mxu0 }
 0x2b2   : > { %v1534_v9 = vadd.f32 %v6906_v4, %v1429_v33  ;;  %v1430_v32 = vmul.f32 %v6901_v20, %v1244_v56  ;;  %v5512_v17 = vpop.f32.mrb[143].mxu0 }
 0x2b4   : > { %v1632_v36 = vmax.f32 %v1534_v9, 0.0  ;;  %v1535_v30 = vadd.f32 %v6906_v4, %v1430_v32 }
 0x2b6   : > { %v6930_v58 = vadd.f32 %v6801_v6, %v1632_v36  ;;  %v1633_v35 = vmax.f32 %v1535_v30, 0.0  ;;  %v1783_v6 = vadd.f32 %v6812_v48, %v1586_v47 }
 0x2b7   : > { %v1249_v24 = vpop.f32.mrb[144].mxu0 }
 0x2b8   : > { %v6933_v45 = vadd.f32 %v6809_v46, %v1633_v35  ;;  %v1431_v5 = vmul.f32 %v6901_v20, %v1249_v24  ;;  %v5515_v60 = vpop.f32.mrb[145].mxu0 }
 0x2b9   : > { %v1252_v54 = vpop.f32.mrb[146].mxu0 }
 0x2ba   : > { %v1536_v50 = vadd.f32 %v6906_v4, %v1431_v5  ;;  %v1432_v55 = vmul.f32 %v6901_v20, %v1252_v54  ;;  %v5516_v12 = vpop.f32.mrb[147].mxu0 }
 0x2bc   : > { %v1634_v53 = vmax.f32 %v1536_v50, 0.0  ;;  %v1537_v57 = vadd.f32 %v6906_v4, %v1432_v55 }
 0x2be   : > { %v6943_v46 = vadd.f32 %v6820_v41, %v1634_v53  ;;  %v1635_v1 = vmax.f32 %v1537_v57, 0.0  ;;  %v5793_v53 = vld [vmem:[#allocation8 + $0xe8] sm:$0xff]  }
 0x2bf   : > { %v1257_v28 = vpop.f32.mrb[148].mxu0  ;;  %4977 = vmatprep.subr.bf16.mxu1 %v5793_v53 }
 0x2c0   : > { %v6945_v34 = vadd.f32 %v1783_v6, %v1635_v1  ;;  %v1433_v7 = vmul.f32 %v6901_v20, %v1257_v28  ;;  %v5519_v63 = vpop.f32.mrb[149].mxu0  ;;  %v1834_v41 = vrot.slane %v1635_v1, 4  ;;  %v5794_v6 = vld [vmem:[#allocation8 + $0xa8] sm:$0xff]  }
 0x2c1   : > { %v1260_v26 = vpop.f32.mrb[150].mxu0  ;;  %4978 = vmatpush3.bf16.msra.mxu1 %v5794_v6  ;;  %v6976_v6 = vld [vmem:[#allocation2 + $0x10] sm:$0x80] }
 0x2c2   : > { %v1538_v8 = vadd.f32 %v6906_v4, %v1433_v7  ;;  %v1434_v42 = vmul.f32 %v6901_v20, %v1260_v26  ;;  %v5520_v44 = vpop.f32.mrb[151].mxu0 }
 0x2c4   : > { %v1636_v47 = vmax.f32 %v1538_v8, 0.0  ;;  %v1539_v48 = vadd.f32 %v6906_v4, %v1434_v42 }
 0x2c6   : > { %v1835_v16 = vrot.slane %v1636_v47, 4  ;;  %v1637_v40 = vmax.f32 %v1539_v48, 0.0 }
 0x2c7   : > { %v1265_v33 = vpop.f32.mrb[152].mxu0 }
 0x2c8   : > { %v1836_v19 = vsel %vm920_vm0, %v1834_v41, %v1835_v16  ;;  %v1837_v56 = vrot.slane %v1637_v40, 4  ;;  %v1435_v9 = vmul.f32 %v6901_v20, %v1265_v33  ;;  %v5523_v32 = vpop.f32.mrb[153].mxu0 }
 0x2c9   : > { %v1908_v17 = vadd.f32 %v1836_v19, %v6815_v3  ;;  %v1268_v36 = vpop.f32.mrb[154].mxu0  ;;  %v5795_v19 = vld [vmem:[#allocation8 + $0xf0] sm:$0xff]  }
 0x2ca   : > { %v1838_v30 = vsel %vm920_vm0, %v1835_v16, %v1837_v56  ;;  %v1540_v35 = vadd.f32 %v6906_v4, %v1435_v9  ;;  %v1436_v24 = vmul.f32 %v6901_v20, %v1268_v36  ;;  %v5524_v5 = vpop.f32.mrb[155].mxu0  ;;  %4979 = vmatprep.subr.bf16.mxu1 %v5795_v19 }
 0x2cb   : > { %v1909_v60 = vadd.f32 %v1838_v30, %v6826_v15  ;;  %v1933_v55 = vmul.f32 0.25, %v1908_v17  ;;  %v5797_v30 = vld [vmem:[#allocation8 + $0xf8] sm:$0xff]  }
 0x2cc   : > { %v1638_v54 = vmax.f32 %v1540_v35, 0.0  ;;  %v1541_v50 = vadd.f32 %v6906_v4, %v1436_v24 }
 0x2cd   : > { %v1934_v12 = vmul.f32 0.25, %v1909_v60 }
 0x2ce   : > { %v1839_v57 = vrot.slane %v1638_v54, 4  ;;  %v1639_v39 = vmax.f32 %v1541_v50, 0.0  ;;  %v5798_v54 = vld [vmem:[#allocation8 + $0xb8] sm:$0xff]  }
 0x2cf   : > { %v1958_v3 = vpack.c.bf16 %v1934_v12, %v1933_v55  ;;  %v1273_v1 = vpop.f32.mrb[156].mxu0 }
 0x2d0   : > { %v1840_v23 = vsel %vm920_vm0, %v1837_v56, %v1839_v57  ;;  %v1841_v28 = vrot.slane %v1639_v39, 4  ;;  %v1437_v7 = vmul.f32 %v6901_v20, %v1273_v1  ;;  %v5527_v63 = vpop.f32.mrb[157].mxu0  ;;  %v2068_v56 = vld [vmem:[#allocation2 + $0x8] sm:$0x80] }
 0x2d1   : > { %1971 = vst [vmem:[#allocation2 + $0x18] sm:$0x7f] %v1958_v3  ;;  %v1910_v15 = vadd.f32 %v1840_v23, %v6829_v2  ;;  %v1276_v26 = vpop.f32.mrb[158].mxu0  ;;  %v5796_v2 = vld [vmem:[#allocation8 + $0xb0] sm:$0xff]   ;;  %v2270_v50 = vshrl.u32 %v2068_v56, 16  ;;  %v1975_v55 = vrot.slane %v1958_v3, 7 }
 0x2d2   : > { %v1842_v8 = vsel %vm920_vm0, %v1839_v57, %v1841_v28  ;;  %v1542_v42 = vadd.f32 %v6906_v4, %v1437_v7  ;;  %v1438_v44 = vmul.f32 %v6901_v20, %v1276_v26  ;;  %v5528_v47 = vpop.f32.mrb[159].mxu0  ;;  %4980 = vmatpush3.bf16.msra.mxu1 %v5796_v2 }
 0x2d3   : > { %v1911_v48 = vadd.f32 %v1842_v8, %v6836_v38  ;;  %v1935_v40 = vmul.f32 0.25, %v1910_v15  ;;  %4981 = vmatprep.subr.bf16.mxu1 %v5797_v30 }
 0x2d4   : > { %v1640_v41 = vmax.f32 %v1542_v42, 0.0  ;;  %v1543_v16 = vadd.f32 %v6906_v4, %v1438_v44  ;;  %v2630_v42 = vrot.slane %v6976_v6, 7  ;;  %v2272_v44 = vsel %vm2089_vm4, %v2270_v50, %v6778_v11 }
 0x2d5   : > { %v1936_v33 = vmul.f32 0.25, %v1911_v48  ;;  %v2624_v56 = vrot.slane %v2272_v44, 7 }
 0x2d6   : > { %v1843_v9 = vrot.slane %v1640_v41, 4  ;;  %v1641_v32 = vmax.f32 %v1543_v16, 0.0  ;;  %4982 = vmatpush3.bf16.msra.mxu1 %v5798_v54 }
 0x2d7   : > { %v6967_v17 = vpack.c.bf16 %v1936_v33, %v1935_v40  ;;  %v1281_v36 = vpop.f32.mrb[160].mxu0 }
 0x2d8   : > { %v1844_v35 = vsel %vm920_vm0, %v1841_v28, %v1843_v9  ;;  %v1845_v24 = vrot.slane %v1641_v32, 4  ;;  %v1439_v38 = vmul.f32 %v6901_v20, %v1281_v36  ;;  %v5531_v5 = vpop.f32.mrb[161].mxu0  ;;  %v6971_v60 = vld [vmem:[#allocation2 + $0x18] sm:$0xff] }
 0x2d9   : > { %v1976_v12 = vrot.slane %v6967_v17, 7  ;;  %v1912_v53 = vadd.f32 %v1844_v35, %v6839_v25  ;;  %v1284_v57 = vpop.f32.mrb[162].mxu0  ;;  %v2110_v39 = vshll.u32 %v6971_v60, 16  ;;  %v2285_v25 = vshrl.u32 %v6976_v6, 16 }
 0x2da   : > { %v1846_v1 = vsel %vm920_vm0, %v1843_v9, %v1845_v24  ;;  %v1544_v23 = vadd.f32 %v6906_v4, %v1439_v38  ;;  %v1440_v28 = vmul.f32 %v6901_v20, %v1284_v57  ;;  %v5532_v7 = vpop.f32.mrb[163].mxu0  ;;  %v1982_v35 = vrot.slane %v6967_v17, 6 }
 0x2db   : > { %v1977_v63 = vsel %vm1974_vm5, %v1975_v55, %v1976_v12  ;;  %v1913_v3 = vadd.f32 %v1846_v1, %v6846_v14  ;;  %v2112_v15 = vrot.slane %v2110_v39, 1  ;;  %v1937_v47 = vmul.f32 0.25, %v1912_v53 }
 0x2dc   : > { %1979 = vst [vmem:[#allocation2 + $0x20] sm:$0x7f] %v1977_v63  ;;  %v1642_v26 = vmax.f32 %v1544_v23, 0.0  ;;  %v1545_v8 = vadd.f32 %v6906_v4, %v1440_v28  ;;  %v2114_v50 = vshrl.u32 %v6971_v60, 16  ;;  %v7005_v57 = vrot.slane %v6971_v60, 7 }
 0x2dd   : > { %v1938_v48 = vmul.f32 0.25, %v1913_v3  ;;  %v2113_v41 = vsel %vm2089_vm4, %v6778_v11, %v2112_v15  ;;  %v2291_v1 = vsel %vm2089_vm4, %v2285_v25, %v2112_v15  ;;  %v7019_v44 = vrot.slane %v6971_v60, 1 }
 0x2de   : > { %v1847_v14 = vrot.slane %v1642_v26, 4  ;;  %v1643_v16 = vmax.f32 %v1545_v8, 0.0  ;;  %v6990_v40 = vrot.slane %v2113_v41, 7  ;;  %v2116_v63 = vor.u32 %v2114_v50, %v2112_v15 }
 0x2df   : > { %v1960_v33 = vpack.c.bf16 %v1938_v48, %v1937_v47  ;;  %v1289_v19 = vpop.f32.mrb[164].mxu0  ;;  %v2633_v41 = vrot.slane %v2291_v1, 7  ;;  %v7027_v15 = vsel %vm1974_vm5, %v6795_v51, %v7005_v57 }
 0x2e0   : > { %v1848_v9 = vsel %vm920_vm0, %v1845_v24, %v1847_v14  ;;  %v1849_v32 = vrot.slane %v1643_v16, 4  ;;  %v1441_v2 = vmul.f32 %v6901_v20, %v1289_v19  ;;  %v5535_v36 = vpop.f32.mrb[165].mxu0  ;;  %v2640_v30 = vsel %vm1974_vm5, %v6790_v49, %v6990_v40 }
 0x2e1   : > { %v1983_v38 = vrot.slane %v1960_v33, 6  ;;  %v1914_v5 = vadd.f32 %v1848_v9, %v6849_v21  ;;  %v1292_v54 = vpop.f32.mrb[166].mxu0  ;;  %3405 = vmatprep.mubr.bf16.mxu1 %v2640_v30  ;;  %v7014_v23 = vsel %vm1974_vm5, %v2624_v56, %v6990_v40 }
 0x2e2   : > { %v1850_v24 = vsel %vm920_vm0, %v1847_v14, %v1849_v32  ;;  %v1546_v55 = vadd.f32 %v6906_v4, %v1441_v2  ;;  %v1442_v12 = vmul.f32 %v6901_v20, %v1292_v54  ;;  %v5536_v53 = vpop.f32.mrb[167].mxu0  ;;  %3406 = vmatmul.mubr.bf16.gmra.mrb[4].mxu1 %v6795_v51  ;;  %v1989_v14 = vrot.slane %v1960_v33, 5 }
 0x2e3   : > { %v1984_v17 = vsel %vm1981_vm6, %v1982_v35, %v1983_v38  ;;  %v1915_v21 = vadd.f32 %v1850_v24, %v6856_v52  ;;  %v7009_v39 = vld [vmem:[#allocation2 + $0x20] sm:$0xff]  ;;  %v1939_v26 = vmul.f32 0.25, %v1914_v5 }
 0x2e4   : > { %1986 = vst [vmem:[#allocation2 + $0x28] sm:$0x7f] %v1984_v17  ;;  %v1644_v28 = vmax.f32 %v1546_v55, 0.0  ;;  %v1547_v7 = vadd.f32 %v6906_v4, %v1442_v12  ;;  %v2118_v3 = vshll.u32 %v7009_v39, 16  ;;  %v2243_v52 = vrot.slane %v7009_v39, 1 }
 0x2e5   : > { %v1940_v8 = vmul.f32 0.25, %v1915_v21  ;;  %v2122_v54 = vshrl.u32 %v7009_v39, 16  ;;  %v7045_v12 = vsel %vm2237_vm7, %v6778_v11, %v7019_v44  ;;  %v2654_v1 = vrot.slane %v7009_v39, 7 }
 0x2e6   : > { %v1851_v47 = vrot.slane %v1644_v28, 4  ;;  %v1645_v25 = vmax.f32 %v1547_v7, 0.0  ;;  %v2120_v48 = vrot.slane %v2118_v3, 1  ;;  %v2244_v60 = vsel %vm2237_vm7, %v7019_v44, %v2243_v52 }
 0x2e7   : > { %v7022_v16 = vpack.c.bf16 %v1940_v8, %v1939_v26  ;;  %v1297_v19 = vpop.f32.mrb[168].mxu0  ;;  %v8135_v8 = vrot.slane %v7045_v12, 7  ;;  %v7075_v6 = vrot.slane %v2244_v60, 7 }
 0x2e8   : > { %v1852_v56 = vsel %vm920_vm0, %v1849_v32, %v1851_v47  ;;  %v1853_v9 = vrot.slane %v1645_v25, 4  ;;  %v1443_v2 = vmul.f32 %v6901_v20, %v1297_v19  ;;  %v5539_v36 = vpop.f32.mrb[169].mxu0  ;;  %v2121_v33 = vsel %vm2089_vm4, %v2116_v63, %v2120_v48 }
 0x2e9   : > { %v1990_v30 = vrot.slane %v7022_v16, 5  ;;  %v1916_v35 = vadd.f32 %v1852_v56, %v6859_v59  ;;  %v1300_v38 = vpop.f32.mrb[170].mxu0  ;;  %v2644_v5 = vrot.slane %v2121_v33, 7  ;;  %v7073_v36 = vsel %vm1974_vm5, %v7005_v57, %v2654_v1 }
 0x2ea   : > { %v1854_v50 = vsel %vm920_vm0, %v1851_v47, %v1853_v9  ;;  %v1548_v24 = vadd.f32 %v6906_v4, %v1443_v2  ;;  %v1444_v32 = vmul.f32 %v6901_v20, %v1300_v38  ;;  %v5540_v55 = vpop.f32.mrb[171].mxu0 }
 0x2eb   : > { %v1991_v53 = vsel %vm1988_vm8, %v1989_v14, %v1990_v30  ;;  %v1917_v59 = vadd.f32 %v1854_v50, %v6866_v22  ;;  %v7051_v17 = vsel %vm1974_vm5, %v6990_v40, %v2644_v5  ;;  %v7053_v21 = vld [vmem:[#allocation2 + $0x28] sm:$0xff]  ;;  %v2635_v63 = vsel %vm1974_vm5, %v2633_v41, %v2644_v5 }
 0x2ec   : > { %1993 = vst [vmem:[#allocation2 + $0x30] sm:$0x7f] %v1991_v53  ;;  %v1646_v28 = vmax.f32 %v1548_v24, 0.0  ;;  %v1549_v7 = vadd.f32 %v6906_v4, %v1444_v32  ;;  %3413 = vmatprep.mubr.bf16.mxu1 %v7051_v17  ;;  %v2126_v3 = vshll.u32 %v7053_v21, 16  ;;  %v1941_v26 = vmul.f32 0.25, %v1916_v35  ;;  %3880 = vmatprep.mubr.bf16.mxu0 %v2635_v63 }
 0x2ed   : > { %v1942_v22 = vmul.f32 0.25, %v1917_v59  ;;  %3414 = vmatmul.mubr.bf16.gmra.mrb[8].mxu1 %v7027_v15  ;;  %v2632_v40 = vsel %vm1974_vm5, %v2630_v42, %v7005_v57  ;;  %v2124_v14 = vor.u32 %v2122_v54, %v2120_v48  ;;  %v1996_v41 = vrot.slane %v7022_v16, 4 }
 0x2ee   : > { %v1855_v47 = vrot.slane %v1646_v28, 4  ;;  %v1647_v25 = vmax.f32 %v1549_v7, 0.0  ;;  %3881 = vmatmul.mubr.bf16.vlgmr.msra.gmra.mrb[196].mxu0 %v2632_v40  ;;  %v2128_v19 = vrot.slane %v2126_v3, 1  ;;  %v2245_v24 = vrot.slane %v7053_v21, 1 }
 0x2ef   : > { %v7067_v56 = vpack.c.bf16 %v1942_v22, %v1941_v26  ;;  %v1305_v2 = vpop.f32.mrb[172].mxu0  ;;  %v2636_v55 = vrot.slane %v7019_v44, 7  ;;  %v2130_v7 = vshrl.u32 %v7053_v21, 16  ;;  %v2666_v26 = vrot.slane %v7053_v21, 7 }
 0x2f0   : > { %v1856_v42 = vsel %vm920_vm0, %v1853_v9, %v1855_v47  ;;  %v1857_v33 = vrot.slane %v1647_v25, 4  ;;  %v1445_v30 = vmul.f32 %v6901_v20, %v1305_v2  ;;  %v5543_v48 = vpop.f32.mrb[173].mxu0  ;;  %v2129_v35 = vsel %vm2089_vm4, %v2124_v14, %v2128_v19 }
 0x2f1   : > { %v1997_v16 = vrot.slane %v7067_v56, 4  ;;  %v1918_v38 = vadd.f32 %v1856_v42, %v6869_v29  ;;  %v1308_v54 = vpop.f32.mrb[174].mxu0  ;;  %v2656_v50 = vrot.slane %v2129_v35, 7  ;;  %v7112_v40 = vsel %vm2237_vm7, %v2243_v52, %v2245_v24 }
 0x2f2   : > { %v1858_v57 = vsel %vm920_vm0, %v1855_v47, %v1857_v33  ;;  %v1550_v60 = vadd.f32 %v6906_v4, %v1445_v30  ;;  %v1446_v9 = vmul.f32 %v6901_v20, %v1308_v54  ;;  %v5544_v32 = vpop.f32.mrb[175].mxu0  ;;  %v2132_v14 = vor.u32 %v2130_v7, %v2128_v19 }
 0x2f3   : > { %v1998_v53 = vsel %vm920_vm0, %v1996_v41, %v1997_v16  ;;  %v1919_v59 = vadd.f32 %v1858_v57, %v6876_v0  ;;  %v7090_v28 = vsel %vm1974_vm5, %v2644_v5, %v2656_v50  ;;  %v7092_v29 = vld [vmem:[#allocation2 + $0x30] sm:$0xff]  ;;  %v1943_v0 = vmul.f32 0.25, %v1918_v38 }
 0x2f4   : > { %2000 = vst [vmem:[#allocation2 + $0x38] sm:$0x7f] %v1998_v53  ;;  %v1648_v63 = vmax.f32 %v1550_v60, 0.0  ;;  %v1551_v3 = vadd.f32 %v6906_v4, %v1446_v9  ;;  %3421 = vmatprep.mubr.bf16.mxu1 %v7090_v28  ;;  %3888 = vmatprep.mubr.bf16.mxu0 %v7090_v28  ;;  %v2134_v44 = vshll.u32 %v7092_v29, 16  ;;  %v7105_v5 = vsel %vm1974_vm5, %v8135_v8, %v7075_v6 }
 0x2f5   : > { %v1944_v22 = vmul.f32 0.25, %v1919_v59  ;;  %3422 = vmatmul.mubr.bf16.gmra.mrb[12].mxu1 %v7073_v36  ;;  %v2003_v2 = vrot.slane %v7067_v56, 3  ;;  %v2658_v48 = vrot.slane %v7112_v40, 7  ;;  %v7121_v35 = vsel %vm1974_vm5, %v2636_v55, %v7075_v6 }
 0x2f6   : > { %v1859_v47 = vrot.slane %v1648_v63, 4  ;;  %v1649_v25 = vmax.f32 %v1551_v3, 0.0  ;;  %3889 = vmatmul.mubr.bf16.gmra.mrb[200].mxu0 %v7073_v36  ;;  %v2136_v41 = vrot.slane %v2134_v44, 1  ;;  %8155 = vst [vmem:[#allocation18_spill] sm:$0xff] %v7121_v35  ;;  %v2247_v32 = vrot.slane %v7092_v29, 1 }
 0x2f7   : > { %v7116_v42 = vpack.c.bf16 %v1944_v22, %v1943_v0  ;;  %v1313_v30 = vpop.f32.mrb[176].mxu0  ;;  %v7137_v59 = vsel %vm1974_vm5, %v2654_v1, %v2666_v26  ;;  %v2138_v0 = vshrl.u32 %v7092_v29, 16  ;;  %v2678_v1 = vrot.slane %v7092_v29, 7 }
 0x2f8   : > { %v1860_v52 = vsel %vm920_vm0, %v1857_v33, %v1859_v47  ;;  %v1861_v16 = vrot.slane %v1649_v25, 4  ;;  %v1447_v38 = vmul.f32 %v6901_v20, %v1313_v30  ;;  %v5547_v54 = vpop.f32.mrb[177].mxu0  ;;  %v2137_v19 = vsel %vm2089_vm4, %v2132_v14, %v2136_v41 }
 0x2f9   : > { %v2004_v56 = vrot.slane %v7116_v42, 3  ;;  %v1920_v57 = vadd.f32 %v1860_v52, %v6879_v43  ;;  %v1316_v60 = vpop.f32.mrb[178].mxu0  ;;  %v2668_v9 = vrot.slane %v2137_v19, 7  ;;  %v7164_v14 = vsel %vm2237_vm7, %v2245_v24, %v2247_v32 }
 0x2fa   : > { %v1862_v55 = vsel %vm920_vm0, %v1859_v47, %v1861_v16  ;;  %v1552_v53 = vadd.f32 %v6906_v4, %v1447_v38  ;;  %v1448_v33 = vmul.f32 %v6901_v20, %v1316_v60  ;;  %v5548_v7 = vpop.f32.mrb[179].mxu0  ;;  %v2140_v38 = vor.u32 %v2138_v0, %v2136_v41 }
 0x2fb   : > { %v2005_v43 = vsel %vm921_vm2, %v2003_v2, %v2004_v56  ;;  %v1921_v63 = vadd.f32 %v1862_v55, %v6886_v31  ;;  %v7142_v3 = vsel %vm1974_vm5, %v2656_v50, %v2668_v9  ;;  %v7144_v44 = vld [vmem:[#allocation2 + $0x38] sm:$0xff]  ;;  %v1945_v31 = vmul.f32 0.25, %v1920_v57  ;;  %v5799_v2 = vld [vmem:[#allocation8 + $0x140] sm:$0xff]  }
 0x2fc   : > { %2007 = vst [vmem:[#allocation2 + $0x40] sm:$0x7f] %v2005_v43  ;;  %v1650_v22 = vmax.f32 %v1552_v53, 0.0  ;;  %v1553_v47 = vadd.f32 %v6906_v4, %v1448_v33  ;;  %3429 = vmatprep.mubr.bf16.mxu1 %v7142_v3  ;;  %3896 = vmatprep.mubr.bf16.mxu0 %v7142_v3  ;;  %v2142_v39 = vshll.u32 %v7144_v44, 16  ;;  %v7157_v50 = vsel %vm1974_vm5, %v7075_v6, %v2658_v48 }
 0x2fd   : > { %v1946_v25 = vmul.f32 0.25, %v1921_v63  ;;  %3430 = vmatmul.mubr.bf16.gmra.mrb[16].mxu1 %v7137_v59  ;;  %v2010_v19 = vrot.slane %v7116_v42, 2  ;;  %v2670_v6 = vrot.slane %v7164_v14, 7  ;;  %5079 = vmatprep.subr.bf16.mxu1 %v5799_v2  ;;  %v2249_v60 = vrot.slane %v7144_v44, 1 }
 0x2fe   : > { %v1863_v30 = vrot.slane %v1650_v22, 4  ;;  %v1651_v52 = vmax.f32 %v1553_v47, 0.0  ;;  %3897 = vmatmul.mubr.bf16.gmra.mrb[204].mxu0 %v7137_v59  ;;  %v2144_v54 = vrot.slane %v2142_v39, 1 }
 0x2ff   : > { %v1964_v56 = vpack.c.bf16 %v1946_v25, %v1945_v31  ;;  %v1321_v57 = vpop.f32.mrb[180].mxu0  ;;  %v7200_v21 = vsel %vm1974_vm5, %v2658_v48, %v2670_v6  ;;  %v2690_v48 = vrot.slane %v7144_v44, 7 }
 0x300   : > { %v1864_v55 = vsel %vm920_vm0, %v1861_v16, %v1863_v30  ;;  %v1865_v24 = vrot.slane %v1651_v52, 4  ;;  %v1449_v53 = vmul.f32 %v6901_v20, %v1321_v57  ;;  %v5551_v33 = vpop.f32.mrb[181].mxu0  ;;  %v2145_v7 = vsel %vm2089_vm4, %v2140_v38, %v2144_v54 }
 0x301   : > { %v2011_v43 = vrot.slane %v1964_v56, 2  ;;  %v2015_v41 = vrot.slane %v1964_v56, 1  ;;  %v1922_v63 = vadd.f32 %v1864_v55, %v6889_v37  ;;  %v1324_v42 = vpop.f32.mrb[182].mxu0  ;;  %v2680_v0 = vrot.slane %v2145_v7, 7 }
 0x302   : > { %v1866_v22 = vsel %vm920_vm0, %v1863_v30, %v1865_v24  ;;  %v1554_v47 = vadd.f32 %v6906_v4, %v1449_v53  ;;  %v1450_v39 = vmul.f32 %v6901_v20, %v1324_v42  ;;  %v5552_v31 = vpop.f32.mrb[183].mxu0  ;;  %v2146_v16 = vshrl.u32 %v7144_v44, 16 }
 0x303   : > { %v2012_v25 = vsel %vm2009_vm9, %v2010_v19, %v2011_v43  ;;  %2017 = vst [vmem:[#allocation2 + $0x50] sm:$0x7f] %v2015_v41  ;;  %v1923_v14 = vadd.f32 %v1866_v22, %v6896_v27  ;;  %v7181_v2 = vsel %vm1974_vm5, %v2668_v9, %v2680_v0  ;;  %v7188_v37 = vsel %vm1974_vm5, %v2666_v26, %v2678_v1  ;;  %v7190_v30 = vld [vmem:[#allocation2 + $0x40] sm:$0xff] }
 0x304   : > { %2014 = vst [vmem:[#allocation2 + $0x48] sm:$0x7f] %v2012_v25  ;;  %v1652_v52 = vmax.f32 %v1554_v47, 0.0  ;;  %v1555_v38 = vadd.f32 %v6906_v4, %v1450_v39  ;;  %3437 = vmatprep.mubr.bf16.mxu1 %v7181_v2  ;;  %3904 = vmatprep.mubr.bf16.mxu0 %v7181_v2  ;;  %v2148_v27 = vor.u32 %v2146_v16, %v2144_v54  ;;  %v2150_v9 = vshll.u32 %v7190_v30, 16 }
 0x305   : > { %v1947_v19 = vmul.f32 0.25, %v1922_v63  ;;  %v1948_v56 = vmul.f32 0.25, %v1923_v14  ;;  %3438 = vmatmul.mubr.bf16.gmra.mrb[20].mxu1 %v7188_v37  ;;  %v7207_v26 = vsel %vm2237_vm7, %v2247_v32, %v2249_v60  ;;  %v2702_v39 = vrot.slane %v7190_v30, 7 }
 0x306   : > { %v1867_v57 = vrot.slane %v1652_v52, 4  ;;  %v1653_v54 = vmax.f32 %v1555_v38, 0.0  ;;  %3905 = vmatmul.mubr.bf16.gmra.mrb[208].mxu0 %v7188_v37  ;;  %v2152_v55 = vrot.slane %v2150_v9, 1  ;;  %v2682_v53 = vrot.slane %v7207_v26, 7 }
 0x307   : > { %v7211_v33 = vpack.c.bf16 %v1948_v56, %v1947_v19  ;;  %v1329_v40 = vpop.f32.mrb[184].mxu0  ;;  %v2251_v19 = vrot.slane %v7190_v30, 1 }
 0x308   : > { %v1868_v7 = vsel %vm920_vm0, %v1865_v24, %v1867_v57  ;;  %v1869_v43 = vrot.slane %v1653_v54, 4  ;;  %v1451_v41 = vmul.f32 %v6901_v20, %v1329_v40  ;;  %v5555_v63 = vpop.f32.mrb[185].mxu0  ;;  %v2153_v32 = vsel %vm2089_vm4, %v2148_v27, %v2152_v55 }
 0x309   : > { %2018 = vst [vmem:[#allocation2 + $0x58] sm:$0x7f] %v7211_v33  ;;  %v1924_v42 = vadd.f32 %v1868_v7, %v6899_v18  ;;  %v1332_v22 = vpop.f32.mrb[186].mxu0  ;;  %v2692_v47 = vrot.slane %v2153_v32, 7  ;;  %v7228_v52 = vsel %vm1974_vm5, %v2670_v6, %v2682_v53  ;;  %v7237_v27 = vsel %vm1974_vm5, %v2678_v1, %v2690_v48 }
 0x30a   : > { %v1870_v31 = vsel %vm920_vm0, %v1867_v57, %v1869_v43  ;;  %v1556_v16 = vadd.f32 %v6906_v4, %v1451_v41  ;;  %v1452_v24 = vmul.f32 %v6901_v20, %v1332_v22  ;;  %v5556_v25 = vpop.f32.mrb[187].mxu0  ;;  %v7223_v14 = vld [vmem:[#allocation2 + $0x50] sm:$0xff]  ;;  %v7251_v1 = vsel %vm1974_vm5, %v2690_v48, %v2702_v39 }
 0x30b   : > { %v1925_v18 = vadd.f32 %v1870_v31, %v6910_v13  ;;  %v7232_v38 = vsel %vm1974_vm5, %v2680_v0, %v2692_v47  ;;  %v7239_v9 = vld [vmem:[#allocation2 + $0x48] sm:$0xff]  ;;  %v2154_v13 = vshrl.u32 %v7190_v30, 16  ;;  %v1949_v0 = vmul.f32 0.25, %v1924_v42 }
 0x30c   : > { %v1654_v56 = vmax.f32 %v1556_v16, 0.0  ;;  %v1557_v57 = vadd.f32 %v6906_v4, %v1452_v24  ;;  %3445 = vmatprep.mubr.bf16.mxu1 %v7232_v38  ;;  %3912 = vmatprep.mubr.bf16.mxu0 %v7232_v38  ;;  %v2158_v6 = vshll.u32 %v7239_v9, 16  ;;  %v2166_v54 = vshll.u32 %v7223_v14, 16 }
 0x30d   : > { %v1950_v29 = vmul.f32 0.25, %v1925_v18  ;;  %3446 = vmatmul.mubr.bf16.gmra.mrb[24].mxu1 %v7237_v27  ;;  %v2156_v41 = vor.u32 %v2154_v13, %v2152_v55  ;;  %v2021_v32 = vrot.slane %v7211_v33, 7  ;;  %v2162_v31 = vshrl.u32 %v7239_v9, 16 }
 0x30e   : > { %v1871_v40 = vrot.slane %v1654_v56, 4  ;;  %v1655_v7 = vmax.f32 %v1557_v57, 0.0  ;;  %3913 = vmatmul.mubr.bf16.gmra.mrb[212].mxu0 %v7237_v27  ;;  %v2160_v63 = vrot.slane %v2158_v6, 1  ;;  %v7264_v48 = vsel %vm2237_vm7, %v2249_v60, %v2251_v19 }
 0x30f   : > { %v7256_v22 = vpack.c.bf16 %v1950_v29, %v1949_v0  ;;  %v1337_v42 = vpop.f32.mrb[188].mxu0  ;;  %v2168_v6 = vrot.slane %v2166_v54, 1  ;;  %v2255_v26 = vrot.slane %v7223_v14, 1 }
 0x310   : > { %v1872_v16 = vsel %vm920_vm0, %v1869_v43, %v1871_v40  ;;  %v1873_v24 = vrot.slane %v1655_v7, 4  ;;  %v1453_v55 = vmul.f32 %v6901_v20, %v1337_v42  ;;  %v5559_v25 = vpop.f32.mrb[189].mxu0  ;;  %v2161_v33 = vsel %vm2089_vm4, %v2156_v41, %v2160_v63  ;;  %v7271_v0 = vld [vmem:[#allocation2 + $0x58] sm:$0xff] }
 0x311   : > { %v2022_v18 = vrot.slane %v7256_v22, 7  ;;  %v1926_v56 = vadd.f32 %v1872_v16, %v6913_v62  ;;  %v1340_v57 = vpop.f32.mrb[190].mxu0  ;;  %v2704_v13 = vrot.slane %v2161_v33, 7  ;;  %v2164_v7 = vor.u32 %v2162_v31, %v2160_v63 }
 0x312   : > { %v1874_v44 = vsel %vm920_vm0, %v1871_v40, %v1873_v24  ;;  %v1558_v60 = vadd.f32 %v6906_v4, %v1453_v55  ;;  %v1454_v43 = vmul.f32 %v6901_v20, %v1340_v57  ;;  %v5560_v29 = vpop.f32.mrb[191].mxu0  ;;  %v2170_v62 = vshrl.u32 %v7223_v14, 16 }
 0x313   : > { %v2023_v42 = vsel %vm1974_vm5, %v2021_v32, %v2022_v18  ;;  %v1927_v41 = vadd.f32 %v1874_v44, %v6920_v61  ;;  %v7279_v25 = vsel %vm1974_vm5, %v2692_v47, %v2704_v13  ;;  %v2169_v40 = vsel %vm2089_vm4, %v2164_v7, %v2168_v6 }
 0x314   : > { %2025 = vst [vmem:[#allocation2 + $0x60] sm:$0x7f] %v2023_v42  ;;  %v1656_v54 = vmax.f32 %v1558_v60, 0.0  ;;  %v1559_v16 = vadd.f32 %v6906_v4, %v1454_v43  ;;  %3453 = vmatprep.mubr.bf16.mxu1 %v7279_v25  ;;  %3920 = vmatprep.mubr.bf16.mxu0 %v7279_v25  ;;  %v2174_v63 = vshll.u32 %v7271_v0, 16  ;;  %v1951_v32 = vmul.f32 0.25, %v1926_v56 }
 0x315   : > { %v1952_v31 = vmul.f32 0.25, %v1927_v41  ;;  %3454 = vmatmul.mubr.bf16.gmra.mrb[28].mxu1 %v7251_v1  ;;  %v2716_v61 = vrot.slane %v2169_v40, 7  ;;  %v2714_v47 = vrot.slane %v7239_v9, 7  ;;  %v2172_v18 = vor.u32 %v2170_v62, %v2168_v6 }
 0x316   : > { %v1875_v55 = vrot.slane %v1656_v54, 4  ;;  %v1657_v33 = vmax.f32 %v1559_v16, 0.0  ;;  %3921 = vmatmul.mubr.bf16.gmra.mrb[216].mxu0 %v7251_v1  ;;  %v2176_v57 = vrot.slane %v2174_v63, 1  ;;  %v2027_v44 = vrot.slane %v7256_v22, 6 }
 0x317   : > { %v1967_v60 = vpack.c.bf16 %v1952_v31, %v1951_v32  ;;  %v7292_v43 = vsel %vm1974_vm5, %v2704_v13, %v2716_v61  ;;  %v1345_v29 = vpop.f32.mrb[192].mxu0  ;;  %v2178_v56 = vshrl.u32 %v7271_v0, 16  ;;  %v2694_v40 = vrot.slane %v7264_v48, 7 }
 0x318   : > { %v1876_v7 = vsel %vm920_vm0, %v1873_v24, %v1875_v55  ;;  %v1877_v42 = vrot.slane %v1657_v33, 4  ;;  %3461 = vmatprep.mubr.bf16.mxu1 %v7292_v43  ;;  %3928 = vmatprep.mubr.bf16.mxu0 %v7292_v43  ;;  %v1455_v41 = vmul.f32 %v6901_v20, %v1345_v29  ;;  %v5563_v6 = vpop.f32.mrb[193].mxu0  ;;  %v2177_v62 = vsel %vm2089_vm4, %v2172_v18, %v2176_v57 }
 0x319   : > { %v2028_v22 = vrot.slane %v1967_v60, 6  ;;  %v1928_v54 = vadd.f32 %v1876_v7, %v6923_v10  ;;  %v1348_v13 = vpop.f32.mrb[194].mxu0  ;;  %v2728_v16 = vrot.slane %v2177_v62, 7  ;;  %v2253_v33 = vrot.slane %v7239_v9, 1 }
 0x31a   : > { %v1878_v63 = vsel %vm920_vm0, %v1875_v55, %v1877_v42  ;;  %v1560_v24 = vadd.f32 %v6906_v4, %v1455_v41  ;;  %v1456_v32 = vmul.f32 %v6901_v20, %v1348_v13  ;;  %v5564_v31 = vpop.f32.mrb[195].mxu0  ;;  %v7311_v10 = vsel %vm1974_vm5, %v2702_v39, %v2714_v47 }
 0x31b   : > { %v2029_v29 = vsel %vm1981_vm6, %v2027_v44, %v2028_v22  ;;  %v1929_v18 = vadd.f32 %v1878_v63, %v6930_v58  ;;  %v2726_v48 = vrot.slane %v7223_v14, 7  ;;  %v7314_v7 = vld [vmem:[#allocation2 + $0x60] sm:$0xff]  ;;  %v2180_v41 = vor.u32 %v2178_v56, %v2176_v57 }
 0x31c   : > { %2031 = vst [vmem:[#allocation2 + $0x68] sm:$0x7f] %v2029_v29  ;;  %v1658_v55 = vmax.f32 %v1560_v24, 0.0  ;;  %v1561_v20 = vadd.f32 %v6906_v4, %v1456_v32  ;;  %v2182_v9 = vshll.u32 %v7314_v7, 16  ;;  %v1953_v6 = vmul.f32 0.25, %v1928_v54 }
 0x31d   : > { %v1954_v44 = vmul.f32 0.25, %v1929_v18  ;;  %3462 = vmatmul.mubr.bf16.gmra.mrb[32].mxu1 %v7311_v10  ;;  %v7320_v58 = vsel %vm1974_vm5, %v2716_v61, %v2728_v16  ;;  %v7325_v39 = vsel %vm1974_vm5, %v2682_v53, %v2694_v40  ;;  %v2254_v57 = vsel %vm2237_vm7, %v2251_v19, %v2253_v33 }
 0x31e   : > { %v1879_v62 = vrot.slane %v1658_v55, 4  ;;  %v1659_v22 = vmax.f32 %v1561_v20, 0.0  ;;  %3929 = vmatmul.mubr.bf16.gmra.mrb[220].mxu0 %v7311_v10  ;;  %3469 = vmatprep.mubr.bf16.mxu1 %v7320_v58  ;;  %v2184_v4 = vrot.slane %v2182_v9, 1  ;;  %v2706_v61 = vrot.slane %v2254_v57, 7 }
 0x31f   : > { %v1968_v56 = vpack.c.bf16 %v1954_v44, %v1953_v6  ;;  %3936 = vmatprep.mubr.bf16.mxu0 %v7320_v58  ;;  %v7338_v13 = vsel %vm1974_vm5, %v2714_v47, %v2726_v48  ;;  %v2033_v24 = vrot.slane %v1967_v60, 5  ;;  %v2738_v20 = vrot.slane %v7271_v0, 7 }
 0x320   : > { %v1880_v53 = vsel %vm920_vm0, %v1877_v42, %v1879_v62  ;;  %v1881_v54 = vrot.slane %v1659_v22, 4  ;;  %v2185_v63 = vsel %vm2089_vm4, %v2180_v41, %v2184_v4  ;;  %v7345_v18 = vsel %vm1974_vm5, %v2694_v40, %v2706_v61 }
 0x321   : > { %v2034_v30 = vrot.slane %v1968_v56, 5  ;;  %v1930_v19 = vadd.f32 %v1880_v53, %v6933_v45  ;;  %v2740_v32 = vrot.slane %v2185_v63, 7  ;;  %v2256_v42 = vsel %vm2237_vm7, %v2253_v33, %v2255_v26 }
 0x322   : > { %v1882_v31 = vsel %vm920_vm0, %v1879_v62, %v1881_v54  ;;  %v1932_v29 = vadd.f32 %v1881_v54, %v6945_v34  ;;  %v2186_v45 = vshrl.u32 %v7314_v7, 16  ;;  %v2718_v33 = vrot.slane %v2256_v42, 7 }
 0x323   : > { %v2035_v55 = vsel %vm1988_vm8, %v2033_v24, %v2034_v30  ;;  %v1931_v47 = vadd.f32 %v1882_v31, %v6943_v46  ;;  %v7351_v60 = vld [vmem:[#allocation2 + $0x68] sm:$0xff]  ;;  %v1955_v41 = vmul.f32 0.25, %v1930_v19  ;;  %v7355_v34 = vsel %vm1974_vm5, %v2728_v16, %v2740_v32 }
 0x324   : > { %2037 = vst [vmem:[#allocation2 + $0x70] sm:$0x7f] %v2035_v55  ;;  %v1957_v9 = vmul.f32 0.25, %v1932_v29  ;;  %v2190_v40 = vshll.u32 %v7351_v60, 16  ;;  %v2257_v46 = vrot.slane %v7271_v0, 1  ;;  %v2259_v44 = vrot.slane %v7314_v7, 1 }
 0x325   : > { %v1956_v6 = vmul.f32 0.25, %v1931_v47  ;;  %3470 = vmatmul.mubr.bf16.gmra.mrb[36].mxu1 %v7338_v13  ;;  %v2188_v22 = vor.u32 %v2186_v45, %v2184_v4  ;;  %v2261_v16 = vrot.slane %v7351_v60, 1  ;;  %v7366_v54 = vsel %vm1974_vm5, %v2706_v61, %v2718_v33 }
 0x326   : > { %v1970_v62 = vpack.c.bf16 %v1957_v9, %v1957_v9  ;;  %3937 = vmatmul.mubr.bf16.gmra.mrb[224].mxu0 %v7338_v13  ;;  %3477 = vmatprep.mubr.bf16.mxu1 %v7355_v34  ;;  %v2192_v57 = vrot.slane %v2190_v40, 1  ;;  %v2258_v63 = vsel %vm2237_vm7, %v2255_v26, %v2257_v46  ;;  %v2260_v24 = vsel %vm2237_vm7, %v2257_v46, %v2259_v44 }
 0x327   : > { %v1969_v53 = vpack.c.bf16 %v1956_v6, %v1955_v41  ;;  %3944 = vmatprep.mubr.bf16.mxu0 %v7355_v34  ;;  %v2039_v30 = vrot.slane %v1968_v56, 4  ;;  %v2730_v29 = vrot.slane %v2258_v63, 7  ;;  %v2742_v47 = vrot.slane %v2260_v24, 7 }
 0x328   : > { %v2046_v19 = vrot.slane %v1970_v62, 3  ;;  %v2193_v31 = vsel %vm2089_vm4, %v2188_v22, %v2192_v57  ;;  %v2262_v41 = vsel %vm2237_vm7, %v2259_v44, %v2261_v16  ;;  %v7387_v40 = vsel %vm1974_vm5, %v2726_v48, %v2738_v20 }
 0x329   : > { %v2040_v42 = vrot.slane %v1969_v53, 4  ;;  %v2045_v4 = vrot.slane %v1969_v53, 3  ;;  %v2752_v55 = vrot.slane %v2193_v31, 7  ;;  %v7372_v45 = vsel %vm1974_vm5, %v2718_v33, %v2730_v29 }
 0x32a   : > { %v7380_v56 = vsel %vm1974_vm5, %v2730_v29, %v2742_v47  ;;  %v2194_v6 = vshrl.u32 %v7351_v60, 16  ;;  %v2754_v46 = vrot.slane %v2262_v41, 7 }
 0x32b   : > { %v2041_v61 = vsel %vm920_vm0, %v2039_v30, %v2040_v42  ;;  %v2047_v26 = vsel %vm921_vm2, %v2045_v4, %v2046_v19  ;;  %v7377_v9 = vld [vmem:[#allocation2 + $0x70] sm:$0xff]  ;;  %v7393_v44 = vsel %vm1974_vm5, %v2740_v32, %v2752_v55  ;;  %v4871_v62 = vpop.f32.mrb[0].mxu1  ;;  %v2750_v19 = vrot.slane %v7314_v7, 7 }
 0x32c   : > { %2043 = vst [vmem:[#allocation2 + $0x78] sm:$0x7f] %v2041_v61  ;;  %2049 = vst [vmem:[#allocation2 + $0x80] sm:$0x7f] %v2047_v26  ;;  %v2198_v33 = vshll.u32 %v7377_v9, 16  ;;  %v2263_v22 = vrot.slane %v7377_v9, 1  ;;  %v2196_v14 = vor.u32 %v2194_v6, %v2192_v57  ;;  %v7399_v63 = vsel %vm1974_vm5, %v2742_v47, %v2754_v46 }
 0x32d   : > { %3478 = vmatmul.mubr.bf16.gmra.mrb[40].mxu1 %v7387_v40  ;;  %v4872_v53 = vpop.f32.mrb[1].mxu1  ;;  %v7417_v26 = vsel %vm1974_vm5, %v2738_v20, %v2750_v19  ;;  %v2202_v7 = vshrl.u32 %v7377_v9, 16  ;;  %v2762_v20 = vrot.slane %v7351_v60, 7 }
 0x32e   : > { %3945 = vmatmul.mubr.bf16.gmra.mrb[228].mxu0 %v7387_v40  ;;  %3485 = vmatprep.mubr.bf16.mxu1 %v7393_v44  ;;  %v2200_v48 = vrot.slane %v2198_v33, 1  ;;  %v7402_v24 = vadd.f32 %v4872_v53, %v4871_v62  ;;  %v4874_v30 = vpop.f32.mrb[2].mxu1  ;;  %v2264_v32 = vsel %vm2237_vm7, %v2261_v16, %v2263_v22  ;;  %v7430_v53 = vld [vmem:[#allocation2] sm:$0xff] }
 0x32f   : > { %3952 = vmatprep.mubr.bf16.mxu0 %v7393_v44  ;;  %v4875_v29 = vpop.f32.mrb[3].mxu1  ;;  %v2766_v42 = vrot.slane %v2264_v32, 7 }
 0x330   : > { %v2201_v31 = vsel %vm2089_vm4, %v2196_v14, %v2200_v48  ;;  %v7407_v57 = vadd.f32 %v4875_v29, %v4874_v30 }
 0x331   : > { %v2764_v4 = vrot.slane %v2201_v31, 7  ;;  %v7410_v41 = vsel %vm1974_vm5, %v2754_v46, %v2766_v42  ;;  %v2204_v46 = vor.u32 %v2202_v7, %v2200_v48 }
 0x332   : > { %8156 = vst [vmem:[#allocation19_spill] sm:$0xff] %v7407_v57 }
 0x333   : > { %v2065_v47 = vld [vmem:[#allocation2 + $0x78] sm:$0xff]  ;;  %v7412_v61 = vld [vmem:[#allocation2 + $0x80] sm:$0xff]  ;;  %v7422_v6 = vsel %vm1974_vm5, %v2752_v55, %v2764_v4  ;;  %v8136_v55 = vrot.slane %v7430_v53, 1 }
 0x334   : > { %v2206_v16 = vshll.u32 %v2065_v47, 16  ;;  %v2265_v33 = vrot.slane %v2065_v47, 1  ;;  %v2267_v0 = vrot.slane %v7412_v61, 1  ;;  %v2210_v32 = vshrl.u32 %v2065_v47, 16 }
 0x335   : > { %3486 = vmatmul.mubr.bf16.gmra.mrb[44].mxu1 %v7417_v26  ;;  %v2214_v31 = vshll.u32 %v7412_v61, 16 }
 0x336   : > { %3953 = vmatmul.mubr.bf16.gmra.mrb[232].mxu0 %v7417_v26  ;;  %3493 = vmatprep.mubr.bf16.mxu1 %v7422_v6  ;;  %v2208_v62 = vrot.slane %v2206_v16, 1  ;;  %v2266_v14 = vsel %vm2237_vm7, %v2263_v22, %v2265_v33  ;;  %v2268_v7 = vsel %vm2237_vm7, %v2265_v33, %v2267_v0  ;;  %v2814_v60 = vrot.slane %v2267_v0, 7 }
 0x337   : > { %3960 = vmatprep.mubr.bf16.mxu0 %v7422_v6  ;;  %v2778_v29 = vrot.slane %v2266_v14, 7  ;;  %v2790_v35 = vrot.slane %v2268_v7, 7  ;;  %v7440_v22 = vsel %vm1974_vm5, %v2750_v19, %v2762_v20  ;;  %v2216_v57 = vrot.slane %v2214_v31, 1 }
 0x338   : > { %v2209_v30 = vsel %vm2089_vm4, %v2204_v46, %v2208_v62  ;;  %v2212_v16 = vor.u32 %v2210_v32, %v2208_v62  ;;  %v7444_v46 = vsel %vm2237_vm7, %v2267_v0, %v6778_v11  ;;  %v7449_v14 = vsel %vm2237_vm7, %v2267_v0, %v8136_v55 }
 0x339   : > { %v2776_v48 = vrot.slane %v2209_v30, 7  ;;  %v7437_v8 = vsel %vm1974_vm5, %v2766_v42, %v2778_v29  ;;  %8157 = vst [vmem:[#allocation20_spill] sm:$0xff] %v7449_v14  ;;  %v7459_v33 = vsel %vm1974_vm5, %v2778_v29, %v2790_v35  ;;  %v7462_v11 = vsel %vm1974_vm5, %v2790_v35, %v2814_v60 }
 0x33a   : > { %v2217_v19 = vsel %vm2089_vm4, %v2212_v16, %v2216_v57  ;;  %v8138_v62 = vrot.slane %v7444_v46, 7  ;;  %v8137_v0 = vrot.slane %v7449_v14, 7  ;;  %v2218_v31 = vshrl.u32 %v7412_v61, 16 }
 0x33b   : > { %v7453_v42 = vsel %vm1974_vm5, %v2764_v4, %v2776_v48  ;;  %v2774_v4 = vrot.slane %v7377_v9, 7  ;;  %v2788_v32 = vrot.slane %v2217_v19, 7  ;;  %v2400_v29 = vshll.u32 %v7430_v53, 16 }
 0x33c   : > { %v7471_v30 = vsel %vm1974_vm5, %v2790_v35, %v8138_v62  ;;  %v7478_v7 = vsel %vm1974_vm5, %v2790_v35, %v8137_v0  ;;  %v2220_v16 = vor.u32 %v2218_v31, %v2216_v57  ;;  %v2404_v35 = vshrl.u32 %v7430_v53, 16  ;;  %v2066_v62 = vld [vmem:[#allocation2 + $0x80] sm:$0x7f] }
 0x33d   : > { %3494 = vmatmul.mubr.bf16.gmra.mrb[48].mxu1 %v7440_v22  ;;  %8158 = vst [vmem:[#allocation21_spill] sm:$0xff] %v7478_v7  ;;  %v7481_v60 = vsel %vm1974_vm5, %v2762_v20, %v2774_v4  ;;  %v7485_v9 = vsel %vm1974_vm5, %v2776_v48, %v2788_v32  ;;  %v2402_v55 = vrot.slane %v2400_v29, 1  ;;  %v2786_v57 = vrot.slane %v2065_v47, 7 }
 0x33e   : > { %3961 = vmatmul.mubr.bf16.gmra.mrb[236].mxu0 %v7440_v22  ;;  %3501 = vmatprep.mubr.bf16.mxu1 %v7453_v42  ;;  %v2812_v31 = vrot.slane %v2220_v16, 7 }
 0x33f   : > { %3968 = vmatprep.mubr.bf16.mxu0 %v7453_v42  ;;  %v2403_v19 = vsel %vm2089_vm4, %v2220_v16, %v2402_v55  ;;  %v7494_v0 = vor.u32 %v2404_v35, %v2402_v55  ;;  %v7497_v48 = vsel %vm1974_vm5, %v2774_v4, %v2786_v57  ;;  %v5837_v4 = vld [vmem:[#allocation2 + $0x8] sm:$0x80]  ;;  %v7512_v35 = vrot.slane %v7412_v61, 7 }
 0x340   : > { %v7492_v20 = vrot.slane %v2403_v19, 7  ;;  %v2813_v29 = vsel %vm1974_vm5, %v2788_v32, %v2812_v31  ;;  %v2621_v16 = vrot.slane %v5837_v4, 7  ;;  %v2810_v19 = vrot.slane %v2066_v62, 7  ;;  %v5800_v62 = vld [vmem:[#allocation8 + $0x100] sm:$0xff]   ;;  %v5801_v4 = vld [vmem:[#allocation8 + $0x148] sm:$0xff]  }
 0x341   : > { %v7509_v47 = vsel %vm2089_vm4, %v7494_v0, %v2402_v55  ;;  %v7520_v7 = vsel %vm1974_vm5, %v2786_v57, %v7512_v35  ;;  %v8141_v55 = vrot.slane %v7430_v53, 7 }
 0x342   : > { %v7504_v14 = vsel %vm1974_vm5, %v2788_v32, %v7492_v20  ;;  %v8140_v31 = vrot.slane %v7509_v47, 7  ;;  %v2811_v32 = vsel %vm1974_vm5, %v2786_v57, %v2810_v19  ;;  %v5803_v19 = vld [vmem:[#allocation8 + $0x150] sm:$0xff]  }
 0x343   : > { %v2805_v57 = vsel %vm1974_vm5, %v7512_v35, %v8141_v55 }
 0x344   : > { %v2807_v61 = vsel %vm1974_vm5, %v7492_v20, %v8140_v31 }
 0x345   : > { %3502 = vmatmul.mubr.bf16.gmra.mrb[52].mxu1 %v7481_v60 }
 0x346   : > { %3969 = vmatmul.mubr.bf16.gmra.mrb[240].mxu0 %v7481_v60  ;;  %3509 = vmatprep.mubr.bf16.mxu1 %v7485_v9 }
 0x347   : > { %3976 = vmatprep.mubr.bf16.mxu0 %v7485_v9 }
 0x34d   : > { %3510 = vmatmul.mubr.bf16.gmra.mrb[56].mxu1 %v7497_v48 }
 0x34e   : > { %3977 = vmatmul.mubr.bf16.gmra.mrb[244].mxu0 %v7497_v48  ;;  %3517 = vmatprep.mubr.bf16.mxu1 %v2813_v29  ;;  %v2623_v29 = vsel %vm1974_vm5, %v2621_v16, %v6795_v51  ;;  %v2620_v51 = vsel %vm1974_vm5, %v6790_v49, %v6790_v49  ;;  %v5802_v16 = vld [vmem:[#allocation8 + $0x108] sm:$0xff]  }
 0x34f   : > { %3984 = vmatprep.mubr.bf16.mxu0 %v7504_v14 }
 0x355   : > { %3518 = vmatmul.mubr.bf16.gmra.mrb[60].mxu1 %v2811_v32  ;;  %v8159_v32 = vrot.slane %v7045_v12, 7  ;;  %v5810_v12 = vld [vmem:[#allocation8 + $0x128] sm:$0xff]  }
 0x356   : > { %3985 = vmatmul.mubr.bf16.gmra.mrb[248].mxu0 %v7520_v7  ;;  %3558 = vmatprep.mubr.bf16.mxu1 %v2623_v29  ;;  %v5804_v29 = vld [vmem:[#allocation8 + $0x110] sm:$0xff]  }
 0x357   : > { %3992 = vmatprep.mubr.bf16.mxu0 %v2807_v61  ;;  %v7540_v61 = vsel %vm1974_vm5, %v6790_v49, %v8159_v32  ;;  %v7549_v32 = vld [vmem:[#allocation8 + $0x200] sm:$0xff]  }
 0x35d   : > { %3559 = vmatmul.mubr.bf16.vlgmr.msra.gmra.mrb[64].mxu1 %v2620_v51  ;;  %v5805_v51 = vld [vmem:[#allocation8 + $0x158] sm:$0xff]  }
 0x35e   : > { %3993 = vmatmul.mubr.bf16.gmra.mrb[252].mxu0 %v2805_v57  ;;  %3566 = vmatprep.mubr.bf16.mxu1 %v7027_v15  ;;  %v5806_v15 = vld [vmem:[#allocation8 + $0x118] sm:$0xff]   ;;  %v5809_v57 = vld [vmem:[#allocation8 + $0x168] sm:$0xff]  }
 0x35f   : > { %5080 = vmatpush3.bf16.msra.mxu1 %v5800_v62  ;;  %v5807_v62 = vld [vmem:[#allocation8 + $0x160] sm:$0xff]  }
 0x360   : > { %5081 = vmatprep.subr.bf16.mxu1 %v5801_v4  ;;  %v5808_v4 = vld [vmem:[#allocation8 + $0x120] sm:$0xff]  }
 0x363   : > { %5082 = vmatpush3.bf16.msra.mxu1 %v5802_v16  ;;  %v5811_v16 = vld [vmem:[#allocation8 + $0x170] sm:$0xff]  }
 0x364   : > { %5083 = vmatprep.subr.bf16.mxu1 %v5803_v19  ;;  %v5812_v19 = vld [vmem:[#allocation8 + $0x130] sm:$0xff]  }
 0x365   : > { %3567 = vmatmul.mubr.bf16.gmra.mrb[68].mxu1 %v7540_v61 }
 0x366   : > { %3574 = vmatprep.mubr.bf16.mxu1 %v7073_v36  ;;  %v5813_v36 = vld [vmem:[#allocation8 + $0x178] sm:$0xff]  }
 0x367   : > { %5084 = vmatpush3.bf16.msra.mxu1 %v5804_v29  ;;  %v5814_v29 = vld [vmem:[#allocation8 + $0x138] sm:$0xff]  }
 0x368   : > { %5085 = vmatprep.subr.bf16.mxu1 %v5805_v51 }
 0x36b   : > { %5086 = vmatpush3.bf16.msra.mxu1 %v5806_v15 }
 0x36c   : > { %5087 = vmatprep.subr.bf16.mxu1 %v5807_v62 }
 0x36d   : > { %3575 = vmatmul.mubr.bf16.gmra.mrb[72].mxu1 %v7105_v5 }
 0x36e   : > { %3582 = vmatprep.mubr.bf16.mxu1 %v7137_v59 }
 0x36f   : > { %5088 = vmatpush3.bf16.msra.mxu1 %v5808_v4 }
 0x370   : > { %5089 = vmatprep.subr.bf16.mxu1 %v5809_v57 }
 0x373   : > { %5090 = vmatpush3.bf16.msra.mxu1 %v5810_v12 }
 0x374   : > { %5091 = vmatprep.subr.bf16.mxu1 %v5811_v16 }
 0x375   : > { %3583 = vmatmul.mubr.bf16.gmra.mrb[76].mxu1 %v7157_v50 }
 0x376   : > { %3590 = vmatprep.mubr.bf16.mxu1 %v7188_v37 }
 0x377   : > { %5092 = vmatpush3.bf16.msra.mxu1 %v5812_v19 }
 0x378   : > { %5093 = vmatprep.subr.bf16.mxu1 %v5813_v36 }
 0x37b   : > { %5094 = vmatpush3.bf16.msra.mxu1 %v5814_v29 }
 0x37c   : > { %5565 = vmatprep.subr.bf16.mxu1 %v7549_v32 }
 0x37d   : > { %3591 = vmatmul.mubr.bf16.gmra.mrb[80].mxu1 %v7200_v21 }
 0x37e   : > { %3598 = vmatprep.mubr.bf16.mxu1 %v7237_v27 }
 0x385   : > { %3599 = vmatmul.mubr.bf16.gmra.mrb[84].mxu1 %v7228_v52 }
 0x386   : > { %3606 = vmatprep.mubr.bf16.mxu1 %v7251_v1 }
 0x38d   : > { %3607 = vmatmul.mubr.bf16.gmra.mrb[88].mxu1 %v7325_v39 }
 0x38e   : > { %3614 = vmatprep.mubr.bf16.mxu1 %v7311_v10 }
 0x395   : > { %3615 = vmatmul.mubr.bf16.gmra.mrb[92].mxu1 %v7345_v18 }
 0x396   : > { %3622 = vmatprep.mubr.bf16.mxu1 %v7338_v13 }
 0x39d   : > { %3623 = vmatmul.mubr.bf16.gmra.mrb[96].mxu1 %v7366_v54 }
 0x39e   : > { %3630 = vmatprep.mubr.bf16.mxu1 %v7387_v40 }
 0x3a5   : > { %3631 = vmatmul.mubr.bf16.gmra.mrb[100].mxu1 %v7372_v45 }
 0x3a6   : > { %3638 = vmatprep.mubr.bf16.mxu1 %v7417_v26 }
 0x3ad   : > { %3639 = vmatmul.mubr.bf16.gmra.mrb[104].mxu1 %v7380_v56 }
 0x3ae   : > { %3646 = vmatprep.mubr.bf16.mxu1 %v7440_v22 }
 0x3b5   : > { %v4877_v59 = vpop.f32.mrb[4].mxu1  ;;  %3647 = vmatmul.mubr.bf16.gmra.mrb[108].mxu1 %v7399_v63 }
 0x3b6   : > { %v4878_v37 = vpop.f32.mrb[5].mxu1  ;;  %3654 = vmatprep.mubr.bf16.mxu1 %v7481_v60 }
 0x3b7   : > { %v7567_v27 = vadd.f32 %v4878_v37, %v4877_v59  ;;  %v4880_v1 = vpop.f32.mrb[6].mxu1 }
 0x3b8   : > { %v4881_v10 = vpop.f32.mrb[7].mxu1 }
 0x3b9   : > { %v7569_v13 = vadd.f32 %v4881_v10, %v4880_v1 }
 0x3bd   : > { %3655 = vmatmul.mubr.bf16.gmra.mrb[112].mxu1 %v7410_v41 }
 0x3be   : > { %3662 = vmatprep.mubr.bf16.mxu1 %v7497_v48  ;;  %v2069_v48 = vld [vmem:[#allocation2 + $0x88] sm:$0x7f] }
 0x3bf   : > { %v2816_v37 = vrot.slane %v2069_v48, 7 }
 0x3c0   : > { %v4883_v40 = vpop.f32.mrb[8].mxu1 }
 0x3c1   : > { %v5207_v26 = vpop.f32.mrb[196].mxu0  ;;  %v4884_v51 = vpop.f32.mrb[9].mxu1 }
 0x3c2   : > { %v7573_v22 = vadd.f32 %v4884_v51, %v4883_v40  ;;  %v5208_v15 = vpop.f32.mrb[197].mxu0  ;;  %v4886_v62 = vpop.f32.mrb[10].mxu1 }
 0x3c3   : > { %v7575_v4 = vadd.f32 %v5208_v15, %v5207_v26  ;;  %v5210_v60 = vpop.f32.mrb[198].mxu0  ;;  %v4887_v57 = vpop.f32.mrb[11].mxu1 }
 0x3c4   : > { %v7577_v12 = vadd.f32 %v4887_v57, %v4886_v62  ;;  %v5211_v16 = vpop.f32.mrb[199].mxu0 }
 0x3c5   : > { %8160 = vst [vmem:[#allocation22_spill] sm:$0xff] %v7575_v4  ;;  %v7579_v19 = vadd.f32 %v5211_v16, %v5210_v60  ;;  %3663 = vmatmul.mubr.bf16.gmra.mrb[116].mxu1 %v7437_v8  ;;  %v2087_v16 = vld [vmem:[#allocation2 + $0x90] sm:$0x7f] }
 0x3c6   : > { %3670 = vmatprep.mubr.bf16.mxu1 %v7520_v7  ;;  %v2817_v7 = vsel %vm1974_vm5, %v7512_v35, %v2816_v37  ;;  %v2822_v55 = vrot.slane %v2087_v16, 7  ;;  %v8142_v35 = vrot.slane %v7494_v0, 7  ;;  %v8166_v37 = vrot.slane %v7430_v53, 7 }
 0x3c7   : > { %8161 = vst [vmem:[#allocation23_spill] sm:$0xff] %v7579_v19 }
 0x3c8   : > { %v4889_v36 = vpop.f32.mrb[12].mxu1 }
 0x3c9   : > { %v5213_v29 = vpop.f32.mrb[200].mxu0  ;;  %v4890_v59 = vpop.f32.mrb[13].mxu1 }
 0x3ca   : > { %v7583_v1 = vadd.f32 %v4890_v59, %v4889_v36  ;;  %v5214_v10 = vpop.f32.mrb[201].mxu0  ;;  %v4892_v40 = vpop.f32.mrb[14].mxu1 }
 0x3cb   : > { %v7585_v26 = vadd.f32 %v5214_v10, %v5213_v29  ;;  %v5216_v51 = vpop.f32.mrb[202].mxu0  ;;  %v4893_v15 = vpop.f32.mrb[15].mxu1 }
 0x3cc   : > { %v7587_v62 = vadd.f32 %v4893_v15, %v4892_v40  ;;  %v5217_v60 = vpop.f32.mrb[203].mxu0 }
 0x3cd   : > { %8162 = vst [vmem:[#allocation24_spill] sm:$0xff] %v7585_v26  ;;  %v7589_v57 = vadd.f32 %v5217_v60, %v5216_v51  ;;  %3671 = vmatmul.mubr.bf16.gmra.mrb[120].mxu1 %v7459_v33 }
 0x3ce   : > { %3678 = vmatprep.mubr.bf16.mxu1 %v2817_v7  ;;  %v2823_v7 = vsel %vm1974_vm5, %v8166_v37, %v2822_v55  ;;  %v5816_v55 = vld [vmem:[#allocation8 + $0x208] sm:$0xff]  }
 0x3cf   : > { %8163 = vst [vmem:[#allocation25_spill] sm:$0xff] %v7589_v57 }
 0x3d0   : > { %v4895_v48 = vpop.f32.mrb[16].mxu1 }
 0x3d1   : > { %v5219_v36 = vpop.f32.mrb[204].mxu0  ;;  %v4896_v59 = vpop.f32.mrb[17].mxu1 }
 0x3d2   : > { %v7594_v31 = vadd.f32 %v4896_v59, %v4895_v48  ;;  %v5220_v29 = vpop.f32.mrb[205].mxu0  ;;  %v4898_v10 = vpop.f32.mrb[18].mxu1  ;;  %v8167_v48 = vrot.slane %v7509_v47, 7  ;;  %v5817_v47 = vld [vmem:[#allocation8 + $0x210] sm:$0xff]  }
 0x3d3   : > { %v7596_v40 = vadd.f32 %v5220_v29, %v5219_v36  ;;  %v5222_v15 = vpop.f32.mrb[206].mxu0  ;;  %v4899_v51 = vpop.f32.mrb[19].mxu1 }
 0x3d4   : > { %v7598_v60 = vadd.f32 %v4899_v51, %v4898_v10  ;;  %v5223_v57 = vpop.f32.mrb[207].mxu0  ;;  %v2825_v36 = vsel %vm1974_vm5, %v8167_v48, %v8142_v35 }
 0x3d5   : > { %8164 = vst [vmem:[#allocation26_spill] sm:$0xff] %v7596_v40  ;;  %v7600_v26 = vadd.f32 %v5223_v57, %v5222_v15  ;;  %3679 = vmatmul.mubr.bf16.gmra.mrb[124].mxu1 %v7462_v11  ;;  %4000 = vmatprep.mubr.bf16.mxu0 %v2825_v36 }
 0x3d6   : > { %3719 = vmatprep.mubr.bf16.mxu1 %v7540_v61  ;;  %4001 = vmatmul.mubr.bf16.gmra.mrb[0].mxu0 %v2823_v7 }
 0x3d7   : > { %8165 = vst [vmem:[#allocation27_spill] sm:$0xff] %v7600_v26 }
 0x3d8   : > { %v4901_v16 = vpop.f32.mrb[20].mxu1 }
 0x3d9   : > { %v5225_v59 = vpop.f32.mrb[208].mxu0  ;;  %v4902_v57 = vpop.f32.mrb[21].mxu1 }
 0x3da   : > { %v7613_v29 = vadd.f32 %v4902_v57, %v4901_v16  ;;  %v5226_v11 = vpop.f32.mrb[209].mxu0  ;;  %v4904_v61 = vpop.f32.mrb[22].mxu1 }
 0x3db   : > { %v7615_v10 = vadd.f32 %v5226_v11, %v5225_v59  ;;  %v5228_v15 = vpop.f32.mrb[210].mxu0  ;;  %v4905_v51 = vpop.f32.mrb[23].mxu1 }
 0x3dc   : > { %v7617_v37 = vadd.f32 %v4905_v51, %v4904_v61  ;;  %v5229_v26 = vpop.f32.mrb[211].mxu0  ;;  %v5819_v51 = vld [vmem:[#allocation8 + $0x220] sm:$0xff]  }
 0x3dd   : > { %8168 = vst [vmem:[#allocation28_spill] sm:$0xff] %v7615_v10  ;;  %v7619_v40 = vadd.f32 %v5229_v26, %v5228_v15  ;;  %3720 = vmatmul.mubr.bf16.vlgmr.msra.gmra.mrb[128].mxu1 %v7014_v23  ;;  %v5818_v23 = vld [vmem:[#allocation8 + $0x218] sm:$0xff]  }
 0x3de   : > { %3727 = vmatprep.mubr.bf16.mxu1 %v7105_v5  ;;  %5566 = vmatpush3.bf16.msra.mxu1 %v7549_v32 }
 0x3df   : > { %8169 = vst [vmem:[#allocation29_spill] sm:$0xff] %v7619_v40  ;;  %5567 = vmatprep.subr.bf16.mxu1 %v5816_v55 }
 0x3e0   : > { %v4907_v16 = vpop.f32.mrb[24].mxu1 }
 0x3e1   : > { %v5231_v7 = vpop.f32.mrb[212].mxu0  ;;  %v4908_v48 = vpop.f32.mrb[25].mxu1 }
 0x3e2   : > { %v7624_v36 = vadd.f32 %v4908_v48, %v4907_v16  ;;  %v5232_v59 = vpop.f32.mrb[213].mxu0  ;;  %v4910_v57 = vpop.f32.mrb[26].mxu1  ;;  %5568 = vmatpush3.bf16.msra.mxu1 %v5816_v55 }
 0x3e3   : > { %v7626_v11 = vadd.f32 %v5232_v59, %v5231_v7  ;;  %v5234_v26 = vpop.f32.mrb[214].mxu0  ;;  %v4911_v61 = vpop.f32.mrb[27].mxu1  ;;  %5569 = vmatprep.subr.bf16.mxu1 %v5817_v47 }
 0x3e4   : > { %v7628_v15 = vadd.f32 %v4911_v61, %v4910_v57  ;;  %v5235_v5 = vpop.f32.mrb[215].mxu0 }
 0x3e5   : > { %8170 = vst [vmem:[#allocation30_spill] sm:$0xff] %v7626_v11  ;;  %v7630_v32 = vadd.f32 %v5235_v5, %v5234_v26  ;;  %3728 = vmatmul.mubr.bf16.gmra.mrb[132].mxu1 %v7051_v17  ;;  %v5820_v5 = vld [vmem:[#allocation8 + $0x228] sm:$0xff]  }
 0x3e6   : > { %3735 = vmatprep.mubr.bf16.mxu1 %v7157_v50  ;;  %5570 = vmatpush3.bf16.msra.mxu1 %v5817_v47 }
 0x3e7   : > { %8171 = vst [vmem:[#allocation31_spill] sm:$0xff] %v7630_v32  ;;  %5571 = vmatprep.subr.bf16.mxu1 %v5818_v23 }
 0x3e8   : > { %v4913_v16 = vpop.f32.mrb[28].mxu1 }
 0x3e9   : > { %v5237_v55 = vpop.f32.mrb[216].mxu0  ;;  %v4914_v7 = vpop.f32.mrb[29].mxu1 }
 0x3ea   : > { %v7634_v48 = vadd.f32 %v4914_v7, %v4913_v16  ;;  %v5238_v59 = vpop.f32.mrb[217].mxu0  ;;  %v4916_v35 = vpop.f32.mrb[30].mxu1  ;;  %5572 = vmatpush3.bf16.msra.mxu1 %v5818_v23  ;;  %v5821_v16 = vld [vmem:[#allocation8 + $0x230] sm:$0xff]  }
 0x3eb   : > { %v7636_v57 = vadd.f32 %v5238_v59, %v5237_v55  ;;  %v5240_v61 = vpop.f32.mrb[218].mxu0  ;;  %v4917_v26 = vpop.f32.mrb[31].mxu1  ;;  %5573 = vmatprep.subr.bf16.mxu1 %v5819_v51 }
 0x3ec   : > { %v7638_v17 = vadd.f32 %v4917_v26, %v4916_v35  ;;  %v5241_v32 = vpop.f32.mrb[219].mxu0 }
 0x3ed   : > { %8172 = vst [vmem:[#allocation32_spill] sm:$0xff] %v7636_v57  ;;  %v7640_v47 = vadd.f32 %v5241_v32, %v5240_v61  ;;  %3736 = vmatmul.mubr.bf16.gmra.mrb[136].mxu1 %v7090_v28  ;;  %v5822_v61 = vld [vmem:[#allocation8 + $0x238] sm:$0xff]  }
 0x3ee   : > { %3743 = vmatprep.mubr.bf16.mxu1 %v7200_v21  ;;  %5574 = vmatpush3.bf16.msra.mxu1 %v5819_v51 }
 0x3ef   : > { %8173 = vst [vmem:[#allocation33_spill] sm:$0xff] %v7640_v47  ;;  %5575 = vmatprep.subr.bf16.mxu1 %v5820_v5 }
 0x3f0   : > { %v4919_v7 = vpop.f32.mrb[32].mxu1 }
 0x3f1   : > { %v5243_v23 = vpop.f32.mrb[220].mxu0  ;;  %v4920_v55 = vpop.f32.mrb[33].mxu1 }
 0x3f2   : > { %v7644_v59 = vadd.f32 %v4920_v55, %v4919_v7  ;;  %v5244_v57 = vpop.f32.mrb[221].mxu0  ;;  %v4922_v11 = vpop.f32.mrb[34].mxu1  ;;  %5576 = vmatpush3.bf16.msra.mxu1 %v5820_v5 }
 0x3f3   : > { %v7646_v35 = vadd.f32 %v5244_v57, %v5243_v23  ;;  %v5246_v26 = vpop.f32.mrb[222].mxu0  ;;  %v4923_v32 = vpop.f32.mrb[35].mxu1  ;;  %5577 = vmatprep.subr.bf16.mxu1 %v5821_v16 }
 0x3f4   : > { %v7648_v28 = vadd.f32 %v4923_v32, %v4922_v11  ;;  %v5247_v47 = vpop.f32.mrb[223].mxu0 }
 0x3f5   : > { %8174 = vst [vmem:[#allocation34_spill] sm:$0xff] %v7646_v35  ;;  %v7650_v51 = vadd.f32 %v5247_v47, %v5246_v26  ;;  %3744 = vmatmul.mubr.bf16.gmra.mrb[140].mxu1 %v7142_v3 }
 0x3f6   : > { %3751 = vmatprep.mubr.bf16.mxu1 %v7228_v52  ;;  %5578 = vmatpush3.bf16.msra.mxu1 %v5821_v16 }
 0x3f7   : > { %8175 = vst [vmem:[#allocation35_spill] sm:$0xff] %v7650_v51  ;;  %5579 = vmatprep.subr.bf16.mxu1 %v5822_v61 }
 0x3f8   : > { %v4925_v7 = vpop.f32.mrb[36].mxu1 }
 0x3f9   : > { %v5249_v55 = vpop.f32.mrb[224].mxu0  ;;  %v4926_v5 = vpop.f32.mrb[37].mxu1 }
 0x3fa   : > { %v7654_v57 = vadd.f32 %v4926_v5, %v4925_v7  ;;  %v5250_v23 = vpop.f32.mrb[225].mxu0  ;;  %v4928_v35 = vpop.f32.mrb[38].mxu1  ;;  %5580 = vmatpush3.bf16.msra.mxu1 %v5822_v61 }
 0x3fb   : > { %v7656_v40 = vadd.f32 %v5250_v23, %v5249_v55  ;;  %v5252_v11 = vpop.f32.mrb[226].mxu0  ;;  %v4929_v32 = vpop.f32.mrb[39].mxu1 }
 0x3fc   : > { %v7658_v47 = vadd.f32 %v4929_v32, %v4928_v35  ;;  %v5253_v26 = vpop.f32.mrb[227].mxu0 }
 0x3fd   : > { %8176 = vst [vmem:[#allocation36_spill] sm:$0xff] %v7656_v40  ;;  %v7660_v3 = vadd.f32 %v5253_v26, %v5252_v11  ;;  %3752 = vmatmul.mubr.bf16.gmra.mrb[144].mxu1 %v7181_v2 }
 0x3fe   : > { %3759 = vmatprep.mubr.bf16.mxu1 %v7325_v39 }
 0x3ff   : > { %8177 = vst [vmem:[#allocation37_spill] sm:$0xff] %v7660_v3 }
 0x400   : > { %v4931_v16 = vpop.f32.mrb[40].mxu1 }
 0x401   : > { %v5255_v51 = vpop.f32.mrb[228].mxu0  ;;  %v4932_v7 = vpop.f32.mrb[41].mxu1 }
 0x402   : > { %v7664_v5 = vadd.f32 %v4932_v7, %v4931_v16  ;;  %v5256_v10 = vpop.f32.mrb[229].mxu0  ;;  %v4934_v61 = vpop.f32.mrb[42].mxu1 }
 0x403   : > { %v7666_v55 = vadd.f32 %v5256_v10, %v5255_v51  ;;  %v5258_v23 = vpop.f32.mrb[230].mxu0  ;;  %v4935_v40 = vpop.f32.mrb[43].mxu1 }
 0x404   : > { %v7668_v35 = vadd.f32 %v4935_v40, %v4934_v61  ;;  %v5259_v32 = vpop.f32.mrb[231].mxu0 }
 0x405   : > { %8178 = vst [vmem:[#allocation38_spill] sm:$0xff] %v7666_v55  ;;  %v7670_v11 = vadd.f32 %v5259_v32, %v5258_v23  ;;  %3760 = vmatmul.mubr.bf16.gmra.mrb[148].mxu1 %v7232_v38 }
 0x406   : > { %3767 = vmatprep.mubr.bf16.mxu1 %v7345_v18 }
 0x407   : > { %8179 = vst [vmem:[#allocation39_spill] sm:$0xff] %v7670_v11 }
 0x408   : > { %v4937_v2 = vpop.f32.mrb[44].mxu1 }
 0x409   : > { %v5261_v26 = vpop.f32.mrb[232].mxu0  ;;  %v4938_v3 = vpop.f32.mrb[45].mxu1 }
 0x40a   : > { %v7674_v16 = vadd.f32 %v4938_v3, %v4937_v2  ;;  %v5262_v7 = vpop.f32.mrb[233].mxu0  ;;  %v4940_v19 = vpop.f32.mrb[46].mxu1 }
 0x40b   : > { %v7676_v10 = vadd.f32 %v5262_v7, %v5261_v26  ;;  %v5264_v51 = vpop.f32.mrb[234].mxu0  ;;  %v4941_v55 = vpop.f32.mrb[47].mxu1 }
 0x40c   : > { %v7678_v40 = vadd.f32 %v4941_v55, %v4940_v19  ;;  %v5265_v61 = vpop.f32.mrb[235].mxu0 }
 0x40d   : > { %8180 = vst [vmem:[#allocation40_spill] sm:$0xff] %v7676_v10  ;;  %v7680_v23 = vadd.f32 %v5265_v61, %v5264_v51  ;;  %3768 = vmatmul.mubr.bf16.gmra.mrb[152].mxu1 %v7279_v25 }
 0x40e   : > { %3775 = vmatprep.mubr.bf16.mxu1 %v7366_v54 }
 0x40f   : > { %8181 = vst [vmem:[#allocation41_spill] sm:$0xff] %v7680_v23 }
 0x410   : > { %v4943_v38 = vpop.f32.mrb[48].mxu1 }
 0x411   : > { %v5267_v32 = vpop.f32.mrb[236].mxu0  ;;  %v4944_v11 = vpop.f32.mrb[49].mxu1 }
 0x412   : > { %v7684_v3 = vadd.f32 %v4944_v11, %v4943_v38  ;;  %v5268_v2 = vpop.f32.mrb[237].mxu0  ;;  %v4946_v4 = vpop.f32.mrb[50].mxu1 }
 0x413   : > { %v7686_v26 = vadd.f32 %v5268_v2, %v5267_v32  ;;  %v5270_v7 = vpop.f32.mrb[238].mxu0  ;;  %v4947_v10 = vpop.f32.mrb[51].mxu1 }
 0x414   : > { %8182 = vst [vmem:[#allocation42_spill] sm:$0xff] %v7684_v3  ;;  %v7688_v19 = vadd.f32 %v4947_v10, %v4946_v4  ;;  %v5271_v55 = vpop.f32.mrb[239].mxu0 }
 0x415   : > { %8183 = vst [vmem:[#allocation43_spill] sm:$0xff] %v7686_v26  ;;  %v7690_v51 = vadd.f32 %v5271_v55, %v5270_v7  ;;  %3776 = vmatmul.mubr.bf16.gmra.mrb[156].mxu1 %v7292_v43 }
 0x416   : > { %3783 = vmatprep.mubr.bf16.mxu1 %v7372_v45 }
 0x417   : > { %8184 = vst [vmem:[#allocation44_spill] sm:$0xff] %v7690_v51 }
 0x418   : > { %v4949_v25 = vpop.f32.mrb[52].mxu1 }
 0x419   : > { %v5273_v61 = vpop.f32.mrb[240].mxu0  ;;  %v4950_v23 = vpop.f32.mrb[53].mxu1 }
 0x41a   : > { %v7694_v11 = vadd.f32 %v4950_v23, %v4949_v25  ;;  %v5274_v38 = vpop.f32.mrb[241].mxu0  ;;  %v4952_v3 = vpop.f32.mrb[54].mxu1 }
 0x41b   : > { %v7696_v32 = vadd.f32 %v5274_v38, %v5273_v61  ;;  %v5276_v2 = vpop.f32.mrb[242].mxu0  ;;  %v4953_v26 = vpop.f32.mrb[55].mxu1 }
 0x41c   : > { %8185 = vst [vmem:[#allocation45_spill] sm:$0xff] %v7694_v11  ;;  %v7698_v4 = vadd.f32 %v4953_v26, %v4952_v3  ;;  %v5277_v10 = vpop.f32.mrb[243].mxu0 }
 0x41d   : > { %8186 = vst [vmem:[#allocation46_spill] sm:$0xff] %v7696_v32  ;;  %v7700_v7 = vadd.f32 %v5277_v10, %v5276_v2  ;;  %3784 = vmatmul.mubr.bf16.gmra.mrb[160].mxu1 %v7320_v58 }
 0x41e   : > { %3791 = vmatprep.mubr.bf16.mxu1 %v7380_v56 }
 0x41f   : > { %8187 = vst [vmem:[#allocation47_spill] sm:$0xff] %v7700_v7 }
 0x420   : > { %v4955_v43 = vpop.f32.mrb[56].mxu1 }
 0x421   : > { %v5279_v55 = vpop.f32.mrb[244].mxu0  ;;  %v4956_v51 = vpop.f32.mrb[57].mxu1 }
 0x422   : > { %v7704_v23 = vadd.f32 %v4956_v51, %v4955_v43  ;;  %v5280_v25 = vpop.f32.mrb[245].mxu0  ;;  %v4958_v11 = vpop.f32.mrb[58].mxu1 }
 0x423   : > { %v7706_v61 = vadd.f32 %v5280_v25, %v5279_v55  ;;  %v5282_v38 = vpop.f32.mrb[246].mxu0  ;;  %v4959_v32 = vpop.f32.mrb[59].mxu1 }
 0x424   : > { %8188 = vst [vmem:[#allocation48_spill] sm:$0xff] %v7704_v23  ;;  %v7708_v3 = vadd.f32 %v4959_v32, %v4958_v11  ;;  %v5283_v26 = vpop.f32.mrb[247].mxu0 }
 0x425   : > { %8189 = vst [vmem:[#allocation49_spill] sm:$0xff] %v7706_v61  ;;  %v7710_v2 = vadd.f32 %v5283_v26, %v5282_v38  ;;  %3792 = vmatmul.mubr.bf16.gmra.mrb[164].mxu1 %v7355_v34 }
 0x426   : > { %8190 = vst [vmem:[#allocation50_spill] sm:$0xff] %v7708_v3  ;;  %3799 = vmatprep.mubr.bf16.mxu1 %v7399_v63 }
 0x427   : > { %8191 = vst [vmem:[#allocation51_spill] sm:$0xff] %v7710_v2 }
 0x428   : > { %v4961_v58 = vpop.f32.mrb[60].mxu1 }
 0x429   : > { %v5285_v10 = vpop.f32.mrb[248].mxu0  ;;  %v4962_v7 = vpop.f32.mrb[61].mxu1 }
 0x42a   : > { %v7714_v51 = vadd.f32 %v4962_v7, %v4961_v58  ;;  %v5286_v43 = vpop.f32.mrb[249].mxu0  ;;  %v4964_v23 = vpop.f32.mrb[62].mxu1 }
 0x42b   : > { %v7716_v55 = vadd.f32 %v5286_v43, %v5285_v10  ;;  %v5288_v25 = vpop.f32.mrb[250].mxu0  ;;  %v4965_v61 = vpop.f32.mrb[63].mxu1 }
 0x42c   : > { %8192 = vst [vmem:[#allocation52_spill] sm:$0xff] %v7714_v51  ;;  %v7718_v11 = vadd.f32 %v4965_v61, %v4964_v23  ;;  %v5289_v32 = vpop.f32.mrb[251].mxu0 }
 0x42d   : > { %8193 = vst [vmem:[#allocation53_spill] sm:$0xff] %v7716_v55  ;;  %v7720_v38 = vadd.f32 %v5289_v32, %v5288_v25  ;;  %3800 = vmatmul.mubr.bf16.gmra.mrb[168].mxu1 %v7393_v44  ;;  %v8196_v44 = vld [vmem:[#allocation19_spill] sm:$0xff] }
 0x42e   : > { %3807 = vmatprep.mubr.bf16.mxu1 %v7410_v41 }
 0x42f   : > { %8194 = vst [vmem:[#allocation54_spill] sm:$0xff] %v7720_v38 }
 0x430   : > { %v4983_v34 = vpop.f32.mrb[64].mxu1 }
 0x431   : > { %v5291_v26 = vpop.f32.mrb[252].mxu0  ;;  %v4984_v2 = vpop.f32.mrb[65].mxu1 }
 0x432   : > { %v4985_v7 = vadd.f32 %v4984_v2, %v4983_v34  ;;  %v5292_v58 = vpop.f32.mrb[253].mxu0  ;;  %v4986_v51 = vpop.f32.mrb[66].mxu1 }
 0x433   : > { %v7724_v3 = vadd.f32 %v5292_v58, %v5291_v26  ;;  %v5294_v10 = vpop.f32.mrb[254].mxu0  ;;  %v4987_v43 = vpop.f32.mrb[67].mxu1 }
 0x434   : > { %v7727_v23 = vadd.f32 %v4985_v7, %v7402_v24  ;;  %v4988_v61 = vadd.f32 %v4987_v43, %v4986_v51  ;;  %v5295_v25 = vpop.f32.mrb[255].mxu0 }
 0x435   : > { %8195 = vst [vmem:[#allocation55_spill] sm:$0xff] %v7724_v3  ;;  %v7729_v32 = vadd.f32 %v5295_v25, %v5294_v10  ;;  %3808 = vmatmul.mubr.bf16.gmra.mrb[172].mxu1 %v7422_v6 }
 0x436   : > { %v7733_v38 = vadd.f32 %v4988_v61, %v8196_v44  ;;  %3815 = vmatprep.mubr.bf16.mxu1 %v7437_v8 }
 0x438   : > { %v4989_v2 = vpop.f32.mrb[68].mxu1 }
 0x439   : > { %v4990_v34 = vpop.f32.mrb[69].mxu1 }
 0x43a   : > { %v4991_v26 = vadd.f32 %v4990_v34, %v4989_v2  ;;  %v4992_v58 = vpop.f32.mrb[70].mxu1 }
 0x43b   : > { %v4993_v3 = vpop.f32.mrb[71].mxu1 }
 0x43c   : > { %v7737_v55 = vadd.f32 %v4991_v26, %v7567_v27  ;;  %v4994_v24 = vadd.f32 %v4993_v3, %v4992_v58 }
 0x43d   : > { %3816 = vmatmul.mubr.bf16.gmra.mrb[176].mxu1 %v7453_v42 }
 0x43e   : > { %v7741_v51 = vadd.f32 %v4994_v24, %v7569_v13  ;;  %3823 = vmatprep.mubr.bf16.mxu1 %v7459_v33 }
 0x440   : > { %v4995_v6 = vpop.f32.mrb[72].mxu1 }
 0x441   : > { %v4996_v7 = vpop.f32.mrb[73].mxu1 }
 0x442   : > { %v4997_v10 = vadd.f32 %v4996_v7, %v4995_v6  ;;  %v4998_v43 = vpop.f32.mrb[74].mxu1 }
 0x443   : > { %v4999_v61 = vpop.f32.mrb[75].mxu1 }
 0x444   : > { %v7745_v25 = vadd.f32 %v4997_v10, %v7573_v22  ;;  %v5000_v44 = vadd.f32 %v4999_v61, %v4998_v43  ;;  %v8197_v22 = vrot.slane %v7444_v46, 7 }
 0x445   : > { %3824 = vmatmul.mubr.bf16.gmra.mrb[180].mxu1 %v7485_v9 }
 0x446   : > { %v7749_v27 = vadd.f32 %v5000_v44, %v7577_v12  ;;  %3831 = vmatprep.mubr.bf16.mxu1 %v7471_v30  ;;  %v2821_v9 = vsel %vm1974_vm5, %v8197_v22, %v6790_v49 }
 0x448   : > { %v5001_v42 = vpop.f32.mrb[76].mxu1 }
 0x449   : > { %v5002_v13 = vpop.f32.mrb[77].mxu1 }
 0x44a   : > { %v5003_v3 = vadd.f32 %v5002_v13, %v5001_v42  ;;  %v5004_v2 = vpop.f32.mrb[78].mxu1 }
 0x44b   : > { %v5005_v34 = vpop.f32.mrb[79].mxu1 }
 0x44c   : > { %v7753_v26 = vadd.f32 %v5003_v3, %v7583_v1  ;;  %v5006_v58 = vadd.f32 %v5005_v34, %v5004_v2 }
 0x44d   : > { %3832 = vmatmul.mubr.bf16.gmra.mrb[184].mxu1 %v7504_v14  ;;  %v8198_v14 = vrot.slane %v7494_v0, 7 }
 0x44e   : > { %v7761_v12 = vadd.f32 %v5006_v58, %v7587_v62  ;;  %3839 = vmatprep.mubr.bf16.mxu1 %v2821_v9  ;;  %v8199_v62 = vld [vmem:[#allocation18_spill] sm:$0xff] }
 0x44f   : > { %v2819_v46 = vsel %vm1974_vm5, %v7492_v20, %v8198_v14 }
 0x450   : > { %v5007_v30 = vpop.f32.mrb[80].mxu1 }
 0x451   : > { %v5008_v24 = vpop.f32.mrb[81].mxu1 }
 0x452   : > { %v5009_v6 = vadd.f32 %v5008_v24, %v5007_v30  ;;  %v5010_v7 = vpop.f32.mrb[82].mxu1 }
 0x453   : > { %v5011_v10 = vpop.f32.mrb[83].mxu1 }
 0x454   : > { %v7764_v1 = vadd.f32 %v5009_v6, %v7594_v31  ;;  %v5012_v43 = vadd.f32 %v5011_v10, %v5010_v7 }
 0x455   : > { %3840 = vmatmul.mubr.bf16.gmra.mrb[188].mxu1 %v2819_v46 }
 0x456   : > { %v7771_v49 = vadd.f32 %v5012_v43, %v7598_v60  ;;  %5581 = vmatprep.mubr.bf16.mxu1 %v8199_v62 }
 0x458   : > { %v5013_v61 = vpop.f32.mrb[84].mxu1 }
 0x459   : > { %v5014_v44 = vpop.f32.mrb[85].mxu1 }
 0x45a   : > { %v5015_v42 = vadd.f32 %v5014_v44, %v5013_v61  ;;  %v5016_v13 = vpop.f32.mrb[86].mxu1 }
 0x45b   : > { %v5017_v3 = vpop.f32.mrb[87].mxu1 }
 0x45c   : > { %v7775_v31 = vadd.f32 %v5015_v42, %v7613_v29  ;;  %v5018_v2 = vadd.f32 %v5017_v3, %v5016_v13 }
 0x45d   : > { %5582 = vmatmul.mubr.bf16.vlgmr.msra.gmra.mrb[192].mxu1 %v7157_v50 }
 0x45e   : > { %v7779_v0 = vadd.f32 %v5018_v2, %v7617_v37  ;;  %5585 = vmatprep.mubr.bf16.mxu1 %v7200_v21 }
 0x460   : > { %v5019_v20 = vpop.f32.mrb[88].mxu1 }
 0x461   : > { %v5020_v60 = vpop.f32.mrb[89].mxu1 }
 0x462   : > { %v5021_v34 = vadd.f32 %v5020_v60, %v5019_v20  ;;  %v5022_v58 = vpop.f32.mrb[90].mxu1 }
 0x463   : > { %v5023_v22 = vpop.f32.mrb[91].mxu1 }
 0x464   : > { %v7783_v9 = vadd.f32 %v5021_v34, %v7624_v36  ;;  %v5024_v30 = vadd.f32 %v5023_v22, %v5022_v58 }
 0x465   : > { %5586 = vmatmul.mubr.bf16.gmra.mrb[196].mxu1 %v7228_v52 }
 0x466   : > { %v7787_v29 = vadd.f32 %v5024_v30, %v7628_v15  ;;  %5589 = vmatprep.mubr.bf16.mxu1 %v7325_v39 }
 0x468   : > { %v5025_v50 = vpop.f32.mrb[92].mxu1 }
 0x469   : > { %v5026_v37 = vpop.f32.mrb[93].mxu1 }
 0x46a   : > { %v5027_v24 = vadd.f32 %v5026_v37, %v5025_v50  ;;  %v5028_v21 = vpop.f32.mrb[94].mxu1  ;;  %v8201_v37 = vld [vmem:[#allocation21_spill] sm:$0xff] }
 0x46b   : > { %v5029_v6 = vpop.f32.mrb[95].mxu1 }
 0x46c   : > { %v7791_v7 = vadd.f32 %v5027_v24, %v7634_v48  ;;  %v5030_v10 = vadd.f32 %v5029_v6, %v5028_v21 }
 0x46d   : > { %5590 = vmatmul.mubr.bf16.gmra.mrb[200].mxu1 %v7345_v18 }
 0x46e   : > { %v7795_v36 = vadd.f32 %v5030_v10, %v7638_v17  ;;  %5593 = vmatprep.mubr.bf16.mxu1 %v7366_v54 }
 0x470   : > { %v5031_v52 = vpop.f32.mrb[96].mxu1 }
 0x471   : > { %v5032_v15 = vpop.f32.mrb[97].mxu1 }
 0x472   : > { %v5033_v43 = vadd.f32 %v5032_v15, %v5031_v52  ;;  %v5034_v39 = vpop.f32.mrb[98].mxu1 }
 0x473   : > { %v5035_v14 = vpop.f32.mrb[99].mxu1 }
 0x474   : > { %v7799_v46 = vadd.f32 %v5033_v43, %v7644_v59  ;;  %v5036_v62 = vadd.f32 %v5035_v14, %v5034_v39 }
 0x475   : > { %5594 = vmatmul.mubr.bf16.gmra.mrb[204].mxu1 %v7372_v45 }
 0x476   : > { %v7803_v48 = vadd.f32 %v5036_v62, %v7648_v28  ;;  %5597 = vmatprep.mubr.bf16.mxu1 %v7380_v56 }
 0x478   : > { %v5037_v18 = vpop.f32.mrb[100].mxu1 }
 0x479   : > { %v5038_v17 = vpop.f32.mrb[101].mxu1 }
 0x47a   : > { %v5039_v61 = vadd.f32 %v5038_v17, %v5037_v18  ;;  %v5040_v54 = vpop.f32.mrb[102].mxu1 }
 0x47b   : > { %v5041_v44 = vpop.f32.mrb[103].mxu1 }
 0x47c   : > { %v7807_v42 = vadd.f32 %v5039_v61, %v7654_v57  ;;  %v5042_v13 = vadd.f32 %v5041_v44, %v5040_v54  ;;  %v8205_v54 = vld [vmem:[#allocation45_spill] sm:$0xff] }
 0x47d   : > { %5598 = vmatmul.mubr.bf16.gmra.mrb[208].mxu1 %v7399_v63 }
 0x47e   : > { %v7811_v59 = vadd.f32 %v5042_v13, %v7658_v47  ;;  %5601 = vmatprep.mubr.bf16.mxu1 %v7410_v41  ;;  %v8200_v41 = vrot.slane %v7430_v53, 1 }
 0x480   : > { %v5043_v45 = vpop.f32.mrb[104].mxu1  ;;  %v2808_v34 = vrot.slane %v8200_v41, 7  ;;  %v8207_v41 = vld [vmem:[#allocation50_spill] sm:$0xff] }
 0x481   : > { %v5044_v28 = vpop.f32.mrb[105].mxu1 }
 0x482   : > { %v5045_v3 = vadd.f32 %v5044_v28, %v5043_v45  ;;  %v5046_v56 = vpop.f32.mrb[106].mxu1  ;;  %v2827_v52 = vsel %vm1974_vm5, %v2808_v34, %v2808_v34 }
 0x483   : > { %v5047_v2 = vpop.f32.mrb[107].mxu1 }
 0x484   : > { %v7815_v20 = vadd.f32 %v5045_v3, %v7664_v5  ;;  %v5048_v60 = vadd.f32 %v5047_v2, %v5046_v56 }
 0x485   : > { %5602 = vmatmul.mubr.bf16.gmra.mrb[212].mxu1 %v7437_v8  ;;  %v8202_v8 = vld [vmem:[#allocation20_spill] sm:$0xff] }
 0x486   : > { %v7819_v57 = vadd.f32 %v5048_v60, %v7668_v35  ;;  %5605 = vmatprep.mubr.bf16.mxu1 %v7459_v33  ;;  %v8203_v24 = vrot.slane %v8202_v8, 7  ;;  %v8208_v8 = vld [vmem:[#allocation52_spill] sm:$0xff] }
 0x488   : > { %v5049_v63 = vpop.f32.mrb[108].mxu1  ;;  %v2809_v35 = vsel %vm1974_vm5, %v8203_v24, %v2808_v34 }
 0x489   : > { %v5050_v47 = vpop.f32.mrb[109].mxu1 }
 0x48a   : > { %v5051_v58 = vadd.f32 %v5050_v47, %v5049_v63  ;;  %v5052_v22 = vpop.f32.mrb[110].mxu1  ;;  %v8206_v63 = vld [vmem:[#allocation48_spill] sm:$0xff] }
 0x48b   : > { %v5053_v30 = vpop.f32.mrb[111].mxu1 }
 0x48c   : > { %v7825_v50 = vadd.f32 %v5051_v58, %v7674_v16  ;;  %v5054_v5 = vadd.f32 %v5053_v30, %v5052_v22  ;;  %v8204_v16 = vld [vmem:[#allocation42_spill] sm:$0xff] }
 0x48d   : > { %5606 = vmatmul.mubr.bf16.gmra.mrb[216].mxu1 %v8201_v37 }
 0x48e   : > { %v7832_v33 = vadd.f32 %v5054_v5, %v7678_v40  ;;  %5609 = vmatprep.mubr.bf16.mxu1 %v2809_v35 }
 0x490   : > { %v5055_v21 = vpop.f32.mrb[112].mxu1 }
 0x491   : > { %v5056_v53 = vpop.f32.mrb[113].mxu1 }
 0x492   : > { %v5057_v6 = vadd.f32 %v5056_v53, %v5055_v21  ;;  %v5058_v10 = vpop.f32.mrb[114].mxu1 }
 0x493   : > { %v5059_v15 = vpop.f32.mrb[115].mxu1 }
 0x494   : > { %v7836_v43 = vadd.f32 %v5057_v6, %v8204_v16  ;;  %v5060_v39 = vadd.f32 %v5059_v15, %v5058_v10 }
 0x495   : > { %5610 = vmatmul.mubr.bf16.gmra.mrb[220].mxu1 %v2827_v52 }
 0x496   : > { %v7839_v14 = vadd.f32 %v5060_v39, %v7688_v19 }
 0x498   : > { %v5061_v62 = vpop.f32.mrb[116].mxu1 }
 0x499   : > { %v5062_v18 = vpop.f32.mrb[117].mxu1 }
 0x49a   : > { %v5063_v40 = vadd.f32 %v5062_v18, %v5061_v62  ;;  %v5064_v17 = vpop.f32.mrb[118].mxu1 }
 0x49b   : > { %v5065_v61 = vpop.f32.mrb[119].mxu1 }
 0x49c   : > { %v7842_v44 = vadd.f32 %v5063_v40, %v8205_v54  ;;  %v5066_v13 = vadd.f32 %v5065_v61, %v5064_v17 }
 0x49e   : > { %v7845_v45 = vadd.f32 %v5066_v13, %v7698_v4  ;;  %v8209_v13 = vld [vmem:[#allocation22_spill] sm:$0xff] }
 0x4a0   : > { %v5067_v28 = vpop.f32.mrb[120].mxu1 }
 0x4a1   : > { %v5068_v3 = vpop.f32.mrb[121].mxu1 }
 0x4a2   : > { %v5069_v56 = vadd.f32 %v5068_v3, %v5067_v28  ;;  %v5070_v2 = vpop.f32.mrb[122].mxu1  ;;  %v8210_v3 = vld [vmem:[#allocation23_spill] sm:$0xff] }
 0x4a3   : > { %v5071_v60 = vpop.f32.mrb[123].mxu1 }
 0x4a4   : > { %v7848_v19 = vadd.f32 %v5069_v56, %v8206_v63  ;;  %v5072_v47 = vadd.f32 %v5071_v60, %v5070_v2 }
 0x4a6   : > { %v7851_v34 = vadd.f32 %v5072_v47, %v8207_v41 }
 0x4a8   : > { %v5073_v58 = vpop.f32.mrb[124].mxu1 }
 0x4a9   : > { %v5074_v22 = vpop.f32.mrb[125].mxu1  ;;  %v5297_v35 = vpop.f32.mrb[0].mxu0 }
 0x4aa   : > { %v5075_v30 = vadd.f32 %v5074_v22, %v5073_v58  ;;  %v5076_v5 = vpop.f32.mrb[126].mxu1  ;;  %v5298_v53 = vpop.f32.mrb[1].mxu0 }
 0x4ab   : > { %v5077_v37 = vpop.f32.mrb[127].mxu1  ;;  %v7859_v6 = vadd.f32 %v5298_v53, %v5297_v35  ;;  %v5300_v10 = vpop.f32.mrb[2].mxu0 }
 0x4ac   : > { %v7854_v4 = vadd.f32 %v5075_v30, %v8208_v8  ;;  %v5078_v24 = vadd.f32 %v5077_v37, %v5076_v5  ;;  %v5301_v15 = vpop.f32.mrb[3].mxu0  ;;  %v8212_v5 = vld [vmem:[#allocation25_spill] sm:$0xff] }
 0x4ad   : > { %v7861_v39 = vadd.f32 %v5301_v15, %v5300_v10 }
 0x4ae   : > { %v7857_v21 = vadd.f32 %v5078_v24, %v7718_v11 }
 0x4b0   : > { %v5095_v52 = vpop.f32.mrb[128].mxu1 }
 0x4b1   : > { %v5096_v16 = vpop.f32.mrb[129].mxu1 }
 0x4b2   : > { %v5097_v62 = vadd.f32 %v5096_v16, %v5095_v52  ;;  %v5098_v18 = vpop.f32.mrb[130].mxu1 }
 0x4b3   : > { %v5099_v40 = vpop.f32.mrb[131].mxu1 }
 0x4b4   : > { %v3722_v17 = vadd.f32 %v5097_v62, %v7727_v23  ;;  %v5100_v61 = vadd.f32 %v5099_v40, %v5098_v18  ;;  %v8211_v23 = vld [vmem:[#allocation24_spill] sm:$0xff]  ;;  %v8214_v62 = vld [vmem:[#allocation27_spill] sm:$0xff] }
 0x4b6   : > { %v3725_v54 = vadd.f32 %v5100_v61, %v7733_v38  ;;  %v7866_v11 = vadd.f32 %v8209_v13, %v3722_v17 }
 0x4b8   : > { %v5101_v28 = vpop.f32.mrb[132].mxu1  ;;  %v7869_v56 = vadd.f32 %v8210_v3, %v3725_v54 }
 0x4b9   : > { %v5102_v2 = vpop.f32.mrb[133].mxu1 }
 0x4ba   : > { %v5103_v60 = vadd.f32 %v5102_v2, %v5101_v28  ;;  %v5104_v63 = vpop.f32.mrb[134].mxu1 }
 0x4bb   : > { %v5105_v47 = vpop.f32.mrb[135].mxu1 }
 0x4bc   : > { %v3730_v41 = vadd.f32 %v5103_v60, %v7737_v55  ;;  %v5106_v58 = vadd.f32 %v5105_v47, %v5104_v63  ;;  %v8213_v55 = vld [vmem:[#allocation26_spill] sm:$0xff]  ;;  %v8216_v60 = vld [vmem:[#allocation29_spill] sm:$0xff] }
 0x4be   : > { %v3733_v22 = vadd.f32 %v5106_v58, %v7741_v51  ;;  %v7874_v30 = vadd.f32 %v8211_v23, %v3730_v41 }
 0x4c0   : > { %v5107_v38 = vpop.f32.mrb[136].mxu1  ;;  %v7877_v37 = vadd.f32 %v8212_v5, %v3733_v22 }
 0x4c1   : > { %v5108_v8 = vpop.f32.mrb[137].mxu1 }
 0x4c2   : > { %v5109_v24 = vadd.f32 %v5108_v8, %v5107_v38  ;;  %v5110_v35 = vpop.f32.mrb[138].mxu1 }
 0x4c3   : > { %v5111_v53 = vpop.f32.mrb[139].mxu1 }
 0x4c4   : > { %v3738_v10 = vadd.f32 %v5109_v24, %v7745_v25  ;;  %v5112_v52 = vadd.f32 %v5111_v53, %v5110_v35  ;;  %v8215_v25 = vld [vmem:[#allocation28_spill] sm:$0xff]  ;;  %v8218_v24 = vld [vmem:[#allocation31_spill] sm:$0xff] }
 0x4c6   : > { %v3741_v15 = vadd.f32 %v5112_v52, %v7749_v27  ;;  %v7882_v16 = vadd.f32 %v8213_v55, %v3738_v10 }
 0x4c8   : > { %v5113_v51 = vpop.f32.mrb[140].mxu1  ;;  %v7885_v18 = vadd.f32 %v8214_v62, %v3741_v15 }
 0x4c9   : > { %v5114_v40 = vpop.f32.mrb[141].mxu1 }
 0x4ca   : > { %v5115_v17 = vadd.f32 %v5114_v40, %v5113_v51  ;;  %v5116_v61 = vpop.f32.mrb[142].mxu1 }
 0x4cb   : > { %v5117_v54 = vpop.f32.mrb[143].mxu1 }
 0x4cc   : > { %v3746_v13 = vadd.f32 %v5115_v17, %v7753_v26  ;;  %v5118_v28 = vadd.f32 %v5117_v54, %v5116_v61  ;;  %v8217_v26 = vld [vmem:[#allocation30_spill] sm:$0xff]  ;;  %v8220_v17 = vld [vmem:[#allocation33_spill] sm:$0xff] }
 0x4ce   : > { %v3749_v3 = vadd.f32 %v5118_v28, %v7761_v12  ;;  %v7890_v2 = vadd.f32 %v8215_v25, %v3746_v13 }
 0x4d0   : > { %v5119_v27 = vpop.f32.mrb[144].mxu1  ;;  %v7893_v63 = vadd.f32 %v8216_v60, %v3749_v3 }
 0x4d1   : > { %v5120_v47 = vpop.f32.mrb[145].mxu1 }
 0x4d2   : > { %v5121_v41 = vadd.f32 %v5120_v47, %v5119_v27  ;;  %v5122_v58 = vpop.f32.mrb[146].mxu1 }
 0x4d3   : > { %v5123_v22 = vpop.f32.mrb[147].mxu1 }
 0x4d4   : > { %v3754_v23 = vadd.f32 %v5121_v41, %v7764_v1  ;;  %v5124_v38 = vadd.f32 %v5123_v22, %v5122_v58  ;;  %v8219_v1 = vld [vmem:[#allocation32_spill] sm:$0xff]  ;;  %v8222_v41 = vld [vmem:[#allocation35_spill] sm:$0xff] }
 0x4d6   : > { %v3757_v5 = vadd.f32 %v5124_v38, %v7771_v49  ;;  %v7898_v8 = vadd.f32 %v8217_v26, %v3754_v23 }
 0x4d8   : > { %v5125_v12 = vpop.f32.mrb[148].mxu1  ;;  %v7901_v35 = vadd.f32 %v8218_v24, %v3757_v5 }
 0x4d9   : > { %v5126_v53 = vpop.f32.mrb[149].mxu1 }
 0x4da   : > { %v5127_v10 = vadd.f32 %v5126_v53, %v5125_v12  ;;  %v5128_v52 = vpop.f32.mrb[150].mxu1 }
 0x4db   : > { %v5129_v15 = vpop.f32.mrb[151].mxu1 }
 0x4dc   : > { %v3762_v55 = vadd.f32 %v5127_v10, %v7775_v31  ;;  %v5130_v51 = vadd.f32 %v5129_v15, %v5128_v52  ;;  %v8221_v31 = vld [vmem:[#allocation34_spill] sm:$0xff]  ;;  %v8224_v10 = vld [vmem:[#allocation37_spill] sm:$0xff] }
 0x4de   : > { %v3765_v62 = vadd.f32 %v5130_v51, %v7779_v0  ;;  %v7906_v40 = vadd.f32 %v8219_v1, %v3762_v55 }
 0x4e0   : > { %v5131_v49 = vpop.f32.mrb[152].mxu1  ;;  %v7909_v61 = vadd.f32 %v8220_v17, %v3765_v62 }
 0x4e1   : > { %v5132_v54 = vpop.f32.mrb[153].mxu1 }
 0x4e2   : > { %v5133_v13 = vadd.f32 %v5132_v54, %v5131_v49  ;;  %v5134_v28 = vpop.f32.mrb[154].mxu1 }
 0x4e3   : > { %v5135_v3 = vpop.f32.mrb[155].mxu1 }
 0x4e4   : > { %v3770_v25 = vadd.f32 %v5133_v13, %v7783_v9  ;;  %v5136_v27 = vadd.f32 %v5135_v3, %v5134_v28  ;;  %v8223_v9 = vld [vmem:[#allocation36_spill] sm:$0xff]  ;;  %v8226_v13 = vld [vmem:[#allocation39_spill] sm:$0xff] }
 0x4e6   : > { %v3773_v60 = vadd.f32 %v5136_v27, %v7787_v29  ;;  %v7914_v47 = vadd.f32 %v8221_v31, %v3770_v25  ;;  %v5825_v31 = vld [vmem:[#allocation13 + $0x4] ss:$8 sps:$4 sm:$0xff]  }
 0x4e7   : > { %4372 = vmatprep.mubr.bf16.mxu1 %v5825_v31 }
 0x4e8   : > { %v5137_v0 = vpop.f32.mrb[156].mxu1  ;;  %v7917_v58 = vadd.f32 %v8222_v41, %v3773_v60 }
 0x4e9   : > { %v5138_v22 = vpop.f32.mrb[157].mxu1 }
 0x4ea   : > { %v5139_v23 = vadd.f32 %v5138_v22, %v5137_v0  ;;  %v5140_v38 = vpop.f32.mrb[158].mxu1  ;;  %v8227_v22 = vld [vmem:[#allocation40_spill] sm:$0xff] }
 0x4eb   : > { %v5141_v5 = vpop.f32.mrb[159].mxu1 }
 0x4ec   : > { %v3778_v26 = vadd.f32 %v5139_v23, %v7791_v7  ;;  %v5142_v12 = vadd.f32 %v5141_v5, %v5140_v38  ;;  %v8225_v7 = vld [vmem:[#allocation38_spill] sm:$0xff]  ;;  %v8228_v38 = vld [vmem:[#allocation41_spill] sm:$0xff] }
 0x4ee   : > { %v3781_v24 = vadd.f32 %v5142_v12, %v7795_v36  ;;  %v7922_v53 = vadd.f32 %v8223_v9, %v3778_v26 }
 0x4f0   : > { %v5143_v29 = vpop.f32.mrb[160].mxu1  ;;  %v7925_v52 = vadd.f32 %v8224_v10, %v3781_v24 }
 0x4f1   : > { %v5144_v15 = vpop.f32.mrb[161].mxu1 }
 0x4f2   : > { %v5145_v55 = vadd.f32 %v5144_v15, %v5143_v29  ;;  %v5146_v51 = vpop.f32.mrb[162].mxu1  ;;  %v8229_v15 = vld [vmem:[#allocation43_spill] sm:$0xff] }
 0x4f3   : > { %v5147_v62 = vpop.f32.mrb[163].mxu1 }
 0x4f4   : > { %v3786_v1 = vadd.f32 %v5145_v55, %v7799_v46  ;;  %v5148_v49 = vadd.f32 %v5147_v62, %v5146_v51  ;;  %v8230_v51 = vld [vmem:[#allocation44_spill] sm:$0xff] }
 0x4f6   : > { %v3789_v17 = vadd.f32 %v5148_v49, %v7803_v48  ;;  %v7930_v54 = vadd.f32 %v8225_v7, %v3786_v1 }
 0x4f8   : > { %v5149_v36 = vpop.f32.mrb[164].mxu1  ;;  %v7933_v28 = vadd.f32 %v8226_v13, %v3789_v17 }
 0x4f9   : > { %v5150_v3 = vpop.f32.mrb[165].mxu1 }
 0x4fa   : > { %v5151_v25 = vadd.f32 %v5150_v3, %v5149_v36  ;;  %v5152_v27 = vpop.f32.mrb[166].mxu1 }
 0x4fb   : > { %v5153_v60 = vpop.f32.mrb[167].mxu1 }
 0x4fc   : > { %v3794_v0 = vadd.f32 %v5151_v25, %v7807_v42  ;;  %v5154_v41 = vadd.f32 %v5153_v60, %v5152_v27  ;;  %v8232_v27 = vld [vmem:[#allocation47_spill] sm:$0xff] }
 0x4fe   : > { %v3797_v46 = vadd.f32 %v5154_v41, %v7811_v59  ;;  %v7938_v48 = vadd.f32 %v8227_v22, %v3794_v0 }
 0x500   : > { %v5155_v23 = vpop.f32.mrb[168].mxu1  ;;  %v7941_v5 = vadd.f32 %v8228_v38, %v3797_v46 }
 0x501   : > { %v5156_v26 = vpop.f32.mrb[169].mxu1 }
 0x502   : > { %v5157_v12 = vadd.f32 %v5156_v26, %v5155_v23  ;;  %v5158_v24 = vpop.f32.mrb[170].mxu1 }
 0x503   : > { %v5159_v9 = vpop.f32.mrb[171].mxu1 }
 0x504   : > { %v3802_v29 = vadd.f32 %v5157_v12, %v7815_v20  ;;  %v5160_v10 = vadd.f32 %v5159_v9, %v5158_v24  ;;  %v8231_v20 = vld [vmem:[#allocation46_spill] sm:$0xff]  ;;  %v8234_v12 = vld [vmem:[#allocation51_spill] sm:$0xff] }
 0x506   : > { %v3805_v42 = vadd.f32 %v5160_v10, %v7819_v57  ;;  %v7946_v55 = vadd.f32 %v8229_v15, %v3802_v29 }
 0x508   : > { %v5161_v59 = vpop.f32.mrb[172].mxu1  ;;  %v7949_v62 = vadd.f32 %v8230_v51, %v3805_v42 }
 0x509   : > { %v5162_v1 = vpop.f32.mrb[173].mxu1 }
 0x50a   : > { %v5163_v49 = vadd.f32 %v5162_v1, %v5161_v59  ;;  %v5164_v17 = vpop.f32.mrb[174].mxu1 }
 0x50b   : > { %v5165_v7 = vpop.f32.mrb[175].mxu1 }
 0x50c   : > { %v3810_v36 = vadd.f32 %v5163_v49, %v7825_v50  ;;  %v5166_v13 = vadd.f32 %v5165_v7, %v5164_v17  ;;  %v8233_v50 = vld [vmem:[#allocation49_spill] sm:$0xff]  ;;  %v8236_v49 = vld [vmem:[#allocation54_spill] sm:$0xff] }
 0x50e   : > { %v3813_v3 = vadd.f32 %v5166_v13, %v7832_v33  ;;  %v7954_v25 = vadd.f32 %v8231_v20, %v3810_v36 }
 0x510   : > { %v5167_v57 = vpop.f32.mrb[176].mxu1  ;;  %v7957_v60 = vadd.f32 %v8232_v27, %v3813_v3 }
 0x511   : > { %v5168_v31 = vpop.f32.mrb[177].mxu1 }
 0x512   : > { %v5169_v0 = vadd.f32 %v5168_v31, %v5167_v57  ;;  %v5170_v41 = vpop.f32.mrb[178].mxu1 }
 0x513   : > { %v5171_v46 = vpop.f32.mrb[179].mxu1 }
 0x514   : > { %v3818_v22 = vadd.f32 %v5169_v0, %v7836_v43  ;;  %v5172_v23 = vadd.f32 %v5171_v46, %v5170_v41  ;;  %v8235_v43 = vld [vmem:[#allocation53_spill] sm:$0xff] }
 0x516   : > { %v3821_v38 = vadd.f32 %v5172_v23, %v7839_v14  ;;  %v7962_v26 = vadd.f32 %v8233_v50, %v3818_v22 }
 0x518   : > { %v5173_v33 = vpop.f32.mrb[180].mxu1  ;;  %v7965_v24 = vadd.f32 %v8234_v12, %v3821_v38  ;;  %v7988_v12 = vld [vmem:[#allocation10] ss:$0 sm:$0xff] }
 0x519   : > { %v5174_v9 = vpop.f32.mrb[181].mxu1 }
 0x51a   : > { %v5175_v29 = vadd.f32 %v5174_v9, %v5173_v33  ;;  %v5176_v10 = vpop.f32.mrb[182].mxu1 }
 0x51b   : > { %v5177_v42 = vpop.f32.mrb[183].mxu1 }
 0x51c   : > { %v3826_v15 = vadd.f32 %v5175_v29, %v7842_v44  ;;  %v5178_v59 = vadd.f32 %v5177_v42, %v5176_v10  ;;  %v8237_v44 = vld [vmem:[#allocation55_spill] sm:$0xff]  ;;  %v7994_v10 = vld [vmem:[#allocation11] ss:$0 sm:$0xff] }
 0x51e   : > { %v3829_v51 = vadd.f32 %v5178_v59, %v7845_v45  ;;  %v7970_v1 = vadd.f32 %v8235_v43, %v3826_v15 }
 0x520   : > { %v5179_v14 = vpop.f32.mrb[184].mxu1  ;;  %v7973_v17 = vadd.f32 %v8236_v49, %v3829_v51 }
 0x521   : > { %v5180_v7 = vpop.f32.mrb[185].mxu1 }
 0x522   : > { %v5181_v36 = vadd.f32 %v5180_v7, %v5179_v14  ;;  %v5182_v13 = vpop.f32.mrb[186].mxu1 }
 0x523   : > { %v5183_v3 = vpop.f32.mrb[187].mxu1 }
 0x524   : > { %v3834_v20 = vadd.f32 %v5181_v36, %v7848_v19  ;;  %v5184_v57 = vadd.f32 %v5183_v3, %v5182_v13 }
 0x526   : > { %v3837_v27 = vadd.f32 %v5184_v57, %v7851_v34  ;;  %v7978_v31 = vadd.f32 %v8237_v44, %v3834_v20 }
 0x528   : > { %v5185_v45 = vpop.f32.mrb[188].mxu1  ;;  %v7981_v0 = vadd.f32 %v7729_v32, %v3837_v27 }
 0x529   : > { %v5186_v41 = vpop.f32.mrb[189].mxu1 }
 0x52a   : > { %v5187_v46 = vadd.f32 %v5186_v41, %v5185_v45  ;;  %v5188_v22 = vpop.f32.mrb[190].mxu1 }
 0x52b   : > { %v5189_v23 = vpop.f32.mrb[191].mxu1 }
 0x52c   : > { %v3842_v38 = vadd.f32 %v5187_v46, %v7854_v4  ;;  %v5190_v50 = vadd.f32 %v5189_v23, %v5188_v22 }
 0x52e   : > { %v3845_v33 = vadd.f32 %v5190_v50, %v7857_v21  ;;  %v7986_v19 = vadd.f32 %v7859_v6, %v3842_v38 }
 0x530   : > { %v5583_v34 = vpop.f32.mrb[192].mxu1  ;;  %v7991_v9 = vadd.f32 %v7861_v39, %v3845_v33 }
 0x531   : > { %v4052_v32 = vadd.f32 %v5583_v34, %v7874_v30  ;;  %v4043_v29 = vpop.f32.mrb[193].mxu1 }
 0x532   : > { %v4044_v42 = vadd.f32 %v4043_v29, %v7866_v11  ;;  %v5584_v4 = vpop.f32.mrb[194].mxu1 }
 0x533   : > { %v4179_v15 = vmul.f32 %v7988_v12, %v4052_v32  ;;  %v4055_v21 = vadd.f32 %v5584_v4, %v7877_v37  ;;  %v4046_v6 = vpop.f32.mrb[195].mxu1 }
 0x534   : > { %v4177_v59 = vmul.f32 %v7988_v12, %v4044_v42  ;;  %v4047_v51 = vadd.f32 %v4046_v6, %v7869_v56 }
 0x535   : > { %v4218_v39 = vadd.f32 %v7994_v10, %v4179_v15  ;;  %v4180_v43 = vmul.f32 %v7988_v12, %v4055_v21 }
 0x536   : > { %v4216_v30 = vadd.f32 %v7994_v10, %v4177_v59  ;;  %v4178_v14 = vmul.f32 %v7988_v12, %v4047_v51 }
 0x537   : > { %v4219_v11 = vadd.f32 %v7994_v10, %v4180_v43  ;;  %v4250_v36 = vmax.f32 %v4218_v39, 0.0 }
 0x538   : > { %v4217_v49 = vadd.f32 %v7994_v10, %v4178_v14  ;;  %v5587_v7 = vpop.f32.mrb[196].mxu1  ;;  %v4248_v20 = vmax.f32 %v4216_v30, 0.0 }
 0x539   : > { %v4251_v37 = vmax.f32 %v4219_v11, 0.0  ;;  %v4068_v13 = vadd.f32 %v5587_v7, %v7890_v2  ;;  %v4059_v3 = vpop.f32.mrb[197].mxu1 }
 0x53a   : > { %v4249_v56 = vmax.f32 %v4217_v49, 0.0  ;;  %v4060_v57 = vadd.f32 %v4059_v3, %v7882_v16  ;;  %v5588_v27 = vpop.f32.mrb[198].mxu1 }
 0x53b   : > { %v8009_v44 = vpack.c.bf16 %v4251_v37, %v4250_v36  ;;  %v4183_v45 = vmul.f32 %v7988_v12, %v4068_v13  ;;  %v4071_v41 = vadd.f32 %v5588_v27, %v7893_v63  ;;  %v4062_v46 = vpop.f32.mrb[199].mxu1 }
 0x53c   : > { %v8013_v22 = vpack.c.bf16 %v4249_v56, %v4248_v20  ;;  %v4181_v23 = vmul.f32 %v7988_v12, %v4060_v57  ;;  %v4063_v38 = vadd.f32 %v4062_v46, %v7885_v18 }
 0x53d   : > { %v4222_v2 = vadd.f32 %v7994_v10, %v4183_v45  ;;  %v4184_v50 = vmul.f32 %v7988_v12, %v4071_v41 }
 0x53e   : > { %v4220_v16 = vadd.f32 %v7994_v10, %v4181_v23  ;;  %v4182_v33 = vmul.f32 %v7988_v12, %v4063_v38 }
 0x53f   : > { %v4223_v34 = vadd.f32 %v7994_v10, %v4184_v50  ;;  %v4254_v29 = vmax.f32 %v4222_v2, 0.0 }
 0x540   : > { %v4221_v32 = vadd.f32 %v7994_v10, %v4182_v33  ;;  %v5591_v63 = vpop.f32.mrb[200].mxu1  ;;  %v4252_v21 = vmax.f32 %v4220_v16, 0.0 }
 0x541   : > { %v4255_v42 = vmax.f32 %v4223_v34, 0.0  ;;  %v4084_v4 = vadd.f32 %v5591_v63, %v7906_v40  ;;  %v4075_v15 = vpop.f32.mrb[201].mxu1 }
 0x542   : > { %v4253_v18 = vmax.f32 %v4221_v32, 0.0  ;;  %v4076_v6 = vadd.f32 %v4075_v15, %v7898_v8  ;;  %v5592_v59 = vpop.f32.mrb[202].mxu1 }
 0x543   : > { %v8025_v51 = vpack.c.bf16 %v4255_v42, %v4254_v29  ;;  %v4187_v39 = vmul.f32 %v7988_v12, %v4084_v4  ;;  %v4087_v43 = vadd.f32 %v5592_v59, %v7909_v61  ;;  %v4078_v30 = vpop.f32.mrb[203].mxu1 }
 0x544   : > { %v8029_v14 = vpack.c.bf16 %v4253_v18, %v4252_v21  ;;  %v4185_v11 = vmul.f32 %v7988_v12, %v4076_v6  ;;  %v4079_v49 = vadd.f32 %v4078_v30, %v7901_v35 }
 0x545   : > { %v4226_v40 = vadd.f32 %v7994_v10, %v4187_v39  ;;  %v4188_v7 = vmul.f32 %v7988_v12, %v4087_v43 }
 0x546   : > { %v4224_v8 = vadd.f32 %v7994_v10, %v4185_v11  ;;  %v4186_v36 = vmul.f32 %v7988_v12, %v4079_v49 }
 0x547   : > { %v4227_v37 = vadd.f32 %v7994_v10, %v4188_v7  ;;  %v4258_v3 = vmax.f32 %v4226_v40, 0.0 }
 0x548   : > { %v4225_v13 = vadd.f32 %v7994_v10, %v4186_v36  ;;  %v5595_v61 = vpop.f32.mrb[204].mxu1  ;;  %v4256_v27 = vmax.f32 %v4224_v8, 0.0 }
 0x549   : > { %v4259_v20 = vmax.f32 %v4227_v37, 0.0  ;;  %v4100_v56 = vadd.f32 %v5595_v61, %v7922_v53  ;;  %v4091_v57 = vpop.f32.mrb[205].mxu1 }
 0x54a   : > { %v4257_v35 = vmax.f32 %v4225_v13, 0.0  ;;  %v4092_v45 = vadd.f32 %v4091_v57, %v7914_v47  ;;  %v5596_v41 = vpop.f32.mrb[206].mxu1 }
 0x54b   : > { %v8041_v46 = vpack.c.bf16 %v4259_v20, %v4258_v3  ;;  %v4191_v23 = vmul.f32 %v7988_v12, %v4100_v56  ;;  %v4103_v38 = vadd.f32 %v5596_v41, %v7925_v52  ;;  %v4094_v2 = vpop.f32.mrb[207].mxu1 }
 0x54c   : > { %v8045_v50 = vpack.c.bf16 %v4257_v35, %v4256_v27  ;;  %v4189_v16 = vmul.f32 %v7988_v12, %v4092_v45  ;;  %v4095_v33 = vadd.f32 %v4094_v2, %v7917_v58 }
 0x54d   : > { %v4230_v53 = vadd.f32 %v7994_v10, %v4191_v23  ;;  %v4192_v34 = vmul.f32 %v7988_v12, %v4103_v38 }
 0x54e   : > { %v4228_v47 = vadd.f32 %v7994_v10, %v4189_v16  ;;  %v4190_v32 = vmul.f32 %v7988_v12, %v4095_v33 }
 0x54f   : > { %v4231_v63 = vadd.f32 %v7994_v10, %v4192_v34  ;;  %v4262_v42 = vmax.f32 %v4230_v53, 0.0 }
 0x550   : > { %v4229_v29 = vadd.f32 %v7994_v10, %v4190_v32  ;;  %v5599_v52 = vpop.f32.mrb[208].mxu1  ;;  %v4260_v18 = vmax.f32 %v4228_v47, 0.0 }
 0x551   : > { %v4263_v4 = vmax.f32 %v4231_v63, 0.0  ;;  %v4116_v15 = vadd.f32 %v5599_v52, %v7938_v48  ;;  %v4107_v21 = vpop.f32.mrb[209].mxu1 }
 0x552   : > { %v4261_v58 = vmax.f32 %v4229_v29, 0.0  ;;  %v4108_v6 = vadd.f32 %v4107_v21, %v7930_v54  ;;  %v5600_v59 = vpop.f32.mrb[210].mxu1 }
 0x553   : > { %v8057_v39 = vpack.c.bf16 %v4263_v4, %v4262_v42  ;;  %v4195_v43 = vmul.f32 %v7988_v12, %v4116_v15  ;;  %v4119_v30 = vadd.f32 %v5600_v59, %v7941_v5  ;;  %v4110_v11 = vpop.f32.mrb[211].mxu1 }
 0x554   : > { %v8061_v49 = vpack.c.bf16 %v4261_v58, %v4260_v18  ;;  %v4193_v40 = vmul.f32 %v7988_v12, %v4108_v6  ;;  %v4111_v7 = vadd.f32 %v4110_v11, %v7933_v28 }
 0x555   : > { %v4234_v48 = vadd.f32 %v7994_v10, %v4195_v43  ;;  %v4196_v8 = vmul.f32 %v7988_v12, %v4119_v30 }
 0x556   : > { %v4232_v54 = vadd.f32 %v7994_v10, %v4193_v40  ;;  %v4194_v36 = vmul.f32 %v7988_v12, %v4111_v7 }
 0x557   : > { %v4235_v37 = vadd.f32 %v7994_v10, %v4196_v8  ;;  %v4266_v61 = vmax.f32 %v4234_v48, 0.0 }
 0x558   : > { %v4233_v13 = vadd.f32 %v7994_v10, %v4194_v36  ;;  %v5603_v5 = vpop.f32.mrb[212].mxu1  ;;  %v4264_v57 = vmax.f32 %v4232_v54, 0.0 }
 0x559   : > { %v4267_v3 = vmax.f32 %v4235_v37, 0.0  ;;  %v4132_v20 = vadd.f32 %v5603_v5, %v7954_v25  ;;  %v4123_v56 = vpop.f32.mrb[213].mxu1 }
 0x55a   : > { %v4265_v28 = vmax.f32 %v4233_v13, 0.0  ;;  %v4124_v27 = vadd.f32 %v4123_v56, %v7946_v55  ;;  %v5604_v35 = vpop.f32.mrb[214].mxu1 }
 0x55b   : > { %v4199_v45 = vmul.f32 %v7988_v12, %v4132_v20  ;;  %v4135_v41 = vadd.f32 %v5604_v35, %v7957_v60  ;;  %v4126_v23 = vpop.f32.mrb[215].mxu1  ;;  %v4289_v38 = vpack.c.bf16 %v4267_v3, %v4266_v61 }
 0x55c   : > { %v4197_v2 = vmul.f32 %v7988_v12, %v4124_v27  ;;  %v4127_v16 = vadd.f32 %v4126_v23, %v7949_v62  ;;  %v4288_v33 = vpack.c.bf16 %v4265_v28, %v4264_v57 }
 0x55d   : > { %v4238_v53 = vadd.f32 %v7994_v10, %v4199_v45  ;;  %v4200_v25 = vmul.f32 %v7988_v12, %v4135_v41 }
 0x55e   : > { %v4236_v34 = vadd.f32 %v7994_v10, %v4197_v2  ;;  %v4198_v55 = vmul.f32 %v7988_v12, %v4127_v16  ;;  %5327 = vmatprep.subr.bf16.mxu1 %v4288_v33  ;;  %v5829_v16 = vld [vmem:[#allocation13 + $0x24] ss:$8 sps:$4 sm:$0xff]   ;;  %v4302_v33 = vld [vmem:[#allocation13 + $0x30] sm:$0x11] }
 0x55f   : > { %v4239_v47 = vadd.f32 %v7994_v10, %v4200_v25  ;;  %5328 = vmatpush3.bf16.msra.mxu1 %v8013_v22  ;;  %v4270_v63 = vmax.f32 %v4238_v53, 0.0  ;;  %v4771_v53 = vcombine.high %v4302_v33, %v4302_v33  ;;  %v4770_v25 = vcombine.low %v4302_v33, %v4302_v33 }
 0x560   : > { %v4237_v60 = vadd.f32 %v7994_v10, %v4198_v55  ;;  %v5607_v32 = vpop.f32.mrb[216].mxu1  ;;  %5329 = vmatprep.subr.bf16.mxu1 %v4289_v38  ;;  %v4268_v42 = vmax.f32 %v4236_v34, 0.0 }
 0x561   : > { %v4271_v62 = vmax.f32 %v4239_v47, 0.0  ;;  %v4148_v29 = vadd.f32 %v5607_v32, %v7970_v1  ;;  %v4139_v52 = vpop.f32.mrb[217].mxu1 }
 0x562   : > { %v4269_v4 = vmax.f32 %v4237_v60, 0.0  ;;  %v4140_v15 = vadd.f32 %v4139_v52, %v7962_v26  ;;  %v5608_v21 = vpop.f32.mrb[218].mxu1 }
 0x563   : > { %v4203_v18 = vmul.f32 %v7988_v12, %v4148_v29  ;;  %v4151_v58 = vadd.f32 %v5608_v21, %v7973_v17  ;;  %v4142_v6 = vpop.f32.mrb[219].mxu1  ;;  %5330 = vmatpush3.bf16.msra.mxu1 %v8009_v44  ;;  %v4291_v22 = vpack.c.bf16 %v4271_v62, %v4270_v63 }
 0x564   : > { %v4201_v59 = vmul.f32 %v7988_v12, %v4140_v15  ;;  %v4143_v43 = vadd.f32 %v4142_v6, %v7965_v24  ;;  %v4290_v30 = vpack.c.bf16 %v4269_v4, %v4268_v42 }
 0x565   : > { %v4242_v1 = vadd.f32 %v7994_v10, %v4203_v18  ;;  %v4204_v11 = vmul.f32 %v7988_v12, %v4151_v58 }
 0x566   : > { %v4240_v26 = vadd.f32 %v7994_v10, %v4201_v59  ;;  %v4202_v40 = vmul.f32 %v7988_v12, %v4143_v43  ;;  %5331 = vmatprep.subr.bf16.mxu1 %v4290_v30 }
 0x567   : > { %v4243_v17 = vadd.f32 %v7994_v10, %v4204_v11  ;;  %5332 = vmatpush3.bf16.msra.mxu1 %v8029_v14  ;;  %v4274_v48 = vmax.f32 %v4242_v1, 0.0 }
 0x568   : > { %v4241_v44 = vadd.f32 %v7994_v10, %v4202_v40  ;;  %v5611_v7 = vpop.f32.mrb[220].mxu1  ;;  %5333 = vmatprep.subr.bf16.mxu1 %v4291_v22  ;;  %v4272_v36 = vmax.f32 %v4240_v26, 0.0  ;;  %v4441_v40 = vld [vmem:[%s401_s23 + $0x18] sm:$0x1] }
 0x569   : > { %v4275_v24 = vmax.f32 %v4243_v17, 0.0  ;;  %v4164_v8 = vadd.f32 %v5611_v7, %v7986_v19  ;;  %v4155_v54 = vpop.f32.mrb[221].mxu1 }
 0x56a   : > { %v4273_v37 = vmax.f32 %v4241_v44, 0.0  ;;  %v4156_v13 = vadd.f32 %v4155_v54, %v7978_v31  ;;  %v5612_v5 = vpop.f32.mrb[222].mxu1 }
 0x56b   : > { %v4207_v61 = vmul.f32 %v7988_v12, %v4164_v8  ;;  %v4167_v3 = vadd.f32 %v5612_v5, %v7991_v9  ;;  %v4158_v20 = vpop.f32.mrb[223].mxu1  ;;  %5334 = vmatpush3.bf16.msra.mxu1 %v8025_v51  ;;  %v4293_v14 = vpack.c.bf16 %v4275_v24, %v4274_v48 }
 0x56c   : > { %v4205_v56 = vmul.f32 %v7988_v12, %v4156_v13  ;;  %v4159_v57 = vadd.f32 %v4158_v20, %v7981_v0  ;;  %v4292_v28 = vpack.c.bf16 %v4273_v37, %v4272_v36 }
 0x56d   : > { %v4246_v19 = vadd.f32 %v7994_v10, %v4207_v61  ;;  %v4208_v27 = vmul.f32 %v7988_v12, %v4167_v3 }
 0x56e   : > { %v4244_v31 = vadd.f32 %v7994_v10, %v4205_v56  ;;  %v4206_v35 = vmul.f32 %v7988_v12, %v4159_v57  ;;  %5335 = vmatprep.subr.bf16.mxu1 %v4292_v28  ;;  %v5823_v12 = vld [vmem:[#allocation13] ss:$8 sps:$4 sm:$0xff]  }
 0x56f   : > { %v4247_v9 = vadd.f32 %v7994_v10, %v4208_v27  ;;  %5336 = vmatpush3.bf16.msra.mxu1 %v8045_v50  ;;  %v4278_v45 = vmax.f32 %v4246_v19, 0.0  ;;  %v5826_v50 = vld [vmem:[#allocation13 + $0x14] ss:$8 sps:$4 sm:$0xff]  }
 0x570   : > { %v4245_v51 = vadd.f32 %v7994_v10, %v4206_v35  ;;  %5337 = vmatprep.subr.bf16.mxu1 %v4293_v14  ;;  %v4276_v0 = vmax.f32 %v4244_v31, 0.0  ;;  %v5828_v10 = vld [vmem:[#allocation13 + $0x10] ss:$8 sps:$4 sm:$0xff]  }
 0x571   : > { %v4279_v41 = vmax.f32 %v4247_v9, 0.0 }
 0x572   : > { %v4277_v23 = vmax.f32 %v4245_v51, 0.0 }
 0x573   : > { %5338 = vmatpush3.bf16.msra.mxu1 %v8041_v46  ;;  %v4295_v38 = vpack.c.bf16 %v4279_v41, %v4278_v45  ;;  %v5831_v46 = vld [vmem:[#allocation13 + $0x20] ss:$8 sps:$4 sm:$0xff]  }
 0x574   : > { %v4294_v2 = vpack.c.bf16 %v4277_v23, %v4276_v0 }
 0x576   : > { %5339 = vmatprep.subr.bf16.mxu1 %v4294_v2 }
 0x577   : > { %5340 = vmatpush3.bf16.msra.mxu1 %v8061_v49 }
 0x578   : > { %5341 = vmatprep.subr.bf16.mxu1 %v4295_v38 }
 0x57b   : > { %5342 = vmatpush3.bf16.msra.mxu1 %v8057_v39 }
 0x57e   : > { %4373 = vmatmul.mubr.bf16.vlgmr.msra.gmra.mrb[224].mxu1 %v5823_v12 }
 0x57f   : > { %4380 = vmatprep.mubr.bf16.mxu1 %v5826_v50 }
 0x586   : > { %4381 = vmatmul.mubr.bf16.gmra.mrb[228].mxu1 %v5828_v10 }
 0x587   : > { %4388 = vmatprep.mubr.bf16.mxu1 %v5829_v16 }
 0x58e   : > { %4389 = vmatmul.mubr.bf16.gmra.mrb[232].mxu1 %v5831_v46 }
 0x58f   : > { %4396 = vmatprep.mubr.bf16.mxu1 %v4771_v53 }
 0x596   : > { %4397 = vmatmul.mubr.bf16.gmra.mrb[236].mxu1 %v4770_v25 }
 0x651   : > { %v5343_v49 = vpop.f32.mrb[224].mxu1 }
 0x652   : > { %v5344_v34 = vpop.f32.mrb[225].mxu1 }
 0x653   : > { %v5345_v39 = vadd.f32 %v5344_v34, %v5343_v49  ;;  %v5346_v55 = vpop.f32.mrb[226].mxu1 }
 0x654   : > { %v5347_v47 = vpop.f32.mrb[227].mxu1 }
 0x655   : > { %v5348_v60 = vadd.f32 %v5347_v47, %v5346_v55 }
 0x657   : > { %v4791_v32 = vpack.c.bf16 %v5348_v60, %v5345_v39 }
 0x659   : > { %4792 = vst [vmem:[%s401_s23] sm:$0xff] %v4791_v32   ;;  %v5349_v63 = vpop.f32.mrb[228].mxu1 }
 0x65a   : > { %v5350_v62 = vpop.f32.mrb[229].mxu1 }
 0x65b   : > { %v5351_v29 = vadd.f32 %v5350_v62, %v5349_v63  ;;  %v5352_v52 = vpop.f32.mrb[230].mxu1 }
 0x65c   : > { %v5353_v42 = vpop.f32.mrb[231].mxu1 }
 0x65d   : > { %v5354_v4 = vadd.f32 %v5353_v42, %v5352_v52 }
 0x65f   : > { %v4796_v15 = vpack.c.bf16 %v5354_v4, %v5351_v29 }
 0x661   : > { %4803 = vst [vmem:[%s401_s23 + $0x8] sm:$0xff] %v4796_v15   ;;  %v5355_v21 = vpop.f32.mrb[232].mxu1 }
 0x662   : > { %v5356_v18 = vpop.f32.mrb[233].mxu1 }
 0x663   : > { %v5357_v58 = vadd.f32 %v5356_v18, %v5355_v21  ;;  %v5358_v6 = vpop.f32.mrb[234].mxu1 }
 0x664   : > { %v5359_v22 = vpop.f32.mrb[235].mxu1 }
 0x665   : > { %v5360_v59 = vadd.f32 %v5359_v22, %v5358_v6 }
 0x667   : > { %v4801_v43 = vpack.c.bf16 %v5360_v59, %v5357_v58 }
 0x669   : > { %4804 = vst [vmem:[%s401_s23 + $0x10] sm:$0xff] %v4801_v43   ;;  %v5361_v30 = vpop.f32.mrb[236].mxu1 }
 0x66a   : > { %v5362_v1 = vpop.f32.mrb[237].mxu1 }
 0x66b   : > { %v5363_v11 = vadd.f32 %v5362_v1, %v5361_v30  ;;  %v5364_v26 = vpop.f32.mrb[238].mxu1 }
 0x66c   : > { %v5365_v17 = vpop.f32.mrb[239].mxu1 }
 0x66d   : > { %v4787_v44 = vpack.c.bf16 %v5363_v11, %v5363_v11 }
 0x66f   : > { %v4442_v7 = vsel %vm4440_vm11, %v4787_v44, %v4441_v40 }
 0x670   : > { %4443 = vst [vmem:[%s401_s23 + $0x18] sm:$0x1] %v4442_v7 }
 0x671 PF: > { %s22_s27 = sadd.s32 1, %s6056_s27  }
 0x672   : > { %p19_p10 = scmp.ge.s32.totalorder %s22_s27, 4  }
 0x674   :  { %21 = sbr.rel (!%p19_p10) target bundleno = 4 (0x4), region = 111 }
 0x67b   :  { %4465 = vsyncpa [#allocation4], 1 }
 0x67c   :  { %4467 = vsyncpa [#allocation4 + $0x1], 1 }
 0x67d   :  { %4468 = vsyncpa [#allocation6], 1 }
 0x67e   :  { %4469 = vsyncpa [#allocation9], 1 }
 0x67f   :  { %4470 = vsyncpa [#allocation12], 1 }

// kernel: mnist_convnet_forward.3
= control target key start
LH: loop header
LB: loop body
LE: loop exit
PB: predicated region body
PF: predicated region fallthrough
CT: control target
= control target key end

     0   :  { %s19463_s0 = inlined_call_operand.vmem [shape: bf16[2,6272], index: 0, kind: input, shape index: {}]   ;;  %s19464_s1 = inlined_call_operand.hbm [shape: bf16[6272,1024], index: 1, kind: input, shape index: {}]   ;;  %s19465_s2 = inlined_call_operand.hbm [shape: f32[1,1024], index: 2, kind: input, shape index: {}]   ;;  %s19466_s3 = inlined_call_operand.hbm [shape: bf16[1024,128], index: 3, kind: input, shape index: {}]   ;;  %s19467_s4 = inlined_call_operand.hbm [shape: f32[1,128], index: 4, kind: input, shape index: {}]   ;;  %s19468_s5 = inlined_call_operand.hbm [shape: f32[2,128], index: 5, kind: output, shape index: {}]  }
   0x1   :  { %19477 = sst [smem:[#allocation17_spill]] %s19465_s2 }
   0x2   :  { %10 = vsyncpa [#allocation3], 0 }
   0x3   :  { %12 = vsyncpa [#allocation3 + $0x1], 0 }
   0x4   :  { %13 = vsyncpa [#allocation6], 0 }
   0x5   :  { %15 = vsyncpa [#allocation6 + $0x1], 0 }
   0x6   :  { %16 = vsyncpa [#allocation9], 0 }
   0x7   :  { %17 = vsyncpa [#allocation4], 0  ;;  %s17316_s18 = smov 0   ;;  %s17318_s19 = smov 0  }
   0x8   :  { %s17320_s20 = smov 0   ;;  %s17322_s21 = smov 0  }
   0x9   :  { %s17324_s22 = smov 0   ;;  %s17326_s23 = smov 0  }
   0xa LB: > { %s32_s24 = sadd.s32 1, %s17268_s22  ;;  %s68_s25 = sadd.s32 1, %s17260_s20  ;;  %s17272_s23 = sphi %s17326_s23, %s23_s23   ;;  %s17268_s22 = sphi %s17324_s22, %s19499_s22   ;;  %s17264_s21 = sphi %s17322_s21, %s19498_s21   ;;  %s17260_s20 = sphi %s17320_s20, %s19497_s20   ;;  %s17256_s19 = sphi %s17318_s19, %s19496_s19   ;;  %s17252_s18 = sphi %s17316_s18, %s19495_s18  }
   0xb   : > { %p33_p0 = scmp.ge.s32.totalorder %s32_s24, 2  ;;  %p75_p1 = scmp.ne.s32.totalorder %s17260_s20, %s17256_s19 }
   0xc   : > { %p76_p2 = scmp.eq.s32.totalorder %s17272_s23, 0  ;;  %p14609_p4 = scmp.lt.s32.totalorder %s17272_s23, 2 }
   0xd   : > { %s19501_s24 = smov (%p33_p0, %s32_s24), 0  ;;  %s17357_s27 = sand.u32 1, %s17260_s20  }
   0xe   : > { %19478 = sst [smem:[#allocation15_spill]] %s19501_s24  ;;  %p77_p3 = por %p76_p2, %p75_p1 }
   0xf   : > { %s65_s26 = ssub.s32 %s17268_s22, %s19501_s24  ;;  %s14578_s28 = smul.u32 12544, %s17357_s27 }
  0x10   : > { %p66_p5 = scmp.eq.s32.totalorder %s65_s26, 0  ;;  %p17360_p6 = pnand %p14609_p4, %p77_p3 }
  0x11   : > { %s243_s30 = sand.u32 1, %s17272_s23   ;;  %s12717_s7 = sshll.u32 %s17357_s27, 2 }
  0x12   : > { %s19479_s29 = scalar_select %p17360_p6, 1, 0 }
  0x13   : > { %s17366_s6 = scalar_select %p66_p5, %s17260_s20, %s68_s25  }
  0x14   : > { %s14336_s8 = sshll.u32 %s17268_s22, 6  ;;  %s19481_s2 = sld [smem:[#allocation17_spill]] }
  0x15   : > { %19480 = sst [smem:[#allocation16_spill]] %s17366_s6  ;;  %s247_s12 = scalar_lea.vmem [#allocation5], %s12717_s7 }
  0x16   : > { %s255_s13 = sshll.u32 %s247_s12, 4  ;;  %s17378_s15 = scalar_lea.sflag [#allocation6], %s243_s30  ;;  %s17376_s13 = int_to_ptr.vmem [resolvable:$true] %s255_s13 }
  0x17   : > { %p17384_p8 = pneg %p17360_p6 }
  0x19   : > { %s19482_s17 = scalar_select %p17384_p8, 1, 0 }
  0x1a   : > { %s17373_s11 = scalar_lea.hbm %s19481_s2, %s14336_s8  ;;  %s17071_s7 = scalar_lea.hbm %s19481_s2, 128 }
  0x1b   : > { %s17066_s16 = scalar_lea.hbm %s17373_s11, 64  ;;  %p17072_p11 = scmp.lt.u32.totalorder %s17373_s11, %s19481_s2 }
  0x1c   : > { %p17067_p7 = scmp.ne.s32.totalorder %s17373_s11, %s17066_s16  ;;  %p17073_p12 = scmp.lt.u32.totalorder %s17071_s7, %s17066_s16 }
  0x1d   : > { %p17075_p0 = scmp.lt.u32.totalorder %s17066_s16, %s17373_s11 }
  0x1e   : > { %p17069_p9 = pnand %p17384_p8, %p17067_p7  ;;  %p17074_p13 = por %p17073_p12, %p17072_p11 }
  0x20   : > { %p17070_p10 = pneg %p17069_p9  ;;  %p17076_p1 = por %p17075_p0, %p17074_p13 }
  0x22   : > { %p17077_p2 = pnand %p17076_p1, %p17070_p10 }
  0x24   : > { %17080 = shalt.err (!%p17077_p2)
}
  0x25   : > { %s17081_s30 = scalar_lea.vmem %s17376_s13, 64  ;;  %s17274_s10 = smov [#allocation5]  }
  0x26   : > { %p17082_p3 = scmp.ne.s32.totalorder %s17376_s13, %s17081_s30  ;;  %s17086_s12 = sshll.u32 %s17274_s10, 4  ;;  %s17087_s12 = int_to_ptr.vmem [resolvable:$false] %s17086_s12 }
  0x27   : > { %s17088_s25 = scalar_lea.vmem %s17087_s12, 128  ;;  %p17089_p7 = scmp.lt.s32.totalorder %s17376_s13, %s17087_s12 }
  0x28   : > { %p17084_p4 = pnand %p17082_p3, %p17384_p8  ;;  %p17090_p9 = scmp.lt.s32.totalorder %s17088_s25, %s17081_s30 }
  0x2a   : > { %p17085_p5 = pneg %p17084_p4  ;;  %p17091_p11 = por %p17090_p9, %p17089_p7 }
  0x2c   : > { %p17092_p12 = pnand %p17091_p11, %p17085_p5 }
  0x2e   : > { %17095 = shalt.err (!%p17092_p12)
}
  0x2f   : > { %14604 = dma.hbm_to_vmem [thread:$0]  (!%p17360_p6), %s17373_s11, 64, %s17376_s13, %s17378_s15  }
  0x30   : > { %s17409_s16 = sadd.s32 4294967295, %s17272_s23   ;;  %p81_p10 = scmp.ne.s32.totalorder %s17256_s19, %s17252_s18 }
  0x31   : > { %p19470_p13 = scmp.eq.s32.totalorder %s17409_s16, 0  ;;  %p12711_p0 = scmp.ge.s32.totalorder %s17272_s23, 1 }
  0x32   : > { %p191_p1 = scmp.lt.s32.totalorder %s17272_s23, 3  ;;  %s17275_s11 = smov [#allocation8]  }
  0x33   : > { %p17418_p2 = por %p19470_p13, %p81_p10  ;;  %s211_s13 = sshll.u32 %s17275_s11, 4  ;;  %s212_s13 = int_to_ptr.vmem [resolvable:$true] %s211_s13 }
  0x34   : > { %p17422_p3 = pnand %p12711_p0, %p191_p1  ;;  %s14335_s8 = sshll.u32 %s17268_s22, 8 }
  0x35   : > { %s19483_s26 = scalar_select %p17418_p2, 1, 0 }
  0x36   : > { %s19484_s7 = scalar_select %p17422_p3, 1, 0 }
  0x37   : > { %p14594_p4 = pneg %p17422_p3  ;;  %s17438_s10 = scalar_lea.hbm %s19464_s1, %s14335_s8 }
  0x38   : > { %s226_s12 = scalar_lea.vmem [#allocation2], %s14578_s28  ;;  %s17096_s2 = scalar_lea.hbm %s19467_s4, 16 }
  0x39   : > { %p17431_p5 = pnand %p14594_p4, %p19470_p13  ;;  %s233_s25 = sshll.u32 %s226_s12, 4  ;;  %s17442_s25 = int_to_ptr.vmem [resolvable:$true] %s233_s25 }
  0x3a   : > { %p17097_p7 = scmp.ne.s32.totalorder %s19467_s4, %s17096_s2  ;;  %p17103_p10 = scmp.lt.u32.totalorder %s17096_s2, %s19467_s4 }
  0x3b   : > { %p17098_p9 = pneg %p17431_p5 }
  0x3d   : > { %p17099_p11 = pnand %p17098_p9, %p17097_p7 }
  0x3f   : > { %p17100_p12 = pneg %p17099_p11 }
  0x41   : > { %p17105_p0 = pnand %p17103_p10, %p17100_p12 }
  0x43   : > { %17108 = shalt.err (!%p17105_p0)
}
  0x44   : > { %s17109_s28 = scalar_lea.vmem %s212_s13, 16  ;;  %s17116_s14 = scalar_lea.vmem %s212_s13, 32 }
  0x45   : > { %p17110_p1 = scmp.ne.s32.totalorder %s212_s13, %s17109_s28  ;;  %p17117_p2 = scmp.lt.s32.totalorder %s212_s13, %s212_s13 }
  0x46   : > { %p17118_p3 = scmp.lt.s32.totalorder %s17116_s14, %s17109_s28 }
  0x47   : > { %p17112_p4 = pnand %p17110_p1, %p17098_p9 }
  0x48   : > { %p17119_p6 = por %p17118_p3, %p17117_p2 }
  0x49   : > { %p17113_p13 = pneg %p17112_p4 }
  0x4b   : > { %p17120_p8 = pnand %p17119_p6, %p17113_p13 }
  0x4d   : > { %17123 = shalt.err (!%p17120_p8)
}
  0x4e   : > { %14597 = dma.hbm_to_vmem [thread:$0]  (!%p17431_p5), %s19467_s4, 16, %s212_s13, [#allocation9]  }
  0x4f   : > { %s223_s2 = scalar_lea.sflag [#allocation3], %s17357_s27  ;;  %s17124_s30 = scalar_lea.hbm %s17438_s10, 200704 }
  0x50   : > { %p17125_p7 = scmp.ne.s32.totalorder %s17438_s10, %s17124_s30  ;;  %p19486_p9 = scmp.ne.s32.totalorder %s19482_s17, 0 }
  0x51   : > { %s17129_s18 = scalar_lea.hbm %s19464_s1, 401408  ;;  %p17130_p6 = scmp.lt.u32.totalorder %s17438_s10, %s19464_s1 }
  0x52   : > { %p17127_p11 = pnand %p17125_p7, %p19486_p9  ;;  %p17131_p8 = scmp.lt.u32.totalorder %s17129_s18, %s17124_s30 }
  0x53   : > { %p17133_p3 = scmp.lt.u32.totalorder %s17124_s30, %s17438_s10 }
  0x54   : > { %p17128_p2 = pneg %p17127_p11  ;;  %p17132_p13 = por %p17131_p8, %p17130_p6 }
  0x56   : > { %p17134_p12 = por %p17133_p3, %p17132_p13 }
  0x58   : > { %p17135_p10 = pnand %p17134_p12, %p17128_p2 }
  0x5a   : > { %17138 = shalt.err (!%p17135_p10)
}
  0x5b   : > { %s17139_s13 = scalar_lea.vmem %s17442_s25, 200704  ;;  %s17276_s28 = smov [#allocation2]  }
  0x5c   : > { %p17140_p5 = scmp.ne.s32.totalorder %s17442_s25, %s17139_s13  ;;  %s17144_s14 = sshll.u32 %s17276_s28, 4  ;;  %s17145_s14 = int_to_ptr.vmem [resolvable:$false] %s17144_s14 }
  0x5d   : > { %s17146_s24 = scalar_lea.vmem %s17145_s14, 401408  ;;  %p17147_p4 = scmp.lt.s32.totalorder %s17442_s25, %s17145_s14 }
  0x5e   : > { %p17142_p0 = pnand %p17140_p5, %p19486_p9  ;;  %p17148_p7 = scmp.lt.s32.totalorder %s17146_s24, %s17139_s13 }
  0x60   : > { %p17143_p1 = pneg %p17142_p0  ;;  %p17149_p11 = por %p17148_p7, %p17147_p4 }
  0x62   : > { %p17150_p6 = pnand %p17149_p11, %p17143_p1 }
  0x64   : > { %17153 = shalt.err (!%p17150_p6)
}
  0x65   : > { %s17277_s6 = smov 512   ;;  %s17278_s30 = smov 256  }
  0x66   : > { %s17279_s12 = smov 16   ;;  %p19487_p2 = scmp.ne.s32.totalorder %s19479_s29, 0 }
  0x67   : > { %s14337_s11 = sshll.u32 %s17268_s22, 12  ;;  %s19488_s13 = sshll.u32 %s17357_s27, 8 }
  0x68   : > { %14601 = dma.hbm_to_vmem [thread:$0]  (!%p19487_p2), %s17438_s10, 200704, %s17442_s25, %s223_s2, %s17277_s6, %s17278_s30, %s17279_s12  }
  0x69   : > { %s17488_s8 = scalar_lea.hbm %s19466_s3, %s14337_s11  ;;  %s266_s28 = scalar_lea.vmem [#allocation7], %s19488_s13 }
  0x6a   : > { %s273_s14 = sshll.u32 %s266_s28, 4  ;;  %s17154_s24 = scalar_lea.hbm %s17488_s8, 4096  ;;  %s17492_s14 = int_to_ptr.vmem [resolvable:$true] %s273_s14 }
  0x6b   : > { %p17155_p8 = scmp.ne.s32.totalorder %s17488_s8, %s17154_s24  ;;  %s17159_s2 = scalar_lea.hbm %s19466_s3, 8192 }
  0x6c   : > { %p17160_p12 = scmp.lt.u32.totalorder %s17488_s8, %s19466_s3  ;;  %p17161_p10 = scmp.lt.u32.totalorder %s17159_s2, %s17154_s24 }
  0x6d   : > { %p17157_p13 = pnand %p17155_p8, %p19486_p9  ;;  %p17163_p0 = scmp.lt.u32.totalorder %s17154_s24, %s17488_s8 }
  0x6e   : > { %p17162_p5 = por %p17161_p10, %p17160_p12 }
  0x6f   : > { %p17158_p3 = pneg %p17157_p13 }
  0x70   : > { %p17164_p1 = por %p17163_p0, %p17162_p5 }
  0x72   : > { %p17165_p4 = pnand %p17164_p1, %p17158_p3 }
  0x74   : > { %17168 = shalt.err (!%p17165_p4)
}
  0x75   : > { %s17169_s27 = scalar_lea.vmem %s17492_s14, 4096  ;;  %s17280_s12 = smov [#allocation7]  }
  0x76   : > { %p17170_p7 = scmp.ne.s32.totalorder %s17492_s14, %s17169_s27  ;;  %s17174_s11 = sshll.u32 %s17280_s12, 4  ;;  %s17175_s11 = int_to_ptr.vmem [resolvable:$false] %s17174_s11 }
  0x77   : > { %s17176_s18 = scalar_lea.vmem %s17175_s11, 8192  ;;  %p17177_p8 = scmp.lt.s32.totalorder %s17492_s14, %s17175_s11 }
  0x78   : > { %p17172_p11 = pnand %p17170_p7, %p19486_p9  ;;  %p17178_p13 = scmp.lt.s32.totalorder %s17176_s18, %s17169_s27 }
  0x7a   : > { %p17173_p6 = pneg %p17172_p11  ;;  %p17179_p12 = por %p17178_p13, %p17177_p8 }
  0x7c   : > { %p17180_p10 = pnand %p17179_p12, %p17173_p6 }
  0x7e   : > { %17183 = shalt.err (!%p17180_p10)
}
  0x7f   : > { %s17281_s9 = smov 64   ;;  %s17282_s13 = smov 4  }
  0x80   : > { %14607 = dma.hbm_to_vmem [thread:$0]  (!%p19487_p2), %s17488_s8, 4096, %s17492_s14, %s17378_s15, %s17281_s9, %s17281_s9, %s17282_s13  }
  0x81   : > { %p19489_p9 = scmp.ne.s32.totalorder %s19484_s7, 0 }
  0x82   : > { %s287_s17 = sand.u32 (!%p19489_p9), 1, %s17256_s19   ;;  %p19490_p3 = scmp.ne.s32.totalorder (!%p19489_p9), %s19483_s26, 0 }
  0x83   : > { %285 = sbr.rel (%p19489_p9) target bundleno = 2189 (0x88d), region = 40  ;;  %s288_s24 = scalar_lea.sflag (!%p19489_p9), [#allocation3], %s287_s17 }
  0x84   : > { %s14579_s28 = smul.u32 (!%p19489_p9), 12544, %s287_s17 }
  0x86   : > { %s17519_s10 = scalar_lea.vmem (!%p19489_p9), [#allocation2], %s14579_s28 }
  0x8a   : > { %17235 = dma.done.wait (%p19490_p3), %s288_s24, 200704  }
  0x8b   : > { %17237 = vsyncadd (%p19490_p3), %s288_s24, 4294766592  ;;  %s296_s25 = sand.u32 1, %s17409_s16   ;;  %s12724_s29 = sshll.u32 %s287_s17, 2 }
  0x8c   : > { %s297_s15 = scalar_lea.sflag [#allocation6], %s296_s25  ;;  %s17526_s8 = scalar_lea.vmem [#allocation5], %s12724_s29 }
  0x8d   : > { %17239 = dma.done.wait (%p19490_p3), %s297_s15, 4160  }
  0x8e   : > { %17241 = vsyncadd (%p19490_p3), %s297_s15, 4294963136  ;;  %s12725_s7 = sshll.u32 %s287_s17, 8  ;;  %p19491_p2 = scmp.eq.s32.totalorder %s17409_s16, 0 }
  0x8f   : > { %s17532_s14 = scalar_lea.vmem [#allocation7], %s12725_s7 }
  0x90   : > { %17243 = dma.done.wait (%p19491_p2), [#allocation9], 16   ;;  %p19492_p5 = pmov %p19491_p2 }
  0x91   : > { %v14670_v0 = vld [vmem:[%s17519_s10 + $0x4] ss:$16 sps:$4 sm:$0xff]   ;;  %v14672_v1 = vld [vmem:[%s17519_s10 + $0xc] ss:$16 sps:$4 sm:$0xff]   ;;  %v14674_v2 = vld [vmem:[%s17519_s10] ss:$16 sps:$4 sm:$0xff]   ;;  %v1934_v36 = vlaneseq }
  0x92   : > { %17245 = vsyncadd (%p19492_p5), [#allocation9], 4294967280  ;;  %10158 = vmatprep.subr.bf16.mxu0 %v14670_v0  ;;  %v14675_v3 = vld [vmem:[%s17519_s10 + $0x8] ss:$16 sps:$4 sm:$0xff]   ;;  %11183 = vmatprep.subr.bf16.mxu1 %v14672_v1  ;;  %v14676_v4 = vld [vmem:[%s17519_s10 + $0x24] ss:$16 sps:$4 sm:$0xff]  }
  0x93   : > { %10159 = vmatpush1.bf16.msra.mxu0 %v14674_v2  ;;  %11184 = vmatpush1.bf16.msra.mxu1 %v14675_v3  ;;  %v14678_v5 = vld [vmem:[%s17519_s10 + $0x2c] ss:$16 sps:$4 sm:$0xff]   ;;  %v14680_v6 = vld [vmem:[%s17519_s10 + $0x20] ss:$16 sps:$4 sm:$0xff]   ;;  %v14681_v7 = vld [vmem:[%s17519_s10 + $0x28] ss:$16 sps:$4 sm:$0xff]  }
  0x94   : > { %10160 = vmatprep.subr.bf16.mxu0 %v14676_v4  ;;  %11185 = vmatprep.subr.bf16.mxu1 %v14678_v5  ;;  %v14682_v8 = vld [vmem:[%s17519_s10 + $0x44] ss:$16 sps:$4 sm:$0xff]   ;;  %v14684_v9 = vld [vmem:[%s17519_s10 + $0x4c] ss:$16 sps:$4 sm:$0xff]   ;;  %v14686_v10 = vld [vmem:[%s17519_s10 + $0x40] ss:$16 sps:$4 sm:$0xff]  }
  0x95   : > { %v14687_v11 = vld [vmem:[%s17519_s10 + $0x48] ss:$16 sps:$4 sm:$0xff]   ;;  %v14688_v12 = vld [vmem:[%s17519_s10 + $0x64] ss:$16 sps:$4 sm:$0xff]   ;;  %v14690_v13 = vld [vmem:[%s17519_s10 + $0x6c] ss:$16 sps:$4 sm:$0xff]  }
  0x96   : > { %v14692_v14 = vld [vmem:[%s17519_s10 + $0x60] ss:$16 sps:$4 sm:$0xff]   ;;  %v14693_v15 = vld [vmem:[%s17519_s10 + $0x68] ss:$16 sps:$4 sm:$0xff]   ;;  %v14694_v16 = vld [vmem:[%s17519_s10 + $0x84] ss:$16 sps:$4 sm:$0xff]  }
  0x97   : > { %10161 = vmatpush1.bf16.msra.mxu0 %v14680_v6  ;;  %11186 = vmatpush1.bf16.msra.mxu1 %v14681_v7  ;;  %v14696_v17 = vld [vmem:[%s17519_s10 + $0x8c] ss:$16 sps:$4 sm:$0xff]   ;;  %v14698_v18 = vld [vmem:[%s17519_s10 + $0x80] ss:$16 sps:$4 sm:$0xff]   ;;  %v14699_v19 = vld [vmem:[%s17519_s10 + $0x88] ss:$16 sps:$4 sm:$0xff]  }
  0x98   : > { %10162 = vmatprep.subr.bf16.mxu0 %v14682_v8  ;;  %11187 = vmatprep.subr.bf16.mxu1 %v14684_v9  ;;  %v14700_v20 = vld [vmem:[%s17519_s10 + $0xa4] ss:$16 sps:$4 sm:$0xff]   ;;  %v14702_v21 = vld [vmem:[%s17519_s10 + $0xac] ss:$16 sps:$4 sm:$0xff]   ;;  %v14704_v22 = vld [vmem:[%s17519_s10 + $0xa0] ss:$16 sps:$4 sm:$0xff]  }
  0x99   : > { %v14705_v23 = vld [vmem:[%s17519_s10 + $0xa8] ss:$16 sps:$4 sm:$0xff]   ;;  %v14706_v24 = vld [vmem:[%s17519_s10 + $0xc4] ss:$16 sps:$4 sm:$0xff]   ;;  %v14708_v25 = vld [vmem:[%s17519_s10 + $0xcc] ss:$16 sps:$4 sm:$0xff]  }
  0x9a   : > { %v14710_v26 = vld [vmem:[%s17519_s10 + $0xc0] ss:$16 sps:$4 sm:$0xff]   ;;  %v14711_v27 = vld [vmem:[%s17519_s10 + $0xc8] ss:$16 sps:$4 sm:$0xff]   ;;  %v14712_v28 = vld [vmem:[%s17519_s10 + $0xe4] ss:$16 sps:$4 sm:$0xff]  }
  0x9b   : > { %10163 = vmatpush1.bf16.msra.mxu0 %v14686_v10  ;;  %11188 = vmatpush1.bf16.msra.mxu1 %v14687_v11  ;;  %v14714_v29 = vld [vmem:[%s17519_s10 + $0xec] ss:$16 sps:$4 sm:$0xff]   ;;  %v14716_v30 = vld [vmem:[%s17519_s10 + $0xe0] ss:$16 sps:$4 sm:$0xff]   ;;  %v14717_v31 = vld [vmem:[%s17519_s10 + $0xe8] ss:$16 sps:$4 sm:$0xff]  }
  0x9c   : > { %10164 = vmatprep.subr.bf16.mxu0 %v14688_v12  ;;  %11189 = vmatprep.subr.bf16.mxu1 %v14690_v13  ;;  %v14718_v32 = vld [vmem:[%s17519_s10 + $0x104] ss:$16 sps:$4 sm:$0xff]   ;;  %v14720_v33 = vld [vmem:[%s17519_s10 + $0x10c] ss:$16 sps:$4 sm:$0xff]   ;;  %v14722_v34 = vld [vmem:[%s17519_s10 + $0x100] ss:$16 sps:$4 sm:$0xff]  }
  0x9d   : > { %v14723_v35 = vld [vmem:[%s17519_s10 + $0x108] ss:$16 sps:$4 sm:$0xff]   ;;  %v17283_v37 = vmov 1966171168   ;;  %v14724_v39 = vld [vmem:[%s17519_s10 + $0x124] ss:$16 sps:$4 sm:$0xff]  }
  0x9e   : > { %v1963_v38 = vunpack.c.l.s4 %v17283_v37  ;;  %v14726_v40 = vld [vmem:[%s17519_s10 + $0x12c] ss:$16 sps:$4 sm:$0xff]   ;;  %v14728_v41 = vld [vmem:[%s17519_s10 + $0x120] ss:$16 sps:$4 sm:$0xff]   ;;  %v17577_v42 = vshrl.u32 %v1934_v36, 7  ;;  %p14328_p0 = scmp.ne.s32.totalorder %s17264_s21, 0 }
  0x9f   : > { %10165 = vmatpush1.bf16.msra.mxu0 %v14692_v14  ;;  %11190 = vmatpush1.bf16.msra.mxu1 %v14693_v15  ;;  %v14729_v44 = vld [vmem:[%s17519_s10 + $0x128] ss:$16 sps:$4 sm:$0xff]   ;;  %v14730_v45 = vld [vmem:[%s17519_s10 + $0x144] ss:$16 sps:$4 sm:$0xff]   ;;  %v14732_v46 = vld [vmem:[%s17519_s10 + $0x14c] ss:$16 sps:$4 sm:$0xff]  }
  0xa0   : > { %10166 = vmatprep.subr.bf16.mxu0 %v14694_v16  ;;  %11191 = vmatprep.subr.bf16.mxu1 %v14696_v17  ;;  %v1964_v43 = vunpack.c.0.s8 %v1963_v38  ;;  %v14734_v47 = vld [vmem:[%s17519_s10 + $0x140] ss:$16 sps:$4 sm:$0xff]   ;;  %v14735_v48 = vld [vmem:[%s17519_s10 + $0x148] ss:$16 sps:$4 sm:$0xff]   ;;  %v14736_v50 = vld [vmem:[%s17519_s10 + $0x164] ss:$16 sps:$4 sm:$0xff]  }
  0xa1   : > { %v14738_v51 = vld [vmem:[%s17519_s10 + $0x16c] ss:$16 sps:$4 sm:$0xff]   ;;  %v17592_v52 = vld [vmem:[%s19463_s0] sm:$0xff]  ;;  %v14741_v55 = vld [vmem:[%s17519_s10 + $0x168] ss:$16 sps:$4 sm:$0xff]  }
  0xa2   : > { %v17585_v49 = vsub.s32 %v1964_v43, %v17577_v42  ;;  %v14740_v53 = vld [vmem:[%s17519_s10 + $0x160] ss:$16 sps:$4 sm:$0xff]   ;;  %v14742_v56 = vld [vmem:[%s17519_s10 + $0x184] ss:$16 sps:$4 sm:$0xff]   ;;  %v14744_v57 = vld [vmem:[%s17519_s10 + $0x18c] ss:$16 sps:$4 sm:$0xff]  }
  0xa3   : > { %10167 = vmatpush1.bf16.msra.mxu0 %v14698_v18  ;;  %11192 = vmatpush1.bf16.msra.mxu1 %v14699_v19  ;;  %v14746_v59 = vld [vmem:[%s17519_s10 + $0x180] ss:$16 sps:$4 sm:$0xff]   ;;  %v14747_v61 = vld [vmem:[%s17519_s10 + $0x188] ss:$16 sps:$4 sm:$0xff]   ;;  %v14748_v62 = vld [vmem:[%s17519_s10 + $0x1a4] ss:$16 sps:$4 sm:$0xff]  }
  0xa4   : > { %10168 = vmatprep.subr.bf16.mxu0 %v14700_v20  ;;  %11193 = vmatprep.subr.bf16.mxu1 %v14702_v21  ;;  %v1968_v54 = vrot.slane %v17592_v52, %v17585_v49  ;;  %v14750_v63 = vld [vmem:[%s17519_s10 + $0x1ac] ss:$16 sps:$4 sm:$0xff]   ;;  %v14752_v0 = vld [vmem:[%s17519_s10 + $0x1a0] ss:$16 sps:$4 sm:$0xff]   ;;  %v14753_v1 = vld [vmem:[%s17519_s10 + $0x1a8] ss:$16 sps:$4 sm:$0xff]  }
  0xa5   : > { %v14754_v2 = vld [vmem:[%s17519_s10 + $0x1c4] ss:$16 sps:$4 sm:$0xff]   ;;  %v14756_v3 = vld [vmem:[%s17519_s10 + $0x1cc] ss:$16 sps:$4 sm:$0xff]   ;;  %v14758_v4 = vld [vmem:[%s17519_s10 + $0x1c0] ss:$16 sps:$4 sm:$0xff]  }
  0xa6   : > { %v1976_v58 = vcombine.high %v1968_v54, %v1968_v54  ;;  %v14759_v5 = vld [vmem:[%s17519_s10 + $0x1c8] ss:$16 sps:$4 sm:$0xff]   ;;  %v14760_v6 = vld [vmem:[%s17519_s10 + $0x1e4] ss:$16 sps:$4 sm:$0xff]   ;;  %v14762_v7 = vld [vmem:[%s17519_s10 + $0x1ec] ss:$16 sps:$4 sm:$0xff]   ;;  %v17619_v13 = vrot.slane %v1968_v54, %v17585_v49 }
  0xa7   : > { %10169 = vmatpush1.bf16.msra.mxu0 %v14704_v22  ;;  %11194 = vmatpush1.bf16.msra.mxu1 %v14705_v23  ;;  %v14764_v8 = vld [vmem:[%s17519_s10 + $0x1e0] ss:$16 sps:$4 sm:$0xff]   ;;  %v14765_v9 = vld [vmem:[%s17519_s10 + $0x1e8] ss:$16 sps:$4 sm:$0xff]   ;;  %v14768_v10 = vld [vmem:[%s17519_s10 + $0x204] ss:$16 sps:$4 sm:$0xff]  }
  0xa8   : > { %10170 = vmatprep.subr.bf16.mxu0 %v14706_v24  ;;  %11195 = vmatprep.subr.bf16.mxu1 %v14708_v25  ;;  %v1998_v60 = vrot.slane %v1976_v58, %v17585_v49  ;;  %v14771_v11 = vld [vmem:[%s17519_s10 + $0x20c] ss:$16 sps:$4 sm:$0xff]   ;;  %v14766_v12 = vld [vmem:[%s17519_s10 + $0x200] ss:$16 sps:$4 sm:$0xff]   ;;  %v14769_v14 = vld [vmem:[%s17519_s10 + $0x208] ss:$16 sps:$4 sm:$0xff]  }
  0xa9   : > { %v14774_v15 = vld [vmem:[%s17519_s10 + $0x224] ss:$16 sps:$4 sm:$0xff]   ;;  %v14777_v16 = vld [vmem:[%s17519_s10 + $0x22c] ss:$16 sps:$4 sm:$0xff]   ;;  %v14772_v18 = vld [vmem:[%s17519_s10 + $0x220] ss:$16 sps:$4 sm:$0xff]  }
  0xaa   : > { %10190 = vmatprep.mubr.bf16.mxu0 %v1998_v60  ;;  %11215 = vmatprep.mubr.bf16.mxu1 %v1998_v60  ;;  %v2008_v17 = vcombine.high %v1998_v60, %v1998_v60  ;;  %v14775_v19 = vld [vmem:[%s17519_s10 + $0x228] ss:$16 sps:$4 sm:$0xff]   ;;  %v14780_v20 = vld [vmem:[%s17519_s10 + $0x244] ss:$16 sps:$4 sm:$0xff]   ;;  %v14783_v21 = vld [vmem:[%s17519_s10 + $0x24c] ss:$16 sps:$4 sm:$0xff]  }
  0xab   : > { %10171 = vmatpush1.bf16.msra.mxu0 %v14710_v26  ;;  %11196 = vmatpush1.bf16.msra.mxu1 %v14711_v27  ;;  %v14778_v22 = vld [vmem:[%s17519_s10 + $0x240] ss:$16 sps:$4 sm:$0xff]   ;;  %v14781_v23 = vld [vmem:[%s17519_s10 + $0x248] ss:$16 sps:$4 sm:$0xff]   ;;  %v14786_v24 = vld [vmem:[%s17519_s10 + $0x264] ss:$16 sps:$4 sm:$0xff]  }
  0xac   : > { %10172 = vmatprep.subr.bf16.mxu0 %v14712_v28  ;;  %11197 = vmatprep.subr.bf16.mxu1 %v14714_v29  ;;  %v14789_v25 = vld [vmem:[%s17519_s10 + $0x26c] ss:$16 sps:$4 sm:$0xff]   ;;  %v14784_v26 = vld [vmem:[%s17519_s10 + $0x260] ss:$16 sps:$4 sm:$0xff]   ;;  %v14787_v27 = vld [vmem:[%s17519_s10 + $0x268] ss:$16 sps:$4 sm:$0xff]  }
  0xad   : > { %v14792_v28 = vld [vmem:[%s17519_s10 + $0x284] ss:$16 sps:$4 sm:$0xff]   ;;  %v14795_v29 = vld [vmem:[%s17519_s10 + $0x28c] ss:$16 sps:$4 sm:$0xff]   ;;  %v14802_v38 = vld [vmem:[%s17519_s10 + $0x2c0] ss:$16 sps:$4 sm:$0xff]  }
  0xae   : > { %v14804_v36 = vld [vmem:[%s17519_s10 + $0x2c4] ss:$16 sps:$4 sm:$0xff]   ;;  %v14807_v37 = vld [vmem:[%s17519_s10 + $0x2cc] ss:$16 sps:$4 sm:$0xff]   ;;  %v14808_v43 = vld [vmem:[%s17519_s10 + $0x2e0] ss:$16 sps:$4 sm:$0xff]  }
  0xaf   : > { %10173 = vmatpush1.bf16.msra.mxu0 %v14716_v30  ;;  %11198 = vmatpush1.bf16.msra.mxu1 %v14717_v31  ;;  %v14790_v30 = vld [vmem:[%s17519_s10 + $0x280] ss:$16 sps:$4 sm:$0xff]   ;;  %v14793_v31 = vld [vmem:[%s17519_s10 + $0x288] ss:$16 sps:$4 sm:$0xff]   ;;  %v14837_v60 = vld [vmem:[%s17519_s10 + $0x36c] ss:$16 sps:$4 sm:$0xff]  }
  0xb0   : > { %10174 = vmatprep.subr.bf16.mxu0 %v14718_v32  ;;  %11199 = vmatprep.subr.bf16.mxu1 %v14720_v33  ;;  %v14798_v32 = vld [vmem:[%s17519_s10 + $0x2a4] ss:$16 sps:$4 sm:$0xff]   ;;  %v14801_v33 = vld [vmem:[%s17519_s10 + $0x2ac] ss:$16 sps:$4 sm:$0xff]   ;;  %v14823_v54 = vld [vmem:[%s17519_s10 + $0x328] ss:$16 sps:$4 sm:$0xff]  }
  0xb1   : > { %v14829_v58 = vld [vmem:[%s17519_s10 + $0x348] ss:$16 sps:$4 sm:$0xff]  }
  0xb3   : > { %10175 = vmatpush1.bf16.msra.mxu0 %v14722_v34  ;;  %11200 = vmatpush1.bf16.msra.mxu1 %v14723_v35  ;;  %v14796_v34 = vld [vmem:[%s17519_s10 + $0x2a0] ss:$16 sps:$4 sm:$0xff]   ;;  %v14799_v35 = vld [vmem:[%s17519_s10 + $0x2a8] ss:$16 sps:$4 sm:$0xff]  }
  0xb4   : > { %10176 = vmatprep.subr.bf16.mxu0 %v14724_v39  ;;  %11201 = vmatprep.subr.bf16.mxu1 %v14726_v40  ;;  %v14805_v39 = vld [vmem:[%s17519_s10 + $0x2c8] ss:$16 sps:$4 sm:$0xff]   ;;  %v14810_v40 = vld [vmem:[%s17519_s10 + $0x2e4] ss:$16 sps:$4 sm:$0xff]  }
  0xb7   : > { %10177 = vmatpush1.bf16.msra.mxu0 %v14728_v41  ;;  %11202 = vmatpush1.bf16.msra.mxu1 %v14729_v44  ;;  %v14813_v41 = vld [vmem:[%s17519_s10 + $0x2ec] ss:$16 sps:$4 sm:$0xff]   ;;  %v14811_v44 = vld [vmem:[%s17519_s10 + $0x2e8] ss:$16 sps:$4 sm:$0xff]  }
  0xb8   : > { %10178 = vmatprep.subr.bf16.mxu0 %v14730_v45  ;;  %11203 = vmatprep.subr.bf16.mxu1 %v14732_v46  ;;  %v14816_v45 = vld [vmem:[%s17519_s10 + $0x304] ss:$16 sps:$4 sm:$0xff]   ;;  %v14819_v46 = vld [vmem:[%s17519_s10 + $0x30c] ss:$16 sps:$4 sm:$0xff]  }
  0xbb   : > { %10179 = vmatpush1.bf16.msra.mxu0 %v14734_v47  ;;  %11204 = vmatpush1.bf16.msra.mxu1 %v14735_v48  ;;  %v14814_v47 = vld [vmem:[%s17519_s10 + $0x300] ss:$16 sps:$4 sm:$0xff]   ;;  %v14817_v48 = vld [vmem:[%s17519_s10 + $0x308] ss:$16 sps:$4 sm:$0xff]  }
  0xbc   : > { %10180 = vmatprep.subr.bf16.mxu0 %v14736_v50  ;;  %11205 = vmatprep.subr.bf16.mxu1 %v14738_v51  ;;  %v14822_v50 = vld [vmem:[%s17519_s10 + $0x324] ss:$16 sps:$4 sm:$0xff]   ;;  %v14825_v51 = vld [vmem:[%s17519_s10 + $0x32c] ss:$16 sps:$4 sm:$0xff]  }
  0xbf   : > { %10181 = vmatpush1.bf16.msra.mxu0 %v14740_v53  ;;  %11206 = vmatpush1.bf16.msra.mxu1 %v14741_v55  ;;  %v14820_v53 = vld [vmem:[%s17519_s10 + $0x320] ss:$16 sps:$4 sm:$0xff]   ;;  %v14828_v55 = vld [vmem:[%s17519_s10 + $0x344] ss:$16 sps:$4 sm:$0xff]  }
  0xc0   : > { %10182 = vmatprep.subr.bf16.mxu0 %v14742_v56  ;;  %11207 = vmatprep.subr.bf16.mxu1 %v14744_v57  ;;  %v14831_v56 = vld [vmem:[%s17519_s10 + $0x34c] ss:$16 sps:$4 sm:$0xff]   ;;  %v14826_v57 = vld [vmem:[%s17519_s10 + $0x340] ss:$16 sps:$4 sm:$0xff]  }
  0xc3   : > { %10183 = vmatpush1.bf16.msra.mxu0 %v14746_v59  ;;  %11208 = vmatpush1.bf16.msra.mxu1 %v14747_v61  ;;  %v14834_v59 = vld [vmem:[%s17519_s10 + $0x364] ss:$16 sps:$4 sm:$0xff]   ;;  %v14832_v61 = vld [vmem:[%s17519_s10 + $0x360] ss:$16 sps:$4 sm:$0xff]  }
  0xc4   : > { %10184 = vmatprep.subr.bf16.mxu0 %v14748_v62  ;;  %11209 = vmatprep.subr.bf16.mxu1 %v14750_v63  ;;  %v14835_v62 = vld [vmem:[%s17519_s10 + $0x368] ss:$16 sps:$4 sm:$0xff]   ;;  %v14840_v63 = vld [vmem:[%s17519_s10 + $0x384] ss:$16 sps:$4 sm:$0xff]  }
  0xc7   : > { %10185 = vmatpush1.bf16.msra.mxu0 %v14752_v0  ;;  %11210 = vmatpush1.bf16.msra.mxu1 %v14753_v1  ;;  %v14843_v0 = vld [vmem:[%s17519_s10 + $0x38c] ss:$16 sps:$4 sm:$0xff]   ;;  %v14838_v1 = vld [vmem:[%s17519_s10 + $0x380] ss:$16 sps:$4 sm:$0xff]  }
  0xc8   : > { %10186 = vmatprep.subr.bf16.mxu0 %v14754_v2  ;;  %11211 = vmatprep.subr.bf16.mxu1 %v14756_v3  ;;  %v14841_v2 = vld [vmem:[%s17519_s10 + $0x388] ss:$16 sps:$4 sm:$0xff]   ;;  %v14846_v3 = vld [vmem:[%s17519_s10 + $0x3a4] ss:$16 sps:$4 sm:$0xff]  }
  0xcb   : > { %10187 = vmatpush1.bf16.msra.mxu0 %v14758_v4  ;;  %11212 = vmatpush1.bf16.msra.mxu1 %v14759_v5  ;;  %v14849_v4 = vld [vmem:[%s17519_s10 + $0x3ac] ss:$16 sps:$4 sm:$0xff]   ;;  %v14844_v5 = vld [vmem:[%s17519_s10 + $0x3a0] ss:$16 sps:$4 sm:$0xff]  }
  0xcc   : > { %10188 = vmatprep.subr.bf16.mxu0 %v14760_v6  ;;  %11213 = vmatprep.subr.bf16.mxu1 %v14762_v7  ;;  %v14847_v6 = vld [vmem:[%s17519_s10 + $0x3a8] ss:$16 sps:$4 sm:$0xff]   ;;  %v14852_v7 = vld [vmem:[%s17519_s10 + $0x3c4] ss:$16 sps:$4 sm:$0xff]  }
  0xcf   : > { %10189 = vmatpush1.bf16.msra.mxu0 %v14764_v8  ;;  %11214 = vmatpush1.bf16.msra.mxu1 %v14765_v9  ;;  %v14855_v8 = vld [vmem:[%s17519_s10 + $0x3cc] ss:$16 sps:$4 sm:$0xff]   ;;  %v1961_v9 = vcombine.high %v17592_v52, %v17592_v52  ;;  %v14859_v52 = vld [vmem:[%s17519_s10 + $0x3e8] ss:$16 sps:$4 sm:$0xff]  }
  0xd0   : > { %10199 = vmatprep.subr.bf16.mxu0 %v14768_v10  ;;  %11224 = vmatprep.subr.bf16.mxu1 %v14771_v11  ;;  %v14850_v10 = vld [vmem:[%s17519_s10 + $0x3c0] ss:$16 sps:$4 sm:$0xff]   ;;  %v14853_v11 = vld [vmem:[%s17519_s10 + $0x3c8] ss:$16 sps:$4 sm:$0xff]  }
  0xd2   : > { %10191 = vmatmul.mubr.bf16.vlgmr.msra.gmra.mrb[0].mxu0 %v17619_v13  ;;  %11216 = vmatmul.mubr.bf16.vlgmr.msra.gmra.mrb[0].mxu1 %v17619_v13 }
  0xd3   : > { %10200 = vmatpush1.bf16.msra.mxu0 %v14766_v12  ;;  %11225 = vmatpush1.bf16.msra.mxu1 %v14769_v14  ;;  %v14858_v12 = vld [vmem:[%s17519_s10 + $0x3e4] ss:$16 sps:$4 sm:$0xff]   ;;  %v14861_v14 = vld [vmem:[%s17519_s10 + $0x3ec] ss:$16 sps:$4 sm:$0xff]  }
  0xd4   : > { %10201 = vmatprep.subr.bf16.mxu0 %v14774_v15  ;;  %11226 = vmatprep.subr.bf16.mxu1 %v14777_v16  ;;  %v17685_v15 = vrot.slane %v1961_v9, %v17585_v49  ;;  %v14856_v16 = vld [vmem:[%s17519_s10 + $0x3e0] ss:$16 sps:$4 sm:$0xff]   ;;  %v14937_v9 = vld [vmem:[%s17519_s10 + $0x588] ss:$16 sps:$4 sm:$0xff]  }
  0xd5   : > { %10231 = vmatprep.mubr.bf16.mxu0 %v2008_v17  ;;  %11256 = vmatprep.mubr.bf16.mxu1 %v2008_v17  ;;  %v14864_v17 = vld [vmem:[%s17519_s10 + $0x404] ss:$16 sps:$4 sm:$0xff]  }
  0xd7   : > { %10202 = vmatpush1.bf16.msra.mxu0 %v14772_v18  ;;  %11227 = vmatpush1.bf16.msra.mxu1 %v14775_v19  ;;  %v14867_v18 = vld [vmem:[%s17519_s10 + $0x40c] ss:$16 sps:$4 sm:$0xff]   ;;  %v1977_v19 = vcombine.high %v17685_v15, %v17685_v15 }
  0xd8   : > { %10203 = vmatprep.subr.bf16.mxu0 %v14780_v20  ;;  %11228 = vmatprep.subr.bf16.mxu1 %v14783_v21  ;;  %v14862_v20 = vld [vmem:[%s17519_s10 + $0x400] ss:$16 sps:$4 sm:$0xff]   ;;  %v2006_v21 = vcombine.high %v17619_v13, %v17619_v13  ;;  %v14871_v13 = vld [vmem:[%s17519_s10 + $0x428] ss:$16 sps:$4 sm:$0xff]  }
  0xdb   : > { %10204 = vmatpush1.bf16.msra.mxu0 %v14778_v22  ;;  %11229 = vmatpush1.bf16.msra.mxu1 %v14781_v23  ;;  %v14865_v22 = vld [vmem:[%s17519_s10 + $0x408] ss:$16 sps:$4 sm:$0xff]   ;;  %v14870_v23 = vld [vmem:[%s17519_s10 + $0x424] ss:$16 sps:$4 sm:$0xff]  }
  0xdc   : > { %10205 = vmatprep.subr.bf16.mxu0 %v14786_v24  ;;  %11230 = vmatprep.subr.bf16.mxu1 %v14789_v25  ;;  %v14873_v24 = vld [vmem:[%s17519_s10 + $0x42c] ss:$16 sps:$4 sm:$0xff]   ;;  %v17700_v25 = vrot.slane %v1977_v19, %v17585_v49  ;;  %v14954_v19 = vld [vmem:[%s17519_s10 + $0x5e4] ss:$16 sps:$4 sm:$0xff]  }
  0xdf   : > { %10206 = vmatpush1.bf16.msra.mxu0 %v14784_v26  ;;  %11231 = vmatpush1.bf16.msra.mxu1 %v14787_v27  ;;  %v14868_v26 = vld [vmem:[%s17519_s10 + $0x420] ss:$16 sps:$4 sm:$0xff]   ;;  %v14876_v27 = vld [vmem:[%s17519_s10 + $0x444] ss:$16 sps:$4 sm:$0xff]  }
  0xe0   : > { %10207 = vmatprep.subr.bf16.mxu0 %v14792_v28  ;;  %11232 = vmatprep.subr.bf16.mxu1 %v14795_v29  ;;  %v14879_v28 = vld [vmem:[%s17519_s10 + $0x44c] ss:$16 sps:$4 sm:$0xff]   ;;  %v14874_v29 = vld [vmem:[%s17519_s10 + $0x440] ss:$16 sps:$4 sm:$0xff]  }
  0xe3   : > { %10208 = vmatpush1.bf16.msra.mxu0 %v14790_v30  ;;  %11233 = vmatpush1.bf16.msra.mxu1 %v14793_v31  ;;  %v14877_v30 = vld [vmem:[%s17519_s10 + $0x448] ss:$16 sps:$4 sm:$0xff]   ;;  %v14882_v31 = vld [vmem:[%s17519_s10 + $0x464] ss:$16 sps:$4 sm:$0xff]  }
  0xe4   : > { %10209 = vmatprep.subr.bf16.mxu0 %v14798_v32  ;;  %11234 = vmatprep.subr.bf16.mxu1 %v14801_v33  ;;  %v14885_v32 = vld [vmem:[%s17519_s10 + $0x46c] ss:$16 sps:$4 sm:$0xff]   ;;  %v14880_v33 = vld [vmem:[%s17519_s10 + $0x460] ss:$16 sps:$4 sm:$0xff]  }
  0xe7   : > { %10210 = vmatpush1.bf16.msra.mxu0 %v14796_v34  ;;  %11235 = vmatpush1.bf16.msra.mxu1 %v14799_v35  ;;  %v14883_v34 = vld [vmem:[%s17519_s10 + $0x468] ss:$16 sps:$4 sm:$0xff]   ;;  %v14888_v35 = vld [vmem:[%s17519_s10 + $0x484] ss:$16 sps:$4 sm:$0xff]  }
  0xe8   : > { %10211 = vmatprep.subr.bf16.mxu0 %v14804_v36  ;;  %11236 = vmatprep.subr.bf16.mxu1 %v14807_v37  ;;  %v14891_v36 = vld [vmem:[%s17519_s10 + $0x48c] ss:$16 sps:$4 sm:$0xff]   ;;  %v14886_v37 = vld [vmem:[%s17519_s10 + $0x480] ss:$16 sps:$4 sm:$0xff]  }
  0xeb   : > { %10212 = vmatpush1.bf16.msra.mxu0 %v14802_v38  ;;  %11237 = vmatpush1.bf16.msra.mxu1 %v14805_v39  ;;  %v14889_v38 = vld [vmem:[%s17519_s10 + $0x488] ss:$16 sps:$4 sm:$0xff]   ;;  %v14894_v39 = vld [vmem:[%s17519_s10 + $0x4a4] ss:$16 sps:$4 sm:$0xff]  }
  0xec   : > { %10213 = vmatprep.subr.bf16.mxu0 %v14810_v40  ;;  %11238 = vmatprep.subr.bf16.mxu1 %v14813_v41  ;;  %v14897_v40 = vld [vmem:[%s17519_s10 + $0x4ac] ss:$16 sps:$4 sm:$0xff]   ;;  %v14892_v41 = vld [vmem:[%s17519_s10 + $0x4a0] ss:$16 sps:$4 sm:$0xff]  }
  0xef   : > { %10214 = vmatpush1.bf16.msra.mxu0 %v14808_v43  ;;  %11239 = vmatpush1.bf16.msra.mxu1 %v14811_v44  ;;  %v14895_v43 = vld [vmem:[%s17519_s10 + $0x4a8] ss:$16 sps:$4 sm:$0xff]   ;;  %v14900_v44 = vld [vmem:[%s17519_s10 + $0x4c4] ss:$16 sps:$4 sm:$0xff]  }
  0xf0   : > { %10215 = vmatprep.subr.bf16.mxu0 %v14816_v45  ;;  %11240 = vmatprep.subr.bf16.mxu1 %v14819_v46  ;;  %v14903_v45 = vld [vmem:[%s17519_s10 + $0x4cc] ss:$16 sps:$4 sm:$0xff]   ;;  %v14898_v46 = vld [vmem:[%s17519_s10 + $0x4c0] ss:$16 sps:$4 sm:$0xff]  }
  0xf3   : > { %10216 = vmatpush1.bf16.msra.mxu0 %v14814_v47  ;;  %11241 = vmatpush1.bf16.msra.mxu1 %v14817_v48  ;;  %v14901_v47 = vld [vmem:[%s17519_s10 + $0x4c8] ss:$16 sps:$4 sm:$0xff]   ;;  %v14906_v48 = vld [vmem:[%s17519_s10 + $0x4e4] ss:$16 sps:$4 sm:$0xff]  }
  0xf4   : > { %10217 = vmatprep.subr.bf16.mxu0 %v14822_v50  ;;  %11242 = vmatprep.subr.bf16.mxu1 %v14825_v51  ;;  %v14909_v50 = vld [vmem:[%s17519_s10 + $0x4ec] ss:$16 sps:$4 sm:$0xff]   ;;  %v14904_v51 = vld [vmem:[%s17519_s10 + $0x4e0] ss:$16 sps:$4 sm:$0xff]  }
  0xf7   : > { %10218 = vmatpush1.bf16.msra.mxu0 %v14820_v53  ;;  %11243 = vmatpush1.bf16.msra.mxu1 %v14823_v54  ;;  %v14907_v53 = vld [vmem:[%s17519_s10 + $0x4e8] ss:$16 sps:$4 sm:$0xff]   ;;  %v14912_v54 = vld [vmem:[%s17519_s10 + $0x504] ss:$16 sps:$4 sm:$0xff]  }
  0xf8   : > { %10219 = vmatprep.subr.bf16.mxu0 %v14828_v55  ;;  %11244 = vmatprep.subr.bf16.mxu1 %v14831_v56  ;;  %v14915_v55 = vld [vmem:[%s17519_s10 + $0x50c] ss:$16 sps:$4 sm:$0xff]   ;;  %v14910_v56 = vld [vmem:[%s17519_s10 + $0x500] ss:$16 sps:$4 sm:$0xff]  }
  0xfb   : > { %10220 = vmatpush1.bf16.msra.mxu0 %v14826_v57  ;;  %11245 = vmatpush1.bf16.msra.mxu1 %v14829_v58  ;;  %v14913_v57 = vld [vmem:[%s17519_s10 + $0x508] ss:$16 sps:$4 sm:$0xff]   ;;  %v14918_v58 = vld [vmem:[%s17519_s10 + $0x524] ss:$16 sps:$4 sm:$0xff]  }
  0xfc   : > { %10221 = vmatprep.subr.bf16.mxu0 %v14834_v59  ;;  %11246 = vmatprep.subr.bf16.mxu1 %v14837_v60  ;;  %v14921_v59 = vld [vmem:[%s17519_s10 + $0x52c] ss:$16 sps:$4 sm:$0xff]   ;;  %v14916_v60 = vld [vmem:[%s17519_s10 + $0x520] ss:$16 sps:$4 sm:$0xff]  }
  0xff   : > { %10222 = vmatpush1.bf16.msra.mxu0 %v14832_v61  ;;  %11247 = vmatpush1.bf16.msra.mxu1 %v14835_v62  ;;  %v14919_v61 = vld [vmem:[%s17519_s10 + $0x528] ss:$16 sps:$4 sm:$0xff]   ;;  %v14924_v62 = vld [vmem:[%s17519_s10 + $0x544] ss:$16 sps:$4 sm:$0xff]  }
 0x100   : > { %10223 = vmatprep.subr.bf16.mxu0 %v14840_v63  ;;  %11248 = vmatprep.subr.bf16.mxu1 %v14843_v0  ;;  %v14927_v63 = vld [vmem:[%s17519_s10 + $0x54c] ss:$16 sps:$4 sm:$0xff]   ;;  %v14922_v0 = vld [vmem:[%s17519_s10 + $0x540] ss:$16 sps:$4 sm:$0xff]  }
 0x103   : > { %10224 = vmatpush1.bf16.msra.mxu0 %v14838_v1  ;;  %11249 = vmatpush1.bf16.msra.mxu1 %v14841_v2  ;;  %v14925_v1 = vld [vmem:[%s17519_s10 + $0x548] ss:$16 sps:$4 sm:$0xff]   ;;  %v14930_v2 = vld [vmem:[%s17519_s10 + $0x564] ss:$16 sps:$4 sm:$0xff]  }
 0x104   : > { %10225 = vmatprep.subr.bf16.mxu0 %v14846_v3  ;;  %11250 = vmatprep.subr.bf16.mxu1 %v14849_v4  ;;  %v14933_v3 = vld [vmem:[%s17519_s10 + $0x56c] ss:$16 sps:$4 sm:$0xff]   ;;  %v14928_v4 = vld [vmem:[%s17519_s10 + $0x560] ss:$16 sps:$4 sm:$0xff]  }
 0x107   : > { %10226 = vmatpush1.bf16.msra.mxu0 %v14844_v5  ;;  %11251 = vmatpush1.bf16.msra.mxu1 %v14847_v6  ;;  %v14931_v5 = vld [vmem:[%s17519_s10 + $0x568] ss:$16 sps:$4 sm:$0xff]   ;;  %v14936_v6 = vld [vmem:[%s17519_s10 + $0x584] ss:$16 sps:$4 sm:$0xff]  }
 0x108   : > { %10227 = vmatprep.subr.bf16.mxu0 %v14852_v7  ;;  %11252 = vmatprep.subr.bf16.mxu1 %v14855_v8  ;;  %v14939_v7 = vld [vmem:[%s17519_s10 + $0x58c] ss:$16 sps:$4 sm:$0xff]   ;;  %v14934_v8 = vld [vmem:[%s17519_s10 + $0x580] ss:$16 sps:$4 sm:$0xff]  }
 0x10b   : > { %10228 = vmatpush1.bf16.msra.mxu0 %v14850_v10  ;;  %11253 = vmatpush1.bf16.msra.mxu1 %v14853_v11  ;;  %v14942_v10 = vld [vmem:[%s17519_s10 + $0x5a4] ss:$16 sps:$4 sm:$0xff]   ;;  %v14945_v11 = vld [vmem:[%s17519_s10 + $0x5ac] ss:$16 sps:$4 sm:$0xff]  }
 0x10c   : > { %10229 = vmatprep.subr.bf16.mxu0 %v14858_v12  ;;  %11254 = vmatprep.subr.bf16.mxu1 %v14861_v14  ;;  %v14940_v12 = vld [vmem:[%s17519_s10 + $0x5a0] ss:$16 sps:$4 sm:$0xff]   ;;  %v14943_v14 = vld [vmem:[%s17519_s10 + $0x5a8] ss:$16 sps:$4 sm:$0xff]  }
 0x10f   : > { %10230 = vmatpush1.bf16.msra.mxu0 %v14856_v16  ;;  %11255 = vmatpush1.bf16.msra.mxu1 %v14859_v52  ;;  %v14948_v16 = vld [vmem:[%s17519_s10 + $0x5c4] ss:$16 sps:$4 sm:$0xff]   ;;  %v14951_v52 = vld [vmem:[%s17519_s10 + $0x5cc] ss:$16 sps:$4 sm:$0xff]  }
 0x110   : > { %10240 = vmatprep.subr.bf16.mxu0 %v14864_v17  ;;  %11265 = vmatprep.subr.bf16.mxu1 %v14867_v18  ;;  %v14946_v17 = vld [vmem:[%s17519_s10 + $0x5c0] ss:$16 sps:$4 sm:$0xff]   ;;  %v14949_v18 = vld [vmem:[%s17519_s10 + $0x5c8] ss:$16 sps:$4 sm:$0xff]  }
 0x112   : > { %10232 = vmatmul.mubr.bf16.vlgmr.msra.gmra.mrb[0].mxu0 %v2006_v21  ;;  %11257 = vmatmul.mubr.bf16.vlgmr.msra.gmra.mrb[0].mxu1 %v2006_v21  ;;  %v14952_v21 = vld [vmem:[%s17519_s10 + $0x5e0] ss:$16 sps:$4 sm:$0xff]  }
 0x113   : > { %10241 = vmatpush1.bf16.msra.mxu0 %v14862_v20  ;;  %11266 = vmatpush1.bf16.msra.mxu1 %v14865_v22  ;;  %v14957_v20 = vld [vmem:[%s17519_s10 + $0x5ec] ss:$16 sps:$4 sm:$0xff]   ;;  %v14955_v22 = vld [vmem:[%s17519_s10 + $0x5e8] ss:$16 sps:$4 sm:$0xff]  }
 0x114   : > { %10242 = vmatprep.subr.bf16.mxu0 %v14870_v23  ;;  %11267 = vmatprep.subr.bf16.mxu1 %v14873_v24  ;;  %v14961_v23 = vld [vmem:[%s17519_s10 + $0x604] ss:$16 sps:$4 sm:$0xff]   ;;  %v14964_v24 = vld [vmem:[%s17519_s10 + $0x60c] ss:$16 sps:$4 sm:$0xff]  }
 0x115   : > { %10272 = vmatprep.mubr.bf16.mxu0 %v17700_v25  ;;  %11297 = vmatprep.mubr.bf16.mxu1 %v17700_v25 }
 0x117   : > { %10243 = vmatpush1.bf16.msra.mxu0 %v14868_v26  ;;  %11268 = vmatpush1.bf16.msra.mxu1 %v14871_v13  ;;  %v14959_v26 = vld [vmem:[%s17519_s10 + $0x600] ss:$16 sps:$4 sm:$0xff]   ;;  %v17767_v13 = vrot.slane %v17685_v15, %v17585_v49 }
 0x118   : > { %10244 = vmatprep.subr.bf16.mxu0 %v14876_v27  ;;  %11269 = vmatprep.subr.bf16.mxu1 %v14879_v28  ;;  %v14962_v27 = vld [vmem:[%s17519_s10 + $0x608] ss:$16 sps:$4 sm:$0xff]   ;;  %v14967_v28 = vld [vmem:[%s17519_s10 + $0x624] ss:$16 sps:$4 sm:$0xff]   ;;  %v14965_v15 = vld [vmem:[%s17519_s10 + $0x620] ss:$16 sps:$4 sm:$0xff]  }
 0x11b   : > { %10245 = vmatpush1.bf16.msra.mxu0 %v14874_v29  ;;  %11270 = vmatpush1.bf16.msra.mxu1 %v14877_v30  ;;  %v14970_v29 = vld [vmem:[%s17519_s10 + $0x62c] ss:$16 sps:$4 sm:$0xff]   ;;  %v2009_v30 = vcombine.high %v17700_v25, %v17700_v25  ;;  %v14971_v25 = vld [vmem:[%s17519_s10 + $0x640] ss:$16 sps:$4 sm:$0xff]  }
 0x11c   : > { %10246 = vmatprep.subr.bf16.mxu0 %v14882_v31  ;;  %11271 = vmatprep.subr.bf16.mxu1 %v14885_v32  ;;  %v14968_v31 = vld [vmem:[%s17519_s10 + $0x628] ss:$16 sps:$4 sm:$0xff]   ;;  %v14973_v32 = vld [vmem:[%s17519_s10 + $0x644] ss:$16 sps:$4 sm:$0xff]  }
 0x11f   : > { %10247 = vmatpush1.bf16.msra.mxu0 %v14880_v33  ;;  %11272 = vmatpush1.bf16.msra.mxu1 %v14883_v34  ;;  %v14976_v33 = vld [vmem:[%s17519_s10 + $0x64c] ss:$16 sps:$4 sm:$0xff]   ;;  %v14974_v34 = vld [vmem:[%s17519_s10 + $0x648] ss:$16 sps:$4 sm:$0xff]  }
 0x120   : > { %10248 = vmatprep.subr.bf16.mxu0 %v14888_v35  ;;  %11273 = vmatprep.subr.bf16.mxu1 %v14891_v36  ;;  %v14979_v35 = vld [vmem:[%s17519_s10 + $0x664] ss:$16 sps:$4 sm:$0xff]   ;;  %v14982_v36 = vld [vmem:[%s17519_s10 + $0x66c] ss:$16 sps:$4 sm:$0xff]  }
 0x123   : > { %10249 = vmatpush1.bf16.msra.mxu0 %v14886_v37  ;;  %11274 = vmatpush1.bf16.msra.mxu1 %v14889_v38  ;;  %v14977_v37 = vld [vmem:[%s17519_s10 + $0x660] ss:$16 sps:$4 sm:$0xff]   ;;  %v14980_v38 = vld [vmem:[%s17519_s10 + $0x668] ss:$16 sps:$4 sm:$0xff]  }
 0x124   : > { %10250 = vmatprep.subr.bf16.mxu0 %v14894_v39  ;;  %11275 = vmatprep.subr.bf16.mxu1 %v14897_v40  ;;  %v14985_v39 = vld [vmem:[%s17519_s10 + $0x684] ss:$16 sps:$4 sm:$0xff]   ;;  %v14988_v40 = vld [vmem:[%s17519_s10 + $0x68c] ss:$16 sps:$4 sm:$0xff]  }
 0x127   : > { %10251 = vmatpush1.bf16.msra.mxu0 %v14892_v41  ;;  %11276 = vmatpush1.bf16.msra.mxu1 %v14895_v43  ;;  %v14983_v41 = vld [vmem:[%s17519_s10 + $0x680] ss:$16 sps:$4 sm:$0xff]   ;;  %v14986_v43 = vld [vmem:[%s17519_s10 + $0x688] ss:$16 sps:$4 sm:$0xff]  }
 0x128   : > { %10252 = vmatprep.subr.bf16.mxu0 %v14900_v44  ;;  %11277 = vmatprep.subr.bf16.mxu1 %v14903_v45  ;;  %v14991_v44 = vld [vmem:[%s17519_s10 + $0x6a4] ss:$16 sps:$4 sm:$0xff]   ;;  %v14994_v45 = vld [vmem:[%s17519_s10 + $0x6ac] ss:$16 sps:$4 sm:$0xff]  }
 0x12b   : > { %10253 = vmatpush1.bf16.msra.mxu0 %v14898_v46  ;;  %11278 = vmatpush1.bf16.msra.mxu1 %v14901_v47  ;;  %v14989_v46 = vld [vmem:[%s17519_s10 + $0x6a0] ss:$16 sps:$4 sm:$0xff]   ;;  %v14992_v47 = vld [vmem:[%s17519_s10 + $0x6a8] ss:$16 sps:$4 sm:$0xff]  }
 0x12c   : > { %10254 = vmatprep.subr.bf16.mxu0 %v14906_v48  ;;  %11279 = vmatprep.subr.bf16.mxu1 %v14909_v50  ;;  %v14997_v48 = vld [vmem:[%s17519_s10 + $0x6c4] ss:$16 sps:$4 sm:$0xff]   ;;  %v15000_v50 = vld [vmem:[%s17519_s10 + $0x6cc] ss:$16 sps:$4 sm:$0xff]  }
 0x12f   : > { %10255 = vmatpush1.bf16.msra.mxu0 %v14904_v51  ;;  %11280 = vmatpush1.bf16.msra.mxu1 %v14907_v53  ;;  %v14995_v51 = vld [vmem:[%s17519_s10 + $0x6c0] ss:$16 sps:$4 sm:$0xff]   ;;  %v14998_v53 = vld [vmem:[%s17519_s10 + $0x6c8] ss:$16 sps:$4 sm:$0xff]  }
 0x130   : > { %10256 = vmatprep.subr.bf16.mxu0 %v14912_v54  ;;  %11281 = vmatprep.subr.bf16.mxu1 %v14915_v55  ;;  %v15003_v54 = vld [vmem:[%s17519_s10 + $0x6e4] ss:$16 sps:$4 sm:$0xff]   ;;  %v15006_v55 = vld [vmem:[%s17519_s10 + $0x6ec] ss:$16 sps:$4 sm:$0xff]  }
 0x133   : > { %10257 = vmatpush1.bf16.msra.mxu0 %v14910_v56  ;;  %11282 = vmatpush1.bf16.msra.mxu1 %v14913_v57  ;;  %v15001_v56 = vld [vmem:[%s17519_s10 + $0x6e0] ss:$16 sps:$4 sm:$0xff]   ;;  %v15004_v57 = vld [vmem:[%s17519_s10 + $0x6e8] ss:$16 sps:$4 sm:$0xff]  }
 0x134   : > { %10258 = vmatprep.subr.bf16.mxu0 %v14918_v58  ;;  %11283 = vmatprep.subr.bf16.mxu1 %v14921_v59  ;;  %v15009_v58 = vld [vmem:[%s17519_s10 + $0x704] ss:$16 sps:$4 sm:$0xff]   ;;  %v15012_v59 = vld [vmem:[%s17519_s10 + $0x70c] ss:$16 sps:$4 sm:$0xff]  }
 0x137   : > { %10259 = vmatpush1.bf16.msra.mxu0 %v14916_v60  ;;  %11284 = vmatpush1.bf16.msra.mxu1 %v14919_v61  ;;  %v15007_v60 = vld [vmem:[%s17519_s10 + $0x700] ss:$16 sps:$4 sm:$0xff]   ;;  %v15010_v61 = vld [vmem:[%s17519_s10 + $0x708] ss:$16 sps:$4 sm:$0xff]  }
 0x138   : > { %10260 = vmatprep.subr.bf16.mxu0 %v14924_v62  ;;  %11285 = vmatprep.subr.bf16.mxu1 %v14927_v63  ;;  %v15015_v62 = vld [vmem:[%s17519_s10 + $0x724] ss:$16 sps:$4 sm:$0xff]   ;;  %v15018_v63 = vld [vmem:[%s17519_s10 + $0x72c] ss:$16 sps:$4 sm:$0xff]  }
 0x13b   : > { %10261 = vmatpush1.bf16.msra.mxu0 %v14922_v0  ;;  %11286 = vmatpush1.bf16.msra.mxu1 %v14925_v1  ;;  %v15013_v0 = vld [vmem:[%s17519_s10 + $0x720] ss:$16 sps:$4 sm:$0xff]   ;;  %v15016_v1 = vld [vmem:[%s17519_s10 + $0x728] ss:$16 sps:$4 sm:$0xff]  }
 0x13c   : > { %10262 = vmatprep.subr.bf16.mxu0 %v14930_v2  ;;  %11287 = vmatprep.subr.bf16.mxu1 %v14933_v3  ;;  %v15021_v2 = vld [vmem:[%s17519_s10 + $0x744] ss:$16 sps:$4 sm:$0xff]   ;;  %v15024_v3 = vld [vmem:[%s17519_s10 + $0x74c] ss:$16 sps:$4 sm:$0xff]  }
 0x13f   : > { %10263 = vmatpush1.bf16.msra.mxu0 %v14928_v4  ;;  %11288 = vmatpush1.bf16.msra.mxu1 %v14931_v5  ;;  %v15019_v4 = vld [vmem:[%s17519_s10 + $0x740] ss:$16 sps:$4 sm:$0xff]   ;;  %v15022_v5 = vld [vmem:[%s17519_s10 + $0x748] ss:$16 sps:$4 sm:$0xff]  }
 0x140   : > { %10264 = vmatprep.subr.bf16.mxu0 %v14936_v6  ;;  %11289 = vmatprep.subr.bf16.mxu1 %v14939_v7  ;;  %v15027_v6 = vld [vmem:[%s17519_s10 + $0x764] ss:$16 sps:$4 sm:$0xff]   ;;  %v15030_v7 = vld [vmem:[%s17519_s10 + $0x76c] ss:$16 sps:$4 sm:$0xff]  }
 0x143   : > { %10265 = vmatpush1.bf16.msra.mxu0 %v14934_v8  ;;  %11290 = vmatpush1.bf16.msra.mxu1 %v14937_v9  ;;  %v15025_v8 = vld [vmem:[%s17519_s10 + $0x760] ss:$16 sps:$4 sm:$0xff]   ;;  %v15028_v9 = vld [vmem:[%s17519_s10 + $0x768] ss:$16 sps:$4 sm:$0xff]  }
 0x144   : > { %10266 = vmatprep.subr.bf16.mxu0 %v14942_v10  ;;  %11291 = vmatprep.subr.bf16.mxu1 %v14945_v11  ;;  %v15033_v10 = vld [vmem:[%s17519_s10 + $0x784] ss:$16 sps:$4 sm:$0xff]   ;;  %v15036_v11 = vld [vmem:[%s17519_s10 + $0x78c] ss:$16 sps:$4 sm:$0xff]  }
 0x147   : > { %10267 = vmatpush1.bf16.msra.mxu0 %v14940_v12  ;;  %11292 = vmatpush1.bf16.msra.mxu1 %v14943_v14  ;;  %v15031_v12 = vld [vmem:[%s17519_s10 + $0x780] ss:$16 sps:$4 sm:$0xff]   ;;  %v15034_v14 = vld [vmem:[%s17519_s10 + $0x788] ss:$16 sps:$4 sm:$0xff]  }
 0x148   : > { %10268 = vmatprep.subr.bf16.mxu0 %v14948_v16  ;;  %11293 = vmatprep.subr.bf16.mxu1 %v14951_v52  ;;  %v15039_v16 = vld [vmem:[%s17519_s10 + $0x7a4] ss:$16 sps:$4 sm:$0xff]   ;;  %v15042_v52 = vld [vmem:[%s17519_s10 + $0x7ac] ss:$16 sps:$4 sm:$0xff]  }
 0x14b   : > { %10269 = vmatpush1.bf16.msra.mxu0 %v14946_v17  ;;  %11294 = vmatpush1.bf16.msra.mxu1 %v14949_v18  ;;  %v15037_v17 = vld [vmem:[%s17519_s10 + $0x7a0] ss:$16 sps:$4 sm:$0xff]   ;;  %v15040_v18 = vld [vmem:[%s17519_s10 + $0x7a8] ss:$16 sps:$4 sm:$0xff]  }
 0x14c   : > { %10270 = vmatprep.subr.bf16.mxu0 %v14954_v19  ;;  %11295 = vmatprep.subr.bf16.mxu1 %v14957_v20  ;;  %v15045_v19 = vld [vmem:[%s17519_s10 + $0x7c4] ss:$16 sps:$4 sm:$0xff]   ;;  %v15048_v20 = vld [vmem:[%s17519_s10 + $0x7cc] ss:$16 sps:$4 sm:$0xff]  }
 0x14f   : > { %10271 = vmatpush1.bf16.msra.mxu0 %v14952_v21  ;;  %11296 = vmatpush1.bf16.msra.mxu1 %v14955_v22  ;;  %v17831_v21 = vld.sshfl [vmem:[%s19463_s0 + $0x8] sm:$0xff pattern:$0x75316420]  ;;  %v15043_v22 = vld [vmem:[%s17519_s10 + $0x7c0] ss:$16 sps:$4 sm:$0xff]  }
 0x150   : > { %10281 = vmatprep.subr.bf16.mxu0 %v14961_v23  ;;  %11306 = vmatprep.subr.bf16.mxu1 %v14964_v24  ;;  %v15046_v23 = vld [vmem:[%s17519_s10 + $0x7c8] ss:$16 sps:$4 sm:$0xff]   ;;  %v15051_v24 = vld [vmem:[%s17519_s10 + $0x7e4] ss:$16 sps:$4 sm:$0xff]  }
 0x152   : > { %10273 = vmatmul.mubr.bf16.vlgmr.msra.gmra.mrb[0].mxu0 %v17767_v13  ;;  %11298 = vmatmul.mubr.bf16.vlgmr.msra.gmra.mrb[0].mxu1 %v17767_v13 }
 0x153   : > { %10282 = vmatpush1.bf16.msra.mxu0 %v14959_v26  ;;  %11307 = vmatpush1.bf16.msra.mxu1 %v14962_v27  ;;  %v15054_v26 = vld [vmem:[%s17519_s10 + $0x7ec] ss:$16 sps:$4 sm:$0xff]   ;;  %v15049_v27 = vld [vmem:[%s17519_s10 + $0x7e0] ss:$16 sps:$4 sm:$0xff]  }
 0x154   : > { %10283 = vmatprep.subr.bf16.mxu0 %v14967_v28  ;;  %11308 = vmatprep.subr.bf16.mxu1 %v14970_v29  ;;  %v15052_v28 = vld [vmem:[%s17519_s10 + $0x7e8] ss:$16 sps:$4 sm:$0xff]   ;;  %v15057_v29 = vld [vmem:[%s17519_s10 + $0x804] ss:$16 sps:$4 sm:$0xff]  }
 0x155   : > { %10313 = vmatprep.mubr.bf16.mxu0 %v2009_v30  ;;  %11338 = vmatprep.mubr.bf16.mxu1 %v2009_v30  ;;  %v15060_v30 = vld [vmem:[%s17519_s10 + $0x80c] ss:$16 sps:$4 sm:$0xff]  }
 0x157   : > { %10284 = vmatpush1.bf16.msra.mxu0 %v14965_v15  ;;  %11309 = vmatpush1.bf16.msra.mxu1 %v14968_v31  ;;  %v2025_v15 = vcombine.high %v17831_v21, %v17831_v21  ;;  %v2007_v31 = vcombine.high %v17767_v13, %v17767_v13  ;;  %v15061_v13 = vld [vmem:[%s17519_s10 + $0x820] ss:$16 sps:$4 sm:$0xff]  }
 0x158   : > { %10285 = vmatprep.subr.bf16.mxu0 %v14973_v32  ;;  %11310 = vmatprep.subr.bf16.mxu1 %v14976_v33  ;;  %v15055_v32 = vld [vmem:[%s17519_s10 + $0x800] ss:$16 sps:$4 sm:$0xff]   ;;  %v15058_v33 = vld [vmem:[%s17519_s10 + $0x808] ss:$16 sps:$4 sm:$0xff]  }
 0x15b   : > { %10286 = vmatpush1.bf16.msra.mxu0 %v14971_v25  ;;  %11311 = vmatpush1.bf16.msra.mxu1 %v14974_v34  ;;  %v15063_v25 = vld [vmem:[%s17519_s10 + $0x824] ss:$16 sps:$4 sm:$0xff]   ;;  %v15066_v34 = vld [vmem:[%s17519_s10 + $0x82c] ss:$16 sps:$4 sm:$0xff]  }
 0x15c   : > { %10287 = vmatprep.subr.bf16.mxu0 %v14979_v35  ;;  %11312 = vmatprep.subr.bf16.mxu1 %v14982_v36  ;;  %v17850_v35 = vrot.slane %v2025_v15, %v17585_v49  ;;  %v15064_v36 = vld [vmem:[%s17519_s10 + $0x828] ss:$16 sps:$4 sm:$0xff]   ;;  %v15147_v15 = vld [vmem:[%s17519_s10 + $0x9e4] ss:$16 sps:$4 sm:$0xff]  }
 0x15f   : > { %10288 = vmatpush1.bf16.msra.mxu0 %v14977_v37  ;;  %11313 = vmatpush1.bf16.msra.mxu1 %v14980_v38  ;;  %v15069_v37 = vld [vmem:[%s17519_s10 + $0x844] ss:$16 sps:$4 sm:$0xff]   ;;  %v15072_v38 = vld [vmem:[%s17519_s10 + $0x84c] ss:$16 sps:$4 sm:$0xff]  }
 0x160   : > { %10289 = vmatprep.subr.bf16.mxu0 %v14985_v39  ;;  %11314 = vmatprep.subr.bf16.mxu1 %v14988_v40  ;;  %v15067_v39 = vld [vmem:[%s17519_s10 + $0x840] ss:$16 sps:$4 sm:$0xff]   ;;  %v15070_v40 = vld [vmem:[%s17519_s10 + $0x848] ss:$16 sps:$4 sm:$0xff]  }
 0x163   : > { %10290 = vmatpush1.bf16.msra.mxu0 %v14983_v41  ;;  %11315 = vmatpush1.bf16.msra.mxu1 %v14986_v43  ;;  %v15075_v41 = vld [vmem:[%s17519_s10 + $0x864] ss:$16 sps:$4 sm:$0xff]   ;;  %v15078_v43 = vld [vmem:[%s17519_s10 + $0x86c] ss:$16 sps:$4 sm:$0xff]  }
 0x164   : > { %10291 = vmatprep.subr.bf16.mxu0 %v14991_v44  ;;  %11316 = vmatprep.subr.bf16.mxu1 %v14994_v45  ;;  %v15073_v44 = vld [vmem:[%s17519_s10 + $0x860] ss:$16 sps:$4 sm:$0xff]   ;;  %v15076_v45 = vld [vmem:[%s17519_s10 + $0x868] ss:$16 sps:$4 sm:$0xff]  }
 0x167   : > { %10292 = vmatpush1.bf16.msra.mxu0 %v14989_v46  ;;  %11317 = vmatpush1.bf16.msra.mxu1 %v14992_v47  ;;  %v15081_v46 = vld [vmem:[%s17519_s10 + $0x884] ss:$16 sps:$4 sm:$0xff]   ;;  %v15084_v47 = vld [vmem:[%s17519_s10 + $0x88c] ss:$16 sps:$4 sm:$0xff]  }
 0x168   : > { %10293 = vmatprep.subr.bf16.mxu0 %v14997_v48  ;;  %11318 = vmatprep.subr.bf16.mxu1 %v15000_v50  ;;  %v15079_v48 = vld [vmem:[%s17519_s10 + $0x880] ss:$16 sps:$4 sm:$0xff]   ;;  %v15082_v50 = vld [vmem:[%s17519_s10 + $0x888] ss:$16 sps:$4 sm:$0xff]  }
 0x16b   : > { %10294 = vmatpush1.bf16.msra.mxu0 %v14995_v51  ;;  %11319 = vmatpush1.bf16.msra.mxu1 %v14998_v53  ;;  %v15087_v51 = vld [vmem:[%s17519_s10 + $0x8a4] ss:$16 sps:$4 sm:$0xff]   ;;  %v15090_v53 = vld [vmem:[%s17519_s10 + $0x8ac] ss:$16 sps:$4 sm:$0xff]  }
 0x16c   : > { %10295 = vmatprep.subr.bf16.mxu0 %v15003_v54  ;;  %11320 = vmatprep.subr.bf16.mxu1 %v15006_v55  ;;  %v15085_v54 = vld [vmem:[%s17519_s10 + $0x8a0] ss:$16 sps:$4 sm:$0xff]   ;;  %v15088_v55 = vld [vmem:[%s17519_s10 + $0x8a8] ss:$16 sps:$4 sm:$0xff]  }
 0x16f   : > { %10296 = vmatpush1.bf16.msra.mxu0 %v15001_v56  ;;  %11321 = vmatpush1.bf16.msra.mxu1 %v15004_v57  ;;  %v15093_v56 = vld [vmem:[%s17519_s10 + $0x8c4] ss:$16 sps:$4 sm:$0xff]   ;;  %v15096_v57 = vld [vmem:[%s17519_s10 + $0x8cc] ss:$16 sps:$4 sm:$0xff]  }
 0x170   : > { %10297 = vmatprep.subr.bf16.mxu0 %v15009_v58  ;;  %11322 = vmatprep.subr.bf16.mxu1 %v15012_v59  ;;  %v15091_v58 = vld [vmem:[%s17519_s10 + $0x8c0] ss:$16 sps:$4 sm:$0xff]   ;;  %v15094_v59 = vld [vmem:[%s17519_s10 + $0x8c8] ss:$16 sps:$4 sm:$0xff]  }
 0x173   : > { %10298 = vmatpush1.bf16.msra.mxu0 %v15007_v60  ;;  %11323 = vmatpush1.bf16.msra.mxu1 %v15010_v61  ;;  %v15099_v60 = vld [vmem:[%s17519_s10 + $0x8e4] ss:$16 sps:$4 sm:$0xff]   ;;  %v15102_v61 = vld [vmem:[%s17519_s10 + $0x8ec] ss:$16 sps:$4 sm:$0xff]  }
 0x174   : > { %10299 = vmatprep.subr.bf16.mxu0 %v15015_v62  ;;  %11324 = vmatprep.subr.bf16.mxu1 %v15018_v63  ;;  %v15097_v62 = vld [vmem:[%s17519_s10 + $0x8e0] ss:$16 sps:$4 sm:$0xff]   ;;  %v15100_v63 = vld [vmem:[%s17519_s10 + $0x8e8] ss:$16 sps:$4 sm:$0xff]  }
 0x177   : > { %10300 = vmatpush1.bf16.msra.mxu0 %v15013_v0  ;;  %11325 = vmatpush1.bf16.msra.mxu1 %v15016_v1  ;;  %v15105_v0 = vld [vmem:[%s17519_s10 + $0x904] ss:$16 sps:$4 sm:$0xff]   ;;  %v15108_v1 = vld [vmem:[%s17519_s10 + $0x90c] ss:$16 sps:$4 sm:$0xff]  }
 0x178   : > { %10301 = vmatprep.subr.bf16.mxu0 %v15021_v2  ;;  %11326 = vmatprep.subr.bf16.mxu1 %v15024_v3  ;;  %v15103_v2 = vld [vmem:[%s17519_s10 + $0x900] ss:$16 sps:$4 sm:$0xff]   ;;  %v15106_v3 = vld [vmem:[%s17519_s10 + $0x908] ss:$16 sps:$4 sm:$0xff]  }
 0x17b   : > { %10302 = vmatpush1.bf16.msra.mxu0 %v15019_v4  ;;  %11327 = vmatpush1.bf16.msra.mxu1 %v15022_v5  ;;  %v15111_v4 = vld [vmem:[%s17519_s10 + $0x924] ss:$16 sps:$4 sm:$0xff]   ;;  %v15114_v5 = vld [vmem:[%s17519_s10 + $0x92c] ss:$16 sps:$4 sm:$0xff]  }
 0x17c   : > { %10303 = vmatprep.subr.bf16.mxu0 %v15027_v6  ;;  %11328 = vmatprep.subr.bf16.mxu1 %v15030_v7  ;;  %v15109_v6 = vld [vmem:[%s17519_s10 + $0x920] ss:$16 sps:$4 sm:$0xff]   ;;  %v15112_v7 = vld [vmem:[%s17519_s10 + $0x928] ss:$16 sps:$4 sm:$0xff]  }
 0x17f   : > { %10304 = vmatpush1.bf16.msra.mxu0 %v15025_v8  ;;  %11329 = vmatpush1.bf16.msra.mxu1 %v15028_v9  ;;  %v15117_v8 = vld [vmem:[%s17519_s10 + $0x944] ss:$16 sps:$4 sm:$0xff]   ;;  %v15120_v9 = vld [vmem:[%s17519_s10 + $0x94c] ss:$16 sps:$4 sm:$0xff]  }
 0x180   : > { %10305 = vmatprep.subr.bf16.mxu0 %v15033_v10  ;;  %11330 = vmatprep.subr.bf16.mxu1 %v15036_v11  ;;  %v15115_v10 = vld [vmem:[%s17519_s10 + $0x940] ss:$16 sps:$4 sm:$0xff]   ;;  %v15118_v11 = vld [vmem:[%s17519_s10 + $0x948] ss:$16 sps:$4 sm:$0xff]  }
 0x183   : > { %10306 = vmatpush1.bf16.msra.mxu0 %v15031_v12  ;;  %11331 = vmatpush1.bf16.msra.mxu1 %v15034_v14  ;;  %v15123_v12 = vld [vmem:[%s17519_s10 + $0x964] ss:$16 sps:$4 sm:$0xff]   ;;  %v15126_v14 = vld [vmem:[%s17519_s10 + $0x96c] ss:$16 sps:$4 sm:$0xff]  }
 0x184   : > { %10307 = vmatprep.subr.bf16.mxu0 %v15039_v16  ;;  %11332 = vmatprep.subr.bf16.mxu1 %v15042_v52  ;;  %v15121_v16 = vld [vmem:[%s17519_s10 + $0x960] ss:$16 sps:$4 sm:$0xff]   ;;  %v15124_v52 = vld [vmem:[%s17519_s10 + $0x968] ss:$16 sps:$4 sm:$0xff]  }
 0x187   : > { %10308 = vmatpush1.bf16.msra.mxu0 %v15037_v17  ;;  %11333 = vmatpush1.bf16.msra.mxu1 %v15040_v18  ;;  %v15129_v17 = vld [vmem:[%s17519_s10 + $0x984] ss:$16 sps:$4 sm:$0xff]   ;;  %v15132_v18 = vld [vmem:[%s17519_s10 + $0x98c] ss:$16 sps:$4 sm:$0xff]  }
 0x188   : > { %10309 = vmatprep.subr.bf16.mxu0 %v15045_v19  ;;  %11334 = vmatprep.subr.bf16.mxu1 %v15048_v20  ;;  %v15127_v19 = vld [vmem:[%s17519_s10 + $0x980] ss:$16 sps:$4 sm:$0xff]   ;;  %v15130_v20 = vld [vmem:[%s17519_s10 + $0x988] ss:$16 sps:$4 sm:$0xff]  }
 0x18b   : > { %10310 = vmatpush1.bf16.msra.mxu0 %v15043_v22  ;;  %11335 = vmatpush1.bf16.msra.mxu1 %v15046_v23  ;;  %v15135_v22 = vld [vmem:[%s17519_s10 + $0x9a4] ss:$16 sps:$4 sm:$0xff]   ;;  %v15138_v23 = vld [vmem:[%s17519_s10 + $0x9ac] ss:$16 sps:$4 sm:$0xff]  }
 0x18c   : > { %10311 = vmatprep.subr.bf16.mxu0 %v15051_v24  ;;  %11336 = vmatprep.subr.bf16.mxu1 %v15054_v26  ;;  %v15133_v24 = vld [vmem:[%s17519_s10 + $0x9a0] ss:$16 sps:$4 sm:$0xff]   ;;  %v15136_v26 = vld [vmem:[%s17519_s10 + $0x9a8] ss:$16 sps:$4 sm:$0xff]  }
 0x18f   : > { %10312 = vmatpush1.bf16.msra.mxu0 %v15049_v27  ;;  %11337 = vmatpush1.bf16.msra.mxu1 %v15052_v28  ;;  %v15141_v27 = vld [vmem:[%s17519_s10 + $0x9c4] ss:$16 sps:$4 sm:$0xff]   ;;  %v15144_v28 = vld [vmem:[%s17519_s10 + $0x9cc] ss:$16 sps:$4 sm:$0xff]  }
 0x190   : > { %10322 = vmatprep.subr.bf16.mxu0 %v15057_v29  ;;  %11347 = vmatprep.subr.bf16.mxu1 %v15060_v30  ;;  %v15139_v29 = vld [vmem:[%s17519_s10 + $0x9c0] ss:$16 sps:$4 sm:$0xff]   ;;  %v15142_v30 = vld [vmem:[%s17519_s10 + $0x9c8] ss:$16 sps:$4 sm:$0xff]  }
 0x192   : > { %10314 = vmatmul.mubr.bf16.vlgmr.msra.gmra.mrb[0].mxu0 %v2007_v31  ;;  %11339 = vmatmul.mubr.bf16.vlgmr.msra.gmra.mrb[0].mxu1 %v2007_v31  ;;  %v15150_v31 = vld [vmem:[%s17519_s10 + $0x9ec] ss:$16 sps:$4 sm:$0xff]  }
 0x193   : > { %10323 = vmatpush1.bf16.msra.mxu0 %v15055_v32  ;;  %11348 = vmatpush1.bf16.msra.mxu1 %v15058_v33  ;;  %v15145_v32 = vld [vmem:[%s17519_s10 + $0x9e0] ss:$16 sps:$4 sm:$0xff]   ;;  %v15148_v33 = vld [vmem:[%s17519_s10 + $0x9e8] ss:$16 sps:$4 sm:$0xff]  }
 0x194   : > { %10324 = vmatprep.subr.bf16.mxu0 %v15063_v25  ;;  %11349 = vmatprep.subr.bf16.mxu1 %v15066_v34  ;;  %v15153_v25 = vld [vmem:[%s17519_s10 + $0xa04] ss:$16 sps:$4 sm:$0xff]   ;;  %v15156_v34 = vld [vmem:[%s17519_s10 + $0xa0c] ss:$16 sps:$4 sm:$0xff]  }
 0x195   : > { %10354 = vmatprep.mubr.bf16.mxu0 %v17850_v35  ;;  %11379 = vmatprep.mubr.bf16.mxu1 %v17850_v35 }
 0x197   : > { %10325 = vmatpush1.bf16.msra.mxu0 %v15061_v13  ;;  %11350 = vmatpush1.bf16.msra.mxu1 %v15064_v36  ;;  %v17916_v13 = vrot.slane %v17831_v21, %v17585_v49  ;;  %v15151_v36 = vld [vmem:[%s17519_s10 + $0xa00] ss:$16 sps:$4 sm:$0xff]  }
 0x198   : > { %10326 = vmatprep.subr.bf16.mxu0 %v15069_v37  ;;  %11351 = vmatprep.subr.bf16.mxu1 %v15072_v38  ;;  %v15154_v37 = vld [vmem:[%s17519_s10 + $0xa08] ss:$16 sps:$4 sm:$0xff]   ;;  %v15159_v38 = vld [vmem:[%s17519_s10 + $0xa24] ss:$16 sps:$4 sm:$0xff]   ;;  %v15157_v21 = vld [vmem:[%s17519_s10 + $0xa20] ss:$16 sps:$4 sm:$0xff]  }
 0x19b   : > { %10327 = vmatpush1.bf16.msra.mxu0 %v15067_v39  ;;  %11352 = vmatpush1.bf16.msra.mxu1 %v15070_v40  ;;  %v15162_v39 = vld [vmem:[%s17519_s10 + $0xa2c] ss:$16 sps:$4 sm:$0xff]   ;;  %v2057_v40 = vcombine.high %v17850_v35, %v17850_v35  ;;  %v15163_v35 = vld [vmem:[%s17519_s10 + $0xa40] ss:$16 sps:$4 sm:$0xff]  }
 0x19c   : > { %10328 = vmatprep.subr.bf16.mxu0 %v15075_v41  ;;  %11353 = vmatprep.subr.bf16.mxu1 %v15078_v43  ;;  %v15160_v41 = vld [vmem:[%s17519_s10 + $0xa28] ss:$16 sps:$4 sm:$0xff]   ;;  %v15165_v43 = vld [vmem:[%s17519_s10 + $0xa44] ss:$16 sps:$4 sm:$0xff]  }
 0x19f   : > { %10329 = vmatpush1.bf16.msra.mxu0 %v15073_v44  ;;  %11354 = vmatpush1.bf16.msra.mxu1 %v15076_v45  ;;  %v15168_v44 = vld [vmem:[%s17519_s10 + $0xa4c] ss:$16 sps:$4 sm:$0xff]   ;;  %v15166_v45 = vld [vmem:[%s17519_s10 + $0xa48] ss:$16 sps:$4 sm:$0xff]  }
 0x1a0   : > { %10330 = vmatprep.subr.bf16.mxu0 %v15081_v46  ;;  %11355 = vmatprep.subr.bf16.mxu1 %v15084_v47  ;;  %v15171_v46 = vld [vmem:[%s17519_s10 + $0xa64] ss:$16 sps:$4 sm:$0xff]   ;;  %v15174_v47 = vld [vmem:[%s17519_s10 + $0xa6c] ss:$16 sps:$4 sm:$0xff]  }
 0x1a3   : > { %10331 = vmatpush1.bf16.msra.mxu0 %v15079_v48  ;;  %11356 = vmatpush1.bf16.msra.mxu1 %v15082_v50  ;;  %v15169_v48 = vld [vmem:[%s17519_s10 + $0xa60] ss:$16 sps:$4 sm:$0xff]   ;;  %v15172_v50 = vld [vmem:[%s17519_s10 + $0xa68] ss:$16 sps:$4 sm:$0xff]  }
 0x1a4   : > { %10332 = vmatprep.subr.bf16.mxu0 %v15087_v51  ;;  %11357 = vmatprep.subr.bf16.mxu1 %v15090_v53  ;;  %v15177_v51 = vld [vmem:[%s17519_s10 + $0xa84] ss:$16 sps:$4 sm:$0xff]   ;;  %v15180_v53 = vld [vmem:[%s17519_s10 + $0xa8c] ss:$16 sps:$4 sm:$0xff]  }
 0x1a7   : > { %10333 = vmatpush1.bf16.msra.mxu0 %v15085_v54  ;;  %11358 = vmatpush1.bf16.msra.mxu1 %v15088_v55  ;;  %v15175_v54 = vld [vmem:[%s17519_s10 + $0xa80] ss:$16 sps:$4 sm:$0xff]   ;;  %v15178_v55 = vld [vmem:[%s17519_s10 + $0xa88] ss:$16 sps:$4 sm:$0xff]  }
 0x1a8   : > { %10334 = vmatprep.subr.bf16.mxu0 %v15093_v56  ;;  %11359 = vmatprep.subr.bf16.mxu1 %v15096_v57  ;;  %v15183_v56 = vld [vmem:[%s17519_s10 + $0xaa4] ss:$16 sps:$4 sm:$0xff]   ;;  %v15186_v57 = vld [vmem:[%s17519_s10 + $0xaac] ss:$16 sps:$4 sm:$0xff]  }
 0x1ab   : > { %10335 = vmatpush1.bf16.msra.mxu0 %v15091_v58  ;;  %11360 = vmatpush1.bf16.msra.mxu1 %v15094_v59  ;;  %v15181_v58 = vld [vmem:[%s17519_s10 + $0xaa0] ss:$16 sps:$4 sm:$0xff]   ;;  %v15184_v59 = vld [vmem:[%s17519_s10 + $0xaa8] ss:$16 sps:$4 sm:$0xff]  }
 0x1ac   : > { %10336 = vmatprep.subr.bf16.mxu0 %v15099_v60  ;;  %11361 = vmatprep.subr.bf16.mxu1 %v15102_v61  ;;  %v15189_v60 = vld [vmem:[%s17519_s10 + $0xac4] ss:$16 sps:$4 sm:$0xff]   ;;  %v15192_v61 = vld [vmem:[%s17519_s10 + $0xacc] ss:$16 sps:$4 sm:$0xff]  }
 0x1af   : > { %10337 = vmatpush1.bf16.msra.mxu0 %v15097_v62  ;;  %11362 = vmatpush1.bf16.msra.mxu1 %v15100_v63  ;;  %v15187_v62 = vld [vmem:[%s17519_s10 + $0xac0] ss:$16 sps:$4 sm:$0xff]   ;;  %v15190_v63 = vld [vmem:[%s17519_s10 + $0xac8] ss:$16 sps:$4 sm:$0xff]  }
 0x1b0   : > { %10338 = vmatprep.subr.bf16.mxu0 %v15105_v0  ;;  %11363 = vmatprep.subr.bf16.mxu1 %v15108_v1  ;;  %v15195_v0 = vld [vmem:[%s17519_s10 + $0xae4] ss:$16 sps:$4 sm:$0xff]   ;;  %v15198_v1 = vld [vmem:[%s17519_s10 + $0xaec] ss:$16 sps:$4 sm:$0xff]  }
 0x1b3   : > { %10339 = vmatpush1.bf16.msra.mxu0 %v15103_v2  ;;  %11364 = vmatpush1.bf16.msra.mxu1 %v15106_v3  ;;  %v15193_v2 = vld [vmem:[%s17519_s10 + $0xae0] ss:$16 sps:$4 sm:$0xff]   ;;  %v15196_v3 = vld [vmem:[%s17519_s10 + $0xae8] ss:$16 sps:$4 sm:$0xff]  }
 0x1b4   : > { %10340 = vmatprep.subr.bf16.mxu0 %v15111_v4  ;;  %11365 = vmatprep.subr.bf16.mxu1 %v15114_v5  ;;  %v15201_v4 = vld [vmem:[%s17519_s10 + $0xb04] ss:$16 sps:$4 sm:$0xff]   ;;  %v15204_v5 = vld [vmem:[%s17519_s10 + $0xb0c] ss:$16 sps:$4 sm:$0xff]  }
 0x1b7   : > { %10341 = vmatpush1.bf16.msra.mxu0 %v15109_v6  ;;  %11366 = vmatpush1.bf16.msra.mxu1 %v15112_v7  ;;  %v15199_v6 = vld [vmem:[%s17519_s10 + $0xb00] ss:$16 sps:$4 sm:$0xff]   ;;  %v15202_v7 = vld [vmem:[%s17519_s10 + $0xb08] ss:$16 sps:$4 sm:$0xff]  }
 0x1b8   : > { %10342 = vmatprep.subr.bf16.mxu0 %v15117_v8  ;;  %11367 = vmatprep.subr.bf16.mxu1 %v15120_v9  ;;  %v15207_v8 = vld [vmem:[%s17519_s10 + $0xb24] ss:$16 sps:$4 sm:$0xff]   ;;  %v15210_v9 = vld [vmem:[%s17519_s10 + $0xb2c] ss:$16 sps:$4 sm:$0xff]  }
 0x1bb   : > { %10343 = vmatpush1.bf16.msra.mxu0 %v15115_v10  ;;  %11368 = vmatpush1.bf16.msra.mxu1 %v15118_v11  ;;  %v15205_v10 = vld [vmem:[%s17519_s10 + $0xb20] ss:$16 sps:$4 sm:$0xff]   ;;  %v15208_v11 = vld [vmem:[%s17519_s10 + $0xb28] ss:$16 sps:$4 sm:$0xff]  }
 0x1bc   : > { %10344 = vmatprep.subr.bf16.mxu0 %v15123_v12  ;;  %11369 = vmatprep.subr.bf16.mxu1 %v15126_v14  ;;  %v15213_v12 = vld [vmem:[%s17519_s10 + $0xb44] ss:$16 sps:$4 sm:$0xff]   ;;  %v15216_v14 = vld [vmem:[%s17519_s10 + $0xb4c] ss:$16 sps:$4 sm:$0xff]  }
 0x1bf   : > { %10345 = vmatpush1.bf16.msra.mxu0 %v15121_v16  ;;  %11370 = vmatpush1.bf16.msra.mxu1 %v15124_v52  ;;  %v15211_v16 = vld [vmem:[%s17519_s10 + $0xb40] ss:$16 sps:$4 sm:$0xff]   ;;  %v15214_v52 = vld [vmem:[%s17519_s10 + $0xb48] ss:$16 sps:$4 sm:$0xff]  }
 0x1c0   : > { %10346 = vmatprep.subr.bf16.mxu0 %v15129_v17  ;;  %11371 = vmatprep.subr.bf16.mxu1 %v15132_v18  ;;  %v15219_v17 = vld [vmem:[%s17519_s10 + $0xb64] ss:$16 sps:$4 sm:$0xff]   ;;  %v15222_v18 = vld [vmem:[%s17519_s10 + $0xb6c] ss:$16 sps:$4 sm:$0xff]  }
 0x1c3   : > { %10347 = vmatpush1.bf16.msra.mxu0 %v15127_v19  ;;  %11372 = vmatpush1.bf16.msra.mxu1 %v15130_v20  ;;  %v15217_v19 = vld [vmem:[%s17519_s10 + $0xb60] ss:$16 sps:$4 sm:$0xff]   ;;  %v15220_v20 = vld [vmem:[%s17519_s10 + $0xb68] ss:$16 sps:$4 sm:$0xff]  }
 0x1c4   : > { %10348 = vmatprep.subr.bf16.mxu0 %v15135_v22  ;;  %11373 = vmatprep.subr.bf16.mxu1 %v15138_v23  ;;  %v15225_v22 = vld [vmem:[%s17519_s10 + $0xb84] ss:$16 sps:$4 sm:$0xff]   ;;  %v15228_v23 = vld [vmem:[%s17519_s10 + $0xb8c] ss:$16 sps:$4 sm:$0xff]  }
 0x1c7   : > { %10349 = vmatpush1.bf16.msra.mxu0 %v15133_v24  ;;  %11374 = vmatpush1.bf16.msra.mxu1 %v15136_v26  ;;  %v15223_v24 = vld [vmem:[%s17519_s10 + $0xb80] ss:$16 sps:$4 sm:$0xff]   ;;  %v15226_v26 = vld [vmem:[%s17519_s10 + $0xb88] ss:$16 sps:$4 sm:$0xff]  }
 0x1c8   : > { %10350 = vmatprep.subr.bf16.mxu0 %v15141_v27  ;;  %11375 = vmatprep.subr.bf16.mxu1 %v15144_v28  ;;  %v15231_v27 = vld [vmem:[%s17519_s10 + $0xba4] ss:$16 sps:$4 sm:$0xff]   ;;  %v15234_v28 = vld [vmem:[%s17519_s10 + $0xbac] ss:$16 sps:$4 sm:$0xff]  }
 0x1cb   : > { %10351 = vmatpush1.bf16.msra.mxu0 %v15139_v29  ;;  %11376 = vmatpush1.bf16.msra.mxu1 %v15142_v30  ;;  %v15229_v29 = vld [vmem:[%s17519_s10 + $0xba0] ss:$16 sps:$4 sm:$0xff]   ;;  %v15232_v30 = vld [vmem:[%s17519_s10 + $0xba8] ss:$16 sps:$4 sm:$0xff]  }
 0x1cc   : > { %10352 = vmatprep.subr.bf16.mxu0 %v15147_v15  ;;  %11377 = vmatprep.subr.bf16.mxu1 %v15150_v31  ;;  %v15237_v15 = vld [vmem:[%s17519_s10 + $0xbc4] ss:$16 sps:$4 sm:$0xff]   ;;  %v15240_v31 = vld [vmem:[%s17519_s10 + $0xbcc] ss:$16 sps:$4 sm:$0xff]  }
 0x1cf   : > { %10353 = vmatpush1.bf16.msra.mxu0 %v15145_v32  ;;  %11378 = vmatpush1.bf16.msra.mxu1 %v15148_v33  ;;  %v17060_v32 = vld [vmem:[%s19463_s0 + $0x8] sm:$0xff] }
 0x1d0   : > { %10363 = vmatprep.subr.bf16.mxu0 %v15153_v25  ;;  %11388 = vmatprep.subr.bf16.mxu1 %v15156_v34  ;;  %v2010_v33 = vcombine.high %v17060_v32, %v17060_v32  ;;  %v15235_v25 = vld [vmem:[%s17519_s10 + $0xbc0] ss:$16 sps:$4 sm:$0xff]   ;;  %v15238_v34 = vld [vmem:[%s17519_s10 + $0xbc8] ss:$16 sps:$4 sm:$0xff]  }
 0x1d1   : > { %v15319_v32 = vld [vmem:[%s17519_s10 + $0xd80] ss:$16 sps:$4 sm:$0xff]  }
 0x1d2   : > { %10355 = vmatmul.mubr.bf16.vlgmr.msra.gmra.mrb[0].mxu0 %v17916_v13  ;;  %11380 = vmatmul.mubr.bf16.vlgmr.msra.gmra.mrb[0].mxu1 %v17916_v13 }
 0x1d3   : > { %10364 = vmatpush1.bf16.msra.mxu0 %v15151_v36  ;;  %11389 = vmatpush1.bf16.msra.mxu1 %v15154_v37  ;;  %v15243_v36 = vld [vmem:[%s17519_s10 + $0xbe4] ss:$16 sps:$4 sm:$0xff]   ;;  %v15246_v37 = vld [vmem:[%s17519_s10 + $0xbec] ss:$16 sps:$4 sm:$0xff]  }
 0x1d4   : > { %10365 = vmatprep.subr.bf16.mxu0 %v15159_v38  ;;  %11390 = vmatprep.subr.bf16.mxu1 %v15162_v39  ;;  %v17986_v38 = vrot.slane %v2010_v33, %v17585_v49  ;;  %v15241_v39 = vld [vmem:[%s17519_s10 + $0xbe0] ss:$16 sps:$4 sm:$0xff]   ;;  %v15322_v33 = vld [vmem:[%s17519_s10 + $0xd88] ss:$16 sps:$4 sm:$0xff]  }
 0x1d5   : > { %10395 = vmatprep.mubr.bf16.mxu0 %v2057_v40  ;;  %11420 = vmatprep.mubr.bf16.mxu1 %v2057_v40  ;;  %v15244_v40 = vld [vmem:[%s17519_s10 + $0xbe8] ss:$16 sps:$4 sm:$0xff]  }
 0x1d7   : > { %10366 = vmatpush1.bf16.msra.mxu0 %v15157_v21  ;;  %11391 = vmatpush1.bf16.msra.mxu1 %v15160_v41  ;;  %v15249_v21 = vld [vmem:[%s17519_s10 + $0xc04] ss:$16 sps:$4 sm:$0xff]   ;;  %v15252_v41 = vld [vmem:[%s17519_s10 + $0xc0c] ss:$16 sps:$4 sm:$0xff]  }
 0x1d8   : > { %10367 = vmatprep.subr.bf16.mxu0 %v15165_v43  ;;  %11392 = vmatprep.subr.bf16.mxu1 %v15168_v44  ;;  %v2026_v43 = vcombine.high %v17986_v38, %v17986_v38  ;;  %v2055_v44 = vcombine.high %v17916_v13, %v17916_v13  ;;  %v15253_v13 = vld [vmem:[%s17519_s10 + $0xc20] ss:$16 sps:$4 sm:$0xff]  }
 0x1db   : > { %10368 = vmatpush1.bf16.msra.mxu0 %v15163_v35  ;;  %11393 = vmatpush1.bf16.msra.mxu1 %v15166_v45  ;;  %v15247_v35 = vld [vmem:[%s17519_s10 + $0xc00] ss:$16 sps:$4 sm:$0xff]   ;;  %v15250_v45 = vld [vmem:[%s17519_s10 + $0xc08] ss:$16 sps:$4 sm:$0xff]  }
 0x1dc   : > { %10369 = vmatprep.subr.bf16.mxu0 %v15171_v46  ;;  %11394 = vmatprep.subr.bf16.mxu1 %v15174_v47  ;;  %v15255_v46 = vld [vmem:[%s17519_s10 + $0xc24] ss:$16 sps:$4 sm:$0xff]   ;;  %v15258_v47 = vld [vmem:[%s17519_s10 + $0xc2c] ss:$16 sps:$4 sm:$0xff]  }
 0x1df   : > { %10370 = vmatpush1.bf16.msra.mxu0 %v15169_v48  ;;  %11395 = vmatpush1.bf16.msra.mxu1 %v15172_v50  ;;  %v18001_v48 = vrot.slane %v2026_v43, %v17585_v49  ;;  %v15256_v50 = vld [vmem:[%s17519_s10 + $0xc28] ss:$16 sps:$4 sm:$0xff]   ;;  %v15339_v43 = vld [vmem:[%s17519_s10 + $0xde4] ss:$16 sps:$4 sm:$0xff]  }
 0x1e0   : > { %10371 = vmatprep.subr.bf16.mxu0 %v15177_v51  ;;  %11396 = vmatprep.subr.bf16.mxu1 %v15180_v53  ;;  %v15261_v51 = vld [vmem:[%s17519_s10 + $0xc44] ss:$16 sps:$4 sm:$0xff]   ;;  %v15264_v53 = vld [vmem:[%s17519_s10 + $0xc4c] ss:$16 sps:$4 sm:$0xff]  }
 0x1e3   : > { %10372 = vmatpush1.bf16.msra.mxu0 %v15175_v54  ;;  %11397 = vmatpush1.bf16.msra.mxu1 %v15178_v55  ;;  %v15259_v54 = vld [vmem:[%s17519_s10 + $0xc40] ss:$16 sps:$4 sm:$0xff]   ;;  %v15262_v55 = vld [vmem:[%s17519_s10 + $0xc48] ss:$16 sps:$4 sm:$0xff]  }
 0x1e4   : > { %10373 = vmatprep.subr.bf16.mxu0 %v15183_v56  ;;  %11398 = vmatprep.subr.bf16.mxu1 %v15186_v57  ;;  %v15267_v56 = vld [vmem:[%s17519_s10 + $0xc64] ss:$16 sps:$4 sm:$0xff]   ;;  %v15270_v57 = vld [vmem:[%s17519_s10 + $0xc6c] ss:$16 sps:$4 sm:$0xff]  }
 0x1e7   : > { %10374 = vmatpush1.bf16.msra.mxu0 %v15181_v58  ;;  %11399 = vmatpush1.bf16.msra.mxu1 %v15184_v59  ;;  %v15265_v58 = vld [vmem:[%s17519_s10 + $0xc60] ss:$16 sps:$4 sm:$0xff]   ;;  %v15268_v59 = vld [vmem:[%s17519_s10 + $0xc68] ss:$16 sps:$4 sm:$0xff]  }
 0x1e8   : > { %10375 = vmatprep.subr.bf16.mxu0 %v15189_v60  ;;  %11400 = vmatprep.subr.bf16.mxu1 %v15192_v61  ;;  %v15273_v60 = vld [vmem:[%s17519_s10 + $0xc84] ss:$16 sps:$4 sm:$0xff]   ;;  %v15276_v61 = vld [vmem:[%s17519_s10 + $0xc8c] ss:$16 sps:$4 sm:$0xff]  }
 0x1eb   : > { %10376 = vmatpush1.bf16.msra.mxu0 %v15187_v62  ;;  %11401 = vmatpush1.bf16.msra.mxu1 %v15190_v63  ;;  %v15271_v62 = vld [vmem:[%s17519_s10 + $0xc80] ss:$16 sps:$4 sm:$0xff]   ;;  %v15274_v63 = vld [vmem:[%s17519_s10 + $0xc88] ss:$16 sps:$4 sm:$0xff]  }
 0x1ec   : > { %10377 = vmatprep.subr.bf16.mxu0 %v15195_v0  ;;  %11402 = vmatprep.subr.bf16.mxu1 %v15198_v1  ;;  %v15279_v0 = vld [vmem:[%s17519_s10 + $0xca4] ss:$16 sps:$4 sm:$0xff]   ;;  %v15282_v1 = vld [vmem:[%s17519_s10 + $0xcac] ss:$16 sps:$4 sm:$0xff]  }
 0x1ef   : > { %10378 = vmatpush1.bf16.msra.mxu0 %v15193_v2  ;;  %11403 = vmatpush1.bf16.msra.mxu1 %v15196_v3  ;;  %v15277_v2 = vld [vmem:[%s17519_s10 + $0xca0] ss:$16 sps:$4 sm:$0xff]   ;;  %v15280_v3 = vld [vmem:[%s17519_s10 + $0xca8] ss:$16 sps:$4 sm:$0xff]  }
 0x1f0   : > { %10379 = vmatprep.subr.bf16.mxu0 %v15201_v4  ;;  %11404 = vmatprep.subr.bf16.mxu1 %v15204_v5  ;;  %v15285_v4 = vld [vmem:[%s17519_s10 + $0xcc4] ss:$16 sps:$4 sm:$0xff]   ;;  %v15288_v5 = vld [vmem:[%s17519_s10 + $0xccc] ss:$16 sps:$4 sm:$0xff]  }
 0x1f3   : > { %10380 = vmatpush1.bf16.msra.mxu0 %v15199_v6  ;;  %11405 = vmatpush1.bf16.msra.mxu1 %v15202_v7  ;;  %v15283_v6 = vld [vmem:[%s17519_s10 + $0xcc0] ss:$16 sps:$4 sm:$0xff]   ;;  %v15286_v7 = vld [vmem:[%s17519_s10 + $0xcc8] ss:$16 sps:$4 sm:$0xff]  }
 0x1f4   : > { %10381 = vmatprep.subr.bf16.mxu0 %v15207_v8  ;;  %11406 = vmatprep.subr.bf16.mxu1 %v15210_v9  ;;  %v15291_v8 = vld [vmem:[%s17519_s10 + $0xce4] ss:$16 sps:$4 sm:$0xff]   ;;  %v15294_v9 = vld [vmem:[%s17519_s10 + $0xcec] ss:$16 sps:$4 sm:$0xff]  }
 0x1f7   : > { %10382 = vmatpush1.bf16.msra.mxu0 %v15205_v10  ;;  %11407 = vmatpush1.bf16.msra.mxu1 %v15208_v11  ;;  %v15289_v10 = vld [vmem:[%s17519_s10 + $0xce0] ss:$16 sps:$4 sm:$0xff]   ;;  %v15292_v11 = vld [vmem:[%s17519_s10 + $0xce8] ss:$16 sps:$4 sm:$0xff]  }
 0x1f8   : > { %10383 = vmatprep.subr.bf16.mxu0 %v15213_v12  ;;  %11408 = vmatprep.subr.bf16.mxu1 %v15216_v14  ;;  %v15297_v12 = vld [vmem:[%s17519_s10 + $0xd04] ss:$16 sps:$4 sm:$0xff]   ;;  %v15300_v14 = vld [vmem:[%s17519_s10 + $0xd0c] ss:$16 sps:$4 sm:$0xff]  }
 0x1fb   : > { %10384 = vmatpush1.bf16.msra.mxu0 %v15211_v16  ;;  %11409 = vmatpush1.bf16.msra.mxu1 %v15214_v52  ;;  %v15295_v16 = vld [vmem:[%s17519_s10 + $0xd00] ss:$16 sps:$4 sm:$0xff]   ;;  %v15298_v52 = vld [vmem:[%s17519_s10 + $0xd08] ss:$16 sps:$4 sm:$0xff]  }
 0x1fc   : > { %10385 = vmatprep.subr.bf16.mxu0 %v15219_v17  ;;  %11410 = vmatprep.subr.bf16.mxu1 %v15222_v18  ;;  %v15303_v17 = vld [vmem:[%s17519_s10 + $0xd24] ss:$16 sps:$4 sm:$0xff]   ;;  %v15306_v18 = vld [vmem:[%s17519_s10 + $0xd2c] ss:$16 sps:$4 sm:$0xff]  }
 0x1ff   : > { %10386 = vmatpush1.bf16.msra.mxu0 %v15217_v19  ;;  %11411 = vmatpush1.bf16.msra.mxu1 %v15220_v20  ;;  %v15301_v19 = vld [vmem:[%s17519_s10 + $0xd20] ss:$16 sps:$4 sm:$0xff]   ;;  %v15304_v20 = vld [vmem:[%s17519_s10 + $0xd28] ss:$16 sps:$4 sm:$0xff]  }
 0x200   : > { %10387 = vmatprep.subr.bf16.mxu0 %v15225_v22  ;;  %11412 = vmatprep.subr.bf16.mxu1 %v15228_v23  ;;  %v15309_v22 = vld [vmem:[%s17519_s10 + $0xd44] ss:$16 sps:$4 sm:$0xff]   ;;  %v15312_v23 = vld [vmem:[%s17519_s10 + $0xd4c] ss:$16 sps:$4 sm:$0xff]  }
 0x203   : > { %10388 = vmatpush1.bf16.msra.mxu0 %v15223_v24  ;;  %11413 = vmatpush1.bf16.msra.mxu1 %v15226_v26  ;;  %v15307_v24 = vld [vmem:[%s17519_s10 + $0xd40] ss:$16 sps:$4 sm:$0xff]   ;;  %v15310_v26 = vld [vmem:[%s17519_s10 + $0xd48] ss:$16 sps:$4 sm:$0xff]  }
 0x204   : > { %10389 = vmatprep.subr.bf16.mxu0 %v15231_v27  ;;  %11414 = vmatprep.subr.bf16.mxu1 %v15234_v28  ;;  %v15315_v27 = vld [vmem:[%s17519_s10 + $0xd64] ss:$16 sps:$4 sm:$0xff]   ;;  %v15318_v28 = vld [vmem:[%s17519_s10 + $0xd6c] ss:$16 sps:$4 sm:$0xff]  }
 0x207   : > { %10390 = vmatpush1.bf16.msra.mxu0 %v15229_v29  ;;  %11415 = vmatpush1.bf16.msra.mxu1 %v15232_v30  ;;  %v15313_v29 = vld [vmem:[%s17519_s10 + $0xd60] ss:$16 sps:$4 sm:$0xff]   ;;  %v15316_v30 = vld [vmem:[%s17519_s10 + $0xd68] ss:$16 sps:$4 sm:$0xff]  }
 0x208   : > { %10391 = vmatprep.subr.bf16.mxu0 %v15237_v15  ;;  %11416 = vmatprep.subr.bf16.mxu1 %v15240_v31  ;;  %v15321_v15 = vld [vmem:[%s17519_s10 + $0xd84] ss:$16 sps:$4 sm:$0xff]   ;;  %v15324_v31 = vld [vmem:[%s17519_s10 + $0xd8c] ss:$16 sps:$4 sm:$0xff]  }
 0x20b   : > { %10392 = vmatpush1.bf16.msra.mxu0 %v15235_v25  ;;  %11417 = vmatpush1.bf16.msra.mxu1 %v15238_v34  ;;  %v15327_v25 = vld [vmem:[%s17519_s10 + $0xda4] ss:$16 sps:$4 sm:$0xff]   ;;  %v15330_v34 = vld [vmem:[%s17519_s10 + $0xdac] ss:$16 sps:$4 sm:$0xff]  }
 0x20c   : > { %10393 = vmatprep.subr.bf16.mxu0 %v15243_v36  ;;  %11418 = vmatprep.subr.bf16.mxu1 %v15246_v37  ;;  %v15325_v36 = vld [vmem:[%s17519_s10 + $0xda0] ss:$16 sps:$4 sm:$0xff]   ;;  %v15328_v37 = vld [vmem:[%s17519_s10 + $0xda8] ss:$16 sps:$4 sm:$0xff]  }
 0x20f   : > { %10394 = vmatpush1.bf16.msra.mxu0 %v15241_v39  ;;  %11419 = vmatpush1.bf16.msra.mxu1 %v15244_v40  ;;  %v15333_v39 = vld [vmem:[%s17519_s10 + $0xdc4] ss:$16 sps:$4 sm:$0xff]   ;;  %v15336_v40 = vld [vmem:[%s17519_s10 + $0xdcc] ss:$16 sps:$4 sm:$0xff]  }
 0x210   : > { %10404 = vmatprep.subr.bf16.mxu0 %v15249_v21  ;;  %11429 = vmatprep.subr.bf16.mxu1 %v15252_v41  ;;  %v15331_v21 = vld [vmem:[%s17519_s10 + $0xdc0] ss:$16 sps:$4 sm:$0xff]   ;;  %v15334_v41 = vld [vmem:[%s17519_s10 + $0xdc8] ss:$16 sps:$4 sm:$0xff]  }
 0x212   : > { %10396 = vmatmul.mubr.bf16.vlgmr.msra.gmra.mrb[0].mxu0 %v2055_v44  ;;  %11421 = vmatmul.mubr.bf16.vlgmr.msra.gmra.mrb[0].mxu1 %v2055_v44  ;;  %v15342_v44 = vld [vmem:[%s17519_s10 + $0xdec] ss:$16 sps:$4 sm:$0xff]  }
 0x213   : > { %10405 = vmatpush1.bf16.msra.mxu0 %v15247_v35  ;;  %11430 = vmatpush1.bf16.msra.mxu1 %v15250_v45  ;;  %v15337_v35 = vld [vmem:[%s17519_s10 + $0xde0] ss:$16 sps:$4 sm:$0xff]   ;;  %v15340_v45 = vld [vmem:[%s17519_s10 + $0xde8] ss:$16 sps:$4 sm:$0xff]  }
 0x214   : > { %10406 = vmatprep.subr.bf16.mxu0 %v15255_v46  ;;  %11431 = vmatprep.subr.bf16.mxu1 %v15258_v47  ;;  %v15346_v46 = vld [vmem:[%s17519_s10 + $0xe04] ss:$16 sps:$4 sm:$0xff]   ;;  %v15349_v47 = vld [vmem:[%s17519_s10 + $0xe0c] ss:$16 sps:$4 sm:$0xff]  }
 0x215   : > { %10436 = vmatprep.mubr.bf16.mxu0 %v18001_v48  ;;  %11461 = vmatprep.mubr.bf16.mxu1 %v18001_v48 }
 0x217   : > { %10407 = vmatpush1.bf16.msra.mxu0 %v15253_v13  ;;  %11432 = vmatpush1.bf16.msra.mxu1 %v15256_v50  ;;  %v18067_v13 = vrot.slane %v17986_v38, %v17585_v49  ;;  %v15344_v50 = vld [vmem:[%s17519_s10 + $0xe00] ss:$16 sps:$4 sm:$0xff]  }
 0x218   : > { %10408 = vmatprep.subr.bf16.mxu0 %v15261_v51  ;;  %11433 = vmatprep.subr.bf16.mxu1 %v15264_v53  ;;  %v15347_v51 = vld [vmem:[%s17519_s10 + $0xe08] ss:$16 sps:$4 sm:$0xff]   ;;  %v15352_v53 = vld [vmem:[%s17519_s10 + $0xe24] ss:$16 sps:$4 sm:$0xff]   ;;  %v15350_v38 = vld [vmem:[%s17519_s10 + $0xe20] ss:$16 sps:$4 sm:$0xff]  }
 0x21b   : > { %10409 = vmatpush1.bf16.msra.mxu0 %v15259_v54  ;;  %11434 = vmatpush1.bf16.msra.mxu1 %v15262_v55  ;;  %v15355_v54 = vld [vmem:[%s17519_s10 + $0xe2c] ss:$16 sps:$4 sm:$0xff]   ;;  %v2058_v55 = vcombine.high %v18001_v48, %v18001_v48  ;;  %v15356_v48 = vld [vmem:[%s17519_s10 + $0xe40] ss:$16 sps:$4 sm:$0xff]  }
 0x21c   : > { %10410 = vmatprep.subr.bf16.mxu0 %v15267_v56  ;;  %11435 = vmatprep.subr.bf16.mxu1 %v15270_v57  ;;  %v15353_v56 = vld [vmem:[%s17519_s10 + $0xe28] ss:$16 sps:$4 sm:$0xff]   ;;  %v15358_v57 = vld [vmem:[%s17519_s10 + $0xe44] ss:$16 sps:$4 sm:$0xff]  }
 0x21f   : > { %10411 = vmatpush1.bf16.msra.mxu0 %v15265_v58  ;;  %11436 = vmatpush1.bf16.msra.mxu1 %v15268_v59  ;;  %v15361_v58 = vld [vmem:[%s17519_s10 + $0xe4c] ss:$16 sps:$4 sm:$0xff]   ;;  %v15359_v59 = vld [vmem:[%s17519_s10 + $0xe48] ss:$16 sps:$4 sm:$0xff]  }
 0x220   : > { %10412 = vmatprep.subr.bf16.mxu0 %v15273_v60  ;;  %11437 = vmatprep.subr.bf16.mxu1 %v15276_v61  ;;  %v15364_v60 = vld [vmem:[%s17519_s10 + $0xe64] ss:$16 sps:$4 sm:$0xff]   ;;  %v15367_v61 = vld [vmem:[%s17519_s10 + $0xe6c] ss:$16 sps:$4 sm:$0xff]  }
 0x223   : > { %10413 = vmatpush1.bf16.msra.mxu0 %v15271_v62  ;;  %11438 = vmatpush1.bf16.msra.mxu1 %v15274_v63  ;;  %v15362_v62 = vld [vmem:[%s17519_s10 + $0xe60] ss:$16 sps:$4 sm:$0xff]   ;;  %v15365_v63 = vld [vmem:[%s17519_s10 + $0xe68] ss:$16 sps:$4 sm:$0xff]  }
 0x224   : > { %10414 = vmatprep.subr.bf16.mxu0 %v15279_v0  ;;  %11439 = vmatprep.subr.bf16.mxu1 %v15282_v1  ;;  %v15370_v0 = vld [vmem:[%s17519_s10 + $0xe84] ss:$16 sps:$4 sm:$0xff]   ;;  %v15373_v1 = vld [vmem:[%s17519_s10 + $0xe8c] ss:$16 sps:$4 sm:$0xff]  }
 0x227   : > { %10415 = vmatpush1.bf16.msra.mxu0 %v15277_v2  ;;  %11440 = vmatpush1.bf16.msra.mxu1 %v15280_v3  ;;  %v15368_v2 = vld [vmem:[%s17519_s10 + $0xe80] ss:$16 sps:$4 sm:$0xff]   ;;  %v15371_v3 = vld [vmem:[%s17519_s10 + $0xe88] ss:$16 sps:$4 sm:$0xff]  }
 0x228   : > { %10416 = vmatprep.subr.bf16.mxu0 %v15285_v4  ;;  %11441 = vmatprep.subr.bf16.mxu1 %v15288_v5  ;;  %v15376_v4 = vld [vmem:[%s17519_s10 + $0xea4] ss:$16 sps:$4 sm:$0xff]   ;;  %v15379_v5 = vld [vmem:[%s17519_s10 + $0xeac] ss:$16 sps:$4 sm:$0xff]  }
 0x22b   : > { %10417 = vmatpush1.bf16.msra.mxu0 %v15283_v6  ;;  %11442 = vmatpush1.bf16.msra.mxu1 %v15286_v7  ;;  %v15374_v6 = vld [vmem:[%s17519_s10 + $0xea0] ss:$16 sps:$4 sm:$0xff]   ;;  %v15377_v7 = vld [vmem:[%s17519_s10 + $0xea8] ss:$16 sps:$4 sm:$0xff]  }
 0x22c   : > { %10418 = vmatprep.subr.bf16.mxu0 %v15291_v8  ;;  %11443 = vmatprep.subr.bf16.mxu1 %v15294_v9  ;;  %v15382_v8 = vld [vmem:[%s17519_s10 + $0xec4] ss:$16 sps:$4 sm:$0xff]   ;;  %v15385_v9 = vld [vmem:[%s17519_s10 + $0xecc] ss:$16 sps:$4 sm:$0xff]  }
 0x22f   : > { %10419 = vmatpush1.bf16.msra.mxu0 %v15289_v10  ;;  %11444 = vmatpush1.bf16.msra.mxu1 %v15292_v11  ;;  %v15380_v10 = vld [vmem:[%s17519_s10 + $0xec0] ss:$16 sps:$4 sm:$0xff]   ;;  %v15383_v11 = vld [vmem:[%s17519_s10 + $0xec8] ss:$16 sps:$4 sm:$0xff]  }
 0x230   : > { %10420 = vmatprep.subr.bf16.mxu0 %v15297_v12  ;;  %11445 = vmatprep.subr.bf16.mxu1 %v15300_v14  ;;  %v15388_v12 = vld [vmem:[%s17519_s10 + $0xee4] ss:$16 sps:$4 sm:$0xff]   ;;  %v15391_v14 = vld [vmem:[%s17519_s10 + $0xeec] ss:$16 sps:$4 sm:$0xff]  }
 0x233   : > { %10421 = vmatpush1.bf16.msra.mxu0 %v15295_v16  ;;  %11446 = vmatpush1.bf16.msra.mxu1 %v15298_v52  ;;  %v15386_v16 = vld [vmem:[%s17519_s10 + $0xee0] ss:$16 sps:$4 sm:$0xff]   ;;  %v15389_v52 = vld [vmem:[%s17519_s10 + $0xee8] ss:$16 sps:$4 sm:$0xff]  }
 0x234   : > { %10422 = vmatprep.subr.bf16.mxu0 %v15303_v17  ;;  %11447 = vmatprep.subr.bf16.mxu1 %v15306_v18  ;;  %v15394_v17 = vld [vmem:[%s17519_s10 + $0xf04] ss:$16 sps:$4 sm:$0xff]   ;;  %v15397_v18 = vld [vmem:[%s17519_s10 + $0xf0c] ss:$16 sps:$4 sm:$0xff]  }
 0x237   : > { %10423 = vmatpush1.bf16.msra.mxu0 %v15301_v19  ;;  %11448 = vmatpush1.bf16.msra.mxu1 %v15304_v20  ;;  %v15392_v19 = vld [vmem:[%s17519_s10 + $0xf00] ss:$16 sps:$4 sm:$0xff]   ;;  %v15395_v20 = vld [vmem:[%s17519_s10 + $0xf08] ss:$16 sps:$4 sm:$0xff]  }
 0x238   : > { %10424 = vmatprep.subr.bf16.mxu0 %v15309_v22  ;;  %11449 = vmatprep.subr.bf16.mxu1 %v15312_v23  ;;  %v15400_v22 = vld [vmem:[%s17519_s10 + $0xf24] ss:$16 sps:$4 sm:$0xff]   ;;  %v15403_v23 = vld [vmem:[%s17519_s10 + $0xf2c] ss:$16 sps:$4 sm:$0xff]  }
 0x23b   : > { %10425 = vmatpush1.bf16.msra.mxu0 %v15307_v24  ;;  %11450 = vmatpush1.bf16.msra.mxu1 %v15310_v26  ;;  %v15398_v24 = vld [vmem:[%s17519_s10 + $0xf20] ss:$16 sps:$4 sm:$0xff]   ;;  %v15401_v26 = vld [vmem:[%s17519_s10 + $0xf28] ss:$16 sps:$4 sm:$0xff]  }
 0x23c   : > { %10426 = vmatprep.subr.bf16.mxu0 %v15315_v27  ;;  %11451 = vmatprep.subr.bf16.mxu1 %v15318_v28  ;;  %v15406_v27 = vld [vmem:[%s17519_s10 + $0xf44] ss:$16 sps:$4 sm:$0xff]   ;;  %v15409_v28 = vld [vmem:[%s17519_s10 + $0xf4c] ss:$16 sps:$4 sm:$0xff]  }
 0x23f   : > { %10427 = vmatpush1.bf16.msra.mxu0 %v15313_v29  ;;  %11452 = vmatpush1.bf16.msra.mxu1 %v15316_v30  ;;  %v15404_v29 = vld [vmem:[%s17519_s10 + $0xf40] ss:$16 sps:$4 sm:$0xff]   ;;  %v15407_v30 = vld [vmem:[%s17519_s10 + $0xf48] ss:$16 sps:$4 sm:$0xff]  }
 0x240   : > { %10428 = vmatprep.subr.bf16.mxu0 %v15321_v15  ;;  %11453 = vmatprep.subr.bf16.mxu1 %v15324_v31  ;;  %v15412_v15 = vld [vmem:[%s17519_s10 + $0xf64] ss:$16 sps:$4 sm:$0xff]   ;;  %v15415_v31 = vld [vmem:[%s17519_s10 + $0xf6c] ss:$16 sps:$4 sm:$0xff]  }
 0x243   : > { %10429 = vmatpush1.bf16.msra.mxu0 %v15319_v32  ;;  %11454 = vmatpush1.bf16.msra.mxu1 %v15322_v33  ;;  %v15410_v32 = vld [vmem:[%s17519_s10 + $0xf60] ss:$16 sps:$4 sm:$0xff]   ;;  %v15413_v33 = vld [vmem:[%s17519_s10 + $0xf68] ss:$16 sps:$4 sm:$0xff]  }
 0x244   : > { %10430 = vmatprep.subr.bf16.mxu0 %v15327_v25  ;;  %11455 = vmatprep.subr.bf16.mxu1 %v15330_v34  ;;  %v15418_v25 = vld [vmem:[%s17519_s10 + $0xf84] ss:$16 sps:$4 sm:$0xff]   ;;  %v15421_v34 = vld [vmem:[%s17519_s10 + $0xf8c] ss:$16 sps:$4 sm:$0xff]  }
 0x247   : > { %10431 = vmatpush1.bf16.msra.mxu0 %v15325_v36  ;;  %11456 = vmatpush1.bf16.msra.mxu1 %v15328_v37  ;;  %v15416_v36 = vld [vmem:[%s17519_s10 + $0xf80] ss:$16 sps:$4 sm:$0xff]   ;;  %v15419_v37 = vld [vmem:[%s17519_s10 + $0xf88] ss:$16 sps:$4 sm:$0xff]  }
 0x248   : > { %10432 = vmatprep.subr.bf16.mxu0 %v15333_v39  ;;  %11457 = vmatprep.subr.bf16.mxu1 %v15336_v40  ;;  %v15424_v39 = vld [vmem:[%s17519_s10 + $0xfa4] ss:$16 sps:$4 sm:$0xff]   ;;  %v15427_v40 = vld [vmem:[%s17519_s10 + $0xfac] ss:$16 sps:$4 sm:$0xff]  }
 0x24b   : > { %10433 = vmatpush1.bf16.msra.mxu0 %v15331_v21  ;;  %11458 = vmatpush1.bf16.msra.mxu1 %v15334_v41  ;;  %v15422_v21 = vld [vmem:[%s17519_s10 + $0xfa0] ss:$16 sps:$4 sm:$0xff]   ;;  %v15425_v41 = vld [vmem:[%s17519_s10 + $0xfa8] ss:$16 sps:$4 sm:$0xff]  }
 0x24c   : > { %10434 = vmatprep.subr.bf16.mxu0 %v15339_v43  ;;  %11459 = vmatprep.subr.bf16.mxu1 %v15342_v44  ;;  %v15430_v43 = vld [vmem:[%s17519_s10 + $0xfc4] ss:$16 sps:$4 sm:$0xff]   ;;  %v15433_v44 = vld [vmem:[%s17519_s10 + $0xfcc] ss:$16 sps:$4 sm:$0xff]  }
 0x24f   : > { %10435 = vmatpush1.bf16.msra.mxu0 %v15337_v35  ;;  %11460 = vmatpush1.bf16.msra.mxu1 %v15340_v45  ;;  %v18132_v35 = vld.sshfl [vmem:[%s19463_s0 + $0x10] sm:$0xff pattern:$0x75316420] }
 0x250   : > { %10445 = vmatprep.subr.bf16.mxu0 %v15346_v46  ;;  %11470 = vmatprep.subr.bf16.mxu1 %v15349_v47  ;;  %v15428_v45 = vld [vmem:[%s17519_s10 + $0xfc0] ss:$16 sps:$4 sm:$0xff]   ;;  %v15431_v46 = vld [vmem:[%s17519_s10 + $0xfc8] ss:$16 sps:$4 sm:$0xff]   ;;  %v15436_v47 = vld [vmem:[%s17519_s10 + $0xfe4] ss:$16 sps:$4 sm:$0xff]  }
 0x252   : > { %10437 = vmatmul.mubr.bf16.vlgmr.msra.gmra.mrb[0].mxu0 %v18067_v13  ;;  %11462 = vmatmul.mubr.bf16.vlgmr.msra.gmra.mrb[0].mxu1 %v18067_v13 }
 0x253   : > { %10446 = vmatpush1.bf16.msra.mxu0 %v15344_v50  ;;  %11471 = vmatpush1.bf16.msra.mxu1 %v15347_v51  ;;  %v15439_v50 = vld [vmem:[%s17519_s10 + $0xfec] ss:$16 sps:$4 sm:$0xff]   ;;  %v15434_v51 = vld [vmem:[%s17519_s10 + $0xfe0] ss:$16 sps:$4 sm:$0xff]  }
 0x254   : > { %10447 = vmatprep.subr.bf16.mxu0 %v15352_v53  ;;  %11472 = vmatprep.subr.bf16.mxu1 %v15355_v54  ;;  %v15437_v53 = vld [vmem:[%s17519_s10 + $0xfe8] ss:$16 sps:$4 sm:$0xff]   ;;  %v15442_v54 = vld [vmem:[%s17519_s10 + $0x1004] ss:$16 sps:$4 sm:$0xff]  }
 0x255   : > { %10477 = vmatprep.mubr.bf16.mxu0 %v2058_v55  ;;  %11502 = vmatprep.mubr.bf16.mxu1 %v2058_v55  ;;  %v15445_v55 = vld [vmem:[%s17519_s10 + $0x100c] ss:$16 sps:$4 sm:$0xff]  }
 0x257   : > { %10448 = vmatpush1.bf16.msra.mxu0 %v15350_v38  ;;  %11473 = vmatpush1.bf16.msra.mxu1 %v15353_v56  ;;  %v2074_v38 = vcombine.high %v18132_v35, %v18132_v35  ;;  %v2056_v56 = vcombine.high %v18067_v13, %v18067_v13  ;;  %v15446_v13 = vld [vmem:[%s17519_s10 + $0x1020] ss:$16 sps:$4 sm:$0xff]  }
 0x258   : > { %10449 = vmatprep.subr.bf16.mxu0 %v15358_v57  ;;  %11474 = vmatprep.subr.bf16.mxu1 %v15361_v58  ;;  %v15440_v57 = vld [vmem:[%s17519_s10 + $0x1000] ss:$16 sps:$4 sm:$0xff]   ;;  %v15443_v58 = vld [vmem:[%s17519_s10 + $0x1008] ss:$16 sps:$4 sm:$0xff]  }
 0x25b   : > { %10450 = vmatpush1.bf16.msra.mxu0 %v15356_v48  ;;  %11475 = vmatpush1.bf16.msra.mxu1 %v15359_v59  ;;  %v15448_v48 = vld [vmem:[%s17519_s10 + $0x1024] ss:$16 sps:$4 sm:$0xff]   ;;  %v15451_v59 = vld [vmem:[%s17519_s10 + $0x102c] ss:$16 sps:$4 sm:$0xff]  }
 0x25c   : > { %10451 = vmatprep.subr.bf16.mxu0 %v15364_v60  ;;  %11476 = vmatprep.subr.bf16.mxu1 %v15367_v61  ;;  %v18151_v60 = vrot.slane %v2074_v38, %v17585_v49  ;;  %v15449_v61 = vld [vmem:[%s17519_s10 + $0x1028] ss:$16 sps:$4 sm:$0xff]   ;;  %v15532_v38 = vld [vmem:[%s17519_s10 + $0x11e4] ss:$16 sps:$4 sm:$0xff]  }
 0x25f   : > { %10452 = vmatpush1.bf16.msra.mxu0 %v15362_v62  ;;  %11477 = vmatpush1.bf16.msra.mxu1 %v15365_v63  ;;  %v15454_v62 = vld [vmem:[%s17519_s10 + $0x1044] ss:$16 sps:$4 sm:$0xff]   ;;  %v15457_v63 = vld [vmem:[%s17519_s10 + $0x104c] ss:$16 sps:$4 sm:$0xff]  }
 0x260   : > { %10453 = vmatprep.subr.bf16.mxu0 %v15370_v0  ;;  %11478 = vmatprep.subr.bf16.mxu1 %v15373_v1  ;;  %v15452_v0 = vld [vmem:[%s17519_s10 + $0x1040] ss:$16 sps:$4 sm:$0xff]   ;;  %v15455_v1 = vld [vmem:[%s17519_s10 + $0x1048] ss:$16 sps:$4 sm:$0xff]  }
 0x263   : > { %10454 = vmatpush1.bf16.msra.mxu0 %v15368_v2  ;;  %11479 = vmatpush1.bf16.msra.mxu1 %v15371_v3  ;;  %v15460_v2 = vld [vmem:[%s17519_s10 + $0x1064] ss:$16 sps:$4 sm:$0xff]   ;;  %v15463_v3 = vld [vmem:[%s17519_s10 + $0x106c] ss:$16 sps:$4 sm:$0xff]  }
 0x264   : > { %10455 = vmatprep.subr.bf16.mxu0 %v15376_v4  ;;  %11480 = vmatprep.subr.bf16.mxu1 %v15379_v5  ;;  %v15458_v4 = vld [vmem:[%s17519_s10 + $0x1060] ss:$16 sps:$4 sm:$0xff]   ;;  %v15461_v5 = vld [vmem:[%s17519_s10 + $0x1068] ss:$16 sps:$4 sm:$0xff]  }
 0x267   : > { %10456 = vmatpush1.bf16.msra.mxu0 %v15374_v6  ;;  %11481 = vmatpush1.bf16.msra.mxu1 %v15377_v7  ;;  %v15466_v6 = vld [vmem:[%s17519_s10 + $0x1084] ss:$16 sps:$4 sm:$0xff]   ;;  %v15469_v7 = vld [vmem:[%s17519_s10 + $0x108c] ss:$16 sps:$4 sm:$0xff]  }
 0x268   : > { %10457 = vmatprep.subr.bf16.mxu0 %v15382_v8  ;;  %11482 = vmatprep.subr.bf16.mxu1 %v15385_v9  ;;  %v15464_v8 = vld [vmem:[%s17519_s10 + $0x1080] ss:$16 sps:$4 sm:$0xff]   ;;  %v15467_v9 = vld [vmem:[%s17519_s10 + $0x1088] ss:$16 sps:$4 sm:$0xff]  }
 0x26b   : > { %10458 = vmatpush1.bf16.msra.mxu0 %v15380_v10  ;;  %11483 = vmatpush1.bf16.msra.mxu1 %v15383_v11  ;;  %v15472_v10 = vld [vmem:[%s17519_s10 + $0x10a4] ss:$16 sps:$4 sm:$0xff]   ;;  %v15475_v11 = vld [vmem:[%s17519_s10 + $0x10ac] ss:$16 sps:$4 sm:$0xff]  }
 0x26c   : > { %10459 = vmatprep.subr.bf16.mxu0 %v15388_v12  ;;  %11484 = vmatprep.subr.bf16.mxu1 %v15391_v14  ;;  %v15470_v12 = vld [vmem:[%s17519_s10 + $0x10a0] ss:$16 sps:$4 sm:$0xff]   ;;  %v15473_v14 = vld [vmem:[%s17519_s10 + $0x10a8] ss:$16 sps:$4 sm:$0xff]  }
 0x26f   : > { %10460 = vmatpush1.bf16.msra.mxu0 %v15386_v16  ;;  %11485 = vmatpush1.bf16.msra.mxu1 %v15389_v52  ;;  %v15478_v16 = vld [vmem:[%s17519_s10 + $0x10c4] ss:$16 sps:$4 sm:$0xff]   ;;  %v15481_v52 = vld [vmem:[%s17519_s10 + $0x10cc] ss:$16 sps:$4 sm:$0xff]  }
 0x270   : > { %10461 = vmatprep.subr.bf16.mxu0 %v15394_v17  ;;  %11486 = vmatprep.subr.bf16.mxu1 %v15397_v18  ;;  %v15476_v17 = vld [vmem:[%s17519_s10 + $0x10c0] ss:$16 sps:$4 sm:$0xff]   ;;  %v15479_v18 = vld [vmem:[%s17519_s10 + $0x10c8] ss:$16 sps:$4 sm:$0xff]  }
 0x273   : > { %10462 = vmatpush1.bf16.msra.mxu0 %v15392_v19  ;;  %11487 = vmatpush1.bf16.msra.mxu1 %v15395_v20  ;;  %v15484_v19 = vld [vmem:[%s17519_s10 + $0x10e4] ss:$16 sps:$4 sm:$0xff]   ;;  %v15487_v20 = vld [vmem:[%s17519_s10 + $0x10ec] ss:$16 sps:$4 sm:$0xff]  }
 0x274   : > { %10463 = vmatprep.subr.bf16.mxu0 %v15400_v22  ;;  %11488 = vmatprep.subr.bf16.mxu1 %v15403_v23  ;;  %v15482_v22 = vld [vmem:[%s17519_s10 + $0x10e0] ss:$16 sps:$4 sm:$0xff]   ;;  %v15485_v23 = vld [vmem:[%s17519_s10 + $0x10e8] ss:$16 sps:$4 sm:$0xff]  }
 0x277   : > { %10464 = vmatpush1.bf16.msra.mxu0 %v15398_v24  ;;  %11489 = vmatpush1.bf16.msra.mxu1 %v15401_v26  ;;  %v15490_v24 = vld [vmem:[%s17519_s10 + $0x1104] ss:$16 sps:$4 sm:$0xff]   ;;  %v15493_v26 = vld [vmem:[%s17519_s10 + $0x110c] ss:$16 sps:$4 sm:$0xff]  }
 0x278   : > { %10465 = vmatprep.subr.bf16.mxu0 %v15406_v27  ;;  %11490 = vmatprep.subr.bf16.mxu1 %v15409_v28  ;;  %v15488_v27 = vld [vmem:[%s17519_s10 + $0x1100] ss:$16 sps:$4 sm:$0xff]   ;;  %v15491_v28 = vld [vmem:[%s17519_s10 + $0x1108] ss:$16 sps:$4 sm:$0xff]  }
 0x27b   : > { %10466 = vmatpush1.bf16.msra.mxu0 %v15404_v29  ;;  %11491 = vmatpush1.bf16.msra.mxu1 %v15407_v30  ;;  %v15496_v29 = vld [vmem:[%s17519_s10 + $0x1124] ss:$16 sps:$4 sm:$0xff]   ;;  %v15499_v30 = vld [vmem:[%s17519_s10 + $0x112c] ss:$16 sps:$4 sm:$0xff]  }
 0x27c   : > { %10467 = vmatprep.subr.bf16.mxu0 %v15412_v15  ;;  %11492 = vmatprep.subr.bf16.mxu1 %v15415_v31  ;;  %v15494_v15 = vld [vmem:[%s17519_s10 + $0x1120] ss:$16 sps:$4 sm:$0xff]   ;;  %v15497_v31 = vld [vmem:[%s17519_s10 + $0x1128] ss:$16 sps:$4 sm:$0xff]  }
 0x27f   : > { %10468 = vmatpush1.bf16.msra.mxu0 %v15410_v32  ;;  %11493 = vmatpush1.bf16.msra.mxu1 %v15413_v33  ;;  %v15502_v32 = vld [vmem:[%s17519_s10 + $0x1144] ss:$16 sps:$4 sm:$0xff]   ;;  %v15505_v33 = vld [vmem:[%s17519_s10 + $0x114c] ss:$16 sps:$4 sm:$0xff]  }
 0x280   : > { %10469 = vmatprep.subr.bf16.mxu0 %v15418_v25  ;;  %11494 = vmatprep.subr.bf16.mxu1 %v15421_v34  ;;  %v15500_v25 = vld [vmem:[%s17519_s10 + $0x1140] ss:$16 sps:$4 sm:$0xff]   ;;  %v15503_v34 = vld [vmem:[%s17519_s10 + $0x1148] ss:$16 sps:$4 sm:$0xff]  }
 0x283   : > { %10470 = vmatpush1.bf16.msra.mxu0 %v15416_v36  ;;  %11495 = vmatpush1.bf16.msra.mxu1 %v15419_v37  ;;  %v15508_v36 = vld [vmem:[%s17519_s10 + $0x1164] ss:$16 sps:$4 sm:$0xff]   ;;  %v15511_v37 = vld [vmem:[%s17519_s10 + $0x116c] ss:$16 sps:$4 sm:$0xff]  }
 0x284   : > { %10471 = vmatprep.subr.bf16.mxu0 %v15424_v39  ;;  %11496 = vmatprep.subr.bf16.mxu1 %v15427_v40  ;;  %v15506_v39 = vld [vmem:[%s17519_s10 + $0x1160] ss:$16 sps:$4 sm:$0xff]   ;;  %v15509_v40 = vld [vmem:[%s17519_s10 + $0x1168] ss:$16 sps:$4 sm:$0xff]  }
 0x287   : > { %10472 = vmatpush1.bf16.msra.mxu0 %v15422_v21  ;;  %11497 = vmatpush1.bf16.msra.mxu1 %v15425_v41  ;;  %v15514_v21 = vld [vmem:[%s17519_s10 + $0x1184] ss:$16 sps:$4 sm:$0xff]   ;;  %v15517_v41 = vld [vmem:[%s17519_s10 + $0x118c] ss:$16 sps:$4 sm:$0xff]  }
 0x288   : > { %10473 = vmatprep.subr.bf16.mxu0 %v15430_v43  ;;  %11498 = vmatprep.subr.bf16.mxu1 %v15433_v44  ;;  %v15512_v43 = vld [vmem:[%s17519_s10 + $0x1180] ss:$16 sps:$4 sm:$0xff]   ;;  %v15515_v44 = vld [vmem:[%s17519_s10 + $0x1188] ss:$16 sps:$4 sm:$0xff]  }
 0x28b   : > { %10474 = vmatpush1.bf16.msra.mxu0 %v15428_v45  ;;  %11499 = vmatpush1.bf16.msra.mxu1 %v15431_v46  ;;  %v15520_v45 = vld [vmem:[%s17519_s10 + $0x11a4] ss:$16 sps:$4 sm:$0xff]   ;;  %v15523_v46 = vld [vmem:[%s17519_s10 + $0x11ac] ss:$16 sps:$4 sm:$0xff]  }
 0x28c   : > { %10475 = vmatprep.subr.bf16.mxu0 %v15436_v47  ;;  %11500 = vmatprep.subr.bf16.mxu1 %v15439_v50  ;;  %v15518_v47 = vld [vmem:[%s17519_s10 + $0x11a0] ss:$16 sps:$4 sm:$0xff]   ;;  %v15521_v50 = vld [vmem:[%s17519_s10 + $0x11a8] ss:$16 sps:$4 sm:$0xff]  }
 0x28f   : > { %10476 = vmatpush1.bf16.msra.mxu0 %v15434_v51  ;;  %11501 = vmatpush1.bf16.msra.mxu1 %v15437_v53  ;;  %v15526_v51 = vld [vmem:[%s17519_s10 + $0x11c4] ss:$16 sps:$4 sm:$0xff]   ;;  %v15529_v53 = vld [vmem:[%s17519_s10 + $0x11cc] ss:$16 sps:$4 sm:$0xff]  }
 0x290   : > { %10486 = vmatprep.subr.bf16.mxu0 %v15442_v54  ;;  %11511 = vmatprep.subr.bf16.mxu1 %v15445_v55  ;;  %v15524_v54 = vld [vmem:[%s17519_s10 + $0x11c0] ss:$16 sps:$4 sm:$0xff]   ;;  %v15527_v55 = vld [vmem:[%s17519_s10 + $0x11c8] ss:$16 sps:$4 sm:$0xff]  }
 0x292   : > { %10478 = vmatmul.mubr.bf16.vlgmr.msra.gmra.mrb[0].mxu0 %v2056_v56  ;;  %11503 = vmatmul.mubr.bf16.vlgmr.msra.gmra.mrb[0].mxu1 %v2056_v56  ;;  %v15535_v56 = vld [vmem:[%s17519_s10 + $0x11ec] ss:$16 sps:$4 sm:$0xff]  }
 0x293   : > { %10487 = vmatpush1.bf16.msra.mxu0 %v15440_v57  ;;  %11512 = vmatpush1.bf16.msra.mxu1 %v15443_v58  ;;  %v15530_v57 = vld [vmem:[%s17519_s10 + $0x11e0] ss:$16 sps:$4 sm:$0xff]   ;;  %v15533_v58 = vld [vmem:[%s17519_s10 + $0x11e8] ss:$16 sps:$4 sm:$0xff]  }
 0x294   : > { %10488 = vmatprep.subr.bf16.mxu0 %v15448_v48  ;;  %11513 = vmatprep.subr.bf16.mxu1 %v15451_v59  ;;  %v15538_v48 = vld [vmem:[%s17519_s10 + $0x1204] ss:$16 sps:$4 sm:$0xff]   ;;  %v15541_v59 = vld [vmem:[%s17519_s10 + $0x120c] ss:$16 sps:$4 sm:$0xff]  }
 0x295   : > { %10518 = vmatprep.mubr.bf16.mxu0 %v18151_v60  ;;  %11543 = vmatprep.mubr.bf16.mxu1 %v18151_v60 }
 0x297   : > { %10489 = vmatpush1.bf16.msra.mxu0 %v15446_v13  ;;  %11514 = vmatpush1.bf16.msra.mxu1 %v15449_v61  ;;  %v18217_v13 = vrot.slane %v18132_v35, %v17585_v49  ;;  %v15536_v61 = vld [vmem:[%s17519_s10 + $0x1200] ss:$16 sps:$4 sm:$0xff]  }
 0x298   : > { %10490 = vmatprep.subr.bf16.mxu0 %v15454_v62  ;;  %11515 = vmatprep.subr.bf16.mxu1 %v15457_v63  ;;  %v15539_v62 = vld [vmem:[%s17519_s10 + $0x1208] ss:$16 sps:$4 sm:$0xff]   ;;  %v15544_v63 = vld [vmem:[%s17519_s10 + $0x1224] ss:$16 sps:$4 sm:$0xff]   ;;  %v15542_v35 = vld [vmem:[%s17519_s10 + $0x1220] ss:$16 sps:$4 sm:$0xff]  }
 0x29b   : > { %10491 = vmatpush1.bf16.msra.mxu0 %v15452_v0  ;;  %11516 = vmatpush1.bf16.msra.mxu1 %v15455_v1  ;;  %v15547_v0 = vld [vmem:[%s17519_s10 + $0x122c] ss:$16 sps:$4 sm:$0xff]   ;;  %v2106_v1 = vcombine.high %v18151_v60, %v18151_v60  ;;  %v15548_v60 = vld [vmem:[%s17519_s10 + $0x1240] ss:$16 sps:$4 sm:$0xff]  }
 0x29c   : > { %10492 = vmatprep.subr.bf16.mxu0 %v15460_v2  ;;  %11517 = vmatprep.subr.bf16.mxu1 %v15463_v3  ;;  %v15545_v2 = vld [vmem:[%s17519_s10 + $0x1228] ss:$16 sps:$4 sm:$0xff]   ;;  %v15550_v3 = vld [vmem:[%s17519_s10 + $0x1244] ss:$16 sps:$4 sm:$0xff]  }
 0x29f   : > { %10493 = vmatpush1.bf16.msra.mxu0 %v15458_v4  ;;  %11518 = vmatpush1.bf16.msra.mxu1 %v15461_v5  ;;  %v15553_v4 = vld [vmem:[%s17519_s10 + $0x124c] ss:$16 sps:$4 sm:$0xff]   ;;  %v15551_v5 = vld [vmem:[%s17519_s10 + $0x1248] ss:$16 sps:$4 sm:$0xff]  }
 0x2a0   : > { %10494 = vmatprep.subr.bf16.mxu0 %v15466_v6  ;;  %11519 = vmatprep.subr.bf16.mxu1 %v15469_v7  ;;  %v15556_v6 = vld [vmem:[%s17519_s10 + $0x1264] ss:$16 sps:$4 sm:$0xff]   ;;  %v15559_v7 = vld [vmem:[%s17519_s10 + $0x126c] ss:$16 sps:$4 sm:$0xff]  }
 0x2a3   : > { %10495 = vmatpush1.bf16.msra.mxu0 %v15464_v8  ;;  %11520 = vmatpush1.bf16.msra.mxu1 %v15467_v9  ;;  %v15554_v8 = vld [vmem:[%s17519_s10 + $0x1260] ss:$16 sps:$4 sm:$0xff]   ;;  %v15557_v9 = vld [vmem:[%s17519_s10 + $0x1268] ss:$16 sps:$4 sm:$0xff]  }
 0x2a4   : > { %10496 = vmatprep.subr.bf16.mxu0 %v15472_v10  ;;  %11521 = vmatprep.subr.bf16.mxu1 %v15475_v11  ;;  %v15562_v10 = vld [vmem:[%s17519_s10 + $0x1284] ss:$16 sps:$4 sm:$0xff]   ;;  %v15565_v11 = vld [vmem:[%s17519_s10 + $0x128c] ss:$16 sps:$4 sm:$0xff]  }
 0x2a7   : > { %10497 = vmatpush1.bf16.msra.mxu0 %v15470_v12  ;;  %11522 = vmatpush1.bf16.msra.mxu1 %v15473_v14  ;;  %v15560_v12 = vld [vmem:[%s17519_s10 + $0x1280] ss:$16 sps:$4 sm:$0xff]   ;;  %v15563_v14 = vld [vmem:[%s17519_s10 + $0x1288] ss:$16 sps:$4 sm:$0xff]  }
 0x2a8   : > { %10498 = vmatprep.subr.bf16.mxu0 %v15478_v16  ;;  %11523 = vmatprep.subr.bf16.mxu1 %v15481_v52  ;;  %v15568_v16 = vld [vmem:[%s17519_s10 + $0x12a4] ss:$16 sps:$4 sm:$0xff]   ;;  %v15571_v52 = vld [vmem:[%s17519_s10 + $0x12ac] ss:$16 sps:$4 sm:$0xff]  }
 0x2ab   : > { %10499 = vmatpush1.bf16.msra.mxu0 %v15476_v17  ;;  %11524 = vmatpush1.bf16.msra.mxu1 %v15479_v18  ;;  %v15566_v17 = vld [vmem:[%s17519_s10 + $0x12a0] ss:$16 sps:$4 sm:$0xff]   ;;  %v15569_v18 = vld [vmem:[%s17519_s10 + $0x12a8] ss:$16 sps:$4 sm:$0xff]  }
 0x2ac   : > { %10500 = vmatprep.subr.bf16.mxu0 %v15484_v19  ;;  %11525 = vmatprep.subr.bf16.mxu1 %v15487_v20  ;;  %v15574_v19 = vld [vmem:[%s17519_s10 + $0x12c4] ss:$16 sps:$4 sm:$0xff]   ;;  %v15577_v20 = vld [vmem:[%s17519_s10 + $0x12cc] ss:$16 sps:$4 sm:$0xff]  }
 0x2af   : > { %10501 = vmatpush1.bf16.msra.mxu0 %v15482_v22  ;;  %11526 = vmatpush1.bf16.msra.mxu1 %v15485_v23  ;;  %v15572_v22 = vld [vmem:[%s17519_s10 + $0x12c0] ss:$16 sps:$4 sm:$0xff]   ;;  %v15575_v23 = vld [vmem:[%s17519_s10 + $0x12c8] ss:$16 sps:$4 sm:$0xff]  }
 0x2b0   : > { %10502 = vmatprep.subr.bf16.mxu0 %v15490_v24  ;;  %11527 = vmatprep.subr.bf16.mxu1 %v15493_v26  ;;  %v15580_v24 = vld [vmem:[%s17519_s10 + $0x12e4] ss:$16 sps:$4 sm:$0xff]   ;;  %v15583_v26 = vld [vmem:[%s17519_s10 + $0x12ec] ss:$16 sps:$4 sm:$0xff]  }
 0x2b3   : > { %10503 = vmatpush1.bf16.msra.mxu0 %v15488_v27  ;;  %11528 = vmatpush1.bf16.msra.mxu1 %v15491_v28  ;;  %v15578_v27 = vld [vmem:[%s17519_s10 + $0x12e0] ss:$16 sps:$4 sm:$0xff]   ;;  %v15581_v28 = vld [vmem:[%s17519_s10 + $0x12e8] ss:$16 sps:$4 sm:$0xff]  }
 0x2b4   : > { %10504 = vmatprep.subr.bf16.mxu0 %v15496_v29  ;;  %11529 = vmatprep.subr.bf16.mxu1 %v15499_v30  ;;  %v15586_v29 = vld [vmem:[%s17519_s10 + $0x1304] ss:$16 sps:$4 sm:$0xff]   ;;  %v15589_v30 = vld [vmem:[%s17519_s10 + $0x130c] ss:$16 sps:$4 sm:$0xff]  }
 0x2b7   : > { %10505 = vmatpush1.bf16.msra.mxu0 %v15494_v15  ;;  %11530 = vmatpush1.bf16.msra.mxu1 %v15497_v31  ;;  %v15584_v15 = vld [vmem:[%s17519_s10 + $0x1300] ss:$16 sps:$4 sm:$0xff]   ;;  %v15587_v31 = vld [vmem:[%s17519_s10 + $0x1308] ss:$16 sps:$4 sm:$0xff]  }
 0x2b8   : > { %10506 = vmatprep.subr.bf16.mxu0 %v15502_v32  ;;  %11531 = vmatprep.subr.bf16.mxu1 %v15505_v33  ;;  %v15592_v32 = vld [vmem:[%s17519_s10 + $0x1324] ss:$16 sps:$4 sm:$0xff]   ;;  %v15595_v33 = vld [vmem:[%s17519_s10 + $0x132c] ss:$16 sps:$4 sm:$0xff]  }
 0x2bb   : > { %10507 = vmatpush1.bf16.msra.mxu0 %v15500_v25  ;;  %11532 = vmatpush1.bf16.msra.mxu1 %v15503_v34  ;;  %v15590_v25 = vld [vmem:[%s17519_s10 + $0x1320] ss:$16 sps:$4 sm:$0xff]   ;;  %v15593_v34 = vld [vmem:[%s17519_s10 + $0x1328] ss:$16 sps:$4 sm:$0xff]  }
 0x2bc   : > { %10508 = vmatprep.subr.bf16.mxu0 %v15508_v36  ;;  %11533 = vmatprep.subr.bf16.mxu1 %v15511_v37  ;;  %v15598_v36 = vld [vmem:[%s17519_s10 + $0x1344] ss:$16 sps:$4 sm:$0xff]   ;;  %v15601_v37 = vld [vmem:[%s17519_s10 + $0x134c] ss:$16 sps:$4 sm:$0xff]  }
 0x2bf   : > { %10509 = vmatpush1.bf16.msra.mxu0 %v15506_v39  ;;  %11534 = vmatpush1.bf16.msra.mxu1 %v15509_v40  ;;  %v15596_v39 = vld [vmem:[%s17519_s10 + $0x1340] ss:$16 sps:$4 sm:$0xff]   ;;  %v15599_v40 = vld [vmem:[%s17519_s10 + $0x1348] ss:$16 sps:$4 sm:$0xff]  }
 0x2c0   : > { %10510 = vmatprep.subr.bf16.mxu0 %v15514_v21  ;;  %11535 = vmatprep.subr.bf16.mxu1 %v15517_v41  ;;  %v15604_v21 = vld [vmem:[%s17519_s10 + $0x1364] ss:$16 sps:$4 sm:$0xff]   ;;  %v15607_v41 = vld [vmem:[%s17519_s10 + $0x136c] ss:$16 sps:$4 sm:$0xff]  }
 0x2c3   : > { %10511 = vmatpush1.bf16.msra.mxu0 %v15512_v43  ;;  %11536 = vmatpush1.bf16.msra.mxu1 %v15515_v44  ;;  %v15602_v43 = vld [vmem:[%s17519_s10 + $0x1360] ss:$16 sps:$4 sm:$0xff]   ;;  %v15605_v44 = vld [vmem:[%s17519_s10 + $0x1368] ss:$16 sps:$4 sm:$0xff]  }
 0x2c4   : > { %10512 = vmatprep.subr.bf16.mxu0 %v15520_v45  ;;  %11537 = vmatprep.subr.bf16.mxu1 %v15523_v46  ;;  %v15610_v45 = vld [vmem:[%s17519_s10 + $0x1384] ss:$16 sps:$4 sm:$0xff]   ;;  %v15613_v46 = vld [vmem:[%s17519_s10 + $0x138c] ss:$16 sps:$4 sm:$0xff]  }
 0x2c7   : > { %10513 = vmatpush1.bf16.msra.mxu0 %v15518_v47  ;;  %11538 = vmatpush1.bf16.msra.mxu1 %v15521_v50  ;;  %v15608_v47 = vld [vmem:[%s17519_s10 + $0x1380] ss:$16 sps:$4 sm:$0xff]   ;;  %v15611_v50 = vld [vmem:[%s17519_s10 + $0x1388] ss:$16 sps:$4 sm:$0xff]  }
 0x2c8   : > { %10514 = vmatprep.subr.bf16.mxu0 %v15526_v51  ;;  %11539 = vmatprep.subr.bf16.mxu1 %v15529_v53  ;;  %v15616_v51 = vld [vmem:[%s17519_s10 + $0x13a4] ss:$16 sps:$4 sm:$0xff]   ;;  %v15619_v53 = vld [vmem:[%s17519_s10 + $0x13ac] ss:$16 sps:$4 sm:$0xff]  }
 0x2cb   : > { %10515 = vmatpush1.bf16.msra.mxu0 %v15524_v54  ;;  %11540 = vmatpush1.bf16.msra.mxu1 %v15527_v55  ;;  %v15614_v54 = vld [vmem:[%s17519_s10 + $0x13a0] ss:$16 sps:$4 sm:$0xff]   ;;  %v15617_v55 = vld [vmem:[%s17519_s10 + $0x13a8] ss:$16 sps:$4 sm:$0xff]  }
 0x2cc   : > { %10516 = vmatprep.subr.bf16.mxu0 %v15532_v38  ;;  %11541 = vmatprep.subr.bf16.mxu1 %v15535_v56  ;;  %v15622_v38 = vld [vmem:[%s17519_s10 + $0x13c4] ss:$16 sps:$4 sm:$0xff]   ;;  %v15625_v56 = vld [vmem:[%s17519_s10 + $0x13cc] ss:$16 sps:$4 sm:$0xff]  }
 0x2cf   : > { %10517 = vmatpush1.bf16.msra.mxu0 %v15530_v57  ;;  %11542 = vmatpush1.bf16.msra.mxu1 %v15533_v58  ;;  %v17061_v57 = vld [vmem:[%s19463_s0 + $0x10] sm:$0xff] }
 0x2d0   : > { %10527 = vmatprep.subr.bf16.mxu0 %v15538_v48  ;;  %11552 = vmatprep.subr.bf16.mxu1 %v15541_v59  ;;  %v2059_v58 = vcombine.high %v17061_v57, %v17061_v57  ;;  %v15620_v48 = vld [vmem:[%s17519_s10 + $0x13c0] ss:$16 sps:$4 sm:$0xff]   ;;  %v15623_v59 = vld [vmem:[%s17519_s10 + $0x13c8] ss:$16 sps:$4 sm:$0xff]  }
 0x2d1   : > { %v15704_v57 = vld [vmem:[%s17519_s10 + $0x1580] ss:$16 sps:$4 sm:$0xff]  }
 0x2d2   : > { %10519 = vmatmul.mubr.bf16.vlgmr.msra.gmra.mrb[0].mxu0 %v18217_v13  ;;  %11544 = vmatmul.mubr.bf16.vlgmr.msra.gmra.mrb[0].mxu1 %v18217_v13 }
 0x2d3   : > { %10528 = vmatpush1.bf16.msra.mxu0 %v15536_v61  ;;  %11553 = vmatpush1.bf16.msra.mxu1 %v15539_v62  ;;  %v15628_v61 = vld [vmem:[%s17519_s10 + $0x13e4] ss:$16 sps:$4 sm:$0xff]   ;;  %v15631_v62 = vld [vmem:[%s17519_s10 + $0x13ec] ss:$16 sps:$4 sm:$0xff]  }
 0x2d4   : > { %10529 = vmatprep.subr.bf16.mxu0 %v15544_v63  ;;  %11554 = vmatprep.subr.bf16.mxu1 %v15547_v0  ;;  %v18287_v63 = vrot.slane %v2059_v58, %v17585_v49  ;;  %v15626_v0 = vld [vmem:[%s17519_s10 + $0x13e0] ss:$16 sps:$4 sm:$0xff]   ;;  %v15707_v58 = vld [vmem:[%s17519_s10 + $0x1588] ss:$16 sps:$4 sm:$0xff]  }
 0x2d5   : > { %10559 = vmatprep.mubr.bf16.mxu0 %v2106_v1  ;;  %11584 = vmatprep.mubr.bf16.mxu1 %v2106_v1  ;;  %v15629_v1 = vld [vmem:[%s17519_s10 + $0x13e8] ss:$16 sps:$4 sm:$0xff]  }
 0x2d7   : > { %10530 = vmatpush1.bf16.msra.mxu0 %v15542_v35  ;;  %11555 = vmatpush1.bf16.msra.mxu1 %v15545_v2  ;;  %v15634_v35 = vld [vmem:[%s17519_s10 + $0x1404] ss:$16 sps:$4 sm:$0xff]   ;;  %v15637_v2 = vld [vmem:[%s17519_s10 + $0x140c] ss:$16 sps:$4 sm:$0xff]  }
 0x2d8   : > { %10531 = vmatprep.subr.bf16.mxu0 %v15550_v3  ;;  %11556 = vmatprep.subr.bf16.mxu1 %v15553_v4  ;;  %v2075_v3 = vcombine.high %v18287_v63, %v18287_v63  ;;  %v2104_v4 = vcombine.high %v18217_v13, %v18217_v13  ;;  %v15638_v13 = vld [vmem:[%s17519_s10 + $0x1420] ss:$16 sps:$4 sm:$0xff]  }
 0x2db   : > { %10532 = vmatpush1.bf16.msra.mxu0 %v15548_v60  ;;  %11557 = vmatpush1.bf16.msra.mxu1 %v15551_v5  ;;  %v15632_v60 = vld [vmem:[%s17519_s10 + $0x1400] ss:$16 sps:$4 sm:$0xff]   ;;  %v15635_v5 = vld [vmem:[%s17519_s10 + $0x1408] ss:$16 sps:$4 sm:$0xff]  }
 0x2dc   : > { %10533 = vmatprep.subr.bf16.mxu0 %v15556_v6  ;;  %11558 = vmatprep.subr.bf16.mxu1 %v15559_v7  ;;  %v15640_v6 = vld [vmem:[%s17519_s10 + $0x1424] ss:$16 sps:$4 sm:$0xff]   ;;  %v15643_v7 = vld [vmem:[%s17519_s10 + $0x142c] ss:$16 sps:$4 sm:$0xff]  }
 0x2df   : > { %10534 = vmatpush1.bf16.msra.mxu0 %v15554_v8  ;;  %11559 = vmatpush1.bf16.msra.mxu1 %v15557_v9  ;;  %v18302_v8 = vrot.slane %v2075_v3, %v17585_v49  ;;  %v15641_v9 = vld [vmem:[%s17519_s10 + $0x1428] ss:$16 sps:$4 sm:$0xff]   ;;  %v15724_v3 = vld [vmem:[%s17519_s10 + $0x15e4] ss:$16 sps:$4 sm:$0xff]  }
 0x2e0   : > { %10535 = vmatprep.subr.bf16.mxu0 %v15562_v10  ;;  %11560 = vmatprep.subr.bf16.mxu1 %v15565_v11  ;;  %v15646_v10 = vld [vmem:[%s17519_s10 + $0x1444] ss:$16 sps:$4 sm:$0xff]   ;;  %v15649_v11 = vld [vmem:[%s17519_s10 + $0x144c] ss:$16 sps:$4 sm:$0xff]  }
 0x2e3   : > { %10536 = vmatpush1.bf16.msra.mxu0 %v15560_v12  ;;  %11561 = vmatpush1.bf16.msra.mxu1 %v15563_v14  ;;  %v15644_v12 = vld [vmem:[%s17519_s10 + $0x1440] ss:$16 sps:$4 sm:$0xff]   ;;  %v15647_v14 = vld [vmem:[%s17519_s10 + $0x1448] ss:$16 sps:$4 sm:$0xff]  }
 0x2e4   : > { %10537 = vmatprep.subr.bf16.mxu0 %v15568_v16  ;;  %11562 = vmatprep.subr.bf16.mxu1 %v15571_v52  ;;  %v15652_v16 = vld [vmem:[%s17519_s10 + $0x1464] ss:$16 sps:$4 sm:$0xff]   ;;  %v15655_v52 = vld [vmem:[%s17519_s10 + $0x146c] ss:$16 sps:$4 sm:$0xff]  }
 0x2e7   : > { %10538 = vmatpush1.bf16.msra.mxu0 %v15566_v17  ;;  %11563 = vmatpush1.bf16.msra.mxu1 %v15569_v18  ;;  %v15650_v17 = vld [vmem:[%s17519_s10 + $0x1460] ss:$16 sps:$4 sm:$0xff]   ;;  %v15653_v18 = vld [vmem:[%s17519_s10 + $0x1468] ss:$16 sps:$4 sm:$0xff]  }
 0x2e8   : > { %10539 = vmatprep.subr.bf16.mxu0 %v15574_v19  ;;  %11564 = vmatprep.subr.bf16.mxu1 %v15577_v20  ;;  %v15658_v19 = vld [vmem:[%s17519_s10 + $0x1484] ss:$16 sps:$4 sm:$0xff]   ;;  %v15661_v20 = vld [vmem:[%s17519_s10 + $0x148c] ss:$16 sps:$4 sm:$0xff]  }
 0x2eb   : > { %10540 = vmatpush1.bf16.msra.mxu0 %v15572_v22  ;;  %11565 = vmatpush1.bf16.msra.mxu1 %v15575_v23  ;;  %v15656_v22 = vld [vmem:[%s17519_s10 + $0x1480] ss:$16 sps:$4 sm:$0xff]   ;;  %v15659_v23 = vld [vmem:[%s17519_s10 + $0x1488] ss:$16 sps:$4 sm:$0xff]  }
 0x2ec   : > { %10541 = vmatprep.subr.bf16.mxu0 %v15580_v24  ;;  %11566 = vmatprep.subr.bf16.mxu1 %v15583_v26  ;;  %v15664_v24 = vld [vmem:[%s17519_s10 + $0x14a4] ss:$16 sps:$4 sm:$0xff]   ;;  %v15667_v26 = vld [vmem:[%s17519_s10 + $0x14ac] ss:$16 sps:$4 sm:$0xff]  }
 0x2ef   : > { %10542 = vmatpush1.bf16.msra.mxu0 %v15578_v27  ;;  %11567 = vmatpush1.bf16.msra.mxu1 %v15581_v28  ;;  %v15662_v27 = vld [vmem:[%s17519_s10 + $0x14a0] ss:$16 sps:$4 sm:$0xff]   ;;  %v15665_v28 = vld [vmem:[%s17519_s10 + $0x14a8] ss:$16 sps:$4 sm:$0xff]  }
 0x2f0   : > { %10543 = vmatprep.subr.bf16.mxu0 %v15586_v29  ;;  %11568 = vmatprep.subr.bf16.mxu1 %v15589_v30  ;;  %v15670_v29 = vld [vmem:[%s17519_s10 + $0x14c4] ss:$16 sps:$4 sm:$0xff]   ;;  %v15673_v30 = vld [vmem:[%s17519_s10 + $0x14cc] ss:$16 sps:$4 sm:$0xff]  }
 0x2f3   : > { %10544 = vmatpush1.bf16.msra.mxu0 %v15584_v15  ;;  %11569 = vmatpush1.bf16.msra.mxu1 %v15587_v31  ;;  %v15668_v15 = vld [vmem:[%s17519_s10 + $0x14c0] ss:$16 sps:$4 sm:$0xff]   ;;  %v15671_v31 = vld [vmem:[%s17519_s10 + $0x14c8] ss:$16 sps:$4 sm:$0xff]  }
 0x2f4   : > { %10545 = vmatprep.subr.bf16.mxu0 %v15592_v32  ;;  %11570 = vmatprep.subr.bf16.mxu1 %v15595_v33  ;;  %v15676_v32 = vld [vmem:[%s17519_s10 + $0x14e4] ss:$16 sps:$4 sm:$0xff]   ;;  %v15679_v33 = vld [vmem:[%s17519_s10 + $0x14ec] ss:$16 sps:$4 sm:$0xff]  }
 0x2f7   : > { %10546 = vmatpush1.bf16.msra.mxu0 %v15590_v25  ;;  %11571 = vmatpush1.bf16.msra.mxu1 %v15593_v34  ;;  %v15674_v25 = vld [vmem:[%s17519_s10 + $0x14e0] ss:$16 sps:$4 sm:$0xff]   ;;  %v15677_v34 = vld [vmem:[%s17519_s10 + $0x14e8] ss:$16 sps:$4 sm:$0xff]  }
 0x2f8   : > { %10547 = vmatprep.subr.bf16.mxu0 %v15598_v36  ;;  %11572 = vmatprep.subr.bf16.mxu1 %v15601_v37  ;;  %v15682_v36 = vld [vmem:[%s17519_s10 + $0x1504] ss:$16 sps:$4 sm:$0xff]   ;;  %v15685_v37 = vld [vmem:[%s17519_s10 + $0x150c] ss:$16 sps:$4 sm:$0xff]  }
 0x2fb   : > { %10548 = vmatpush1.bf16.msra.mxu0 %v15596_v39  ;;  %11573 = vmatpush1.bf16.msra.mxu1 %v15599_v40  ;;  %v15680_v39 = vld [vmem:[%s17519_s10 + $0x1500] ss:$16 sps:$4 sm:$0xff]   ;;  %v15683_v40 = vld [vmem:[%s17519_s10 + $0x1508] ss:$16 sps:$4 sm:$0xff]  }
 0x2fc   : > { %10549 = vmatprep.subr.bf16.mxu0 %v15604_v21  ;;  %11574 = vmatprep.subr.bf16.mxu1 %v15607_v41  ;;  %v15688_v21 = vld [vmem:[%s17519_s10 + $0x1524] ss:$16 sps:$4 sm:$0xff]   ;;  %v15691_v41 = vld [vmem:[%s17519_s10 + $0x152c] ss:$16 sps:$4 sm:$0xff]  }
 0x2ff   : > { %10550 = vmatpush1.bf16.msra.mxu0 %v15602_v43  ;;  %11575 = vmatpush1.bf16.msra.mxu1 %v15605_v44  ;;  %v15686_v43 = vld [vmem:[%s17519_s10 + $0x1520] ss:$16 sps:$4 sm:$0xff]   ;;  %v15689_v44 = vld [vmem:[%s17519_s10 + $0x1528] ss:$16 sps:$4 sm:$0xff]  }
 0x300   : > { %10551 = vmatprep.subr.bf16.mxu0 %v15610_v45  ;;  %11576 = vmatprep.subr.bf16.mxu1 %v15613_v46  ;;  %v15694_v45 = vld [vmem:[%s17519_s10 + $0x1544] ss:$16 sps:$4 sm:$0xff]   ;;  %v15697_v46 = vld [vmem:[%s17519_s10 + $0x154c] ss:$16 sps:$4 sm:$0xff]  }
 0x303   : > { %10552 = vmatpush1.bf16.msra.mxu0 %v15608_v47  ;;  %11577 = vmatpush1.bf16.msra.mxu1 %v15611_v50  ;;  %v15692_v47 = vld [vmem:[%s17519_s10 + $0x1540] ss:$16 sps:$4 sm:$0xff]   ;;  %v15695_v50 = vld [vmem:[%s17519_s10 + $0x1548] ss:$16 sps:$4 sm:$0xff]  }
 0x304   : > { %10553 = vmatprep.subr.bf16.mxu0 %v15616_v51  ;;  %11578 = vmatprep.subr.bf16.mxu1 %v15619_v53  ;;  %v15700_v51 = vld [vmem:[%s17519_s10 + $0x1564] ss:$16 sps:$4 sm:$0xff]   ;;  %v15703_v53 = vld [vmem:[%s17519_s10 + $0x156c] ss:$16 sps:$4 sm:$0xff]  }
 0x307   : > { %10554 = vmatpush1.bf16.msra.mxu0 %v15614_v54  ;;  %11579 = vmatpush1.bf16.msra.mxu1 %v15617_v55  ;;  %v15698_v54 = vld [vmem:[%s17519_s10 + $0x1560] ss:$16 sps:$4 sm:$0xff]   ;;  %v15701_v55 = vld [vmem:[%s17519_s10 + $0x1568] ss:$16 sps:$4 sm:$0xff]  }
 0x308   : > { %10555 = vmatprep.subr.bf16.mxu0 %v15622_v38  ;;  %11580 = vmatprep.subr.bf16.mxu1 %v15625_v56  ;;  %v15706_v38 = vld [vmem:[%s17519_s10 + $0x1584] ss:$16 sps:$4 sm:$0xff]   ;;  %v15709_v56 = vld [vmem:[%s17519_s10 + $0x158c] ss:$16 sps:$4 sm:$0xff]  }
 0x30b   : > { %10556 = vmatpush1.bf16.msra.mxu0 %v15620_v48  ;;  %11581 = vmatpush1.bf16.msra.mxu1 %v15623_v59  ;;  %v15712_v48 = vld [vmem:[%s17519_s10 + $0x15a4] ss:$16 sps:$4 sm:$0xff]   ;;  %v15715_v59 = vld [vmem:[%s17519_s10 + $0x15ac] ss:$16 sps:$4 sm:$0xff]  }
 0x30c   : > { %10557 = vmatprep.subr.bf16.mxu0 %v15628_v61  ;;  %11582 = vmatprep.subr.bf16.mxu1 %v15631_v62  ;;  %v15710_v61 = vld [vmem:[%s17519_s10 + $0x15a0] ss:$16 sps:$4 sm:$0xff]   ;;  %v15713_v62 = vld [vmem:[%s17519_s10 + $0x15a8] ss:$16 sps:$4 sm:$0xff]  }
 0x30f   : > { %10558 = vmatpush1.bf16.msra.mxu0 %v15626_v0  ;;  %11583 = vmatpush1.bf16.msra.mxu1 %v15629_v1  ;;  %v15718_v0 = vld [vmem:[%s17519_s10 + $0x15c4] ss:$16 sps:$4 sm:$0xff]   ;;  %v15721_v1 = vld [vmem:[%s17519_s10 + $0x15cc] ss:$16 sps:$4 sm:$0xff]  }
 0x310   : > { %10568 = vmatprep.subr.bf16.mxu0 %v15634_v35  ;;  %11593 = vmatprep.subr.bf16.mxu1 %v15637_v2  ;;  %v15716_v35 = vld [vmem:[%s17519_s10 + $0x15c0] ss:$16 sps:$4 sm:$0xff]   ;;  %v15719_v2 = vld [vmem:[%s17519_s10 + $0x15c8] ss:$16 sps:$4 sm:$0xff]  }
 0x312   : > { %10560 = vmatmul.mubr.bf16.vlgmr.msra.gmra.mrb[0].mxu0 %v2104_v4  ;;  %11585 = vmatmul.mubr.bf16.vlgmr.msra.gmra.mrb[0].mxu1 %v2104_v4  ;;  %v15727_v4 = vld [vmem:[%s17519_s10 + $0x15ec] ss:$16 sps:$4 sm:$0xff]  }
 0x313   : > { %10569 = vmatpush1.bf16.msra.mxu0 %v15632_v60  ;;  %11594 = vmatpush1.bf16.msra.mxu1 %v15635_v5  ;;  %v15722_v60 = vld [vmem:[%s17519_s10 + $0x15e0] ss:$16 sps:$4 sm:$0xff]   ;;  %v15725_v5 = vld [vmem:[%s17519_s10 + $0x15e8] ss:$16 sps:$4 sm:$0xff]  }
 0x314   : > { %10570 = vmatprep.subr.bf16.mxu0 %v15640_v6  ;;  %11595 = vmatprep.subr.bf16.mxu1 %v15643_v7  ;;  %v15731_v6 = vld [vmem:[%s17519_s10 + $0x1604] ss:$16 sps:$4 sm:$0xff]   ;;  %v15734_v7 = vld [vmem:[%s17519_s10 + $0x160c] ss:$16 sps:$4 sm:$0xff]  }
 0x315   : > { %10600 = vmatprep.mubr.bf16.mxu0 %v18302_v8  ;;  %11625 = vmatprep.mubr.bf16.mxu1 %v18302_v8 }
 0x317   : > { %10571 = vmatpush1.bf16.msra.mxu0 %v15638_v13  ;;  %11596 = vmatpush1.bf16.msra.mxu1 %v15641_v9  ;;  %v18368_v13 = vrot.slane %v18287_v63, %v17585_v49  ;;  %v15729_v9 = vld [vmem:[%s17519_s10 + $0x1600] ss:$16 sps:$4 sm:$0xff]  }
 0x318   : > { %10572 = vmatprep.subr.bf16.mxu0 %v15646_v10  ;;  %11597 = vmatprep.subr.bf16.mxu1 %v15649_v11  ;;  %v15732_v10 = vld [vmem:[%s17519_s10 + $0x1608] ss:$16 sps:$4 sm:$0xff]   ;;  %v15737_v11 = vld [vmem:[%s17519_s10 + $0x1624] ss:$16 sps:$4 sm:$0xff]   ;;  %v15735_v63 = vld [vmem:[%s17519_s10 + $0x1620] ss:$16 sps:$4 sm:$0xff]  }
 0x31b   : > { %10573 = vmatpush1.bf16.msra.mxu0 %v15644_v12  ;;  %11598 = vmatpush1.bf16.msra.mxu1 %v15647_v14  ;;  %v15740_v12 = vld [vmem:[%s17519_s10 + $0x162c] ss:$16 sps:$4 sm:$0xff]   ;;  %v2107_v14 = vcombine.high %v18302_v8, %v18302_v8  ;;  %v15741_v8 = vld [vmem:[%s17519_s10 + $0x1640] ss:$16 sps:$4 sm:$0xff]  }
 0x31c   : > { %10574 = vmatprep.subr.bf16.mxu0 %v15652_v16  ;;  %11599 = vmatprep.subr.bf16.mxu1 %v15655_v52  ;;  %v15738_v16 = vld [vmem:[%s17519_s10 + $0x1628] ss:$16 sps:$4 sm:$0xff]   ;;  %v15743_v52 = vld [vmem:[%s17519_s10 + $0x1644] ss:$16 sps:$4 sm:$0xff]  }
 0x31f   : > { %10575 = vmatpush1.bf16.msra.mxu0 %v15650_v17  ;;  %11600 = vmatpush1.bf16.msra.mxu1 %v15653_v18  ;;  %v15746_v17 = vld [vmem:[%s17519_s10 + $0x164c] ss:$16 sps:$4 sm:$0xff]   ;;  %v15744_v18 = vld [vmem:[%s17519_s10 + $0x1648] ss:$16 sps:$4 sm:$0xff]  }
 0x320   : > { %10576 = vmatprep.subr.bf16.mxu0 %v15658_v19  ;;  %11601 = vmatprep.subr.bf16.mxu1 %v15661_v20  ;;  %v15749_v19 = vld [vmem:[%s17519_s10 + $0x1664] ss:$16 sps:$4 sm:$0xff]   ;;  %v15752_v20 = vld [vmem:[%s17519_s10 + $0x166c] ss:$16 sps:$4 sm:$0xff]  }
 0x323   : > { %10577 = vmatpush1.bf16.msra.mxu0 %v15656_v22  ;;  %11602 = vmatpush1.bf16.msra.mxu1 %v15659_v23  ;;  %v15747_v22 = vld [vmem:[%s17519_s10 + $0x1660] ss:$16 sps:$4 sm:$0xff]   ;;  %v15750_v23 = vld [vmem:[%s17519_s10 + $0x1668] ss:$16 sps:$4 sm:$0xff]  }
 0x324   : > { %10578 = vmatprep.subr.bf16.mxu0 %v15664_v24  ;;  %11603 = vmatprep.subr.bf16.mxu1 %v15667_v26  ;;  %v15755_v24 = vld [vmem:[%s17519_s10 + $0x1684] ss:$16 sps:$4 sm:$0xff]   ;;  %v15758_v26 = vld [vmem:[%s17519_s10 + $0x168c] ss:$16 sps:$4 sm:$0xff]  }
 0x327   : > { %10579 = vmatpush1.bf16.msra.mxu0 %v15662_v27  ;;  %11604 = vmatpush1.bf16.msra.mxu1 %v15665_v28  ;;  %v15753_v27 = vld [vmem:[%s17519_s10 + $0x1680] ss:$16 sps:$4 sm:$0xff]   ;;  %v15756_v28 = vld [vmem:[%s17519_s10 + $0x1688] ss:$16 sps:$4 sm:$0xff]  }
 0x328   : > { %10580 = vmatprep.subr.bf16.mxu0 %v15670_v29  ;;  %11605 = vmatprep.subr.bf16.mxu1 %v15673_v30  ;;  %v15761_v29 = vld [vmem:[%s17519_s10 + $0x16a4] ss:$16 sps:$4 sm:$0xff]   ;;  %v15764_v30 = vld [vmem:[%s17519_s10 + $0x16ac] ss:$16 sps:$4 sm:$0xff]  }
 0x32b   : > { %10581 = vmatpush1.bf16.msra.mxu0 %v15668_v15  ;;  %11606 = vmatpush1.bf16.msra.mxu1 %v15671_v31  ;;  %v15759_v15 = vld [vmem:[%s17519_s10 + $0x16a0] ss:$16 sps:$4 sm:$0xff]   ;;  %v15762_v31 = vld [vmem:[%s17519_s10 + $0x16a8] ss:$16 sps:$4 sm:$0xff]  }
 0x32c   : > { %10582 = vmatprep.subr.bf16.mxu0 %v15676_v32  ;;  %11607 = vmatprep.subr.bf16.mxu1 %v15679_v33  ;;  %v15767_v32 = vld [vmem:[%s17519_s10 + $0x16c4] ss:$16 sps:$4 sm:$0xff]   ;;  %v15770_v33 = vld [vmem:[%s17519_s10 + $0x16cc] ss:$16 sps:$4 sm:$0xff]  }
 0x32f   : > { %10583 = vmatpush1.bf16.msra.mxu0 %v15674_v25  ;;  %11608 = vmatpush1.bf16.msra.mxu1 %v15677_v34  ;;  %v15765_v25 = vld [vmem:[%s17519_s10 + $0x16c0] ss:$16 sps:$4 sm:$0xff]   ;;  %v15768_v34 = vld [vmem:[%s17519_s10 + $0x16c8] ss:$16 sps:$4 sm:$0xff]  }
 0x330   : > { %10584 = vmatprep.subr.bf16.mxu0 %v15682_v36  ;;  %11609 = vmatprep.subr.bf16.mxu1 %v15685_v37  ;;  %v15773_v36 = vld [vmem:[%s17519_s10 + $0x16e4] ss:$16 sps:$4 sm:$0xff]   ;;  %v15776_v37 = vld [vmem:[%s17519_s10 + $0x16ec] ss:$16 sps:$4 sm:$0xff]  }
 0x333   : > { %10585 = vmatpush1.bf16.msra.mxu0 %v15680_v39  ;;  %11610 = vmatpush1.bf16.msra.mxu1 %v15683_v40  ;;  %v15771_v39 = vld [vmem:[%s17519_s10 + $0x16e0] ss:$16 sps:$4 sm:$0xff]   ;;  %v15774_v40 = vld [vmem:[%s17519_s10 + $0x16e8] ss:$16 sps:$4 sm:$0xff]  }
 0x334   : > { %10586 = vmatprep.subr.bf16.mxu0 %v15688_v21  ;;  %11611 = vmatprep.subr.bf16.mxu1 %v15691_v41  ;;  %v15779_v21 = vld [vmem:[%s17519_s10 + $0x1704] ss:$16 sps:$4 sm:$0xff]   ;;  %v15782_v41 = vld [vmem:[%s17519_s10 + $0x170c] ss:$16 sps:$4 sm:$0xff]  }
 0x337   : > { %10587 = vmatpush1.bf16.msra.mxu0 %v15686_v43  ;;  %11612 = vmatpush1.bf16.msra.mxu1 %v15689_v44  ;;  %v15777_v43 = vld [vmem:[%s17519_s10 + $0x1700] ss:$16 sps:$4 sm:$0xff]   ;;  %v15780_v44 = vld [vmem:[%s17519_s10 + $0x1708] ss:$16 sps:$4 sm:$0xff]  }
 0x338   : > { %10588 = vmatprep.subr.bf16.mxu0 %v15694_v45  ;;  %11613 = vmatprep.subr.bf16.mxu1 %v15697_v46  ;;  %v15785_v45 = vld [vmem:[%s17519_s10 + $0x1724] ss:$16 sps:$4 sm:$0xff]   ;;  %v15788_v46 = vld [vmem:[%s17519_s10 + $0x172c] ss:$16 sps:$4 sm:$0xff]  }
 0x33b   : > { %10589 = vmatpush1.bf16.msra.mxu0 %v15692_v47  ;;  %11614 = vmatpush1.bf16.msra.mxu1 %v15695_v50  ;;  %v15783_v47 = vld [vmem:[%s17519_s10 + $0x1720] ss:$16 sps:$4 sm:$0xff]   ;;  %v15786_v50 = vld [vmem:[%s17519_s10 + $0x1728] ss:$16 sps:$4 sm:$0xff]  }
 0x33c   : > { %10590 = vmatprep.subr.bf16.mxu0 %v15700_v51  ;;  %11615 = vmatprep.subr.bf16.mxu1 %v15703_v53  ;;  %v15791_v51 = vld [vmem:[%s17519_s10 + $0x1744] ss:$16 sps:$4 sm:$0xff]   ;;  %v15794_v53 = vld [vmem:[%s17519_s10 + $0x174c] ss:$16 sps:$4 sm:$0xff]  }
 0x33f   : > { %10591 = vmatpush1.bf16.msra.mxu0 %v15698_v54  ;;  %11616 = vmatpush1.bf16.msra.mxu1 %v15701_v55  ;;  %v15789_v54 = vld [vmem:[%s17519_s10 + $0x1740] ss:$16 sps:$4 sm:$0xff]   ;;  %v15792_v55 = vld [vmem:[%s17519_s10 + $0x1748] ss:$16 sps:$4 sm:$0xff]  }
 0x340   : > { %10592 = vmatprep.subr.bf16.mxu0 %v15706_v38  ;;  %11617 = vmatprep.subr.bf16.mxu1 %v15709_v56  ;;  %v15797_v38 = vld [vmem:[%s17519_s10 + $0x1764] ss:$16 sps:$4 sm:$0xff]   ;;  %v15800_v56 = vld [vmem:[%s17519_s10 + $0x176c] ss:$16 sps:$4 sm:$0xff]  }
 0x343   : > { %10593 = vmatpush1.bf16.msra.mxu0 %v15704_v57  ;;  %11618 = vmatpush1.bf16.msra.mxu1 %v15707_v58  ;;  %v15795_v57 = vld [vmem:[%s17519_s10 + $0x1760] ss:$16 sps:$4 sm:$0xff]   ;;  %v15798_v58 = vld [vmem:[%s17519_s10 + $0x1768] ss:$16 sps:$4 sm:$0xff]  }
 0x344   : > { %10594 = vmatprep.subr.bf16.mxu0 %v15712_v48  ;;  %11619 = vmatprep.subr.bf16.mxu1 %v15715_v59  ;;  %v15803_v48 = vld [vmem:[%s17519_s10 + $0x1784] ss:$16 sps:$4 sm:$0xff]   ;;  %v15806_v59 = vld [vmem:[%s17519_s10 + $0x178c] ss:$16 sps:$4 sm:$0xff]  }
 0x347   : > { %10595 = vmatpush1.bf16.msra.mxu0 %v15710_v61  ;;  %11620 = vmatpush1.bf16.msra.mxu1 %v15713_v62  ;;  %v15801_v61 = vld [vmem:[%s17519_s10 + $0x1780] ss:$16 sps:$4 sm:$0xff]   ;;  %v15804_v62 = vld [vmem:[%s17519_s10 + $0x1788] ss:$16 sps:$4 sm:$0xff]  }
 0x348   : > { %10596 = vmatprep.subr.bf16.mxu0 %v15718_v0  ;;  %11621 = vmatprep.subr.bf16.mxu1 %v15721_v1  ;;  %v15809_v0 = vld [vmem:[%s17519_s10 + $0x17a4] ss:$16 sps:$4 sm:$0xff]   ;;  %v15812_v1 = vld [vmem:[%s17519_s10 + $0x17ac] ss:$16 sps:$4 sm:$0xff]  }
 0x34b   : > { %10597 = vmatpush1.bf16.msra.mxu0 %v15716_v35  ;;  %11622 = vmatpush1.bf16.msra.mxu1 %v15719_v2  ;;  %v15807_v35 = vld [vmem:[%s17519_s10 + $0x17a0] ss:$16 sps:$4 sm:$0xff]   ;;  %v15810_v2 = vld [vmem:[%s17519_s10 + $0x17a8] ss:$16 sps:$4 sm:$0xff]  }
 0x34c   : > { %10598 = vmatprep.subr.bf16.mxu0 %v15724_v3  ;;  %11623 = vmatprep.subr.bf16.mxu1 %v15727_v4  ;;  %v15815_v3 = vld [vmem:[%s17519_s10 + $0x17c4] ss:$16 sps:$4 sm:$0xff]   ;;  %v15818_v4 = vld [vmem:[%s17519_s10 + $0x17cc] ss:$16 sps:$4 sm:$0xff]  }
 0x34f   : > { %10599 = vmatpush1.bf16.msra.mxu0 %v15722_v60  ;;  %11624 = vmatpush1.bf16.msra.mxu1 %v15725_v5  ;;  %v18433_v60 = vld.sshfl [vmem:[%s19463_s0 + $0x18] sm:$0xff pattern:$0x75316420]  ;;  %v15813_v5 = vld [vmem:[%s17519_s10 + $0x17c0] ss:$16 sps:$4 sm:$0xff]  }
 0x350   : > { %10609 = vmatprep.subr.bf16.mxu0 %v15731_v6  ;;  %11634 = vmatprep.subr.bf16.mxu1 %v15734_v7  ;;  %v15816_v6 = vld [vmem:[%s17519_s10 + $0x17c8] ss:$16 sps:$4 sm:$0xff]   ;;  %v15821_v7 = vld [vmem:[%s17519_s10 + $0x17e4] ss:$16 sps:$4 sm:$0xff]  }
 0x352   : > { %10601 = vmatmul.mubr.bf16.vlgmr.msra.gmra.mrb[0].mxu0 %v18368_v13  ;;  %11626 = vmatmul.mubr.bf16.vlgmr.msra.gmra.mrb[0].mxu1 %v18368_v13 }
 0x353   : > { %10610 = vmatpush1.bf16.msra.mxu0 %v15729_v9  ;;  %11635 = vmatpush1.bf16.msra.mxu1 %v15732_v10  ;;  %v15824_v9 = vld [vmem:[%s17519_s10 + $0x17ec] ss:$16 sps:$4 sm:$0xff]   ;;  %v15819_v10 = vld [vmem:[%s17519_s10 + $0x17e0] ss:$16 sps:$4 sm:$0xff]  }
 0x354   : > { %10611 = vmatprep.subr.bf16.mxu0 %v15737_v11  ;;  %11636 = vmatprep.subr.bf16.mxu1 %v15740_v12  ;;  %v15822_v11 = vld [vmem:[%s17519_s10 + $0x17e8] ss:$16 sps:$4 sm:$0xff]   ;;  %v15827_v12 = vld [vmem:[%s17519_s10 + $0x1804] ss:$16 sps:$4 sm:$0xff]  }
 0x355   : > { %10641 = vmatprep.mubr.bf16.mxu0 %v2107_v14  ;;  %11666 = vmatprep.mubr.bf16.mxu1 %v2107_v14  ;;  %v15830_v14 = vld [vmem:[%s17519_s10 + $0x180c] ss:$16 sps:$4 sm:$0xff]  }
 0x357   : > { %10612 = vmatpush1.bf16.msra.mxu0 %v15735_v63  ;;  %11637 = vmatpush1.bf16.msra.mxu1 %v15738_v16  ;;  %v2123_v63 = vcombine.high %v18433_v60, %v18433_v60  ;;  %v2105_v16 = vcombine.high %v18368_v13, %v18368_v13  ;;  %v15831_v13 = vld [vmem:[%s17519_s10 + $0x1820] ss:$16 sps:$4 sm:$0xff]  }
 0x358   : > { %10613 = vmatprep.subr.bf16.mxu0 %v15743_v52  ;;  %11638 = vmatprep.subr.bf16.mxu1 %v15746_v17  ;;  %v15825_v52 = vld [vmem:[%s17519_s10 + $0x1800] ss:$16 sps:$4 sm:$0xff]   ;;  %v15828_v17 = vld [vmem:[%s17519_s10 + $0x1808] ss:$16 sps:$4 sm:$0xff]  }
 0x35b   : > { %10614 = vmatpush1.bf16.msra.mxu0 %v15741_v8  ;;  %11639 = vmatpush1.bf16.msra.mxu1 %v15744_v18  ;;  %v15833_v8 = vld [vmem:[%s17519_s10 + $0x1824] ss:$16 sps:$4 sm:$0xff]   ;;  %v15836_v18 = vld [vmem:[%s17519_s10 + $0x182c] ss:$16 sps:$4 sm:$0xff]  }
 0x35c   : > { %10615 = vmatprep.subr.bf16.mxu0 %v15749_v19  ;;  %11640 = vmatprep.subr.bf16.mxu1 %v15752_v20  ;;  %v18452_v19 = vrot.slane %v2123_v63, %v17585_v49  ;;  %v15834_v20 = vld [vmem:[%s17519_s10 + $0x1828] ss:$16 sps:$4 sm:$0xff]   ;;  %v15917_v63 = vld [vmem:[%s17519_s10 + $0x19e4] ss:$16 sps:$4 sm:$0xff]  }
 0x35f   : > { %10616 = vmatpush1.bf16.msra.mxu0 %v15747_v22  ;;  %11641 = vmatpush1.bf16.msra.mxu1 %v15750_v23  ;;  %v15839_v22 = vld [vmem:[%s17519_s10 + $0x1844] ss:$16 sps:$4 sm:$0xff]   ;;  %v15842_v23 = vld [vmem:[%s17519_s10 + $0x184c] ss:$16 sps:$4 sm:$0xff]  }
 0x360   : > { %10617 = vmatprep.subr.bf16.mxu0 %v15755_v24  ;;  %11642 = vmatprep.subr.bf16.mxu1 %v15758_v26  ;;  %v15837_v24 = vld [vmem:[%s17519_s10 + $0x1840] ss:$16 sps:$4 sm:$0xff]   ;;  %v15840_v26 = vld [vmem:[%s17519_s10 + $0x1848] ss:$16 sps:$4 sm:$0xff]  }
 0x363   : > { %10618 = vmatpush1.bf16.msra.mxu0 %v15753_v27  ;;  %11643 = vmatpush1.bf16.msra.mxu1 %v15756_v28  ;;  %v15845_v27 = vld [vmem:[%s17519_s10 + $0x1864] ss:$16 sps:$4 sm:$0xff]   ;;  %v15848_v28 = vld [vmem:[%s17519_s10 + $0x186c] ss:$16 sps:$4 sm:$0xff]  }
 0x364   : > { %10619 = vmatprep.subr.bf16.mxu0 %v15761_v29  ;;  %11644 = vmatprep.subr.bf16.mxu1 %v15764_v30  ;;  %v15843_v29 = vld [vmem:[%s17519_s10 + $0x1860] ss:$16 sps:$4 sm:$0xff]   ;;  %v15846_v30 = vld [vmem:[%s17519_s10 + $0x1868] ss:$16 sps:$4 sm:$0xff]  }
 0x367   : > { %10620 = vmatpush1.bf16.msra.mxu0 %v15759_v15  ;;  %11645 = vmatpush1.bf16.msra.mxu1 %v15762_v31  ;;  %v15851_v15 = vld [vmem:[%s17519_s10 + $0x1884] ss:$16 sps:$4 sm:$0xff]   ;;  %v15854_v31 = vld [vmem:[%s17519_s10 + $0x188c] ss:$16 sps:$4 sm:$0xff]  }
 0x368   : > { %10621 = vmatprep.subr.bf16.mxu0 %v15767_v32  ;;  %11646 = vmatprep.subr.bf16.mxu1 %v15770_v33  ;;  %v15849_v32 = vld [vmem:[%s17519_s10 + $0x1880] ss:$16 sps:$4 sm:$0xff]   ;;  %v15852_v33 = vld [vmem:[%s17519_s10 + $0x1888] ss:$16 sps:$4 sm:$0xff]  }
 0x36b   : > { %10622 = vmatpush1.bf16.msra.mxu0 %v15765_v25  ;;  %11647 = vmatpush1.bf16.msra.mxu1 %v15768_v34  ;;  %v15857_v25 = vld [vmem:[%s17519_s10 + $0x18a4] ss:$16 sps:$4 sm:$0xff]   ;;  %v15860_v34 = vld [vmem:[%s17519_s10 + $0x18ac] ss:$16 sps:$4 sm:$0xff]  }
 0x36c   : > { %10623 = vmatprep.subr.bf16.mxu0 %v15773_v36  ;;  %11648 = vmatprep.subr.bf16.mxu1 %v15776_v37  ;;  %v15855_v36 = vld [vmem:[%s17519_s10 + $0x18a0] ss:$16 sps:$4 sm:$0xff]   ;;  %v15858_v37 = vld [vmem:[%s17519_s10 + $0x18a8] ss:$16 sps:$4 sm:$0xff]  }
 0x36f   : > { %10624 = vmatpush1.bf16.msra.mxu0 %v15771_v39  ;;  %11649 = vmatpush1.bf16.msra.mxu1 %v15774_v40  ;;  %v15863_v39 = vld [vmem:[%s17519_s10 + $0x18c4] ss:$16 sps:$4 sm:$0xff]   ;;  %v15866_v40 = vld [vmem:[%s17519_s10 + $0x18cc] ss:$16 sps:$4 sm:$0xff]  }
 0x370   : > { %10625 = vmatprep.subr.bf16.mxu0 %v15779_v21  ;;  %11650 = vmatprep.subr.bf16.mxu1 %v15782_v41  ;;  %v15861_v21 = vld [vmem:[%s17519_s10 + $0x18c0] ss:$16 sps:$4 sm:$0xff]   ;;  %v15864_v41 = vld [vmem:[%s17519_s10 + $0x18c8] ss:$16 sps:$4 sm:$0xff]  }
 0x373   : > { %10626 = vmatpush1.bf16.msra.mxu0 %v15777_v43  ;;  %11651 = vmatpush1.bf16.msra.mxu1 %v15780_v44  ;;  %v15869_v43 = vld [vmem:[%s17519_s10 + $0x18e4] ss:$16 sps:$4 sm:$0xff]   ;;  %v15872_v44 = vld [vmem:[%s17519_s10 + $0x18ec] ss:$16 sps:$4 sm:$0xff]  }
 0x374   : > { %10627 = vmatprep.subr.bf16.mxu0 %v15785_v45  ;;  %11652 = vmatprep.subr.bf16.mxu1 %v15788_v46  ;;  %v15867_v45 = vld [vmem:[%s17519_s10 + $0x18e0] ss:$16 sps:$4 sm:$0xff]   ;;  %v15870_v46 = vld [vmem:[%s17519_s10 + $0x18e8] ss:$16 sps:$4 sm:$0xff]  }
 0x377   : > { %10628 = vmatpush1.bf16.msra.mxu0 %v15783_v47  ;;  %11653 = vmatpush1.bf16.msra.mxu1 %v15786_v50  ;;  %v15875_v47 = vld [vmem:[%s17519_s10 + $0x1904] ss:$16 sps:$4 sm:$0xff]   ;;  %v15878_v50 = vld [vmem:[%s17519_s10 + $0x190c] ss:$16 sps:$4 sm:$0xff]  }
 0x378   : > { %10629 = vmatprep.subr.bf16.mxu0 %v15791_v51  ;;  %11654 = vmatprep.subr.bf16.mxu1 %v15794_v53  ;;  %v15873_v51 = vld [vmem:[%s17519_s10 + $0x1900] ss:$16 sps:$4 sm:$0xff]   ;;  %v15876_v53 = vld [vmem:[%s17519_s10 + $0x1908] ss:$16 sps:$4 sm:$0xff]  }
 0x37b   : > { %10630 = vmatpush1.bf16.msra.mxu0 %v15789_v54  ;;  %11655 = vmatpush1.bf16.msra.mxu1 %v15792_v55  ;;  %v15881_v54 = vld [vmem:[%s17519_s10 + $0x1924] ss:$16 sps:$4 sm:$0xff]   ;;  %v15884_v55 = vld [vmem:[%s17519_s10 + $0x192c] ss:$16 sps:$4 sm:$0xff]  }
 0x37c   : > { %10631 = vmatprep.subr.bf16.mxu0 %v15797_v38  ;;  %11656 = vmatprep.subr.bf16.mxu1 %v15800_v56  ;;  %v15879_v38 = vld [vmem:[%s17519_s10 + $0x1920] ss:$16 sps:$4 sm:$0xff]   ;;  %v15882_v56 = vld [vmem:[%s17519_s10 + $0x1928] ss:$16 sps:$4 sm:$0xff]  }
 0x37f   : > { %10632 = vmatpush1.bf16.msra.mxu0 %v15795_v57  ;;  %11657 = vmatpush1.bf16.msra.mxu1 %v15798_v58  ;;  %v15887_v57 = vld [vmem:[%s17519_s10 + $0x1944] ss:$16 sps:$4 sm:$0xff]   ;;  %v15890_v58 = vld [vmem:[%s17519_s10 + $0x194c] ss:$16 sps:$4 sm:$0xff]  }
 0x380   : > { %10633 = vmatprep.subr.bf16.mxu0 %v15803_v48  ;;  %11658 = vmatprep.subr.bf16.mxu1 %v15806_v59  ;;  %v15885_v48 = vld [vmem:[%s17519_s10 + $0x1940] ss:$16 sps:$4 sm:$0xff]   ;;  %v15888_v59 = vld [vmem:[%s17519_s10 + $0x1948] ss:$16 sps:$4 sm:$0xff]  }
 0x383   : > { %10634 = vmatpush1.bf16.msra.mxu0 %v15801_v61  ;;  %11659 = vmatpush1.bf16.msra.mxu1 %v15804_v62  ;;  %v15893_v61 = vld [vmem:[%s17519_s10 + $0x1964] ss:$16 sps:$4 sm:$0xff]   ;;  %v15896_v62 = vld [vmem:[%s17519_s10 + $0x196c] ss:$16 sps:$4 sm:$0xff]  }
 0x384   : > { %10635 = vmatprep.subr.bf16.mxu0 %v15809_v0  ;;  %11660 = vmatprep.subr.bf16.mxu1 %v15812_v1  ;;  %v15891_v0 = vld [vmem:[%s17519_s10 + $0x1960] ss:$16 sps:$4 sm:$0xff]   ;;  %v15894_v1 = vld [vmem:[%s17519_s10 + $0x1968] ss:$16 sps:$4 sm:$0xff]  }
 0x387   : > { %10636 = vmatpush1.bf16.msra.mxu0 %v15807_v35  ;;  %11661 = vmatpush1.bf16.msra.mxu1 %v15810_v2  ;;  %v15899_v35 = vld [vmem:[%s17519_s10 + $0x1984] ss:$16 sps:$4 sm:$0xff]   ;;  %v15902_v2 = vld [vmem:[%s17519_s10 + $0x198c] ss:$16 sps:$4 sm:$0xff]  }
 0x388   : > { %10637 = vmatprep.subr.bf16.mxu0 %v15815_v3  ;;  %11662 = vmatprep.subr.bf16.mxu1 %v15818_v4  ;;  %v15897_v3 = vld [vmem:[%s17519_s10 + $0x1980] ss:$16 sps:$4 sm:$0xff]   ;;  %v15900_v4 = vld [vmem:[%s17519_s10 + $0x1988] ss:$16 sps:$4 sm:$0xff]  }
 0x38b   : > { %10638 = vmatpush1.bf16.msra.mxu0 %v15813_v5  ;;  %11663 = vmatpush1.bf16.msra.mxu1 %v15816_v6  ;;  %v15905_v5 = vld [vmem:[%s17519_s10 + $0x19a4] ss:$16 sps:$4 sm:$0xff]   ;;  %v15908_v6 = vld [vmem:[%s17519_s10 + $0x19ac] ss:$16 sps:$4 sm:$0xff]  }
 0x38c   : > { %10639 = vmatprep.subr.bf16.mxu0 %v15821_v7  ;;  %11664 = vmatprep.subr.bf16.mxu1 %v15824_v9  ;;  %v15903_v7 = vld [vmem:[%s17519_s10 + $0x19a0] ss:$16 sps:$4 sm:$0xff]   ;;  %v15906_v9 = vld [vmem:[%s17519_s10 + $0x19a8] ss:$16 sps:$4 sm:$0xff]  }
 0x38f   : > { %10640 = vmatpush1.bf16.msra.mxu0 %v15819_v10  ;;  %11665 = vmatpush1.bf16.msra.mxu1 %v15822_v11  ;;  %v15911_v10 = vld [vmem:[%s17519_s10 + $0x19c4] ss:$16 sps:$4 sm:$0xff]   ;;  %v15914_v11 = vld [vmem:[%s17519_s10 + $0x19cc] ss:$16 sps:$4 sm:$0xff]  }
 0x390   : > { %10650 = vmatprep.subr.bf16.mxu0 %v15827_v12  ;;  %11675 = vmatprep.subr.bf16.mxu1 %v15830_v14  ;;  %v15909_v12 = vld [vmem:[%s17519_s10 + $0x19c0] ss:$16 sps:$4 sm:$0xff]   ;;  %v15912_v14 = vld [vmem:[%s17519_s10 + $0x19c8] ss:$16 sps:$4 sm:$0xff]  }
 0x392   : > { %10642 = vmatmul.mubr.bf16.vlgmr.msra.gmra.mrb[0].mxu0 %v2105_v16  ;;  %11667 = vmatmul.mubr.bf16.vlgmr.msra.gmra.mrb[0].mxu1 %v2105_v16  ;;  %v15920_v16 = vld [vmem:[%s17519_s10 + $0x19ec] ss:$16 sps:$4 sm:$0xff]  }
 0x393   : > { %10651 = vmatpush1.bf16.msra.mxu0 %v15825_v52  ;;  %11676 = vmatpush1.bf16.msra.mxu1 %v15828_v17  ;;  %v15915_v52 = vld [vmem:[%s17519_s10 + $0x19e0] ss:$16 sps:$4 sm:$0xff]   ;;  %v15918_v17 = vld [vmem:[%s17519_s10 + $0x19e8] ss:$16 sps:$4 sm:$0xff]  }
 0x394   : > { %10652 = vmatprep.subr.bf16.mxu0 %v15833_v8  ;;  %11677 = vmatprep.subr.bf16.mxu1 %v15836_v18  ;;  %v15923_v8 = vld [vmem:[%s17519_s10 + $0x1a04] ss:$16 sps:$4 sm:$0xff]   ;;  %v15926_v18 = vld [vmem:[%s17519_s10 + $0x1a0c] ss:$16 sps:$4 sm:$0xff]  }
 0x395   : > { %10682 = vmatprep.mubr.bf16.mxu0 %v18452_v19  ;;  %11707 = vmatprep.mubr.bf16.mxu1 %v18452_v19 }
 0x397   : > { %10653 = vmatpush1.bf16.msra.mxu0 %v15831_v13  ;;  %11678 = vmatpush1.bf16.msra.mxu1 %v15834_v20  ;;  %v18518_v13 = vrot.slane %v18433_v60, %v17585_v49  ;;  %v15921_v20 = vld [vmem:[%s17519_s10 + $0x1a00] ss:$16 sps:$4 sm:$0xff]  }
 0x398   : > { %10654 = vmatprep.subr.bf16.mxu0 %v15839_v22  ;;  %11679 = vmatprep.subr.bf16.mxu1 %v15842_v23  ;;  %v15924_v22 = vld [vmem:[%s17519_s10 + $0x1a08] ss:$16 sps:$4 sm:$0xff]   ;;  %v15929_v23 = vld [vmem:[%s17519_s10 + $0x1a24] ss:$16 sps:$4 sm:$0xff]   ;;  %v15927_v60 = vld [vmem:[%s17519_s10 + $0x1a20] ss:$16 sps:$4 sm:$0xff]  }
 0x39b   : > { %10655 = vmatpush1.bf16.msra.mxu0 %v15837_v24  ;;  %11680 = vmatpush1.bf16.msra.mxu1 %v15840_v26  ;;  %v15932_v24 = vld [vmem:[%s17519_s10 + $0x1a2c] ss:$16 sps:$4 sm:$0xff]   ;;  %v2155_v26 = vcombine.high %v18452_v19, %v18452_v19  ;;  %v15933_v19 = vld [vmem:[%s17519_s10 + $0x1a40] ss:$16 sps:$4 sm:$0xff]  }
 0x39c   : > { %10656 = vmatprep.subr.bf16.mxu0 %v15845_v27  ;;  %11681 = vmatprep.subr.bf16.mxu1 %v15848_v28  ;;  %v15930_v27 = vld [vmem:[%s17519_s10 + $0x1a28] ss:$16 sps:$4 sm:$0xff]   ;;  %v15935_v28 = vld [vmem:[%s17519_s10 + $0x1a44] ss:$16 sps:$4 sm:$0xff]  }
 0x39f   : > { %10657 = vmatpush1.bf16.msra.mxu0 %v15843_v29  ;;  %11682 = vmatpush1.bf16.msra.mxu1 %v15846_v30  ;;  %v15938_v29 = vld [vmem:[%s17519_s10 + $0x1a4c] ss:$16 sps:$4 sm:$0xff]   ;;  %v15936_v30 = vld [vmem:[%s17519_s10 + $0x1a48] ss:$16 sps:$4 sm:$0xff]  }
 0x3a0   : > { %10658 = vmatprep.subr.bf16.mxu0 %v15851_v15  ;;  %11683 = vmatprep.subr.bf16.mxu1 %v15854_v31  ;;  %v15941_v15 = vld [vmem:[%s17519_s10 + $0x1a64] ss:$16 sps:$4 sm:$0xff]   ;;  %v15944_v31 = vld [vmem:[%s17519_s10 + $0x1a6c] ss:$16 sps:$4 sm:$0xff]  }
 0x3a3   : > { %10659 = vmatpush1.bf16.msra.mxu0 %v15849_v32  ;;  %11684 = vmatpush1.bf16.msra.mxu1 %v15852_v33  ;;  %v15939_v32 = vld [vmem:[%s17519_s10 + $0x1a60] ss:$16 sps:$4 sm:$0xff]   ;;  %v15942_v33 = vld [vmem:[%s17519_s10 + $0x1a68] ss:$16 sps:$4 sm:$0xff]  }
 0x3a4   : > { %10660 = vmatprep.subr.bf16.mxu0 %v15857_v25  ;;  %11685 = vmatprep.subr.bf16.mxu1 %v15860_v34  ;;  %v15947_v25 = vld [vmem:[%s17519_s10 + $0x1a84] ss:$16 sps:$4 sm:$0xff]   ;;  %v15950_v34 = vld [vmem:[%s17519_s10 + $0x1a8c] ss:$16 sps:$4 sm:$0xff]  }
 0x3a7   : > { %10661 = vmatpush1.bf16.msra.mxu0 %v15855_v36  ;;  %11686 = vmatpush1.bf16.msra.mxu1 %v15858_v37  ;;  %v15945_v36 = vld [vmem:[%s17519_s10 + $0x1a80] ss:$16 sps:$4 sm:$0xff]   ;;  %v15948_v37 = vld [vmem:[%s17519_s10 + $0x1a88] ss:$16 sps:$4 sm:$0xff]  }
 0x3a8   : > { %10662 = vmatprep.subr.bf16.mxu0 %v15863_v39  ;;  %11687 = vmatprep.subr.bf16.mxu1 %v15866_v40  ;;  %v15953_v39 = vld [vmem:[%s17519_s10 + $0x1aa4] ss:$16 sps:$4 sm:$0xff]   ;;  %v15956_v40 = vld [vmem:[%s17519_s10 + $0x1aac] ss:$16 sps:$4 sm:$0xff]  }
 0x3ab   : > { %10663 = vmatpush1.bf16.msra.mxu0 %v15861_v21  ;;  %11688 = vmatpush1.bf16.msra.mxu1 %v15864_v41  ;;  %v15951_v21 = vld [vmem:[%s17519_s10 + $0x1aa0] ss:$16 sps:$4 sm:$0xff]   ;;  %v15954_v41 = vld [vmem:[%s17519_s10 + $0x1aa8] ss:$16 sps:$4 sm:$0xff]  }
 0x3ac   : > { %10664 = vmatprep.subr.bf16.mxu0 %v15869_v43  ;;  %11689 = vmatprep.subr.bf16.mxu1 %v15872_v44  ;;  %v15959_v43 = vld [vmem:[%s17519_s10 + $0x1ac4] ss:$16 sps:$4 sm:$0xff]   ;;  %v15962_v44 = vld [vmem:[%s17519_s10 + $0x1acc] ss:$16 sps:$4 sm:$0xff]  }
 0x3af   : > { %10665 = vmatpush1.bf16.msra.mxu0 %v15867_v45  ;;  %11690 = vmatpush1.bf16.msra.mxu1 %v15870_v46  ;;  %v15957_v45 = vld [vmem:[%s17519_s10 + $0x1ac0] ss:$16 sps:$4 sm:$0xff]   ;;  %v15960_v46 = vld [vmem:[%s17519_s10 + $0x1ac8] ss:$16 sps:$4 sm:$0xff]  }
 0x3b0   : > { %10666 = vmatprep.subr.bf16.mxu0 %v15875_v47  ;;  %11691 = vmatprep.subr.bf16.mxu1 %v15878_v50  ;;  %v15965_v47 = vld [vmem:[%s17519_s10 + $0x1ae4] ss:$16 sps:$4 sm:$0xff]   ;;  %v15968_v50 = vld [vmem:[%s17519_s10 + $0x1aec] ss:$16 sps:$4 sm:$0xff]  }
 0x3b3   : > { %10667 = vmatpush1.bf16.msra.mxu0 %v15873_v51  ;;  %11692 = vmatpush1.bf16.msra.mxu1 %v15876_v53  ;;  %v15963_v51 = vld [vmem:[%s17519_s10 + $0x1ae0] ss:$16 sps:$4 sm:$0xff]   ;;  %v15966_v53 = vld [vmem:[%s17519_s10 + $0x1ae8] ss:$16 sps:$4 sm:$0xff]  }
 0x3b4   : > { %10668 = vmatprep.subr.bf16.mxu0 %v15881_v54  ;;  %11693 = vmatprep.subr.bf16.mxu1 %v15884_v55  ;;  %v15971_v54 = vld [vmem:[%s17519_s10 + $0x1b04] ss:$16 sps:$4 sm:$0xff]   ;;  %v15974_v55 = vld [vmem:[%s17519_s10 + $0x1b0c] ss:$16 sps:$4 sm:$0xff]  }
 0x3b7   : > { %10669 = vmatpush1.bf16.msra.mxu0 %v15879_v38  ;;  %11694 = vmatpush1.bf16.msra.mxu1 %v15882_v56  ;;  %v15969_v38 = vld [vmem:[%s17519_s10 + $0x1b00] ss:$16 sps:$4 sm:$0xff]   ;;  %v15972_v56 = vld [vmem:[%s17519_s10 + $0x1b08] ss:$16 sps:$4 sm:$0xff]  }
 0x3b8   : > { %10670 = vmatprep.subr.bf16.mxu0 %v15887_v57  ;;  %11695 = vmatprep.subr.bf16.mxu1 %v15890_v58  ;;  %v15977_v57 = vld [vmem:[%s17519_s10 + $0x1b24] ss:$16 sps:$4 sm:$0xff]   ;;  %v15980_v58 = vld [vmem:[%s17519_s10 + $0x1b2c] ss:$16 sps:$4 sm:$0xff]  }
 0x3bb   : > { %10671 = vmatpush1.bf16.msra.mxu0 %v15885_v48  ;;  %11696 = vmatpush1.bf16.msra.mxu1 %v15888_v59  ;;  %v15975_v48 = vld [vmem:[%s17519_s10 + $0x1b20] ss:$16 sps:$4 sm:$0xff]   ;;  %v15978_v59 = vld [vmem:[%s17519_s10 + $0x1b28] ss:$16 sps:$4 sm:$0xff]  }
 0x3bc   : > { %10672 = vmatprep.subr.bf16.mxu0 %v15893_v61  ;;  %11697 = vmatprep.subr.bf16.mxu1 %v15896_v62  ;;  %v15983_v61 = vld [vmem:[%s17519_s10 + $0x1b44] ss:$16 sps:$4 sm:$0xff]   ;;  %v15986_v62 = vld [vmem:[%s17519_s10 + $0x1b4c] ss:$16 sps:$4 sm:$0xff]  }
 0x3bf   : > { %10673 = vmatpush1.bf16.msra.mxu0 %v15891_v0  ;;  %11698 = vmatpush1.bf16.msra.mxu1 %v15894_v1  ;;  %v15981_v0 = vld [vmem:[%s17519_s10 + $0x1b40] ss:$16 sps:$4 sm:$0xff]   ;;  %v15984_v1 = vld [vmem:[%s17519_s10 + $0x1b48] ss:$16 sps:$4 sm:$0xff]  }
 0x3c0   : > { %10674 = vmatprep.subr.bf16.mxu0 %v15899_v35  ;;  %11699 = vmatprep.subr.bf16.mxu1 %v15902_v2  ;;  %v15989_v35 = vld [vmem:[%s17519_s10 + $0x1b64] ss:$16 sps:$4 sm:$0xff]   ;;  %v15992_v2 = vld [vmem:[%s17519_s10 + $0x1b6c] ss:$16 sps:$4 sm:$0xff]  }
 0x3c3   : > { %10675 = vmatpush1.bf16.msra.mxu0 %v15897_v3  ;;  %11700 = vmatpush1.bf16.msra.mxu1 %v15900_v4  ;;  %v15987_v3 = vld [vmem:[%s17519_s10 + $0x1b60] ss:$16 sps:$4 sm:$0xff]   ;;  %v15990_v4 = vld [vmem:[%s17519_s10 + $0x1b68] ss:$16 sps:$4 sm:$0xff]  }
 0x3c4   : > { %10676 = vmatprep.subr.bf16.mxu0 %v15905_v5  ;;  %11701 = vmatprep.subr.bf16.mxu1 %v15908_v6  ;;  %v15995_v5 = vld [vmem:[%s17519_s10 + $0x1b84] ss:$16 sps:$4 sm:$0xff]   ;;  %v15998_v6 = vld [vmem:[%s17519_s10 + $0x1b8c] ss:$16 sps:$4 sm:$0xff]  }
 0x3c7   : > { %10677 = vmatpush1.bf16.msra.mxu0 %v15903_v7  ;;  %11702 = vmatpush1.bf16.msra.mxu1 %v15906_v9  ;;  %v15993_v7 = vld [vmem:[%s17519_s10 + $0x1b80] ss:$16 sps:$4 sm:$0xff]   ;;  %v15996_v9 = vld [vmem:[%s17519_s10 + $0x1b88] ss:$16 sps:$4 sm:$0xff]  }
 0x3c8   : > { %10678 = vmatprep.subr.bf16.mxu0 %v15911_v10  ;;  %11703 = vmatprep.subr.bf16.mxu1 %v15914_v11  ;;  %v16001_v10 = vld [vmem:[%s17519_s10 + $0x1ba4] ss:$16 sps:$4 sm:$0xff]   ;;  %v16004_v11 = vld [vmem:[%s17519_s10 + $0x1bac] ss:$16 sps:$4 sm:$0xff]  }
 0x3cb   : > { %10679 = vmatpush1.bf16.msra.mxu0 %v15909_v12  ;;  %11704 = vmatpush1.bf16.msra.mxu1 %v15912_v14  ;;  %v15999_v12 = vld [vmem:[%s17519_s10 + $0x1ba0] ss:$16 sps:$4 sm:$0xff]   ;;  %v16002_v14 = vld [vmem:[%s17519_s10 + $0x1ba8] ss:$16 sps:$4 sm:$0xff]  }
 0x3cc   : > { %10680 = vmatprep.subr.bf16.mxu0 %v15917_v63  ;;  %11705 = vmatprep.subr.bf16.mxu1 %v15920_v16  ;;  %v16007_v63 = vld [vmem:[%s17519_s10 + $0x1bc4] ss:$16 sps:$4 sm:$0xff]   ;;  %v16010_v16 = vld [vmem:[%s17519_s10 + $0x1bcc] ss:$16 sps:$4 sm:$0xff]  }
 0x3cf   : > { %10681 = vmatpush1.bf16.msra.mxu0 %v15915_v52  ;;  %11706 = vmatpush1.bf16.msra.mxu1 %v15918_v17  ;;  %v17062_v52 = vld [vmem:[%s19463_s0 + $0x18] sm:$0xff] }
 0x3d0   : > { %10691 = vmatprep.subr.bf16.mxu0 %v15923_v8  ;;  %11716 = vmatprep.subr.bf16.mxu1 %v15926_v18  ;;  %v2108_v17 = vcombine.high %v17062_v52, %v17062_v52  ;;  %v16005_v8 = vld [vmem:[%s17519_s10 + $0x1bc0] ss:$16 sps:$4 sm:$0xff]   ;;  %v16008_v18 = vld [vmem:[%s17519_s10 + $0x1bc8] ss:$16 sps:$4 sm:$0xff]  }
 0x3d1   : > { %v16089_v52 = vld [vmem:[%s17519_s10 + $0x1d80] ss:$16 sps:$4 sm:$0xff]  }
 0x3d2   : > { %10683 = vmatmul.mubr.bf16.vlgmr.msra.gmra.mrb[0].mxu0 %v18518_v13  ;;  %11708 = vmatmul.mubr.bf16.vlgmr.msra.gmra.mrb[0].mxu1 %v18518_v13 }
 0x3d3   : > { %10692 = vmatpush1.bf16.msra.mxu0 %v15921_v20  ;;  %11717 = vmatpush1.bf16.msra.mxu1 %v15924_v22  ;;  %v16013_v20 = vld [vmem:[%s17519_s10 + $0x1be4] ss:$16 sps:$4 sm:$0xff]   ;;  %v16016_v22 = vld [vmem:[%s17519_s10 + $0x1bec] ss:$16 sps:$4 sm:$0xff]  }
 0x3d4   : > { %10693 = vmatprep.subr.bf16.mxu0 %v15929_v23  ;;  %11718 = vmatprep.subr.bf16.mxu1 %v15932_v24  ;;  %v18588_v23 = vrot.slane %v2108_v17, %v17585_v49  ;;  %v16011_v24 = vld [vmem:[%s17519_s10 + $0x1be0] ss:$16 sps:$4 sm:$0xff]   ;;  %v16092_v17 = vld [vmem:[%s17519_s10 + $0x1d88] ss:$16 sps:$4 sm:$0xff]  }
 0x3d5   : > { %10723 = vmatprep.mubr.bf16.mxu0 %v2155_v26  ;;  %11748 = vmatprep.mubr.bf16.mxu1 %v2155_v26  ;;  %v16014_v26 = vld [vmem:[%s17519_s10 + $0x1be8] ss:$16 sps:$4 sm:$0xff]  }
 0x3d7   : > { %10694 = vmatpush1.bf16.msra.mxu0 %v15927_v60  ;;  %11719 = vmatpush1.bf16.msra.mxu1 %v15930_v27  ;;  %v16019_v60 = vld [vmem:[%s17519_s10 + $0x1c04] ss:$16 sps:$4 sm:$0xff]   ;;  %v16022_v27 = vld [vmem:[%s17519_s10 + $0x1c0c] ss:$16 sps:$4 sm:$0xff]  }
 0x3d8   : > { %10695 = vmatprep.subr.bf16.mxu0 %v15935_v28  ;;  %11720 = vmatprep.subr.bf16.mxu1 %v15938_v29  ;;  %v2124_v28 = vcombine.high %v18588_v23, %v18588_v23  ;;  %v2153_v29 = vcombine.high %v18518_v13, %v18518_v13  ;;  %v16023_v13 = vld [vmem:[%s17519_s10 + $0x1c20] ss:$16 sps:$4 sm:$0xff]  }
 0x3db   : > { %10696 = vmatpush1.bf16.msra.mxu0 %v15933_v19  ;;  %11721 = vmatpush1.bf16.msra.mxu1 %v15936_v30  ;;  %v16017_v19 = vld [vmem:[%s17519_s10 + $0x1c00] ss:$16 sps:$4 sm:$0xff]   ;;  %v16020_v30 = vld [vmem:[%s17519_s10 + $0x1c08] ss:$16 sps:$4 sm:$0xff]  }
 0x3dc   : > { %10697 = vmatprep.subr.bf16.mxu0 %v15941_v15  ;;  %11722 = vmatprep.subr.bf16.mxu1 %v15944_v31  ;;  %v16025_v15 = vld [vmem:[%s17519_s10 + $0x1c24] ss:$16 sps:$4 sm:$0xff]   ;;  %v16028_v31 = vld [vmem:[%s17519_s10 + $0x1c2c] ss:$16 sps:$4 sm:$0xff]  }
 0x3df   : > { %10698 = vmatpush1.bf16.msra.mxu0 %v15939_v32  ;;  %11723 = vmatpush1.bf16.msra.mxu1 %v15942_v33  ;;  %v18603_v32 = vrot.slane %v2124_v28, %v17585_v49  ;;  %v16026_v33 = vld [vmem:[%s17519_s10 + $0x1c28] ss:$16 sps:$4 sm:$0xff]   ;;  %v16109_v28 = vld [vmem:[%s17519_s10 + $0x1de4] ss:$16 sps:$4 sm:$0xff]  }
 0x3e0   : > { %10699 = vmatprep.subr.bf16.mxu0 %v15947_v25  ;;  %11724 = vmatprep.subr.bf16.mxu1 %v15950_v34  ;;  %v16031_v25 = vld [vmem:[%s17519_s10 + $0x1c44] ss:$16 sps:$4 sm:$0xff]   ;;  %v16034_v34 = vld [vmem:[%s17519_s10 + $0x1c4c] ss:$16 sps:$4 sm:$0xff]  }
 0x3e3   : > { %10700 = vmatpush1.bf16.msra.mxu0 %v15945_v36  ;;  %11725 = vmatpush1.bf16.msra.mxu1 %v15948_v37  ;;  %v16029_v36 = vld [vmem:[%s17519_s10 + $0x1c40] ss:$16 sps:$4 sm:$0xff]   ;;  %v16032_v37 = vld [vmem:[%s17519_s10 + $0x1c48] ss:$16 sps:$4 sm:$0xff]  }
 0x3e4   : > { %10701 = vmatprep.subr.bf16.mxu0 %v15953_v39  ;;  %11726 = vmatprep.subr.bf16.mxu1 %v15956_v40  ;;  %v16037_v39 = vld [vmem:[%s17519_s10 + $0x1c64] ss:$16 sps:$4 sm:$0xff]   ;;  %v16040_v40 = vld [vmem:[%s17519_s10 + $0x1c6c] ss:$16 sps:$4 sm:$0xff]  }
 0x3e7   : > { %10702 = vmatpush1.bf16.msra.mxu0 %v15951_v21  ;;  %11727 = vmatpush1.bf16.msra.mxu1 %v15954_v41  ;;  %v16035_v21 = vld [vmem:[%s17519_s10 + $0x1c60] ss:$16 sps:$4 sm:$0xff]   ;;  %v16038_v41 = vld [vmem:[%s17519_s10 + $0x1c68] ss:$16 sps:$4 sm:$0xff]  }
 0x3e8   : > { %10703 = vmatprep.subr.bf16.mxu0 %v15959_v43  ;;  %11728 = vmatprep.subr.bf16.mxu1 %v15962_v44  ;;  %v16043_v43 = vld [vmem:[%s17519_s10 + $0x1c84] ss:$16 sps:$4 sm:$0xff]   ;;  %v16046_v44 = vld [vmem:[%s17519_s10 + $0x1c8c] ss:$16 sps:$4 sm:$0xff]  }
 0x3eb   : > { %10704 = vmatpush1.bf16.msra.mxu0 %v15957_v45  ;;  %11729 = vmatpush1.bf16.msra.mxu1 %v15960_v46  ;;  %v16041_v45 = vld [vmem:[%s17519_s10 + $0x1c80] ss:$16 sps:$4 sm:$0xff]   ;;  %v16044_v46 = vld [vmem:[%s17519_s10 + $0x1c88] ss:$16 sps:$4 sm:$0xff]  }
 0x3ec   : > { %10705 = vmatprep.subr.bf16.mxu0 %v15965_v47  ;;  %11730 = vmatprep.subr.bf16.mxu1 %v15968_v50  ;;  %v16049_v47 = vld [vmem:[%s17519_s10 + $0x1ca4] ss:$16 sps:$4 sm:$0xff]   ;;  %v16052_v50 = vld [vmem:[%s17519_s10 + $0x1cac] ss:$16 sps:$4 sm:$0xff]  }
 0x3ef   : > { %10706 = vmatpush1.bf16.msra.mxu0 %v15963_v51  ;;  %11731 = vmatpush1.bf16.msra.mxu1 %v15966_v53  ;;  %v16047_v51 = vld [vmem:[%s17519_s10 + $0x1ca0] ss:$16 sps:$4 sm:$0xff]   ;;  %v16050_v53 = vld [vmem:[%s17519_s10 + $0x1ca8] ss:$16 sps:$4 sm:$0xff]  }
 0x3f0   : > { %10707 = vmatprep.subr.bf16.mxu0 %v15971_v54  ;;  %11732 = vmatprep.subr.bf16.mxu1 %v15974_v55  ;;  %v16055_v54 = vld [vmem:[%s17519_s10 + $0x1cc4] ss:$16 sps:$4 sm:$0xff]   ;;  %v16058_v55 = vld [vmem:[%s17519_s10 + $0x1ccc] ss:$16 sps:$4 sm:$0xff]  }
 0x3f3   : > { %10708 = vmatpush1.bf16.msra.mxu0 %v15969_v38  ;;  %11733 = vmatpush1.bf16.msra.mxu1 %v15972_v56  ;;  %v16053_v38 = vld [vmem:[%s17519_s10 + $0x1cc0] ss:$16 sps:$4 sm:$0xff]   ;;  %v16056_v56 = vld [vmem:[%s17519_s10 + $0x1cc8] ss:$16 sps:$4 sm:$0xff]  }
 0x3f4   : > { %10709 = vmatprep.subr.bf16.mxu0 %v15977_v57  ;;  %11734 = vmatprep.subr.bf16.mxu1 %v15980_v58  ;;  %v16061_v57 = vld [vmem:[%s17519_s10 + $0x1ce4] ss:$16 sps:$4 sm:$0xff]   ;;  %v16064_v58 = vld [vmem:[%s17519_s10 + $0x1cec] ss:$16 sps:$4 sm:$0xff]  }
 0x3f7   : > { %10710 = vmatpush1.bf16.msra.mxu0 %v15975_v48  ;;  %11735 = vmatpush1.bf16.msra.mxu1 %v15978_v59  ;;  %v16059_v48 = vld [vmem:[%s17519_s10 + $0x1ce0] ss:$16 sps:$4 sm:$0xff]   ;;  %v16062_v59 = vld [vmem:[%s17519_s10 + $0x1ce8] ss:$16 sps:$4 sm:$0xff]  }
 0x3f8   : > { %10711 = vmatprep.subr.bf16.mxu0 %v15983_v61  ;;  %11736 = vmatprep.subr.bf16.mxu1 %v15986_v62  ;;  %v16067_v61 = vld [vmem:[%s17519_s10 + $0x1d04] ss:$16 sps:$4 sm:$0xff]   ;;  %v16070_v62 = vld [vmem:[%s17519_s10 + $0x1d0c] ss:$16 sps:$4 sm:$0xff]  }
 0x3fb   : > { %10712 = vmatpush1.bf16.msra.mxu0 %v15981_v0  ;;  %11737 = vmatpush1.bf16.msra.mxu1 %v15984_v1  ;;  %v16065_v0 = vld [vmem:[%s17519_s10 + $0x1d00] ss:$16 sps:$4 sm:$0xff]   ;;  %v16068_v1 = vld [vmem:[%s17519_s10 + $0x1d08] ss:$16 sps:$4 sm:$0xff]  }
 0x3fc   : > { %10713 = vmatprep.subr.bf16.mxu0 %v15989_v35  ;;  %11738 = vmatprep.subr.bf16.mxu1 %v15992_v2  ;;  %v16073_v35 = vld [vmem:[%s17519_s10 + $0x1d24] ss:$16 sps:$4 sm:$0xff]   ;;  %v16076_v2 = vld [vmem:[%s17519_s10 + $0x1d2c] ss:$16 sps:$4 sm:$0xff]  }
 0x3ff   : > { %10714 = vmatpush1.bf16.msra.mxu0 %v15987_v3  ;;  %11739 = vmatpush1.bf16.msra.mxu1 %v15990_v4  ;;  %v16071_v3 = vld [vmem:[%s17519_s10 + $0x1d20] ss:$16 sps:$4 sm:$0xff]   ;;  %v16074_v4 = vld [vmem:[%s17519_s10 + $0x1d28] ss:$16 sps:$4 sm:$0xff]  }
 0x400   : > { %10715 = vmatprep.subr.bf16.mxu0 %v15995_v5  ;;  %11740 = vmatprep.subr.bf16.mxu1 %v15998_v6  ;;  %v16079_v5 = vld [vmem:[%s17519_s10 + $0x1d44] ss:$16 sps:$4 sm:$0xff]   ;;  %v16082_v6 = vld [vmem:[%s17519_s10 + $0x1d4c] ss:$16 sps:$4 sm:$0xff]  }
 0x403   : > { %10716 = vmatpush1.bf16.msra.mxu0 %v15993_v7  ;;  %11741 = vmatpush1.bf16.msra.mxu1 %v15996_v9  ;;  %v16077_v7 = vld [vmem:[%s17519_s10 + $0x1d40] ss:$16 sps:$4 sm:$0xff]   ;;  %v16080_v9 = vld [vmem:[%s17519_s10 + $0x1d48] ss:$16 sps:$4 sm:$0xff]  }
 0x404   : > { %10717 = vmatprep.subr.bf16.mxu0 %v16001_v10  ;;  %11742 = vmatprep.subr.bf16.mxu1 %v16004_v11  ;;  %v16085_v10 = vld [vmem:[%s17519_s10 + $0x1d64] ss:$16 sps:$4 sm:$0xff]   ;;  %v16088_v11 = vld [vmem:[%s17519_s10 + $0x1d6c] ss:$16 sps:$4 sm:$0xff]  }
 0x407   : > { %10718 = vmatpush1.bf16.msra.mxu0 %v15999_v12  ;;  %11743 = vmatpush1.bf16.msra.mxu1 %v16002_v14  ;;  %v16083_v12 = vld [vmem:[%s17519_s10 + $0x1d60] ss:$16 sps:$4 sm:$0xff]   ;;  %v16086_v14 = vld [vmem:[%s17519_s10 + $0x1d68] ss:$16 sps:$4 sm:$0xff]  }
 0x408   : > { %10719 = vmatprep.subr.bf16.mxu0 %v16007_v63  ;;  %11744 = vmatprep.subr.bf16.mxu1 %v16010_v16  ;;  %v16091_v63 = vld [vmem:[%s17519_s10 + $0x1d84] ss:$16 sps:$4 sm:$0xff]   ;;  %v16094_v16 = vld [vmem:[%s17519_s10 + $0x1d8c] ss:$16 sps:$4 sm:$0xff]  }
 0x40b   : > { %10720 = vmatpush1.bf16.msra.mxu0 %v16005_v8  ;;  %11745 = vmatpush1.bf16.msra.mxu1 %v16008_v18  ;;  %v16097_v8 = vld [vmem:[%s17519_s10 + $0x1da4] ss:$16 sps:$4 sm:$0xff]   ;;  %v16100_v18 = vld [vmem:[%s17519_s10 + $0x1dac] ss:$16 sps:$4 sm:$0xff]  }
 0x40c   : > { %10721 = vmatprep.subr.bf16.mxu0 %v16013_v20  ;;  %11746 = vmatprep.subr.bf16.mxu1 %v16016_v22  ;;  %v16095_v20 = vld [vmem:[%s17519_s10 + $0x1da0] ss:$16 sps:$4 sm:$0xff]   ;;  %v16098_v22 = vld [vmem:[%s17519_s10 + $0x1da8] ss:$16 sps:$4 sm:$0xff]  }
 0x40f   : > { %10722 = vmatpush1.bf16.msra.mxu0 %v16011_v24  ;;  %11747 = vmatpush1.bf16.msra.mxu1 %v16014_v26  ;;  %v16103_v24 = vld [vmem:[%s17519_s10 + $0x1dc4] ss:$16 sps:$4 sm:$0xff]   ;;  %v16106_v26 = vld [vmem:[%s17519_s10 + $0x1dcc] ss:$16 sps:$4 sm:$0xff]  }
 0x410   : > { %10732 = vmatprep.subr.bf16.mxu0 %v16019_v60  ;;  %11757 = vmatprep.subr.bf16.mxu1 %v16022_v27  ;;  %v16101_v60 = vld [vmem:[%s17519_s10 + $0x1dc0] ss:$16 sps:$4 sm:$0xff]   ;;  %v16104_v27 = vld [vmem:[%s17519_s10 + $0x1dc8] ss:$16 sps:$4 sm:$0xff]  }
 0x412   : > { %10724 = vmatmul.mubr.bf16.vlgmr.msra.gmra.mrb[0].mxu0 %v2153_v29  ;;  %11749 = vmatmul.mubr.bf16.vlgmr.msra.gmra.mrb[0].mxu1 %v2153_v29  ;;  %v16112_v29 = vld [vmem:[%s17519_s10 + $0x1dec] ss:$16 sps:$4 sm:$0xff]  }
 0x413   : > { %10733 = vmatpush1.bf16.msra.mxu0 %v16017_v19  ;;  %11758 = vmatpush1.bf16.msra.mxu1 %v16020_v30  ;;  %v16107_v19 = vld [vmem:[%s17519_s10 + $0x1de0] ss:$16 sps:$4 sm:$0xff]   ;;  %v16110_v30 = vld [vmem:[%s17519_s10 + $0x1de8] ss:$16 sps:$4 sm:$0xff]  }
 0x414   : > { %10734 = vmatprep.subr.bf16.mxu0 %v16025_v15  ;;  %11759 = vmatprep.subr.bf16.mxu1 %v16028_v31  ;;  %v16116_v15 = vld [vmem:[%s17519_s10 + $0x1e04] ss:$16 sps:$4 sm:$0xff]   ;;  %v16119_v31 = vld [vmem:[%s17519_s10 + $0x1e0c] ss:$16 sps:$4 sm:$0xff]  }
 0x415   : > { %10764 = vmatprep.mubr.bf16.mxu0 %v18603_v32  ;;  %11789 = vmatprep.mubr.bf16.mxu1 %v18603_v32 }
 0x417   : > { %10735 = vmatpush1.bf16.msra.mxu0 %v16023_v13  ;;  %11760 = vmatpush1.bf16.msra.mxu1 %v16026_v33  ;;  %v18669_v13 = vrot.slane %v18588_v23, %v17585_v49  ;;  %v16114_v33 = vld [vmem:[%s17519_s10 + $0x1e00] ss:$16 sps:$4 sm:$0xff]  }
 0x418   : > { %10736 = vmatprep.subr.bf16.mxu0 %v16031_v25  ;;  %11761 = vmatprep.subr.bf16.mxu1 %v16034_v34  ;;  %v16117_v25 = vld [vmem:[%s17519_s10 + $0x1e08] ss:$16 sps:$4 sm:$0xff]   ;;  %v16122_v34 = vld [vmem:[%s17519_s10 + $0x1e24] ss:$16 sps:$4 sm:$0xff]   ;;  %v16120_v23 = vld [vmem:[%s17519_s10 + $0x1e20] ss:$16 sps:$4 sm:$0xff]  }
 0x41b   : > { %10737 = vmatpush1.bf16.msra.mxu0 %v16029_v36  ;;  %11762 = vmatpush1.bf16.msra.mxu1 %v16032_v37  ;;  %v16125_v36 = vld [vmem:[%s17519_s10 + $0x1e2c] ss:$16 sps:$4 sm:$0xff]   ;;  %v2156_v37 = vcombine.high %v18603_v32, %v18603_v32  ;;  %v16126_v32 = vld [vmem:[%s17519_s10 + $0x1e40] ss:$16 sps:$4 sm:$0xff]  }
 0x41c   : > { %10738 = vmatprep.subr.bf16.mxu0 %v16037_v39  ;;  %11763 = vmatprep.subr.bf16.mxu1 %v16040_v40  ;;  %v16123_v39 = vld [vmem:[%s17519_s10 + $0x1e28] ss:$16 sps:$4 sm:$0xff]   ;;  %v16128_v40 = vld [vmem:[%s17519_s10 + $0x1e44] ss:$16 sps:$4 sm:$0xff]  }
 0x41f   : > { %10739 = vmatpush1.bf16.msra.mxu0 %v16035_v21  ;;  %11764 = vmatpush1.bf16.msra.mxu1 %v16038_v41  ;;  %v16131_v21 = vld [vmem:[%s17519_s10 + $0x1e4c] ss:$16 sps:$4 sm:$0xff]   ;;  %v16129_v41 = vld [vmem:[%s17519_s10 + $0x1e48] ss:$16 sps:$4 sm:$0xff]  }
 0x420   : > { %10740 = vmatprep.subr.bf16.mxu0 %v16043_v43  ;;  %11765 = vmatprep.subr.bf16.mxu1 %v16046_v44  ;;  %v16134_v43 = vld [vmem:[%s17519_s10 + $0x1e64] ss:$16 sps:$4 sm:$0xff]   ;;  %v16137_v44 = vld [vmem:[%s17519_s10 + $0x1e6c] ss:$16 sps:$4 sm:$0xff]  }
 0x423   : > { %10741 = vmatpush1.bf16.msra.mxu0 %v16041_v45  ;;  %11766 = vmatpush1.bf16.msra.mxu1 %v16044_v46  ;;  %v16132_v45 = vld [vmem:[%s17519_s10 + $0x1e60] ss:$16 sps:$4 sm:$0xff]   ;;  %v16135_v46 = vld [vmem:[%s17519_s10 + $0x1e68] ss:$16 sps:$4 sm:$0xff]  }
 0x424   : > { %10742 = vmatprep.subr.bf16.mxu0 %v16049_v47  ;;  %11767 = vmatprep.subr.bf16.mxu1 %v16052_v50  ;;  %v16140_v47 = vld [vmem:[%s17519_s10 + $0x1e84] ss:$16 sps:$4 sm:$0xff]   ;;  %v16143_v50 = vld [vmem:[%s17519_s10 + $0x1e8c] ss:$16 sps:$4 sm:$0xff]  }
 0x427   : > { %10743 = vmatpush1.bf16.msra.mxu0 %v16047_v51  ;;  %11768 = vmatpush1.bf16.msra.mxu1 %v16050_v53  ;;  %v16138_v51 = vld [vmem:[%s17519_s10 + $0x1e80] ss:$16 sps:$4 sm:$0xff]   ;;  %v16141_v53 = vld [vmem:[%s17519_s10 + $0x1e88] ss:$16 sps:$4 sm:$0xff]  }
 0x428   : > { %10744 = vmatprep.subr.bf16.mxu0 %v16055_v54  ;;  %11769 = vmatprep.subr.bf16.mxu1 %v16058_v55  ;;  %v16146_v54 = vld [vmem:[%s17519_s10 + $0x1ea4] ss:$16 sps:$4 sm:$0xff]   ;;  %v16149_v55 = vld [vmem:[%s17519_s10 + $0x1eac] ss:$16 sps:$4 sm:$0xff]  }
 0x42b   : > { %10745 = vmatpush1.bf16.msra.mxu0 %v16053_v38  ;;  %11770 = vmatpush1.bf16.msra.mxu1 %v16056_v56  ;;  %v16144_v38 = vld [vmem:[%s17519_s10 + $0x1ea0] ss:$16 sps:$4 sm:$0xff]   ;;  %v16147_v56 = vld [vmem:[%s17519_s10 + $0x1ea8] ss:$16 sps:$4 sm:$0xff]  }
 0x42c   : > { %10746 = vmatprep.subr.bf16.mxu0 %v16061_v57  ;;  %11771 = vmatprep.subr.bf16.mxu1 %v16064_v58  ;;  %v16152_v57 = vld [vmem:[%s17519_s10 + $0x1ec4] ss:$16 sps:$4 sm:$0xff]   ;;  %v16155_v58 = vld [vmem:[%s17519_s10 + $0x1ecc] ss:$16 sps:$4 sm:$0xff]  }
 0x42f   : > { %10747 = vmatpush1.bf16.msra.mxu0 %v16059_v48  ;;  %11772 = vmatpush1.bf16.msra.mxu1 %v16062_v59  ;;  %v16150_v48 = vld [vmem:[%s17519_s10 + $0x1ec0] ss:$16 sps:$4 sm:$0xff]   ;;  %v16153_v59 = vld [vmem:[%s17519_s10 + $0x1ec8] ss:$16 sps:$4 sm:$0xff]  }
 0x430   : > { %10748 = vmatprep.subr.bf16.mxu0 %v16067_v61  ;;  %11773 = vmatprep.subr.bf16.mxu1 %v16070_v62  ;;  %v16158_v61 = vld [vmem:[%s17519_s10 + $0x1ee4] ss:$16 sps:$4 sm:$0xff]   ;;  %v16161_v62 = vld [vmem:[%s17519_s10 + $0x1eec] ss:$16 sps:$4 sm:$0xff]  }
 0x433   : > { %10749 = vmatpush1.bf16.msra.mxu0 %v16065_v0  ;;  %11774 = vmatpush1.bf16.msra.mxu1 %v16068_v1  ;;  %v16156_v0 = vld [vmem:[%s17519_s10 + $0x1ee0] ss:$16 sps:$4 sm:$0xff]   ;;  %v16159_v1 = vld [vmem:[%s17519_s10 + $0x1ee8] ss:$16 sps:$4 sm:$0xff]  }
 0x434   : > { %10750 = vmatprep.subr.bf16.mxu0 %v16073_v35  ;;  %11775 = vmatprep.subr.bf16.mxu1 %v16076_v2  ;;  %v16164_v35 = vld [vmem:[%s17519_s10 + $0x1f04] ss:$16 sps:$4 sm:$0xff]   ;;  %v16167_v2 = vld [vmem:[%s17519_s10 + $0x1f0c] ss:$16 sps:$4 sm:$0xff]  }
 0x437   : > { %10751 = vmatpush1.bf16.msra.mxu0 %v16071_v3  ;;  %11776 = vmatpush1.bf16.msra.mxu1 %v16074_v4  ;;  %v16162_v3 = vld [vmem:[%s17519_s10 + $0x1f00] ss:$16 sps:$4 sm:$0xff]   ;;  %v16165_v4 = vld [vmem:[%s17519_s10 + $0x1f08] ss:$16 sps:$4 sm:$0xff]  }
 0x438   : > { %10752 = vmatprep.subr.bf16.mxu0 %v16079_v5  ;;  %11777 = vmatprep.subr.bf16.mxu1 %v16082_v6  ;;  %v16170_v5 = vld [vmem:[%s17519_s10 + $0x1f24] ss:$16 sps:$4 sm:$0xff]   ;;  %v16173_v6 = vld [vmem:[%s17519_s10 + $0x1f2c] ss:$16 sps:$4 sm:$0xff]  }
 0x43b   : > { %10753 = vmatpush1.bf16.msra.mxu0 %v16077_v7  ;;  %11778 = vmatpush1.bf16.msra.mxu1 %v16080_v9  ;;  %v16168_v7 = vld [vmem:[%s17519_s10 + $0x1f20] ss:$16 sps:$4 sm:$0xff]   ;;  %v16171_v9 = vld [vmem:[%s17519_s10 + $0x1f28] ss:$16 sps:$4 sm:$0xff]  }
 0x43c   : > { %10754 = vmatprep.subr.bf16.mxu0 %v16085_v10  ;;  %11779 = vmatprep.subr.bf16.mxu1 %v16088_v11  ;;  %v16176_v10 = vld [vmem:[%s17519_s10 + $0x1f44] ss:$16 sps:$4 sm:$0xff]   ;;  %v16179_v11 = vld [vmem:[%s17519_s10 + $0x1f4c] ss:$16 sps:$4 sm:$0xff]  }
 0x43f   : > { %10755 = vmatpush1.bf16.msra.mxu0 %v16083_v12  ;;  %11780 = vmatpush1.bf16.msra.mxu1 %v16086_v14  ;;  %v16174_v12 = vld [vmem:[%s17519_s10 + $0x1f40] ss:$16 sps:$4 sm:$0xff]   ;;  %v16177_v14 = vld [vmem:[%s17519_s10 + $0x1f48] ss:$16 sps:$4 sm:$0xff]  }
 0x440   : > { %10756 = vmatprep.subr.bf16.mxu0 %v16091_v63  ;;  %11781 = vmatprep.subr.bf16.mxu1 %v16094_v16  ;;  %v16182_v63 = vld [vmem:[%s17519_s10 + $0x1f64] ss:$16 sps:$4 sm:$0xff]   ;;  %v16185_v16 = vld [vmem:[%s17519_s10 + $0x1f6c] ss:$16 sps:$4 sm:$0xff]  }
 0x443   : > { %10757 = vmatpush1.bf16.msra.mxu0 %v16089_v52  ;;  %11782 = vmatpush1.bf16.msra.mxu1 %v16092_v17  ;;  %v16180_v52 = vld [vmem:[%s17519_s10 + $0x1f60] ss:$16 sps:$4 sm:$0xff]   ;;  %v16183_v17 = vld [vmem:[%s17519_s10 + $0x1f68] ss:$16 sps:$4 sm:$0xff]  }
 0x444   : > { %10758 = vmatprep.subr.bf16.mxu0 %v16097_v8  ;;  %11783 = vmatprep.subr.bf16.mxu1 %v16100_v18  ;;  %v16188_v8 = vld [vmem:[%s17519_s10 + $0x1f84] ss:$16 sps:$4 sm:$0xff]   ;;  %v16191_v18 = vld [vmem:[%s17519_s10 + $0x1f8c] ss:$16 sps:$4 sm:$0xff]  }
 0x447   : > { %10759 = vmatpush1.bf16.msra.mxu0 %v16095_v20  ;;  %11784 = vmatpush1.bf16.msra.mxu1 %v16098_v22  ;;  %v16186_v20 = vld [vmem:[%s17519_s10 + $0x1f80] ss:$16 sps:$4 sm:$0xff]   ;;  %v16189_v22 = vld [vmem:[%s17519_s10 + $0x1f88] ss:$16 sps:$4 sm:$0xff]  }
 0x448   : > { %10760 = vmatprep.subr.bf16.mxu0 %v16103_v24  ;;  %11785 = vmatprep.subr.bf16.mxu1 %v16106_v26  ;;  %v16194_v24 = vld [vmem:[%s17519_s10 + $0x1fa4] ss:$16 sps:$4 sm:$0xff]   ;;  %v16197_v26 = vld [vmem:[%s17519_s10 + $0x1fac] ss:$16 sps:$4 sm:$0xff]  }
 0x44b   : > { %10761 = vmatpush1.bf16.msra.mxu0 %v16101_v60  ;;  %11786 = vmatpush1.bf16.msra.mxu1 %v16104_v27  ;;  %v16192_v60 = vld [vmem:[%s17519_s10 + $0x1fa0] ss:$16 sps:$4 sm:$0xff]   ;;  %v16195_v27 = vld [vmem:[%s17519_s10 + $0x1fa8] ss:$16 sps:$4 sm:$0xff]  }
 0x44c   : > { %10762 = vmatprep.subr.bf16.mxu0 %v16109_v28  ;;  %11787 = vmatprep.subr.bf16.mxu1 %v16112_v29  ;;  %v16200_v28 = vld [vmem:[%s17519_s10 + $0x1fc4] ss:$16 sps:$4 sm:$0xff]   ;;  %v16203_v29 = vld [vmem:[%s17519_s10 + $0x1fcc] ss:$16 sps:$4 sm:$0xff]  }
 0x44f   : > { %10763 = vmatpush1.bf16.msra.mxu0 %v16107_v19  ;;  %11788 = vmatpush1.bf16.msra.mxu1 %v16110_v30  ;;  %v18734_v19 = vld [vmem:[%s19463_s0 + $0x20] sm:$0xff] }
 0x450   : > { %10773 = vmatprep.subr.bf16.mxu0 %v16116_v15  ;;  %11798 = vmatprep.subr.bf16.mxu1 %v16119_v31  ;;  %v16198_v30 = vld [vmem:[%s17519_s10 + $0x1fc0] ss:$16 sps:$4 sm:$0xff]   ;;  %v16201_v15 = vld [vmem:[%s17519_s10 + $0x1fc8] ss:$16 sps:$4 sm:$0xff]   ;;  %v16206_v31 = vld [vmem:[%s17519_s10 + $0x1fe4] ss:$16 sps:$4 sm:$0xff]  }
 0x452   : > { %10765 = vmatmul.mubr.bf16.vlgmr.msra.gmra.mrb[0].mxu0 %v18669_v13  ;;  %11790 = vmatmul.mubr.bf16.vlgmr.msra.gmra.mrb[0].mxu1 %v18669_v13 }
 0x453   : > { %10774 = vmatpush1.bf16.msra.mxu0 %v16114_v33  ;;  %11799 = vmatpush1.bf16.msra.mxu1 %v16117_v25  ;;  %v16209_v33 = vld [vmem:[%s17519_s10 + $0x1fec] ss:$16 sps:$4 sm:$0xff]   ;;  %v18742_v25 = vrot.slane %v18734_v19, %v17585_v49 }
 0x454   : > { %10775 = vmatprep.subr.bf16.mxu0 %v16122_v34  ;;  %11800 = vmatprep.subr.bf16.mxu1 %v16125_v36  ;;  %v16204_v34 = vld [vmem:[%s17519_s10 + $0x1fe0] ss:$16 sps:$4 sm:$0xff]   ;;  %v16207_v36 = vld [vmem:[%s17519_s10 + $0x1fe8] ss:$16 sps:$4 sm:$0xff]  }
 0x455   : > { %10805 = vmatprep.mubr.bf16.mxu0 %v2156_v37  ;;  %11830 = vmatprep.mubr.bf16.mxu1 %v2156_v37  ;;  %v16212_v37 = vld [vmem:[%s17519_s10 + $0x2004] ss:$16 sps:$4 sm:$0xff]  }
 0x457   : > { %10776 = vmatpush1.bf16.msra.mxu0 %v16120_v23  ;;  %11801 = vmatpush1.bf16.msra.mxu1 %v16123_v39  ;;  %v16215_v23 = vld [vmem:[%s17519_s10 + $0x200c] ss:$16 sps:$4 sm:$0xff]   ;;  %v2172_v39 = vcombine.high %v18742_v25, %v18742_v25 }
 0x458   : > { %10777 = vmatprep.subr.bf16.mxu0 %v16128_v40  ;;  %11802 = vmatprep.subr.bf16.mxu1 %v16131_v21  ;;  %v2154_v40 = vcombine.high %v18669_v13, %v18669_v13  ;;  %v16210_v21 = vld [vmem:[%s17519_s10 + $0x2000] ss:$16 sps:$4 sm:$0xff]  }
 0x459   : > { %v16216_v13 = vld [vmem:[%s17519_s10 + $0x2020] ss:$16 sps:$4 sm:$0xff]  }
 0x45b   : > { %10778 = vmatpush1.bf16.msra.mxu0 %v16126_v32  ;;  %11803 = vmatpush1.bf16.msra.mxu1 %v16129_v41  ;;  %v16213_v32 = vld [vmem:[%s17519_s10 + $0x2008] ss:$16 sps:$4 sm:$0xff]   ;;  %v16218_v41 = vld [vmem:[%s17519_s10 + $0x2024] ss:$16 sps:$4 sm:$0xff]  }
 0x45c   : > { %10779 = vmatprep.subr.bf16.mxu0 %v16134_v43  ;;  %11804 = vmatprep.subr.bf16.mxu1 %v16137_v44  ;;  %v16221_v43 = vld [vmem:[%s17519_s10 + $0x202c] ss:$16 sps:$4 sm:$0xff]   ;;  %v18757_v44 = vrot.slane %v2172_v39, %v17585_v49  ;;  %v16297_v39 = vld [vmem:[%s17519_s10 + $0x21c8] ss:$16 sps:$4 sm:$0xff]  }
 0x45f   : > { %10780 = vmatpush1.bf16.msra.mxu0 %v16132_v45  ;;  %11805 = vmatpush1.bf16.msra.mxu1 %v16135_v46  ;;  %v16219_v45 = vld [vmem:[%s17519_s10 + $0x2028] ss:$16 sps:$4 sm:$0xff]   ;;  %v16224_v46 = vld [vmem:[%s17519_s10 + $0x2044] ss:$16 sps:$4 sm:$0xff]  }
 0x460   : > { %10781 = vmatprep.subr.bf16.mxu0 %v16140_v47  ;;  %11806 = vmatprep.subr.bf16.mxu1 %v16143_v50  ;;  %v16227_v47 = vld [vmem:[%s17519_s10 + $0x204c] ss:$16 sps:$4 sm:$0xff]   ;;  %v16222_v50 = vld [vmem:[%s17519_s10 + $0x2040] ss:$16 sps:$4 sm:$0xff]  }
 0x463   : > { %10782 = vmatpush1.bf16.msra.mxu0 %v16138_v51  ;;  %11807 = vmatpush1.bf16.msra.mxu1 %v16141_v53  ;;  %v16225_v51 = vld [vmem:[%s17519_s10 + $0x2048] ss:$16 sps:$4 sm:$0xff]   ;;  %v16230_v53 = vld [vmem:[%s17519_s10 + $0x2064] ss:$16 sps:$4 sm:$0xff]  }
 0x464   : > { %10783 = vmatprep.subr.bf16.mxu0 %v16146_v54  ;;  %11808 = vmatprep.subr.bf16.mxu1 %v16149_v55  ;;  %v16233_v54 = vld [vmem:[%s17519_s10 + $0x206c] ss:$16 sps:$4 sm:$0xff]   ;;  %v16228_v55 = vld [vmem:[%s17519_s10 + $0x2060] ss:$16 sps:$4 sm:$0xff]  }
 0x467   : > { %10784 = vmatpush1.bf16.msra.mxu0 %v16144_v38  ;;  %11809 = vmatpush1.bf16.msra.mxu1 %v16147_v56  ;;  %v16231_v38 = vld [vmem:[%s17519_s10 + $0x2068] ss:$16 sps:$4 sm:$0xff]   ;;  %v16236_v56 = vld [vmem:[%s17519_s10 + $0x2084] ss:$16 sps:$4 sm:$0xff]  }
 0x468   : > { %10785 = vmatprep.subr.bf16.mxu0 %v16152_v57  ;;  %11810 = vmatprep.subr.bf16.mxu1 %v16155_v58  ;;  %v16239_v57 = vld [vmem:[%s17519_s10 + $0x208c] ss:$16 sps:$4 sm:$0xff]   ;;  %v16234_v58 = vld [vmem:[%s17519_s10 + $0x2080] ss:$16 sps:$4 sm:$0xff]  }
 0x46b   : > { %10786 = vmatpush1.bf16.msra.mxu0 %v16150_v48  ;;  %11811 = vmatpush1.bf16.msra.mxu1 %v16153_v59  ;;  %v16237_v48 = vld [vmem:[%s17519_s10 + $0x2088] ss:$16 sps:$4 sm:$0xff]   ;;  %v16242_v59 = vld [vmem:[%s17519_s10 + $0x20a4] ss:$16 sps:$4 sm:$0xff]  }
 0x46c   : > { %10787 = vmatprep.subr.bf16.mxu0 %v16158_v61  ;;  %11812 = vmatprep.subr.bf16.mxu1 %v16161_v62  ;;  %v16245_v61 = vld [vmem:[%s17519_s10 + $0x20ac] ss:$16 sps:$4 sm:$0xff]   ;;  %v16240_v62 = vld [vmem:[%s17519_s10 + $0x20a0] ss:$16 sps:$4 sm:$0xff]  }
 0x46f   : > { %10788 = vmatpush1.bf16.msra.mxu0 %v16156_v0  ;;  %11813 = vmatpush1.bf16.msra.mxu1 %v16159_v1  ;;  %v16243_v0 = vld [vmem:[%s17519_s10 + $0x20a8] ss:$16 sps:$4 sm:$0xff]   ;;  %v16248_v1 = vld [vmem:[%s17519_s10 + $0x20c4] ss:$16 sps:$4 sm:$0xff]  }
 0x470   : > { %10789 = vmatprep.subr.bf16.mxu0 %v16164_v35  ;;  %11814 = vmatprep.subr.bf16.mxu1 %v16167_v2  ;;  %v16251_v35 = vld [vmem:[%s17519_s10 + $0x20cc] ss:$16 sps:$4 sm:$0xff]   ;;  %v16246_v2 = vld [vmem:[%s17519_s10 + $0x20c0] ss:$16 sps:$4 sm:$0xff]  }
 0x473   : > { %10790 = vmatpush1.bf16.msra.mxu0 %v16162_v3  ;;  %11815 = vmatpush1.bf16.msra.mxu1 %v16165_v4  ;;  %v16249_v3 = vld [vmem:[%s17519_s10 + $0x20c8] ss:$16 sps:$4 sm:$0xff]   ;;  %v16254_v4 = vld [vmem:[%s17519_s10 + $0x20e4] ss:$16 sps:$4 sm:$0xff]  }
 0x474   : > { %10791 = vmatprep.subr.bf16.mxu0 %v16170_v5  ;;  %11816 = vmatprep.subr.bf16.mxu1 %v16173_v6  ;;  %v16257_v5 = vld [vmem:[%s17519_s10 + $0x20ec] ss:$16 sps:$4 sm:$0xff]   ;;  %v16252_v6 = vld [vmem:[%s17519_s10 + $0x20e0] ss:$16 sps:$4 sm:$0xff]  }
 0x477   : > { %10792 = vmatpush1.bf16.msra.mxu0 %v16168_v7  ;;  %11817 = vmatpush1.bf16.msra.mxu1 %v16171_v9  ;;  %v16255_v7 = vld [vmem:[%s17519_s10 + $0x20e8] ss:$16 sps:$4 sm:$0xff]   ;;  %v16260_v9 = vld [vmem:[%s17519_s10 + $0x2104] ss:$16 sps:$4 sm:$0xff]  }
 0x478   : > { %10793 = vmatprep.subr.bf16.mxu0 %v16176_v10  ;;  %11818 = vmatprep.subr.bf16.mxu1 %v16179_v11  ;;  %v16263_v10 = vld [vmem:[%s17519_s10 + $0x210c] ss:$16 sps:$4 sm:$0xff]   ;;  %v16258_v11 = vld [vmem:[%s17519_s10 + $0x2100] ss:$16 sps:$4 sm:$0xff]  }
 0x47b   : > { %10794 = vmatpush1.bf16.msra.mxu0 %v16174_v12  ;;  %11819 = vmatpush1.bf16.msra.mxu1 %v16177_v14  ;;  %v16261_v12 = vld [vmem:[%s17519_s10 + $0x2108] ss:$16 sps:$4 sm:$0xff]   ;;  %v16266_v14 = vld [vmem:[%s17519_s10 + $0x2124] ss:$16 sps:$4 sm:$0xff]  }
 0x47c   : > { %10795 = vmatprep.subr.bf16.mxu0 %v16182_v63  ;;  %11820 = vmatprep.subr.bf16.mxu1 %v16185_v16  ;;  %v16269_v63 = vld [vmem:[%s17519_s10 + $0x212c] ss:$16 sps:$4 sm:$0xff]   ;;  %v16264_v16 = vld [vmem:[%s17519_s10 + $0x2120] ss:$16 sps:$4 sm:$0xff]  }
 0x47f   : > { %10796 = vmatpush1.bf16.msra.mxu0 %v16180_v52  ;;  %11821 = vmatpush1.bf16.msra.mxu1 %v16183_v17  ;;  %v16267_v52 = vld [vmem:[%s17519_s10 + $0x2128] ss:$16 sps:$4 sm:$0xff]   ;;  %v16272_v17 = vld [vmem:[%s17519_s10 + $0x2144] ss:$16 sps:$4 sm:$0xff]  }
 0x480   : > { %10797 = vmatprep.subr.bf16.mxu0 %v16188_v8  ;;  %11822 = vmatprep.subr.bf16.mxu1 %v16191_v18  ;;  %v16275_v8 = vld [vmem:[%s17519_s10 + $0x214c] ss:$16 sps:$4 sm:$0xff]   ;;  %v16270_v18 = vld [vmem:[%s17519_s10 + $0x2140] ss:$16 sps:$4 sm:$0xff]  }
 0x483   : > { %10798 = vmatpush1.bf16.msra.mxu0 %v16186_v20  ;;  %11823 = vmatpush1.bf16.msra.mxu1 %v16189_v22  ;;  %v16273_v20 = vld [vmem:[%s17519_s10 + $0x2148] ss:$16 sps:$4 sm:$0xff]   ;;  %v16278_v22 = vld [vmem:[%s17519_s10 + $0x2164] ss:$16 sps:$4 sm:$0xff]  }
 0x484   : > { %10799 = vmatprep.subr.bf16.mxu0 %v16194_v24  ;;  %11824 = vmatprep.subr.bf16.mxu1 %v16197_v26  ;;  %v16281_v24 = vld [vmem:[%s17519_s10 + $0x216c] ss:$16 sps:$4 sm:$0xff]   ;;  %v16276_v26 = vld [vmem:[%s17519_s10 + $0x2160] ss:$16 sps:$4 sm:$0xff]  }
 0x487   : > { %10800 = vmatpush1.bf16.msra.mxu0 %v16192_v60  ;;  %11825 = vmatpush1.bf16.msra.mxu1 %v16195_v27  ;;  %v16279_v60 = vld [vmem:[%s17519_s10 + $0x2168] ss:$16 sps:$4 sm:$0xff]   ;;  %v16284_v27 = vld [vmem:[%s17519_s10 + $0x2184] ss:$16 sps:$4 sm:$0xff]  }
 0x488   : > { %10801 = vmatprep.subr.bf16.mxu0 %v16200_v28  ;;  %11826 = vmatprep.subr.bf16.mxu1 %v16203_v29  ;;  %v16287_v28 = vld [vmem:[%s17519_s10 + $0x218c] ss:$16 sps:$4 sm:$0xff]   ;;  %v16282_v29 = vld [vmem:[%s17519_s10 + $0x2180] ss:$16 sps:$4 sm:$0xff]  }
 0x48b   : > { %10802 = vmatpush1.bf16.msra.mxu0 %v16198_v30  ;;  %11827 = vmatpush1.bf16.msra.mxu1 %v16201_v15  ;;  %v16285_v30 = vld [vmem:[%s17519_s10 + $0x2188] ss:$16 sps:$4 sm:$0xff]   ;;  %v16290_v15 = vld [vmem:[%s17519_s10 + $0x21a4] ss:$16 sps:$4 sm:$0xff]  }
 0x48c   : > { %10803 = vmatprep.subr.bf16.mxu0 %v16206_v31  ;;  %11828 = vmatprep.subr.bf16.mxu1 %v16209_v33  ;;  %v16293_v31 = vld [vmem:[%s17519_s10 + $0x21ac] ss:$16 sps:$4 sm:$0xff]   ;;  %v16288_v33 = vld [vmem:[%s17519_s10 + $0x21a0] ss:$16 sps:$4 sm:$0xff]  }
 0x48f   : > { %10804 = vmatpush1.bf16.msra.mxu0 %v16204_v34  ;;  %11829 = vmatpush1.bf16.msra.mxu1 %v16207_v36  ;;  %v16291_v34 = vld [vmem:[%s17519_s10 + $0x21a8] ss:$16 sps:$4 sm:$0xff]   ;;  %v16296_v36 = vld [vmem:[%s17519_s10 + $0x21c4] ss:$16 sps:$4 sm:$0xff]  }
 0x490   : > { %10814 = vmatprep.subr.bf16.mxu0 %v16212_v37  ;;  %11839 = vmatprep.subr.bf16.mxu1 %v16215_v23  ;;  %v16299_v37 = vld [vmem:[%s17519_s10 + $0x21cc] ss:$16 sps:$4 sm:$0xff]   ;;  %v16294_v23 = vld [vmem:[%s17519_s10 + $0x21c0] ss:$16 sps:$4 sm:$0xff]  }
 0x492   : > { %10806 = vmatmul.mubr.bf16.vlgmr.msra.gmra.mrb[0].mxu0 %v2154_v40  ;;  %11831 = vmatmul.mubr.bf16.vlgmr.msra.gmra.mrb[0].mxu1 %v2154_v40  ;;  %v16302_v40 = vld [vmem:[%s17519_s10 + $0x21e4] ss:$16 sps:$4 sm:$0xff]  }
 0x493   : > { %10815 = vmatpush1.bf16.msra.mxu0 %v16210_v21  ;;  %11840 = vmatpush1.bf16.msra.mxu1 %v16213_v32  ;;  %v16305_v21 = vld [vmem:[%s17519_s10 + $0x21ec] ss:$16 sps:$4 sm:$0xff]   ;;  %v16300_v32 = vld [vmem:[%s17519_s10 + $0x21e0] ss:$16 sps:$4 sm:$0xff]  }
 0x494   : > { %10816 = vmatprep.subr.bf16.mxu0 %v16218_v41  ;;  %11841 = vmatprep.subr.bf16.mxu1 %v16221_v43  ;;  %v16303_v41 = vld [vmem:[%s17519_s10 + $0x21e8] ss:$16 sps:$4 sm:$0xff]   ;;  %v16308_v43 = vld [vmem:[%s17519_s10 + $0x2204] ss:$16 sps:$4 sm:$0xff]  }
 0x495   : > { %10846 = vmatprep.mubr.bf16.mxu0 %v18757_v44  ;;  %11871 = vmatprep.mubr.bf16.mxu1 %v18757_v44 }
 0x497   : > { %10817 = vmatpush1.bf16.msra.mxu0 %v16216_v13  ;;  %11842 = vmatpush1.bf16.msra.mxu1 %v16219_v45  ;;  %v16311_v13 = vld [vmem:[%s17519_s10 + $0x220c] ss:$16 sps:$4 sm:$0xff]   ;;  %v18823_v45 = vrot.slane %v18742_v25, %v17585_v49  ;;  %v16312_v25 = vld [vmem:[%s17519_s10 + $0x2220] ss:$16 sps:$4 sm:$0xff]  }
 0x498   : > { %10818 = vmatprep.subr.bf16.mxu0 %v16224_v46  ;;  %11843 = vmatprep.subr.bf16.mxu1 %v16227_v47  ;;  %v16306_v46 = vld [vmem:[%s17519_s10 + $0x2200] ss:$16 sps:$4 sm:$0xff]   ;;  %v16309_v47 = vld [vmem:[%s17519_s10 + $0x2208] ss:$16 sps:$4 sm:$0xff]  }
 0x49b   : > { %10819 = vmatpush1.bf16.msra.mxu0 %v16222_v50  ;;  %11844 = vmatpush1.bf16.msra.mxu1 %v16225_v51  ;;  %v16314_v50 = vld [vmem:[%s17519_s10 + $0x2224] ss:$16 sps:$4 sm:$0xff]   ;;  %v16317_v51 = vld [vmem:[%s17519_s10 + $0x222c] ss:$16 sps:$4 sm:$0xff]  }
 0x49c   : > { %10820 = vmatprep.subr.bf16.mxu0 %v16230_v53  ;;  %11845 = vmatprep.subr.bf16.mxu1 %v16233_v54  ;;  %v2204_v53 = vcombine.high %v18757_v44, %v18757_v44  ;;  %v16315_v54 = vld [vmem:[%s17519_s10 + $0x2228] ss:$16 sps:$4 sm:$0xff]   ;;  %v16318_v44 = vld [vmem:[%s17519_s10 + $0x2240] ss:$16 sps:$4 sm:$0xff]  }
 0x49f   : > { %10821 = vmatpush1.bf16.msra.mxu0 %v16228_v55  ;;  %11846 = vmatpush1.bf16.msra.mxu1 %v16231_v38  ;;  %v16320_v55 = vld [vmem:[%s17519_s10 + $0x2244] ss:$16 sps:$4 sm:$0xff]   ;;  %v16323_v38 = vld [vmem:[%s17519_s10 + $0x224c] ss:$16 sps:$4 sm:$0xff]  }
 0x4a0   : > { %10822 = vmatprep.subr.bf16.mxu0 %v16236_v56  ;;  %11847 = vmatprep.subr.bf16.mxu1 %v16239_v57  ;;  %v16321_v56 = vld [vmem:[%s17519_s10 + $0x2248] ss:$16 sps:$4 sm:$0xff]   ;;  %v16326_v57 = vld [vmem:[%s17519_s10 + $0x2264] ss:$16 sps:$4 sm:$0xff]  }
 0x4a3   : > { %10823 = vmatpush1.bf16.msra.mxu0 %v16234_v58  ;;  %11848 = vmatpush1.bf16.msra.mxu1 %v16237_v48  ;;  %v16329_v58 = vld [vmem:[%s17519_s10 + $0x226c] ss:$16 sps:$4 sm:$0xff]   ;;  %v16324_v48 = vld [vmem:[%s17519_s10 + $0x2260] ss:$16 sps:$4 sm:$0xff]  }
 0x4a4   : > { %10824 = vmatprep.subr.bf16.mxu0 %v16242_v59  ;;  %11849 = vmatprep.subr.bf16.mxu1 %v16245_v61  ;;  %v16327_v59 = vld [vmem:[%s17519_s10 + $0x2268] ss:$16 sps:$4 sm:$0xff]   ;;  %v16332_v61 = vld [vmem:[%s17519_s10 + $0x2284] ss:$16 sps:$4 sm:$0xff]  }
 0x4a7   : > { %10825 = vmatpush1.bf16.msra.mxu0 %v16240_v62  ;;  %11850 = vmatpush1.bf16.msra.mxu1 %v16243_v0  ;;  %v16335_v62 = vld [vmem:[%s17519_s10 + $0x228c] ss:$16 sps:$4 sm:$0xff]   ;;  %v16330_v0 = vld [vmem:[%s17519_s10 + $0x2280] ss:$16 sps:$4 sm:$0xff]  }
 0x4a8   : > { %10826 = vmatprep.subr.bf16.mxu0 %v16248_v1  ;;  %11851 = vmatprep.subr.bf16.mxu1 %v16251_v35  ;;  %v16333_v1 = vld [vmem:[%s17519_s10 + $0x2288] ss:$16 sps:$4 sm:$0xff]   ;;  %v16338_v35 = vld [vmem:[%s17519_s10 + $0x22a4] ss:$16 sps:$4 sm:$0xff]  }
 0x4ab   : > { %10827 = vmatpush1.bf16.msra.mxu0 %v16246_v2  ;;  %11852 = vmatpush1.bf16.msra.mxu1 %v16249_v3  ;;  %v16341_v2 = vld [vmem:[%s17519_s10 + $0x22ac] ss:$16 sps:$4 sm:$0xff]   ;;  %v16336_v3 = vld [vmem:[%s17519_s10 + $0x22a0] ss:$16 sps:$4 sm:$0xff]  }
 0x4ac   : > { %10828 = vmatprep.subr.bf16.mxu0 %v16254_v4  ;;  %11853 = vmatprep.subr.bf16.mxu1 %v16257_v5  ;;  %v16339_v4 = vld [vmem:[%s17519_s10 + $0x22a8] ss:$16 sps:$4 sm:$0xff]   ;;  %v16344_v5 = vld [vmem:[%s17519_s10 + $0x22c4] ss:$16 sps:$4 sm:$0xff]  }
 0x4af   : > { %10829 = vmatpush1.bf16.msra.mxu0 %v16252_v6  ;;  %11854 = vmatpush1.bf16.msra.mxu1 %v16255_v7  ;;  %v16347_v6 = vld [vmem:[%s17519_s10 + $0x22cc] ss:$16 sps:$4 sm:$0xff]   ;;  %v16342_v7 = vld [vmem:[%s17519_s10 + $0x22c0] ss:$16 sps:$4 sm:$0xff]  }
 0x4b0   : > { %10830 = vmatprep.subr.bf16.mxu0 %v16260_v9  ;;  %11855 = vmatprep.subr.bf16.mxu1 %v16263_v10  ;;  %v16345_v9 = vld [vmem:[%s17519_s10 + $0x22c8] ss:$16 sps:$4 sm:$0xff]   ;;  %v16350_v10 = vld [vmem:[%s17519_s10 + $0x22e4] ss:$16 sps:$4 sm:$0xff]  }
 0x4b3   : > { %10831 = vmatpush1.bf16.msra.mxu0 %v16258_v11  ;;  %11856 = vmatpush1.bf16.msra.mxu1 %v16261_v12  ;;  %v16353_v11 = vld [vmem:[%s17519_s10 + $0x22ec] ss:$16 sps:$4 sm:$0xff]   ;;  %v16348_v12 = vld [vmem:[%s17519_s10 + $0x22e0] ss:$16 sps:$4 sm:$0xff]  }
 0x4b4   : > { %10832 = vmatprep.subr.bf16.mxu0 %v16266_v14  ;;  %11857 = vmatprep.subr.bf16.mxu1 %v16269_v63  ;;  %v16351_v14 = vld [vmem:[%s17519_s10 + $0x22e8] ss:$16 sps:$4 sm:$0xff]   ;;  %v16356_v63 = vld [vmem:[%s17519_s10 + $0x2304] ss:$16 sps:$4 sm:$0xff]  }
 0x4b7   : > { %10833 = vmatpush1.bf16.msra.mxu0 %v16264_v16  ;;  %11858 = vmatpush1.bf16.msra.mxu1 %v16267_v52  ;;  %v16359_v16 = vld [vmem:[%s17519_s10 + $0x230c] ss:$16 sps:$4 sm:$0xff]   ;;  %v16354_v52 = vld [vmem:[%s17519_s10 + $0x2300] ss:$16 sps:$4 sm:$0xff]  }
 0x4b8   : > { %10834 = vmatprep.subr.bf16.mxu0 %v16272_v17  ;;  %11859 = vmatprep.subr.bf16.mxu1 %v16275_v8  ;;  %v16357_v17 = vld [vmem:[%s17519_s10 + $0x2308] ss:$16 sps:$4 sm:$0xff]   ;;  %v16362_v8 = vld [vmem:[%s17519_s10 + $0x2324] ss:$16 sps:$4 sm:$0xff]  }
 0x4bb   : > { %10835 = vmatpush1.bf16.msra.mxu0 %v16270_v18  ;;  %11860 = vmatpush1.bf16.msra.mxu1 %v16273_v20  ;;  %v16365_v18 = vld [vmem:[%s17519_s10 + $0x232c] ss:$16 sps:$4 sm:$0xff]   ;;  %v16360_v20 = vld [vmem:[%s17519_s10 + $0x2320] ss:$16 sps:$4 sm:$0xff]  }
 0x4bc   : > { %10836 = vmatprep.subr.bf16.mxu0 %v16278_v22  ;;  %11861 = vmatprep.subr.bf16.mxu1 %v16281_v24  ;;  %v16363_v22 = vld [vmem:[%s17519_s10 + $0x2328] ss:$16 sps:$4 sm:$0xff]   ;;  %v16368_v24 = vld [vmem:[%s17519_s10 + $0x2344] ss:$16 sps:$4 sm:$0xff]  }
 0x4bf   : > { %10837 = vmatpush1.bf16.msra.mxu0 %v16276_v26  ;;  %11862 = vmatpush1.bf16.msra.mxu1 %v16279_v60  ;;  %v16371_v26 = vld [vmem:[%s17519_s10 + $0x234c] ss:$16 sps:$4 sm:$0xff]   ;;  %v16366_v60 = vld [vmem:[%s17519_s10 + $0x2340] ss:$16 sps:$4 sm:$0xff]  }
 0x4c0   : > { %10838 = vmatprep.subr.bf16.mxu0 %v16284_v27  ;;  %11863 = vmatprep.subr.bf16.mxu1 %v16287_v28  ;;  %v16369_v27 = vld [vmem:[%s17519_s10 + $0x2348] ss:$16 sps:$4 sm:$0xff]   ;;  %v16374_v28 = vld [vmem:[%s17519_s10 + $0x2364] ss:$16 sps:$4 sm:$0xff]  }
 0x4c3   : > { %10839 = vmatpush1.bf16.msra.mxu0 %v16282_v29  ;;  %11864 = vmatpush1.bf16.msra.mxu1 %v16285_v30  ;;  %v16377_v29 = vld [vmem:[%s17519_s10 + $0x236c] ss:$16 sps:$4 sm:$0xff]   ;;  %v16372_v30 = vld [vmem:[%s17519_s10 + $0x2360] ss:$16 sps:$4 sm:$0xff]  }
 0x4c4   : > { %10840 = vmatprep.subr.bf16.mxu0 %v16290_v15  ;;  %11865 = vmatprep.subr.bf16.mxu1 %v16293_v31  ;;  %v16375_v15 = vld [vmem:[%s17519_s10 + $0x2368] ss:$16 sps:$4 sm:$0xff]   ;;  %v16380_v31 = vld [vmem:[%s17519_s10 + $0x2384] ss:$16 sps:$4 sm:$0xff]  }
 0x4c7   : > { %10841 = vmatpush1.bf16.msra.mxu0 %v16288_v33  ;;  %11866 = vmatpush1.bf16.msra.mxu1 %v16291_v34  ;;  %v16383_v33 = vld [vmem:[%s17519_s10 + $0x238c] ss:$16 sps:$4 sm:$0xff]   ;;  %v16378_v34 = vld [vmem:[%s17519_s10 + $0x2380] ss:$16 sps:$4 sm:$0xff]  }
 0x4c8   : > { %10842 = vmatprep.subr.bf16.mxu0 %v16296_v36  ;;  %11867 = vmatprep.subr.bf16.mxu1 %v16299_v37  ;;  %v16381_v36 = vld [vmem:[%s17519_s10 + $0x2388] ss:$16 sps:$4 sm:$0xff]   ;;  %v16386_v37 = vld [vmem:[%s17519_s10 + $0x23a4] ss:$16 sps:$4 sm:$0xff]  }
 0x4cb   : > { %10843 = vmatpush1.bf16.msra.mxu0 %v16294_v23  ;;  %11868 = vmatpush1.bf16.msra.mxu1 %v16297_v39  ;;  %v16389_v23 = vld [vmem:[%s17519_s10 + $0x23ac] ss:$16 sps:$4 sm:$0xff]   ;;  %v16384_v39 = vld [vmem:[%s17519_s10 + $0x23a0] ss:$16 sps:$4 sm:$0xff]  }
 0x4cc   : > { %10844 = vmatprep.subr.bf16.mxu0 %v16302_v40  ;;  %11869 = vmatprep.subr.bf16.mxu1 %v16305_v21  ;;  %v16387_v40 = vld [vmem:[%s17519_s10 + $0x23a8] ss:$16 sps:$4 sm:$0xff]   ;;  %v16392_v21 = vld [vmem:[%s17519_s10 + $0x23c4] ss:$16 sps:$4 sm:$0xff]  }
 0x4cf   : > { %10845 = vmatpush1.bf16.msra.mxu0 %v16300_v32  ;;  %11870 = vmatpush1.bf16.msra.mxu1 %v16303_v41  ;;  %v16395_v32 = vld [vmem:[%s17519_s10 + $0x23cc] ss:$16 sps:$4 sm:$0xff]   ;;  %v2157_v41 = vcombine.high %v18734_v19, %v18734_v19  ;;  %v16396_v19 = vld [vmem:[%s17519_s10 + $0x23e0] ss:$16 sps:$4 sm:$0xff]  }
 0x4d0   : > { %10855 = vmatprep.subr.bf16.mxu0 %v16308_v43  ;;  %11880 = vmatprep.subr.bf16.mxu1 %v16311_v13  ;;  %v16390_v43 = vld [vmem:[%s17519_s10 + $0x23c0] ss:$16 sps:$4 sm:$0xff]   ;;  %v16393_v13 = vld [vmem:[%s17519_s10 + $0x23c8] ss:$16 sps:$4 sm:$0xff]  }
 0x4d2   : > { %10847 = vmatmul.mubr.bf16.vlgmr.msra.gmra.mrb[0].mxu0 %v18823_v45  ;;  %11872 = vmatmul.mubr.bf16.vlgmr.msra.gmra.mrb[0].mxu1 %v18823_v45 }
 0x4d3   : > { %10856 = vmatpush1.bf16.msra.mxu0 %v16306_v46  ;;  %11881 = vmatpush1.bf16.msra.mxu1 %v16309_v47  ;;  %v16398_v46 = vld [vmem:[%s17519_s10 + $0x23e4] ss:$16 sps:$4 sm:$0xff]   ;;  %v16401_v47 = vld [vmem:[%s17519_s10 + $0x23ec] ss:$16 sps:$4 sm:$0xff]  }
 0x4d4   : > { %10857 = vmatprep.subr.bf16.mxu0 %v16314_v50  ;;  %11882 = vmatprep.subr.bf16.mxu1 %v16317_v51  ;;  %v18892_v50 = vrot.slane %v2157_v41, %v17585_v49  ;;  %v16399_v51 = vld [vmem:[%s17519_s10 + $0x23e8] ss:$16 sps:$4 sm:$0xff]  }
 0x4d5   : > { %10887 = vmatprep.mubr.bf16.mxu0 %v2204_v53  ;;  %11912 = vmatprep.mubr.bf16.mxu1 %v2204_v53  ;;  %v16404_v53 = vld [vmem:[%s17519_s10 + $0x2404] ss:$16 sps:$4 sm:$0xff]   ;;  %v16477_v41 = vld [vmem:[%s17519_s10 + $0x2588] ss:$16 sps:$4 sm:$0xff]  }
 0x4d7   : > { %10858 = vmatpush1.bf16.msra.mxu0 %v16312_v25  ;;  %11883 = vmatpush1.bf16.msra.mxu1 %v16315_v54  ;;  %v16407_v25 = vld [vmem:[%s17519_s10 + $0x240c] ss:$16 sps:$4 sm:$0xff]   ;;  %v2173_v54 = vcombine.high %v18892_v50, %v18892_v50 }
 0x4d8   : > { %10859 = vmatprep.subr.bf16.mxu0 %v16320_v55  ;;  %11884 = vmatprep.subr.bf16.mxu1 %v16323_v38  ;;  %v2202_v55 = vcombine.high %v18823_v45, %v18823_v45  ;;  %v16402_v38 = vld [vmem:[%s17519_s10 + $0x2400] ss:$16 sps:$4 sm:$0xff]  }
 0x4d9   : > { %v16408_v45 = vld [vmem:[%s17519_s10 + $0x2420] ss:$16 sps:$4 sm:$0xff]  }
 0x4db   : > { %10860 = vmatpush1.bf16.msra.mxu0 %v16318_v44  ;;  %11885 = vmatpush1.bf16.msra.mxu1 %v16321_v56  ;;  %v16405_v44 = vld [vmem:[%s17519_s10 + $0x2408] ss:$16 sps:$4 sm:$0xff]   ;;  %v16410_v56 = vld [vmem:[%s17519_s10 + $0x2424] ss:$16 sps:$4 sm:$0xff]  }
 0x4dc   : > { %10861 = vmatprep.subr.bf16.mxu0 %v16326_v57  ;;  %11886 = vmatprep.subr.bf16.mxu1 %v16329_v58  ;;  %v16413_v57 = vld [vmem:[%s17519_s10 + $0x242c] ss:$16 sps:$4 sm:$0xff]   ;;  %v18907_v58 = vrot.slane %v2173_v54, %v17585_v49  ;;  %v16494_v54 = vld [vmem:[%s17519_s10 + $0x25e4] ss:$16 sps:$4 sm:$0xff]  }
 0x4df   : > { %10862 = vmatpush1.bf16.msra.mxu0 %v16324_v48  ;;  %11887 = vmatpush1.bf16.msra.mxu1 %v16327_v59  ;;  %v16411_v48 = vld [vmem:[%s17519_s10 + $0x2428] ss:$16 sps:$4 sm:$0xff]   ;;  %v16416_v59 = vld [vmem:[%s17519_s10 + $0x2444] ss:$16 sps:$4 sm:$0xff]  }
 0x4e0   : > { %10863 = vmatprep.subr.bf16.mxu0 %v16332_v61  ;;  %11888 = vmatprep.subr.bf16.mxu1 %v16335_v62  ;;  %v16419_v61 = vld [vmem:[%s17519_s10 + $0x244c] ss:$16 sps:$4 sm:$0xff]   ;;  %v16414_v62 = vld [vmem:[%s17519_s10 + $0x2440] ss:$16 sps:$4 sm:$0xff]  }
 0x4e3   : > { %10864 = vmatpush1.bf16.msra.mxu0 %v16330_v0  ;;  %11889 = vmatpush1.bf16.msra.mxu1 %v16333_v1  ;;  %v16417_v0 = vld [vmem:[%s17519_s10 + $0x2448] ss:$16 sps:$4 sm:$0xff]   ;;  %v16422_v1 = vld [vmem:[%s17519_s10 + $0x2464] ss:$16 sps:$4 sm:$0xff]  }
 0x4e4   : > { %10865 = vmatprep.subr.bf16.mxu0 %v16338_v35  ;;  %11890 = vmatprep.subr.bf16.mxu1 %v16341_v2  ;;  %v16425_v35 = vld [vmem:[%s17519_s10 + $0x246c] ss:$16 sps:$4 sm:$0xff]   ;;  %v16420_v2 = vld [vmem:[%s17519_s10 + $0x2460] ss:$16 sps:$4 sm:$0xff]  }
 0x4e7   : > { %10866 = vmatpush1.bf16.msra.mxu0 %v16336_v3  ;;  %11891 = vmatpush1.bf16.msra.mxu1 %v16339_v4  ;;  %v16423_v3 = vld [vmem:[%s17519_s10 + $0x2468] ss:$16 sps:$4 sm:$0xff]   ;;  %v16428_v4 = vld [vmem:[%s17519_s10 + $0x2484] ss:$16 sps:$4 sm:$0xff]  }
 0x4e8   : > { %10867 = vmatprep.subr.bf16.mxu0 %v16344_v5  ;;  %11892 = vmatprep.subr.bf16.mxu1 %v16347_v6  ;;  %v16431_v5 = vld [vmem:[%s17519_s10 + $0x248c] ss:$16 sps:$4 sm:$0xff]   ;;  %v16426_v6 = vld [vmem:[%s17519_s10 + $0x2480] ss:$16 sps:$4 sm:$0xff]  }
 0x4eb   : > { %10868 = vmatpush1.bf16.msra.mxu0 %v16342_v7  ;;  %11893 = vmatpush1.bf16.msra.mxu1 %v16345_v9  ;;  %v16429_v7 = vld [vmem:[%s17519_s10 + $0x2488] ss:$16 sps:$4 sm:$0xff]   ;;  %v16434_v9 = vld [vmem:[%s17519_s10 + $0x24a4] ss:$16 sps:$4 sm:$0xff]  }
 0x4ec   : > { %10869 = vmatprep.subr.bf16.mxu0 %v16350_v10  ;;  %11894 = vmatprep.subr.bf16.mxu1 %v16353_v11  ;;  %v16437_v10 = vld [vmem:[%s17519_s10 + $0x24ac] ss:$16 sps:$4 sm:$0xff]   ;;  %v16432_v11 = vld [vmem:[%s17519_s10 + $0x24a0] ss:$16 sps:$4 sm:$0xff]  }
 0x4ef   : > { %10870 = vmatpush1.bf16.msra.mxu0 %v16348_v12  ;;  %11895 = vmatpush1.bf16.msra.mxu1 %v16351_v14  ;;  %v16435_v12 = vld [vmem:[%s17519_s10 + $0x24a8] ss:$16 sps:$4 sm:$0xff]   ;;  %v16440_v14 = vld [vmem:[%s17519_s10 + $0x24c4] ss:$16 sps:$4 sm:$0xff]  }
 0x4f0   : > { %10871 = vmatprep.subr.bf16.mxu0 %v16356_v63  ;;  %11896 = vmatprep.subr.bf16.mxu1 %v16359_v16  ;;  %v16443_v63 = vld [vmem:[%s17519_s10 + $0x24cc] ss:$16 sps:$4 sm:$0xff]   ;;  %v16438_v16 = vld [vmem:[%s17519_s10 + $0x24c0] ss:$16 sps:$4 sm:$0xff]  }
 0x4f3   : > { %10872 = vmatpush1.bf16.msra.mxu0 %v16354_v52  ;;  %11897 = vmatpush1.bf16.msra.mxu1 %v16357_v17  ;;  %v16441_v52 = vld [vmem:[%s17519_s10 + $0x24c8] ss:$16 sps:$4 sm:$0xff]   ;;  %v16446_v17 = vld [vmem:[%s17519_s10 + $0x24e4] ss:$16 sps:$4 sm:$0xff]  }
 0x4f4   : > { %10873 = vmatprep.subr.bf16.mxu0 %v16362_v8  ;;  %11898 = vmatprep.subr.bf16.mxu1 %v16365_v18  ;;  %v16449_v8 = vld [vmem:[%s17519_s10 + $0x24ec] ss:$16 sps:$4 sm:$0xff]   ;;  %v16444_v18 = vld [vmem:[%s17519_s10 + $0x24e0] ss:$16 sps:$4 sm:$0xff]  }
 0x4f7   : > { %10874 = vmatpush1.bf16.msra.mxu0 %v16360_v20  ;;  %11899 = vmatpush1.bf16.msra.mxu1 %v16363_v22  ;;  %v16447_v20 = vld [vmem:[%s17519_s10 + $0x24e8] ss:$16 sps:$4 sm:$0xff]   ;;  %v16452_v22 = vld [vmem:[%s17519_s10 + $0x2504] ss:$16 sps:$4 sm:$0xff]  }
 0x4f8   : > { %10875 = vmatprep.subr.bf16.mxu0 %v16368_v24  ;;  %11900 = vmatprep.subr.bf16.mxu1 %v16371_v26  ;;  %v16455_v24 = vld [vmem:[%s17519_s10 + $0x250c] ss:$16 sps:$4 sm:$0xff]   ;;  %v16450_v26 = vld [vmem:[%s17519_s10 + $0x2500] ss:$16 sps:$4 sm:$0xff]  }
 0x4fb   : > { %10876 = vmatpush1.bf16.msra.mxu0 %v16366_v60  ;;  %11901 = vmatpush1.bf16.msra.mxu1 %v16369_v27  ;;  %v16453_v60 = vld [vmem:[%s17519_s10 + $0x2508] ss:$16 sps:$4 sm:$0xff]   ;;  %v16458_v27 = vld [vmem:[%s17519_s10 + $0x2524] ss:$16 sps:$4 sm:$0xff]  }
 0x4fc   : > { %10877 = vmatprep.subr.bf16.mxu0 %v16374_v28  ;;  %11902 = vmatprep.subr.bf16.mxu1 %v16377_v29  ;;  %v16461_v28 = vld [vmem:[%s17519_s10 + $0x252c] ss:$16 sps:$4 sm:$0xff]   ;;  %v16456_v29 = vld [vmem:[%s17519_s10 + $0x2520] ss:$16 sps:$4 sm:$0xff]  }
 0x4ff   : > { %10878 = vmatpush1.bf16.msra.mxu0 %v16372_v30  ;;  %11903 = vmatpush1.bf16.msra.mxu1 %v16375_v15  ;;  %v16459_v30 = vld [vmem:[%s17519_s10 + $0x2528] ss:$16 sps:$4 sm:$0xff]   ;;  %v16464_v15 = vld [vmem:[%s17519_s10 + $0x2544] ss:$16 sps:$4 sm:$0xff]  }
 0x500   : > { %10879 = vmatprep.subr.bf16.mxu0 %v16380_v31  ;;  %11904 = vmatprep.subr.bf16.mxu1 %v16383_v33  ;;  %v16467_v31 = vld [vmem:[%s17519_s10 + $0x254c] ss:$16 sps:$4 sm:$0xff]   ;;  %v16462_v33 = vld [vmem:[%s17519_s10 + $0x2540] ss:$16 sps:$4 sm:$0xff]  }
 0x503   : > { %10880 = vmatpush1.bf16.msra.mxu0 %v16378_v34  ;;  %11905 = vmatpush1.bf16.msra.mxu1 %v16381_v36  ;;  %v16465_v34 = vld [vmem:[%s17519_s10 + $0x2548] ss:$16 sps:$4 sm:$0xff]   ;;  %v16470_v36 = vld [vmem:[%s17519_s10 + $0x2564] ss:$16 sps:$4 sm:$0xff]  }
 0x504   : > { %10881 = vmatprep.subr.bf16.mxu0 %v16386_v37  ;;  %11906 = vmatprep.subr.bf16.mxu1 %v16389_v23  ;;  %v16473_v37 = vld [vmem:[%s17519_s10 + $0x256c] ss:$16 sps:$4 sm:$0xff]   ;;  %v16468_v23 = vld [vmem:[%s17519_s10 + $0x2560] ss:$16 sps:$4 sm:$0xff]  }
 0x507   : > { %10882 = vmatpush1.bf16.msra.mxu0 %v16384_v39  ;;  %11907 = vmatpush1.bf16.msra.mxu1 %v16387_v40  ;;  %v16471_v39 = vld [vmem:[%s17519_s10 + $0x2568] ss:$16 sps:$4 sm:$0xff]   ;;  %v16476_v40 = vld [vmem:[%s17519_s10 + $0x2584] ss:$16 sps:$4 sm:$0xff]  }
 0x508   : > { %10883 = vmatprep.subr.bf16.mxu0 %v16392_v21  ;;  %11908 = vmatprep.subr.bf16.mxu1 %v16395_v32  ;;  %v16479_v21 = vld [vmem:[%s17519_s10 + $0x258c] ss:$16 sps:$4 sm:$0xff]   ;;  %v16474_v32 = vld [vmem:[%s17519_s10 + $0x2580] ss:$16 sps:$4 sm:$0xff]  }
 0x50b   : > { %10884 = vmatpush1.bf16.msra.mxu0 %v16390_v43  ;;  %11909 = vmatpush1.bf16.msra.mxu1 %v16393_v13  ;;  %v16482_v43 = vld [vmem:[%s17519_s10 + $0x25a4] ss:$16 sps:$4 sm:$0xff]   ;;  %v16485_v13 = vld [vmem:[%s17519_s10 + $0x25ac] ss:$16 sps:$4 sm:$0xff]  }
 0x50c   : > { %10885 = vmatprep.subr.bf16.mxu0 %v16398_v46  ;;  %11910 = vmatprep.subr.bf16.mxu1 %v16401_v47  ;;  %v16480_v46 = vld [vmem:[%s17519_s10 + $0x25a0] ss:$16 sps:$4 sm:$0xff]   ;;  %v16483_v47 = vld [vmem:[%s17519_s10 + $0x25a8] ss:$16 sps:$4 sm:$0xff]  }
 0x50f   : > { %10886 = vmatpush1.bf16.msra.mxu0 %v16396_v19  ;;  %11911 = vmatpush1.bf16.msra.mxu1 %v16399_v51  ;;  %v16488_v19 = vld [vmem:[%s17519_s10 + $0x25c4] ss:$16 sps:$4 sm:$0xff]   ;;  %v16491_v51 = vld [vmem:[%s17519_s10 + $0x25cc] ss:$16 sps:$4 sm:$0xff]  }
 0x510   : > { %10896 = vmatprep.subr.bf16.mxu0 %v16404_v53  ;;  %11921 = vmatprep.subr.bf16.mxu1 %v16407_v25  ;;  %v16486_v53 = vld [vmem:[%s17519_s10 + $0x25c0] ss:$16 sps:$4 sm:$0xff]   ;;  %v16489_v25 = vld [vmem:[%s17519_s10 + $0x25c8] ss:$16 sps:$4 sm:$0xff]  }
 0x512   : > { %10888 = vmatmul.mubr.bf16.vlgmr.msra.gmra.mrb[0].mxu0 %v2202_v55  ;;  %11913 = vmatmul.mubr.bf16.vlgmr.msra.gmra.mrb[0].mxu1 %v2202_v55  ;;  %v16497_v55 = vld [vmem:[%s17519_s10 + $0x25ec] ss:$16 sps:$4 sm:$0xff]  }
 0x513   : > { %10897 = vmatpush1.bf16.msra.mxu0 %v16402_v38  ;;  %11922 = vmatpush1.bf16.msra.mxu1 %v16405_v44  ;;  %v16492_v38 = vld [vmem:[%s17519_s10 + $0x25e0] ss:$16 sps:$4 sm:$0xff]   ;;  %v16495_v44 = vld [vmem:[%s17519_s10 + $0x25e8] ss:$16 sps:$4 sm:$0xff]  }
 0x514   : > { %10898 = vmatprep.subr.bf16.mxu0 %v16410_v56  ;;  %11923 = vmatprep.subr.bf16.mxu1 %v16413_v57  ;;  %v16501_v56 = vld [vmem:[%s17519_s10 + $0x2604] ss:$16 sps:$4 sm:$0xff]   ;;  %v16504_v57 = vld [vmem:[%s17519_s10 + $0x260c] ss:$16 sps:$4 sm:$0xff]  }
 0x515   : > { %10928 = vmatprep.mubr.bf16.mxu0 %v18907_v58  ;;  %11953 = vmatprep.mubr.bf16.mxu1 %v18907_v58 }
 0x517   : > { %10899 = vmatpush1.bf16.msra.mxu0 %v16408_v45  ;;  %11924 = vmatpush1.bf16.msra.mxu1 %v16411_v48  ;;  %v18973_v45 = vrot.slane %v18892_v50, %v17585_v49  ;;  %v16499_v48 = vld [vmem:[%s17519_s10 + $0x2600] ss:$16 sps:$4 sm:$0xff]  }
 0x518   : > { %10900 = vmatprep.subr.bf16.mxu0 %v16416_v59  ;;  %11925 = vmatprep.subr.bf16.mxu1 %v16419_v61  ;;  %v16502_v59 = vld [vmem:[%s17519_s10 + $0x2608] ss:$16 sps:$4 sm:$0xff]   ;;  %v16507_v61 = vld [vmem:[%s17519_s10 + $0x2624] ss:$16 sps:$4 sm:$0xff]   ;;  %v16505_v50 = vld [vmem:[%s17519_s10 + $0x2620] ss:$16 sps:$4 sm:$0xff]  }
 0x51b   : > { %10901 = vmatpush1.bf16.msra.mxu0 %v16414_v62  ;;  %11926 = vmatpush1.bf16.msra.mxu1 %v16417_v0  ;;  %v16510_v62 = vld [vmem:[%s17519_s10 + $0x262c] ss:$16 sps:$4 sm:$0xff]   ;;  %v2205_v0 = vcombine.high %v18907_v58, %v18907_v58  ;;  %v16511_v58 = vld [vmem:[%s17519_s10 + $0x2640] ss:$16 sps:$4 sm:$0xff]  }
 0x51c   : > { %10902 = vmatprep.subr.bf16.mxu0 %v16422_v1  ;;  %11927 = vmatprep.subr.bf16.mxu1 %v16425_v35  ;;  %v16508_v1 = vld [vmem:[%s17519_s10 + $0x2628] ss:$16 sps:$4 sm:$0xff]   ;;  %v16513_v35 = vld [vmem:[%s17519_s10 + $0x2644] ss:$16 sps:$4 sm:$0xff]  }
 0x51f   : > { %10903 = vmatpush1.bf16.msra.mxu0 %v16420_v2  ;;  %11928 = vmatpush1.bf16.msra.mxu1 %v16423_v3  ;;  %v16516_v2 = vld [vmem:[%s17519_s10 + $0x264c] ss:$16 sps:$4 sm:$0xff]   ;;  %v16514_v3 = vld [vmem:[%s17519_s10 + $0x2648] ss:$16 sps:$4 sm:$0xff]  }
 0x520   : > { %10904 = vmatprep.subr.bf16.mxu0 %v16428_v4  ;;  %11929 = vmatprep.subr.bf16.mxu1 %v16431_v5  ;;  %v16519_v4 = vld [vmem:[%s17519_s10 + $0x2664] ss:$16 sps:$4 sm:$0xff]   ;;  %v16522_v5 = vld [vmem:[%s17519_s10 + $0x266c] ss:$16 sps:$4 sm:$0xff]  }
 0x523   : > { %10905 = vmatpush1.bf16.msra.mxu0 %v16426_v6  ;;  %11930 = vmatpush1.bf16.msra.mxu1 %v16429_v7  ;;  %v16517_v6 = vld [vmem:[%s17519_s10 + $0x2660] ss:$16 sps:$4 sm:$0xff]   ;;  %v16520_v7 = vld [vmem:[%s17519_s10 + $0x2668] ss:$16 sps:$4 sm:$0xff]  }
 0x524   : > { %10906 = vmatprep.subr.bf16.mxu0 %v16434_v9  ;;  %11931 = vmatprep.subr.bf16.mxu1 %v16437_v10  ;;  %v16525_v9 = vld [vmem:[%s17519_s10 + $0x2684] ss:$16 sps:$4 sm:$0xff]   ;;  %v16528_v10 = vld [vmem:[%s17519_s10 + $0x268c] ss:$16 sps:$4 sm:$0xff]  }
 0x527   : > { %10907 = vmatpush1.bf16.msra.mxu0 %v16432_v11  ;;  %11932 = vmatpush1.bf16.msra.mxu1 %v16435_v12  ;;  %v16523_v11 = vld [vmem:[%s17519_s10 + $0x2680] ss:$16 sps:$4 sm:$0xff]   ;;  %v16526_v12 = vld [vmem:[%s17519_s10 + $0x2688] ss:$16 sps:$4 sm:$0xff]  }
 0x528   : > { %10908 = vmatprep.subr.bf16.mxu0 %v16440_v14  ;;  %11933 = vmatprep.subr.bf16.mxu1 %v16443_v63  ;;  %v16531_v14 = vld [vmem:[%s17519_s10 + $0x26a4] ss:$16 sps:$4 sm:$0xff]   ;;  %v16534_v63 = vld [vmem:[%s17519_s10 + $0x26ac] ss:$16 sps:$4 sm:$0xff]  }
 0x52b   : > { %10909 = vmatpush1.bf16.msra.mxu0 %v16438_v16  ;;  %11934 = vmatpush1.bf16.msra.mxu1 %v16441_v52  ;;  %v16529_v16 = vld [vmem:[%s17519_s10 + $0x26a0] ss:$16 sps:$4 sm:$0xff]   ;;  %v16532_v52 = vld [vmem:[%s17519_s10 + $0x26a8] ss:$16 sps:$4 sm:$0xff]  }
 0x52c   : > { %10910 = vmatprep.subr.bf16.mxu0 %v16446_v17  ;;  %11935 = vmatprep.subr.bf16.mxu1 %v16449_v8  ;;  %v16537_v17 = vld [vmem:[%s17519_s10 + $0x26c4] ss:$16 sps:$4 sm:$0xff]   ;;  %v16540_v8 = vld [vmem:[%s17519_s10 + $0x26cc] ss:$16 sps:$4 sm:$0xff]  }
 0x52f   : > { %10911 = vmatpush1.bf16.msra.mxu0 %v16444_v18  ;;  %11936 = vmatpush1.bf16.msra.mxu1 %v16447_v20  ;;  %v16535_v18 = vld [vmem:[%s17519_s10 + $0x26c0] ss:$16 sps:$4 sm:$0xff]   ;;  %v16538_v20 = vld [vmem:[%s17519_s10 + $0x26c8] ss:$16 sps:$4 sm:$0xff]  }
 0x530   : > { %10912 = vmatprep.subr.bf16.mxu0 %v16452_v22  ;;  %11937 = vmatprep.subr.bf16.mxu1 %v16455_v24  ;;  %v16543_v22 = vld [vmem:[%s17519_s10 + $0x26e4] ss:$16 sps:$4 sm:$0xff]   ;;  %v16546_v24 = vld [vmem:[%s17519_s10 + $0x26ec] ss:$16 sps:$4 sm:$0xff]  }
 0x533   : > { %10913 = vmatpush1.bf16.msra.mxu0 %v16450_v26  ;;  %11938 = vmatpush1.bf16.msra.mxu1 %v16453_v60  ;;  %v16541_v26 = vld [vmem:[%s17519_s10 + $0x26e0] ss:$16 sps:$4 sm:$0xff]   ;;  %v16544_v60 = vld [vmem:[%s17519_s10 + $0x26e8] ss:$16 sps:$4 sm:$0xff]  }
 0x534   : > { %10914 = vmatprep.subr.bf16.mxu0 %v16458_v27  ;;  %11939 = vmatprep.subr.bf16.mxu1 %v16461_v28  ;;  %v16549_v27 = vld [vmem:[%s17519_s10 + $0x2704] ss:$16 sps:$4 sm:$0xff]   ;;  %v16552_v28 = vld [vmem:[%s17519_s10 + $0x270c] ss:$16 sps:$4 sm:$0xff]  }
 0x537   : > { %10915 = vmatpush1.bf16.msra.mxu0 %v16456_v29  ;;  %11940 = vmatpush1.bf16.msra.mxu1 %v16459_v30  ;;  %v16547_v29 = vld [vmem:[%s17519_s10 + $0x2700] ss:$16 sps:$4 sm:$0xff]   ;;  %v16550_v30 = vld [vmem:[%s17519_s10 + $0x2708] ss:$16 sps:$4 sm:$0xff]  }
 0x538   : > { %10916 = vmatprep.subr.bf16.mxu0 %v16464_v15  ;;  %11941 = vmatprep.subr.bf16.mxu1 %v16467_v31  ;;  %v16555_v15 = vld [vmem:[%s17519_s10 + $0x2724] ss:$16 sps:$4 sm:$0xff]   ;;  %v16558_v31 = vld [vmem:[%s17519_s10 + $0x272c] ss:$16 sps:$4 sm:$0xff]  }
 0x53b   : > { %10917 = vmatpush1.bf16.msra.mxu0 %v16462_v33  ;;  %11942 = vmatpush1.bf16.msra.mxu1 %v16465_v34  ;;  %v16553_v33 = vld [vmem:[%s17519_s10 + $0x2720] ss:$16 sps:$4 sm:$0xff]   ;;  %v16556_v34 = vld [vmem:[%s17519_s10 + $0x2728] ss:$16 sps:$4 sm:$0xff]  }
 0x53c   : > { %10918 = vmatprep.subr.bf16.mxu0 %v16470_v36  ;;  %11943 = vmatprep.subr.bf16.mxu1 %v16473_v37  ;;  %v16561_v36 = vld [vmem:[%s17519_s10 + $0x2744] ss:$16 sps:$4 sm:$0xff]   ;;  %v16564_v37 = vld [vmem:[%s17519_s10 + $0x274c] ss:$16 sps:$4 sm:$0xff]  }
 0x53f   : > { %10919 = vmatpush1.bf16.msra.mxu0 %v16468_v23  ;;  %11944 = vmatpush1.bf16.msra.mxu1 %v16471_v39  ;;  %v16559_v23 = vld [vmem:[%s17519_s10 + $0x2740] ss:$16 sps:$4 sm:$0xff]   ;;  %v16562_v39 = vld [vmem:[%s17519_s10 + $0x2748] ss:$16 sps:$4 sm:$0xff]  }
 0x540   : > { %10920 = vmatprep.subr.bf16.mxu0 %v16476_v40  ;;  %11945 = vmatprep.subr.bf16.mxu1 %v16479_v21  ;;  %v16567_v40 = vld [vmem:[%s17519_s10 + $0x2764] ss:$16 sps:$4 sm:$0xff]   ;;  %v16570_v21 = vld [vmem:[%s17519_s10 + $0x276c] ss:$16 sps:$4 sm:$0xff]  }
 0x543   : > { %10921 = vmatpush1.bf16.msra.mxu0 %v16474_v32  ;;  %11946 = vmatpush1.bf16.msra.mxu1 %v16477_v41  ;;  %v16565_v32 = vld [vmem:[%s17519_s10 + $0x2760] ss:$16 sps:$4 sm:$0xff]   ;;  %v16568_v41 = vld [vmem:[%s17519_s10 + $0x2768] ss:$16 sps:$4 sm:$0xff]  }
 0x544   : > { %10922 = vmatprep.subr.bf16.mxu0 %v16482_v43  ;;  %11947 = vmatprep.subr.bf16.mxu1 %v16485_v13  ;;  %v16573_v43 = vld [vmem:[%s17519_s10 + $0x2784] ss:$16 sps:$4 sm:$0xff]   ;;  %v16576_v13 = vld [vmem:[%s17519_s10 + $0x278c] ss:$16 sps:$4 sm:$0xff]  }
 0x547   : > { %10923 = vmatpush1.bf16.msra.mxu0 %v16480_v46  ;;  %11948 = vmatpush1.bf16.msra.mxu1 %v16483_v47  ;;  %v16571_v46 = vld [vmem:[%s17519_s10 + $0x2780] ss:$16 sps:$4 sm:$0xff]   ;;  %v16574_v47 = vld [vmem:[%s17519_s10 + $0x2788] ss:$16 sps:$4 sm:$0xff]  }
 0x548   : > { %10924 = vmatprep.subr.bf16.mxu0 %v16488_v19  ;;  %11949 = vmatprep.subr.bf16.mxu1 %v16491_v51  ;;  %v16579_v19 = vld [vmem:[%s17519_s10 + $0x27a4] ss:$16 sps:$4 sm:$0xff]   ;;  %v16582_v51 = vld [vmem:[%s17519_s10 + $0x27ac] ss:$16 sps:$4 sm:$0xff]  }
 0x54b   : > { %10925 = vmatpush1.bf16.msra.mxu0 %v16486_v53  ;;  %11950 = vmatpush1.bf16.msra.mxu1 %v16489_v25  ;;  %v16577_v53 = vld [vmem:[%s17519_s10 + $0x27a0] ss:$16 sps:$4 sm:$0xff]   ;;  %v16580_v25 = vld [vmem:[%s17519_s10 + $0x27a8] ss:$16 sps:$4 sm:$0xff]  }
 0x54c   : > { %10926 = vmatprep.subr.bf16.mxu0 %v16494_v54  ;;  %11951 = vmatprep.subr.bf16.mxu1 %v16497_v55  ;;  %v16585_v54 = vld [vmem:[%s17519_s10 + $0x27c4] ss:$16 sps:$4 sm:$0xff]   ;;  %v16588_v55 = vld [vmem:[%s17519_s10 + $0x27cc] ss:$16 sps:$4 sm:$0xff]  }
 0x54f   : > { %10927 = vmatpush1.bf16.msra.mxu0 %v16492_v38  ;;  %11952 = vmatpush1.bf16.msra.mxu1 %v16495_v44  ;;  %v19038_v38 = vld [vmem:[%s19463_s0 + $0x28] sm:$0xff]  ;;  %v16583_v44 = vld [vmem:[%s17519_s10 + $0x27c0] ss:$16 sps:$4 sm:$0xff]  }
 0x550   : > { %10937 = vmatprep.subr.bf16.mxu0 %v16501_v56  ;;  %11962 = vmatprep.subr.bf16.mxu1 %v16504_v57  ;;  %v16586_v56 = vld [vmem:[%s17519_s10 + $0x27c8] ss:$16 sps:$4 sm:$0xff]   ;;  %v16591_v57 = vld [vmem:[%s17519_s10 + $0x27e4] ss:$16 sps:$4 sm:$0xff]  }
 0x552   : > { %10929 = vmatmul.mubr.bf16.vlgmr.msra.gmra.mrb[0].mxu0 %v18973_v45  ;;  %11954 = vmatmul.mubr.bf16.vlgmr.msra.gmra.mrb[0].mxu1 %v18973_v45 }
 0x553   : > { %10938 = vmatpush1.bf16.msra.mxu0 %v16499_v48  ;;  %11963 = vmatpush1.bf16.msra.mxu1 %v16502_v59  ;;  %v16594_v48 = vld [vmem:[%s17519_s10 + $0x27ec] ss:$16 sps:$4 sm:$0xff]   ;;  %v19046_v59 = vrot.slane %v19038_v38, %v17585_v49 }
 0x554   : > { %10939 = vmatprep.subr.bf16.mxu0 %v16507_v61  ;;  %11964 = vmatprep.subr.bf16.mxu1 %v16510_v62  ;;  %v16589_v61 = vld [vmem:[%s17519_s10 + $0x27e0] ss:$16 sps:$4 sm:$0xff]   ;;  %v16592_v62 = vld [vmem:[%s17519_s10 + $0x27e8] ss:$16 sps:$4 sm:$0xff]  }
 0x555   : > { %10969 = vmatprep.mubr.bf16.mxu0 %v2205_v0  ;;  %11994 = vmatprep.mubr.bf16.mxu1 %v2205_v0  ;;  %v16597_v0 = vld [vmem:[%s17519_s10 + $0x2804] ss:$16 sps:$4 sm:$0xff]  }
 0x557   : > { %10940 = vmatpush1.bf16.msra.mxu0 %v16505_v50  ;;  %11965 = vmatpush1.bf16.msra.mxu1 %v16508_v1  ;;  %v16600_v50 = vld [vmem:[%s17519_s10 + $0x280c] ss:$16 sps:$4 sm:$0xff]   ;;  %v2221_v1 = vcombine.high %v19046_v59, %v19046_v59 }
 0x558   : > { %10941 = vmatprep.subr.bf16.mxu0 %v16513_v35  ;;  %11966 = vmatprep.subr.bf16.mxu1 %v16516_v2  ;;  %v2203_v35 = vcombine.high %v18973_v45, %v18973_v45  ;;  %v16595_v2 = vld [vmem:[%s17519_s10 + $0x2800] ss:$16 sps:$4 sm:$0xff]  }
 0x559   : > { %v16601_v45 = vld [vmem:[%s17519_s10 + $0x2820] ss:$16 sps:$4 sm:$0xff]  }
 0x55b   : > { %10942 = vmatpush1.bf16.msra.mxu0 %v16511_v58  ;;  %11967 = vmatpush1.bf16.msra.mxu1 %v16514_v3  ;;  %v16598_v58 = vld [vmem:[%s17519_s10 + $0x2808] ss:$16 sps:$4 sm:$0xff]   ;;  %v16603_v3 = vld [vmem:[%s17519_s10 + $0x2824] ss:$16 sps:$4 sm:$0xff]  }
 0x55c   : > { %10943 = vmatprep.subr.bf16.mxu0 %v16519_v4  ;;  %11968 = vmatprep.subr.bf16.mxu1 %v16522_v5  ;;  %v16606_v4 = vld [vmem:[%s17519_s10 + $0x282c] ss:$16 sps:$4 sm:$0xff]   ;;  %v19061_v5 = vrot.slane %v2221_v1, %v17585_v49  ;;  %v16682_v1 = vld [vmem:[%s17519_s10 + $0x29c8] ss:$16 sps:$4 sm:$0xff]  }
 0x55f   : > { %10944 = vmatpush1.bf16.msra.mxu0 %v16517_v6  ;;  %11969 = vmatpush1.bf16.msra.mxu1 %v16520_v7  ;;  %v16604_v6 = vld [vmem:[%s17519_s10 + $0x2828] ss:$16 sps:$4 sm:$0xff]   ;;  %v16609_v7 = vld [vmem:[%s17519_s10 + $0x2844] ss:$16 sps:$4 sm:$0xff]  }
 0x560   : > { %10945 = vmatprep.subr.bf16.mxu0 %v16525_v9  ;;  %11970 = vmatprep.subr.bf16.mxu1 %v16528_v10  ;;  %v16612_v9 = vld [vmem:[%s17519_s10 + $0x284c] ss:$16 sps:$4 sm:$0xff]   ;;  %v16607_v10 = vld [vmem:[%s17519_s10 + $0x2840] ss:$16 sps:$4 sm:$0xff]  }
 0x563   : > { %10946 = vmatpush1.bf16.msra.mxu0 %v16523_v11  ;;  %11971 = vmatpush1.bf16.msra.mxu1 %v16526_v12  ;;  %v16610_v11 = vld [vmem:[%s17519_s10 + $0x2848] ss:$16 sps:$4 sm:$0xff]   ;;  %v16615_v12 = vld [vmem:[%s17519_s10 + $0x2864] ss:$16 sps:$4 sm:$0xff]  }
 0x564   : > { %10947 = vmatprep.subr.bf16.mxu0 %v16531_v14  ;;  %11972 = vmatprep.subr.bf16.mxu1 %v16534_v63  ;;  %v16618_v14 = vld [vmem:[%s17519_s10 + $0x286c] ss:$16 sps:$4 sm:$0xff]   ;;  %v16613_v63 = vld [vmem:[%s17519_s10 + $0x2860] ss:$16 sps:$4 sm:$0xff]  }
 0x567   : > { %10948 = vmatpush1.bf16.msra.mxu0 %v16529_v16  ;;  %11973 = vmatpush1.bf16.msra.mxu1 %v16532_v52  ;;  %v16616_v16 = vld [vmem:[%s17519_s10 + $0x2868] ss:$16 sps:$4 sm:$0xff]   ;;  %v16621_v52 = vld [vmem:[%s17519_s10 + $0x2884] ss:$16 sps:$4 sm:$0xff]  }
 0x568   : > { %10949 = vmatprep.subr.bf16.mxu0 %v16537_v17  ;;  %11974 = vmatprep.subr.bf16.mxu1 %v16540_v8  ;;  %v16624_v17 = vld [vmem:[%s17519_s10 + $0x288c] ss:$16 sps:$4 sm:$0xff]   ;;  %v16619_v8 = vld [vmem:[%s17519_s10 + $0x2880] ss:$16 sps:$4 sm:$0xff]  }
 0x56b   : > { %10950 = vmatpush1.bf16.msra.mxu0 %v16535_v18  ;;  %11975 = vmatpush1.bf16.msra.mxu1 %v16538_v20  ;;  %v16622_v18 = vld [vmem:[%s17519_s10 + $0x2888] ss:$16 sps:$4 sm:$0xff]   ;;  %v16627_v20 = vld [vmem:[%s17519_s10 + $0x28a4] ss:$16 sps:$4 sm:$0xff]  }
 0x56c   : > { %10951 = vmatprep.subr.bf16.mxu0 %v16543_v22  ;;  %11976 = vmatprep.subr.bf16.mxu1 %v16546_v24  ;;  %v16630_v22 = vld [vmem:[%s17519_s10 + $0x28ac] ss:$16 sps:$4 sm:$0xff]   ;;  %v16625_v24 = vld [vmem:[%s17519_s10 + $0x28a0] ss:$16 sps:$4 sm:$0xff]  }
 0x56f   : > { %10952 = vmatpush1.bf16.msra.mxu0 %v16541_v26  ;;  %11977 = vmatpush1.bf16.msra.mxu1 %v16544_v60  ;;  %v16628_v26 = vld [vmem:[%s17519_s10 + $0x28a8] ss:$16 sps:$4 sm:$0xff]   ;;  %v16633_v60 = vld [vmem:[%s17519_s10 + $0x28c4] ss:$16 sps:$4 sm:$0xff]  }
 0x570   : > { %10953 = vmatprep.subr.bf16.mxu0 %v16549_v27  ;;  %11978 = vmatprep.subr.bf16.mxu1 %v16552_v28  ;;  %v16636_v27 = vld [vmem:[%s17519_s10 + $0x28cc] ss:$16 sps:$4 sm:$0xff]   ;;  %v16631_v28 = vld [vmem:[%s17519_s10 + $0x28c0] ss:$16 sps:$4 sm:$0xff]  }
 0x573   : > { %10954 = vmatpush1.bf16.msra.mxu0 %v16547_v29  ;;  %11979 = vmatpush1.bf16.msra.mxu1 %v16550_v30  ;;  %v16634_v29 = vld [vmem:[%s17519_s10 + $0x28c8] ss:$16 sps:$4 sm:$0xff]   ;;  %v16639_v30 = vld [vmem:[%s17519_s10 + $0x28e4] ss:$16 sps:$4 sm:$0xff]  }
 0x574   : > { %10955 = vmatprep.subr.bf16.mxu0 %v16555_v15  ;;  %11980 = vmatprep.subr.bf16.mxu1 %v16558_v31  ;;  %v16642_v15 = vld [vmem:[%s17519_s10 + $0x28ec] ss:$16 sps:$4 sm:$0xff]   ;;  %v16637_v31 = vld [vmem:[%s17519_s10 + $0x28e0] ss:$16 sps:$4 sm:$0xff]  }
 0x577   : > { %10956 = vmatpush1.bf16.msra.mxu0 %v16553_v33  ;;  %11981 = vmatpush1.bf16.msra.mxu1 %v16556_v34  ;;  %v16640_v33 = vld [vmem:[%s17519_s10 + $0x28e8] ss:$16 sps:$4 sm:$0xff]   ;;  %v16645_v34 = vld [vmem:[%s17519_s10 + $0x2904] ss:$16 sps:$4 sm:$0xff]  }
 0x578   : > { %10957 = vmatprep.subr.bf16.mxu0 %v16561_v36  ;;  %11982 = vmatprep.subr.bf16.mxu1 %v16564_v37  ;;  %v16648_v36 = vld [vmem:[%s17519_s10 + $0x290c] ss:$16 sps:$4 sm:$0xff]   ;;  %v16643_v37 = vld [vmem:[%s17519_s10 + $0x2900] ss:$16 sps:$4 sm:$0xff]  }
 0x57b   : > { %10958 = vmatpush1.bf16.msra.mxu0 %v16559_v23  ;;  %11983 = vmatpush1.bf16.msra.mxu1 %v16562_v39  ;;  %v16646_v23 = vld [vmem:[%s17519_s10 + $0x2908] ss:$16 sps:$4 sm:$0xff]   ;;  %v16651_v39 = vld [vmem:[%s17519_s10 + $0x2924] ss:$16 sps:$4 sm:$0xff]  }
 0x57c   : > { %10959 = vmatprep.subr.bf16.mxu0 %v16567_v40  ;;  %11984 = vmatprep.subr.bf16.mxu1 %v16570_v21  ;;  %v16654_v40 = vld [vmem:[%s17519_s10 + $0x292c] ss:$16 sps:$4 sm:$0xff]   ;;  %v16649_v21 = vld [vmem:[%s17519_s10 + $0x2920] ss:$16 sps:$4 sm:$0xff]  }
 0x57f   : > { %10960 = vmatpush1.bf16.msra.mxu0 %v16565_v32  ;;  %11985 = vmatpush1.bf16.msra.mxu1 %v16568_v41  ;;  %v16652_v32 = vld [vmem:[%s17519_s10 + $0x2928] ss:$16 sps:$4 sm:$0xff]   ;;  %v16657_v41 = vld [vmem:[%s17519_s10 + $0x2944] ss:$16 sps:$4 sm:$0xff]  }
 0x580   : > { %10961 = vmatprep.subr.bf16.mxu0 %v16573_v43  ;;  %11986 = vmatprep.subr.bf16.mxu1 %v16576_v13  ;;  %v16660_v43 = vld [vmem:[%s17519_s10 + $0x294c] ss:$16 sps:$4 sm:$0xff]   ;;  %v16655_v13 = vld [vmem:[%s17519_s10 + $0x2940] ss:$16 sps:$4 sm:$0xff]  }
 0x583   : > { %10962 = vmatpush1.bf16.msra.mxu0 %v16571_v46  ;;  %11987 = vmatpush1.bf16.msra.mxu1 %v16574_v47  ;;  %v16658_v46 = vld [vmem:[%s17519_s10 + $0x2948] ss:$16 sps:$4 sm:$0xff]   ;;  %v16663_v47 = vld [vmem:[%s17519_s10 + $0x2964] ss:$16 sps:$4 sm:$0xff]  }
 0x584   : > { %10963 = vmatprep.subr.bf16.mxu0 %v16579_v19  ;;  %11988 = vmatprep.subr.bf16.mxu1 %v16582_v51  ;;  %v16666_v19 = vld [vmem:[%s17519_s10 + $0x296c] ss:$16 sps:$4 sm:$0xff]   ;;  %v16661_v51 = vld [vmem:[%s17519_s10 + $0x2960] ss:$16 sps:$4 sm:$0xff]  }
 0x587   : > { %10964 = vmatpush1.bf16.msra.mxu0 %v16577_v53  ;;  %11989 = vmatpush1.bf16.msra.mxu1 %v16580_v25  ;;  %v16664_v53 = vld [vmem:[%s17519_s10 + $0x2968] ss:$16 sps:$4 sm:$0xff]   ;;  %v16669_v25 = vld [vmem:[%s17519_s10 + $0x2984] ss:$16 sps:$4 sm:$0xff]  }
 0x588   : > { %10965 = vmatprep.subr.bf16.mxu0 %v16585_v54  ;;  %11990 = vmatprep.subr.bf16.mxu1 %v16588_v55  ;;  %v16672_v54 = vld [vmem:[%s17519_s10 + $0x298c] ss:$16 sps:$4 sm:$0xff]   ;;  %v16667_v55 = vld [vmem:[%s17519_s10 + $0x2980] ss:$16 sps:$4 sm:$0xff]  }
 0x58b   : > { %10966 = vmatpush1.bf16.msra.mxu0 %v16583_v44  ;;  %11991 = vmatpush1.bf16.msra.mxu1 %v16586_v56  ;;  %v16670_v44 = vld [vmem:[%s17519_s10 + $0x2988] ss:$16 sps:$4 sm:$0xff]   ;;  %v16675_v56 = vld [vmem:[%s17519_s10 + $0x29a4] ss:$16 sps:$4 sm:$0xff]  }
 0x58c   : > { %10967 = vmatprep.subr.bf16.mxu0 %v16591_v57  ;;  %11992 = vmatprep.subr.bf16.mxu1 %v16594_v48  ;;  %v16678_v57 = vld [vmem:[%s17519_s10 + $0x29ac] ss:$16 sps:$4 sm:$0xff]   ;;  %v16673_v48 = vld [vmem:[%s17519_s10 + $0x29a0] ss:$16 sps:$4 sm:$0xff]  }
 0x58f   : > { %10968 = vmatpush1.bf16.msra.mxu0 %v16589_v61  ;;  %11993 = vmatpush1.bf16.msra.mxu1 %v16592_v62  ;;  %v16676_v61 = vld [vmem:[%s17519_s10 + $0x29a8] ss:$16 sps:$4 sm:$0xff]   ;;  %v16681_v62 = vld [vmem:[%s17519_s10 + $0x29c4] ss:$16 sps:$4 sm:$0xff]  }
 0x590   : > { %10978 = vmatprep.subr.bf16.mxu0 %v16597_v0  ;;  %12003 = vmatprep.subr.bf16.mxu1 %v16600_v50  ;;  %v16684_v0 = vld [vmem:[%s17519_s10 + $0x29cc] ss:$16 sps:$4 sm:$0xff]   ;;  %v16679_v50 = vld [vmem:[%s17519_s10 + $0x29c0] ss:$16 sps:$4 sm:$0xff]  }
 0x592   : > { %10970 = vmatmul.mubr.bf16.vlgmr.msra.gmra.mrb[0].mxu0 %v2203_v35  ;;  %11995 = vmatmul.mubr.bf16.vlgmr.msra.gmra.mrb[0].mxu1 %v2203_v35  ;;  %v16687_v35 = vld [vmem:[%s17519_s10 + $0x29e4] ss:$16 sps:$4 sm:$0xff]  }
 0x593   : > { %10979 = vmatpush1.bf16.msra.mxu0 %v16595_v2  ;;  %12004 = vmatpush1.bf16.msra.mxu1 %v16598_v58  ;;  %v16690_v2 = vld [vmem:[%s17519_s10 + $0x29ec] ss:$16 sps:$4 sm:$0xff]   ;;  %v16685_v58 = vld [vmem:[%s17519_s10 + $0x29e0] ss:$16 sps:$4 sm:$0xff]  }
 0x594   : > { %10980 = vmatprep.subr.bf16.mxu0 %v16603_v3  ;;  %12005 = vmatprep.subr.bf16.mxu1 %v16606_v4  ;;  %v16688_v3 = vld [vmem:[%s17519_s10 + $0x29e8] ss:$16 sps:$4 sm:$0xff]   ;;  %v16693_v4 = vld [vmem:[%s17519_s10 + $0x2a04] ss:$16 sps:$4 sm:$0xff]  }
 0x595   : > { %11010 = vmatprep.mubr.bf16.mxu0 %v19061_v5  ;;  %12035 = vmatprep.mubr.bf16.mxu1 %v19061_v5 }
 0x597   : > { %10981 = vmatpush1.bf16.msra.mxu0 %v16601_v45  ;;  %12006 = vmatpush1.bf16.msra.mxu1 %v16604_v6  ;;  %v16696_v45 = vld [vmem:[%s17519_s10 + $0x2a0c] ss:$16 sps:$4 sm:$0xff]   ;;  %v19127_v6 = vrot.slane %v19046_v59, %v17585_v49  ;;  %v16697_v59 = vld [vmem:[%s17519_s10 + $0x2a20] ss:$16 sps:$4 sm:$0xff]  }
 0x598   : > { %10982 = vmatprep.subr.bf16.mxu0 %v16609_v7  ;;  %12007 = vmatprep.subr.bf16.mxu1 %v16612_v9  ;;  %v16691_v7 = vld [vmem:[%s17519_s10 + $0x2a00] ss:$16 sps:$4 sm:$0xff]   ;;  %v16694_v9 = vld [vmem:[%s17519_s10 + $0x2a08] ss:$16 sps:$4 sm:$0xff]  }
 0x59b   : > { %10983 = vmatpush1.bf16.msra.mxu0 %v16607_v10  ;;  %12008 = vmatpush1.bf16.msra.mxu1 %v16610_v11  ;;  %v16699_v10 = vld [vmem:[%s17519_s10 + $0x2a24] ss:$16 sps:$4 sm:$0xff]   ;;  %v16702_v11 = vld [vmem:[%s17519_s10 + $0x2a2c] ss:$16 sps:$4 sm:$0xff]  }
 0x59c   : > { %10984 = vmatprep.subr.bf16.mxu0 %v16615_v12  ;;  %12009 = vmatprep.subr.bf16.mxu1 %v16618_v14  ;;  %v2253_v12 = vcombine.high %v19061_v5, %v19061_v5  ;;  %v16700_v14 = vld [vmem:[%s17519_s10 + $0x2a28] ss:$16 sps:$4 sm:$0xff]   ;;  %v16703_v5 = vld [vmem:[%s17519_s10 + $0x2a40] ss:$16 sps:$4 sm:$0xff]  }
 0x59f   : > { %10985 = vmatpush1.bf16.msra.mxu0 %v16613_v63  ;;  %12010 = vmatpush1.bf16.msra.mxu1 %v16616_v16  ;;  %v16705_v63 = vld [vmem:[%s17519_s10 + $0x2a44] ss:$16 sps:$4 sm:$0xff]   ;;  %v16708_v16 = vld [vmem:[%s17519_s10 + $0x2a4c] ss:$16 sps:$4 sm:$0xff]  }
 0x5a0   : > { %10986 = vmatprep.subr.bf16.mxu0 %v16621_v52  ;;  %12011 = vmatprep.subr.bf16.mxu1 %v16624_v17  ;;  %v16706_v52 = vld [vmem:[%s17519_s10 + $0x2a48] ss:$16 sps:$4 sm:$0xff]   ;;  %v16711_v17 = vld [vmem:[%s17519_s10 + $0x2a64] ss:$16 sps:$4 sm:$0xff]  }
 0x5a3   : > { %10987 = vmatpush1.bf16.msra.mxu0 %v16619_v8  ;;  %12012 = vmatpush1.bf16.msra.mxu1 %v16622_v18  ;;  %v16714_v8 = vld [vmem:[%s17519_s10 + $0x2a6c] ss:$16 sps:$4 sm:$0xff]   ;;  %v16709_v18 = vld [vmem:[%s17519_s10 + $0x2a60] ss:$16 sps:$4 sm:$0xff]  }
 0x5a4   : > { %10988 = vmatprep.subr.bf16.mxu0 %v16627_v20  ;;  %12013 = vmatprep.subr.bf16.mxu1 %v16630_v22  ;;  %v16712_v20 = vld [vmem:[%s17519_s10 + $0x2a68] ss:$16 sps:$4 sm:$0xff]   ;;  %v16717_v22 = vld [vmem:[%s17519_s10 + $0x2a84] ss:$16 sps:$4 sm:$0xff]  }
 0x5a7   : > { %10989 = vmatpush1.bf16.msra.mxu0 %v16625_v24  ;;  %12014 = vmatpush1.bf16.msra.mxu1 %v16628_v26  ;;  %v16720_v24 = vld [vmem:[%s17519_s10 + $0x2a8c] ss:$16 sps:$4 sm:$0xff]   ;;  %v16715_v26 = vld [vmem:[%s17519_s10 + $0x2a80] ss:$16 sps:$4 sm:$0xff]  }
 0x5a8   : > { %10990 = vmatprep.subr.bf16.mxu0 %v16633_v60  ;;  %12015 = vmatprep.subr.bf16.mxu1 %v16636_v27  ;;  %v16718_v60 = vld [vmem:[%s17519_s10 + $0x2a88] ss:$16 sps:$4 sm:$0xff]   ;;  %v16723_v27 = vld [vmem:[%s17519_s10 + $0x2aa4] ss:$16 sps:$4 sm:$0xff]  }
 0x5ab   : > { %10991 = vmatpush1.bf16.msra.mxu0 %v16631_v28  ;;  %12016 = vmatpush1.bf16.msra.mxu1 %v16634_v29  ;;  %v16726_v28 = vld [vmem:[%s17519_s10 + $0x2aac] ss:$16 sps:$4 sm:$0xff]   ;;  %v16721_v29 = vld [vmem:[%s17519_s10 + $0x2aa0] ss:$16 sps:$4 sm:$0xff]  }
 0x5ac   : > { %10992 = vmatprep.subr.bf16.mxu0 %v16639_v30  ;;  %12017 = vmatprep.subr.bf16.mxu1 %v16642_v15  ;;  %v16724_v30 = vld [vmem:[%s17519_s10 + $0x2aa8] ss:$16 sps:$4 sm:$0xff]   ;;  %v16729_v15 = vld [vmem:[%s17519_s10 + $0x2ac4] ss:$16 sps:$4 sm:$0xff]  }
 0x5af   : > { %10993 = vmatpush1.bf16.msra.mxu0 %v16637_v31  ;;  %12018 = vmatpush1.bf16.msra.mxu1 %v16640_v33  ;;  %v16732_v31 = vld [vmem:[%s17519_s10 + $0x2acc] ss:$16 sps:$4 sm:$0xff]   ;;  %v16727_v33 = vld [vmem:[%s17519_s10 + $0x2ac0] ss:$16 sps:$4 sm:$0xff]  }
 0x5b0   : > { %10994 = vmatprep.subr.bf16.mxu0 %v16645_v34  ;;  %12019 = vmatprep.subr.bf16.mxu1 %v16648_v36  ;;  %v16730_v34 = vld [vmem:[%s17519_s10 + $0x2ac8] ss:$16 sps:$4 sm:$0xff]   ;;  %v16735_v36 = vld [vmem:[%s17519_s10 + $0x2ae4] ss:$16 sps:$4 sm:$0xff]  }
 0x5b3   : > { %10995 = vmatpush1.bf16.msra.mxu0 %v16643_v37  ;;  %12020 = vmatpush1.bf16.msra.mxu1 %v16646_v23  ;;  %v16738_v37 = vld [vmem:[%s17519_s10 + $0x2aec] ss:$16 sps:$4 sm:$0xff]   ;;  %v16733_v23 = vld [vmem:[%s17519_s10 + $0x2ae0] ss:$16 sps:$4 sm:$0xff]  }
 0x5b4   : > { %10996 = vmatprep.subr.bf16.mxu0 %v16651_v39  ;;  %12021 = vmatprep.subr.bf16.mxu1 %v16654_v40  ;;  %v16736_v39 = vld [vmem:[%s17519_s10 + $0x2ae8] ss:$16 sps:$4 sm:$0xff]   ;;  %v16741_v40 = vld [vmem:[%s17519_s10 + $0x2b04] ss:$16 sps:$4 sm:$0xff]  }
 0x5b7   : > { %10997 = vmatpush1.bf16.msra.mxu0 %v16649_v21  ;;  %12022 = vmatpush1.bf16.msra.mxu1 %v16652_v32  ;;  %v16744_v21 = vld [vmem:[%s17519_s10 + $0x2b0c] ss:$16 sps:$4 sm:$0xff]   ;;  %v16739_v32 = vld [vmem:[%s17519_s10 + $0x2b00] ss:$16 sps:$4 sm:$0xff]  }
 0x5b8   : > { %10998 = vmatprep.subr.bf16.mxu0 %v16657_v41  ;;  %12023 = vmatprep.subr.bf16.mxu1 %v16660_v43  ;;  %v16742_v41 = vld [vmem:[%s17519_s10 + $0x2b08] ss:$16 sps:$4 sm:$0xff]   ;;  %v16747_v43 = vld [vmem:[%s17519_s10 + $0x2b24] ss:$16 sps:$4 sm:$0xff]  }
 0x5bb   : > { %10999 = vmatpush1.bf16.msra.mxu0 %v16655_v13  ;;  %12024 = vmatpush1.bf16.msra.mxu1 %v16658_v46  ;;  %v16750_v13 = vld [vmem:[%s17519_s10 + $0x2b2c] ss:$16 sps:$4 sm:$0xff]   ;;  %v16745_v46 = vld [vmem:[%s17519_s10 + $0x2b20] ss:$16 sps:$4 sm:$0xff]  }
 0x5bc   : > { %11000 = vmatprep.subr.bf16.mxu0 %v16663_v47  ;;  %12025 = vmatprep.subr.bf16.mxu1 %v16666_v19  ;;  %v16748_v47 = vld [vmem:[%s17519_s10 + $0x2b28] ss:$16 sps:$4 sm:$0xff]   ;;  %v16753_v19 = vld [vmem:[%s17519_s10 + $0x2b44] ss:$16 sps:$4 sm:$0xff]  }
 0x5bf   : > { %11001 = vmatpush1.bf16.msra.mxu0 %v16661_v51  ;;  %12026 = vmatpush1.bf16.msra.mxu1 %v16664_v53  ;;  %v16756_v51 = vld [vmem:[%s17519_s10 + $0x2b4c] ss:$16 sps:$4 sm:$0xff]   ;;  %v16751_v53 = vld [vmem:[%s17519_s10 + $0x2b40] ss:$16 sps:$4 sm:$0xff]  }
 0x5c0   : > { %11002 = vmatprep.subr.bf16.mxu0 %v16669_v25  ;;  %12027 = vmatprep.subr.bf16.mxu1 %v16672_v54  ;;  %v16754_v25 = vld [vmem:[%s17519_s10 + $0x2b48] ss:$16 sps:$4 sm:$0xff]   ;;  %v16759_v54 = vld [vmem:[%s17519_s10 + $0x2b64] ss:$16 sps:$4 sm:$0xff]  }
 0x5c3   : > { %11003 = vmatpush1.bf16.msra.mxu0 %v16667_v55  ;;  %12028 = vmatpush1.bf16.msra.mxu1 %v16670_v44  ;;  %v16762_v55 = vld [vmem:[%s17519_s10 + $0x2b6c] ss:$16 sps:$4 sm:$0xff]   ;;  %v16757_v44 = vld [vmem:[%s17519_s10 + $0x2b60] ss:$16 sps:$4 sm:$0xff]  }
 0x5c4   : > { %11004 = vmatprep.subr.bf16.mxu0 %v16675_v56  ;;  %12029 = vmatprep.subr.bf16.mxu1 %v16678_v57  ;;  %v16760_v56 = vld [vmem:[%s17519_s10 + $0x2b68] ss:$16 sps:$4 sm:$0xff]   ;;  %v16765_v57 = vld [vmem:[%s17519_s10 + $0x2b84] ss:$16 sps:$4 sm:$0xff]  }
 0x5c7   : > { %11005 = vmatpush1.bf16.msra.mxu0 %v16673_v48  ;;  %12030 = vmatpush1.bf16.msra.mxu1 %v16676_v61  ;;  %v16768_v48 = vld [vmem:[%s17519_s10 + $0x2b8c] ss:$16 sps:$4 sm:$0xff]   ;;  %v16763_v61 = vld [vmem:[%s17519_s10 + $0x2b80] ss:$16 sps:$4 sm:$0xff]  }
 0x5c8   : > { %11006 = vmatprep.subr.bf16.mxu0 %v16681_v62  ;;  %12031 = vmatprep.subr.bf16.mxu1 %v16684_v0  ;;  %v16766_v62 = vld [vmem:[%s17519_s10 + $0x2b88] ss:$16 sps:$4 sm:$0xff]   ;;  %v16771_v0 = vld [vmem:[%s17519_s10 + $0x2ba4] ss:$16 sps:$4 sm:$0xff]  }
 0x5cb   : > { %11007 = vmatpush1.bf16.msra.mxu0 %v16679_v50  ;;  %12032 = vmatpush1.bf16.msra.mxu1 %v16682_v1  ;;  %v16774_v50 = vld [vmem:[%s17519_s10 + $0x2bac] ss:$16 sps:$4 sm:$0xff]   ;;  %v16769_v1 = vld [vmem:[%s17519_s10 + $0x2ba0] ss:$16 sps:$4 sm:$0xff]  }
 0x5cc   : > { %11008 = vmatprep.subr.bf16.mxu0 %v16687_v35  ;;  %12033 = vmatprep.subr.bf16.mxu1 %v16690_v2  ;;  %v16772_v35 = vld [vmem:[%s17519_s10 + $0x2ba8] ss:$16 sps:$4 sm:$0xff]   ;;  %v16777_v2 = vld [vmem:[%s17519_s10 + $0x2bc4] ss:$16 sps:$4 sm:$0xff]  }
 0x5cf   : > { %11009 = vmatpush1.bf16.msra.mxu0 %v16685_v58  ;;  %12034 = vmatpush1.bf16.msra.mxu1 %v16688_v3  ;;  %v16780_v58 = vld [vmem:[%s17519_s10 + $0x2bcc] ss:$16 sps:$4 sm:$0xff]   ;;  %v2206_v3 = vcombine.high %v19038_v38, %v19038_v38  ;;  %v16781_v38 = vld [vmem:[%s17519_s10 + $0x2be0] ss:$16 sps:$4 sm:$0xff]  }
 0x5d0   : > { %11019 = vmatprep.subr.bf16.mxu0 %v16693_v4  ;;  %12044 = vmatprep.subr.bf16.mxu1 %v16696_v45  ;;  %v16775_v4 = vld [vmem:[%s17519_s10 + $0x2bc0] ss:$16 sps:$4 sm:$0xff]   ;;  %v16778_v45 = vld [vmem:[%s17519_s10 + $0x2bc8] ss:$16 sps:$4 sm:$0xff]  }
 0x5d2   : > { %11011 = vmatmul.mubr.bf16.vlgmr.msra.gmra.mrb[0].mxu0 %v19127_v6  ;;  %12036 = vmatmul.mubr.bf16.vlgmr.msra.gmra.mrb[0].mxu1 %v19127_v6 }
 0x5d3   : > { %11020 = vmatpush1.bf16.msra.mxu0 %v16691_v7  ;;  %12045 = vmatpush1.bf16.msra.mxu1 %v16694_v9  ;;  %v16783_v7 = vld [vmem:[%s17519_s10 + $0x2be4] ss:$16 sps:$4 sm:$0xff]   ;;  %v16786_v9 = vld [vmem:[%s17519_s10 + $0x2bec] ss:$16 sps:$4 sm:$0xff]  }
 0x5d4   : > { %11021 = vmatprep.subr.bf16.mxu0 %v16699_v10  ;;  %12046 = vmatprep.subr.bf16.mxu1 %v16702_v11  ;;  %v19196_v10 = vrot.slane %v2206_v3, %v17585_v49  ;;  %v16784_v11 = vld [vmem:[%s17519_s10 + $0x2be8] ss:$16 sps:$4 sm:$0xff]  }
 0x5d5   : > { %11051 = vmatprep.mubr.bf16.mxu0 %v2253_v12  ;;  %12076 = vmatprep.mubr.bf16.mxu1 %v2253_v12  ;;  %v16789_v12 = vld [vmem:[%s17519_s10 + $0x2c04] ss:$16 sps:$4 sm:$0xff]   ;;  %v16862_v3 = vld [vmem:[%s17519_s10 + $0x2d88] ss:$16 sps:$4 sm:$0xff]  }
 0x5d7   : > { %11022 = vmatpush1.bf16.msra.mxu0 %v16697_v59  ;;  %12047 = vmatpush1.bf16.msra.mxu1 %v16700_v14  ;;  %v16792_v59 = vld [vmem:[%s17519_s10 + $0x2c0c] ss:$16 sps:$4 sm:$0xff]   ;;  %v2222_v14 = vcombine.high %v19196_v10, %v19196_v10 }
 0x5d8   : > { %11023 = vmatprep.subr.bf16.mxu0 %v16705_v63  ;;  %12048 = vmatprep.subr.bf16.mxu1 %v16708_v16  ;;  %v2251_v63 = vcombine.high %v19127_v6, %v19127_v6  ;;  %v16787_v16 = vld [vmem:[%s17519_s10 + $0x2c00] ss:$16 sps:$4 sm:$0xff]  }
 0x5d9   : > { %v16793_v6 = vld [vmem:[%s17519_s10 + $0x2c20] ss:$16 sps:$4 sm:$0xff]  }
 0x5db   : > { %11024 = vmatpush1.bf16.msra.mxu0 %v16703_v5  ;;  %12049 = vmatpush1.bf16.msra.mxu1 %v16706_v52  ;;  %v16790_v5 = vld [vmem:[%s17519_s10 + $0x2c08] ss:$16 sps:$4 sm:$0xff]   ;;  %v16795_v52 = vld [vmem:[%s17519_s10 + $0x2c24] ss:$16 sps:$4 sm:$0xff]  }
 0x5dc   : > { %11025 = vmatprep.subr.bf16.mxu0 %v16711_v17  ;;  %12050 = vmatprep.subr.bf16.mxu1 %v16714_v8  ;;  %v16798_v17 = vld [vmem:[%s17519_s10 + $0x2c2c] ss:$16 sps:$4 sm:$0xff]   ;;  %v19211_v8 = vrot.slane %v2222_v14, %v17585_v49  ;;  %v16879_v14 = vld [vmem:[%s17519_s10 + $0x2de4] ss:$16 sps:$4 sm:$0xff]  }
 0x5df   : > { %11026 = vmatpush1.bf16.msra.mxu0 %v16709_v18  ;;  %12051 = vmatpush1.bf16.msra.mxu1 %v16712_v20  ;;  %v16796_v18 = vld [vmem:[%s17519_s10 + $0x2c28] ss:$16 sps:$4 sm:$0xff]   ;;  %v16801_v20 = vld [vmem:[%s17519_s10 + $0x2c44] ss:$16 sps:$4 sm:$0xff]  }
 0x5e0   : > { %11027 = vmatprep.subr.bf16.mxu0 %v16717_v22  ;;  %12052 = vmatprep.subr.bf16.mxu1 %v16720_v24  ;;  %v16804_v22 = vld [vmem:[%s17519_s10 + $0x2c4c] ss:$16 sps:$4 sm:$0xff]   ;;  %v16799_v24 = vld [vmem:[%s17519_s10 + $0x2c40] ss:$16 sps:$4 sm:$0xff]  }
 0x5e3   : > { %11028 = vmatpush1.bf16.msra.mxu0 %v16715_v26  ;;  %12053 = vmatpush1.bf16.msra.mxu1 %v16718_v60  ;;  %v16802_v26 = vld [vmem:[%s17519_s10 + $0x2c48] ss:$16 sps:$4 sm:$0xff]   ;;  %v16807_v60 = vld [vmem:[%s17519_s10 + $0x2c64] ss:$16 sps:$4 sm:$0xff]  }
 0x5e4   : > { %11029 = vmatprep.subr.bf16.mxu0 %v16723_v27  ;;  %12054 = vmatprep.subr.bf16.mxu1 %v16726_v28  ;;  %v16810_v27 = vld [vmem:[%s17519_s10 + $0x2c6c] ss:$16 sps:$4 sm:$0xff]   ;;  %v16805_v28 = vld [vmem:[%s17519_s10 + $0x2c60] ss:$16 sps:$4 sm:$0xff]  }
 0x5e7   : > { %11030 = vmatpush1.bf16.msra.mxu0 %v16721_v29  ;;  %12055 = vmatpush1.bf16.msra.mxu1 %v16724_v30  ;;  %v16808_v29 = vld [vmem:[%s17519_s10 + $0x2c68] ss:$16 sps:$4 sm:$0xff]   ;;  %v16813_v30 = vld [vmem:[%s17519_s10 + $0x2c84] ss:$16 sps:$4 sm:$0xff]  }
 0x5e8   : > { %11031 = vmatprep.subr.bf16.mxu0 %v16729_v15  ;;  %12056 = vmatprep.subr.bf16.mxu1 %v16732_v31  ;;  %v16816_v15 = vld [vmem:[%s17519_s10 + $0x2c8c] ss:$16 sps:$4 sm:$0xff]   ;;  %v16811_v31 = vld [vmem:[%s17519_s10 + $0x2c80] ss:$16 sps:$4 sm:$0xff]  }
 0x5eb   : > { %11032 = vmatpush1.bf16.msra.mxu0 %v16727_v33  ;;  %12057 = vmatpush1.bf16.msra.mxu1 %v16730_v34  ;;  %v16814_v33 = vld [vmem:[%s17519_s10 + $0x2c88] ss:$16 sps:$4 sm:$0xff]   ;;  %v16819_v34 = vld [vmem:[%s17519_s10 + $0x2ca4] ss:$16 sps:$4 sm:$0xff]  }
 0x5ec   : > { %11033 = vmatprep.subr.bf16.mxu0 %v16735_v36  ;;  %12058 = vmatprep.subr.bf16.mxu1 %v16738_v37  ;;  %v16822_v36 = vld [vmem:[%s17519_s10 + $0x2cac] ss:$16 sps:$4 sm:$0xff]   ;;  %v16817_v37 = vld [vmem:[%s17519_s10 + $0x2ca0] ss:$16 sps:$4 sm:$0xff]  }
 0x5ef   : > { %11034 = vmatpush1.bf16.msra.mxu0 %v16733_v23  ;;  %12059 = vmatpush1.bf16.msra.mxu1 %v16736_v39  ;;  %v16820_v23 = vld [vmem:[%s17519_s10 + $0x2ca8] ss:$16 sps:$4 sm:$0xff]   ;;  %v16825_v39 = vld [vmem:[%s17519_s10 + $0x2cc4] ss:$16 sps:$4 sm:$0xff]  }
 0x5f0   : > { %11035 = vmatprep.subr.bf16.mxu0 %v16741_v40  ;;  %12060 = vmatprep.subr.bf16.mxu1 %v16744_v21  ;;  %v16828_v40 = vld [vmem:[%s17519_s10 + $0x2ccc] ss:$16 sps:$4 sm:$0xff]   ;;  %v16823_v21 = vld [vmem:[%s17519_s10 + $0x2cc0] ss:$16 sps:$4 sm:$0xff]  }
 0x5f3   : > { %11036 = vmatpush1.bf16.msra.mxu0 %v16739_v32  ;;  %12061 = vmatpush1.bf16.msra.mxu1 %v16742_v41  ;;  %v16826_v32 = vld [vmem:[%s17519_s10 + $0x2cc8] ss:$16 sps:$4 sm:$0xff]   ;;  %v16831_v41 = vld [vmem:[%s17519_s10 + $0x2ce4] ss:$16 sps:$4 sm:$0xff]  }
 0x5f4   : > { %11037 = vmatprep.subr.bf16.mxu0 %v16747_v43  ;;  %12062 = vmatprep.subr.bf16.mxu1 %v16750_v13  ;;  %v16834_v43 = vld [vmem:[%s17519_s10 + $0x2cec] ss:$16 sps:$4 sm:$0xff]   ;;  %v16829_v13 = vld [vmem:[%s17519_s10 + $0x2ce0] ss:$16 sps:$4 sm:$0xff]  }
 0x5f7   : > { %11038 = vmatpush1.bf16.msra.mxu0 %v16745_v46  ;;  %12063 = vmatpush1.bf16.msra.mxu1 %v16748_v47  ;;  %v16832_v46 = vld [vmem:[%s17519_s10 + $0x2ce8] ss:$16 sps:$4 sm:$0xff]   ;;  %v16837_v47 = vld [vmem:[%s17519_s10 + $0x2d04] ss:$16 sps:$4 sm:$0xff]  }
 0x5f8   : > { %11039 = vmatprep.subr.bf16.mxu0 %v16753_v19  ;;  %12064 = vmatprep.subr.bf16.mxu1 %v16756_v51  ;;  %v16840_v19 = vld [vmem:[%s17519_s10 + $0x2d0c] ss:$16 sps:$4 sm:$0xff]   ;;  %v16835_v51 = vld [vmem:[%s17519_s10 + $0x2d00] ss:$16 sps:$4 sm:$0xff]  }
 0x5fb   : > { %11040 = vmatpush1.bf16.msra.mxu0 %v16751_v53  ;;  %12065 = vmatpush1.bf16.msra.mxu1 %v16754_v25  ;;  %v16838_v53 = vld [vmem:[%s17519_s10 + $0x2d08] ss:$16 sps:$4 sm:$0xff]   ;;  %v16843_v25 = vld [vmem:[%s17519_s10 + $0x2d24] ss:$16 sps:$4 sm:$0xff]  }
 0x5fc   : > { %11041 = vmatprep.subr.bf16.mxu0 %v16759_v54  ;;  %12066 = vmatprep.subr.bf16.mxu1 %v16762_v55  ;;  %v16846_v54 = vld [vmem:[%s17519_s10 + $0x2d2c] ss:$16 sps:$4 sm:$0xff]   ;;  %v16841_v55 = vld [vmem:[%s17519_s10 + $0x2d20] ss:$16 sps:$4 sm:$0xff]  }
 0x5ff   : > { %11042 = vmatpush1.bf16.msra.mxu0 %v16757_v44  ;;  %12067 = vmatpush1.bf16.msra.mxu1 %v16760_v56  ;;  %v16844_v44 = vld [vmem:[%s17519_s10 + $0x2d28] ss:$16 sps:$4 sm:$0xff]   ;;  %v16849_v56 = vld [vmem:[%s17519_s10 + $0x2d44] ss:$16 sps:$4 sm:$0xff]  }
 0x600   : > { %11043 = vmatprep.subr.bf16.mxu0 %v16765_v57  ;;  %12068 = vmatprep.subr.bf16.mxu1 %v16768_v48  ;;  %v16852_v57 = vld [vmem:[%s17519_s10 + $0x2d4c] ss:$16 sps:$4 sm:$0xff]   ;;  %v16847_v48 = vld [vmem:[%s17519_s10 + $0x2d40] ss:$16 sps:$4 sm:$0xff]  }
 0x603   : > { %11044 = vmatpush1.bf16.msra.mxu0 %v16763_v61  ;;  %12069 = vmatpush1.bf16.msra.mxu1 %v16766_v62  ;;  %v16850_v61 = vld [vmem:[%s17519_s10 + $0x2d48] ss:$16 sps:$4 sm:$0xff]   ;;  %v16855_v62 = vld [vmem:[%s17519_s10 + $0x2d64] ss:$16 sps:$4 sm:$0xff]  }
 0x604   : > { %11045 = vmatprep.subr.bf16.mxu0 %v16771_v0  ;;  %12070 = vmatprep.subr.bf16.mxu1 %v16774_v50  ;;  %v16858_v0 = vld [vmem:[%s17519_s10 + $0x2d6c] ss:$16 sps:$4 sm:$0xff]   ;;  %v16853_v50 = vld [vmem:[%s17519_s10 + $0x2d60] ss:$16 sps:$4 sm:$0xff]  }
 0x607   : > { %11046 = vmatpush1.bf16.msra.mxu0 %v16769_v1  ;;  %12071 = vmatpush1.bf16.msra.mxu1 %v16772_v35  ;;  %v16856_v1 = vld [vmem:[%s17519_s10 + $0x2d68] ss:$16 sps:$4 sm:$0xff]   ;;  %v16861_v35 = vld [vmem:[%s17519_s10 + $0x2d84] ss:$16 sps:$4 sm:$0xff]  }
 0x608   : > { %11047 = vmatprep.subr.bf16.mxu0 %v16777_v2  ;;  %12072 = vmatprep.subr.bf16.mxu1 %v16780_v58  ;;  %v16864_v2 = vld [vmem:[%s17519_s10 + $0x2d8c] ss:$16 sps:$4 sm:$0xff]   ;;  %v16859_v58 = vld [vmem:[%s17519_s10 + $0x2d80] ss:$16 sps:$4 sm:$0xff]  }
 0x60b   : > { %11048 = vmatpush1.bf16.msra.mxu0 %v16775_v4  ;;  %12073 = vmatpush1.bf16.msra.mxu1 %v16778_v45  ;;  %v16867_v4 = vld [vmem:[%s17519_s10 + $0x2da4] ss:$16 sps:$4 sm:$0xff]   ;;  %v16870_v45 = vld [vmem:[%s17519_s10 + $0x2dac] ss:$16 sps:$4 sm:$0xff]  }
 0x60c   : > { %11049 = vmatprep.subr.bf16.mxu0 %v16783_v7  ;;  %12074 = vmatprep.subr.bf16.mxu1 %v16786_v9  ;;  %v16865_v7 = vld [vmem:[%s17519_s10 + $0x2da0] ss:$16 sps:$4 sm:$0xff]   ;;  %v16868_v9 = vld [vmem:[%s17519_s10 + $0x2da8] ss:$16 sps:$4 sm:$0xff]  }
 0x60f   : > { %11050 = vmatpush1.bf16.msra.mxu0 %v16781_v38  ;;  %12075 = vmatpush1.bf16.msra.mxu1 %v16784_v11  ;;  %v16873_v38 = vld [vmem:[%s17519_s10 + $0x2dc4] ss:$16 sps:$4 sm:$0xff]   ;;  %v16876_v11 = vld [vmem:[%s17519_s10 + $0x2dcc] ss:$16 sps:$4 sm:$0xff]  }
 0x610   : > { %11060 = vmatprep.subr.bf16.mxu0 %v16789_v12  ;;  %12085 = vmatprep.subr.bf16.mxu1 %v16792_v59  ;;  %v16871_v12 = vld [vmem:[%s17519_s10 + $0x2dc0] ss:$16 sps:$4 sm:$0xff]   ;;  %v16874_v59 = vld [vmem:[%s17519_s10 + $0x2dc8] ss:$16 sps:$4 sm:$0xff]  }
 0x612   : > { %11052 = vmatmul.mubr.bf16.vlgmr.msra.gmra.mrb[0].mxu0 %v2251_v63  ;;  %12077 = vmatmul.mubr.bf16.vlgmr.msra.gmra.mrb[0].mxu1 %v2251_v63  ;;  %v16882_v63 = vld [vmem:[%s17519_s10 + $0x2dec] ss:$16 sps:$4 sm:$0xff]  }
 0x613   : > { %11061 = vmatpush1.bf16.msra.mxu0 %v16787_v16  ;;  %12086 = vmatpush1.bf16.msra.mxu1 %v16790_v5  ;;  %v16877_v16 = vld [vmem:[%s17519_s10 + $0x2de0] ss:$16 sps:$4 sm:$0xff]   ;;  %v16880_v5 = vld [vmem:[%s17519_s10 + $0x2de8] ss:$16 sps:$4 sm:$0xff]  }
 0x614   : > { %11062 = vmatprep.subr.bf16.mxu0 %v16795_v52  ;;  %12087 = vmatprep.subr.bf16.mxu1 %v16798_v17  ;;  %v16886_v52 = vld [vmem:[%s17519_s10 + $0x2e04] ss:$16 sps:$4 sm:$0xff]   ;;  %v16889_v17 = vld [vmem:[%s17519_s10 + $0x2e0c] ss:$16 sps:$4 sm:$0xff]  }
 0x615   : > { %11092 = vmatprep.mubr.bf16.mxu0 %v19211_v8  ;;  %12117 = vmatprep.mubr.bf16.mxu1 %v19211_v8 }
 0x617   : > { %11063 = vmatpush1.bf16.msra.mxu0 %v16793_v6  ;;  %12088 = vmatpush1.bf16.msra.mxu1 %v16796_v18  ;;  %v19277_v6 = vrot.slane %v19196_v10, %v17585_v49  ;;  %v16884_v18 = vld [vmem:[%s17519_s10 + $0x2e00] ss:$16 sps:$4 sm:$0xff]  }
 0x618   : > { %11064 = vmatprep.subr.bf16.mxu0 %v16801_v20  ;;  %12089 = vmatprep.subr.bf16.mxu1 %v16804_v22  ;;  %v16887_v20 = vld [vmem:[%s17519_s10 + $0x2e08] ss:$16 sps:$4 sm:$0xff]   ;;  %v16892_v22 = vld [vmem:[%s17519_s10 + $0x2e24] ss:$16 sps:$4 sm:$0xff]   ;;  %v16890_v10 = vld [vmem:[%s17519_s10 + $0x2e20] ss:$16 sps:$4 sm:$0xff]  }
 0x61b   : > { %11065 = vmatpush1.bf16.msra.mxu0 %v16799_v24  ;;  %12090 = vmatpush1.bf16.msra.mxu1 %v16802_v26  ;;  %v16895_v24 = vld [vmem:[%s17519_s10 + $0x2e2c] ss:$16 sps:$4 sm:$0xff]   ;;  %v2254_v26 = vcombine.high %v19211_v8, %v19211_v8  ;;  %v16896_v8 = vld [vmem:[%s17519_s10 + $0x2e40] ss:$16 sps:$4 sm:$0xff]  }
 0x61c   : > { %11066 = vmatprep.subr.bf16.mxu0 %v16807_v60  ;;  %12091 = vmatprep.subr.bf16.mxu1 %v16810_v27  ;;  %v16893_v60 = vld [vmem:[%s17519_s10 + $0x2e28] ss:$16 sps:$4 sm:$0xff]   ;;  %v16898_v27 = vld [vmem:[%s17519_s10 + $0x2e44] ss:$16 sps:$4 sm:$0xff]  }
 0x61f   : > { %11067 = vmatpush1.bf16.msra.mxu0 %v16805_v28  ;;  %12092 = vmatpush1.bf16.msra.mxu1 %v16808_v29  ;;  %v16901_v28 = vld [vmem:[%s17519_s10 + $0x2e4c] ss:$16 sps:$4 sm:$0xff]   ;;  %v16899_v29 = vld [vmem:[%s17519_s10 + $0x2e48] ss:$16 sps:$4 sm:$0xff]  }
 0x620   : > { %11068 = vmatprep.subr.bf16.mxu0 %v16813_v30  ;;  %12093 = vmatprep.subr.bf16.mxu1 %v16816_v15  ;;  %v16904_v30 = vld [vmem:[%s17519_s10 + $0x2e64] ss:$16 sps:$4 sm:$0xff]   ;;  %v16907_v15 = vld [vmem:[%s17519_s10 + $0x2e6c] ss:$16 sps:$4 sm:$0xff]  }
 0x623   : > { %11069 = vmatpush1.bf16.msra.mxu0 %v16811_v31  ;;  %12094 = vmatpush1.bf16.msra.mxu1 %v16814_v33  ;;  %v16902_v31 = vld [vmem:[%s17519_s10 + $0x2e60] ss:$16 sps:$4 sm:$0xff]   ;;  %v16905_v33 = vld [vmem:[%s17519_s10 + $0x2e68] ss:$16 sps:$4 sm:$0xff]  }
 0x624   : > { %11070 = vmatprep.subr.bf16.mxu0 %v16819_v34  ;;  %12095 = vmatprep.subr.bf16.mxu1 %v16822_v36  ;;  %v16910_v34 = vld [vmem:[%s17519_s10 + $0x2e84] ss:$16 sps:$4 sm:$0xff]   ;;  %v16913_v36 = vld [vmem:[%s17519_s10 + $0x2e8c] ss:$16 sps:$4 sm:$0xff]  }
 0x627   : > { %11071 = vmatpush1.bf16.msra.mxu0 %v16817_v37  ;;  %12096 = vmatpush1.bf16.msra.mxu1 %v16820_v23  ;;  %v16908_v37 = vld [vmem:[%s17519_s10 + $0x2e80] ss:$16 sps:$4 sm:$0xff]   ;;  %v16911_v23 = vld [vmem:[%s17519_s10 + $0x2e88] ss:$16 sps:$4 sm:$0xff]  }
 0x628   : > { %11072 = vmatprep.subr.bf16.mxu0 %v16825_v39  ;;  %12097 = vmatprep.subr.bf16.mxu1 %v16828_v40  ;;  %v16916_v39 = vld [vmem:[%s17519_s10 + $0x2ea4] ss:$16 sps:$4 sm:$0xff]   ;;  %v16919_v40 = vld [vmem:[%s17519_s10 + $0x2eac] ss:$16 sps:$4 sm:$0xff]  }
 0x62b   : > { %11073 = vmatpush1.bf16.msra.mxu0 %v16823_v21  ;;  %12098 = vmatpush1.bf16.msra.mxu1 %v16826_v32  ;;  %v16914_v21 = vld [vmem:[%s17519_s10 + $0x2ea0] ss:$16 sps:$4 sm:$0xff]   ;;  %v16917_v32 = vld [vmem:[%s17519_s10 + $0x2ea8] ss:$16 sps:$4 sm:$0xff]  }
 0x62c   : > { %11074 = vmatprep.subr.bf16.mxu0 %v16831_v41  ;;  %12099 = vmatprep.subr.bf16.mxu1 %v16834_v43  ;;  %v16922_v41 = vld [vmem:[%s17519_s10 + $0x2ec4] ss:$16 sps:$4 sm:$0xff]   ;;  %v16925_v43 = vld [vmem:[%s17519_s10 + $0x2ecc] ss:$16 sps:$4 sm:$0xff]  }
 0x62f   : > { %11075 = vmatpush1.bf16.msra.mxu0 %v16829_v13  ;;  %12100 = vmatpush1.bf16.msra.mxu1 %v16832_v46  ;;  %v16920_v13 = vld [vmem:[%s17519_s10 + $0x2ec0] ss:$16 sps:$4 sm:$0xff]   ;;  %v16923_v46 = vld [vmem:[%s17519_s10 + $0x2ec8] ss:$16 sps:$4 sm:$0xff]  }
 0x630   : > { %11076 = vmatprep.subr.bf16.mxu0 %v16837_v47  ;;  %12101 = vmatprep.subr.bf16.mxu1 %v16840_v19  ;;  %v16928_v47 = vld [vmem:[%s17519_s10 + $0x2ee4] ss:$16 sps:$4 sm:$0xff]   ;;  %v16931_v19 = vld [vmem:[%s17519_s10 + $0x2eec] ss:$16 sps:$4 sm:$0xff]  }
 0x633   : > { %11077 = vmatpush1.bf16.msra.mxu0 %v16835_v51  ;;  %12102 = vmatpush1.bf16.msra.mxu1 %v16838_v53  ;;  %v16926_v51 = vld [vmem:[%s17519_s10 + $0x2ee0] ss:$16 sps:$4 sm:$0xff]   ;;  %v16929_v53 = vld [vmem:[%s17519_s10 + $0x2ee8] ss:$16 sps:$4 sm:$0xff]  }
 0x634   : > { %11078 = vmatprep.subr.bf16.mxu0 %v16843_v25  ;;  %12103 = vmatprep.subr.bf16.mxu1 %v16846_v54  ;;  %v16934_v25 = vld [vmem:[%s17519_s10 + $0x2f04] ss:$16 sps:$4 sm:$0xff]   ;;  %v16937_v54 = vld [vmem:[%s17519_s10 + $0x2f0c] ss:$16 sps:$4 sm:$0xff]  }
 0x637   : > { %11079 = vmatpush1.bf16.msra.mxu0 %v16841_v55  ;;  %12104 = vmatpush1.bf16.msra.mxu1 %v16844_v44  ;;  %v16932_v55 = vld [vmem:[%s17519_s10 + $0x2f00] ss:$16 sps:$4 sm:$0xff]   ;;  %v16935_v44 = vld [vmem:[%s17519_s10 + $0x2f08] ss:$16 sps:$4 sm:$0xff]  }
 0x638   : > { %11080 = vmatprep.subr.bf16.mxu0 %v16849_v56  ;;  %12105 = vmatprep.subr.bf16.mxu1 %v16852_v57  ;;  %v16940_v56 = vld [vmem:[%s17519_s10 + $0x2f24] ss:$16 sps:$4 sm:$0xff]   ;;  %v16943_v57 = vld [vmem:[%s17519_s10 + $0x2f2c] ss:$16 sps:$4 sm:$0xff]  }
 0x63b   : > { %11081 = vmatpush1.bf16.msra.mxu0 %v16847_v48  ;;  %12106 = vmatpush1.bf16.msra.mxu1 %v16850_v61  ;;  %v16938_v48 = vld [vmem:[%s17519_s10 + $0x2f20] ss:$16 sps:$4 sm:$0xff]   ;;  %v16941_v61 = vld [vmem:[%s17519_s10 + $0x2f28] ss:$16 sps:$4 sm:$0xff]  }
 0x63c   : > { %11082 = vmatprep.subr.bf16.mxu0 %v16855_v62  ;;  %12107 = vmatprep.subr.bf16.mxu1 %v16858_v0  ;;  %v16946_v62 = vld [vmem:[%s17519_s10 + $0x2f44] ss:$16 sps:$4 sm:$0xff]   ;;  %v16949_v0 = vld [vmem:[%s17519_s10 + $0x2f4c] ss:$16 sps:$4 sm:$0xff]  }
 0x63f   : > { %11083 = vmatpush1.bf16.msra.mxu0 %v16853_v50  ;;  %12108 = vmatpush1.bf16.msra.mxu1 %v16856_v1  ;;  %v16944_v50 = vld [vmem:[%s17519_s10 + $0x2f40] ss:$16 sps:$4 sm:$0xff]   ;;  %v16947_v1 = vld [vmem:[%s17519_s10 + $0x2f48] ss:$16 sps:$4 sm:$0xff]  }
 0x640   : > { %11084 = vmatprep.subr.bf16.mxu0 %v16861_v35  ;;  %12109 = vmatprep.subr.bf16.mxu1 %v16864_v2  ;;  %v16952_v35 = vld [vmem:[%s17519_s10 + $0x2f64] ss:$16 sps:$4 sm:$0xff]   ;;  %v16955_v2 = vld [vmem:[%s17519_s10 + $0x2f6c] ss:$16 sps:$4 sm:$0xff]  }
 0x643   : > { %11085 = vmatpush1.bf16.msra.mxu0 %v16859_v58  ;;  %12110 = vmatpush1.bf16.msra.mxu1 %v16862_v3  ;;  %v16950_v58 = vld [vmem:[%s17519_s10 + $0x2f60] ss:$16 sps:$4 sm:$0xff]   ;;  %v16953_v3 = vld [vmem:[%s17519_s10 + $0x2f68] ss:$16 sps:$4 sm:$0xff]  }
 0x644   : > { %11086 = vmatprep.subr.bf16.mxu0 %v16867_v4  ;;  %12111 = vmatprep.subr.bf16.mxu1 %v16870_v45  ;;  %v16958_v4 = vld [vmem:[%s17519_s10 + $0x2f84] ss:$16 sps:$4 sm:$0xff]   ;;  %v16961_v45 = vld [vmem:[%s17519_s10 + $0x2f8c] ss:$16 sps:$4 sm:$0xff]  }
 0x647   : > { %11087 = vmatpush1.bf16.msra.mxu0 %v16865_v7  ;;  %12112 = vmatpush1.bf16.msra.mxu1 %v16868_v9  ;;  %v16956_v7 = vld [vmem:[%s17519_s10 + $0x2f80] ss:$16 sps:$4 sm:$0xff]   ;;  %v16959_v9 = vld [vmem:[%s17519_s10 + $0x2f88] ss:$16 sps:$4 sm:$0xff]  }
 0x648   : > { %11088 = vmatprep.subr.bf16.mxu0 %v16873_v38  ;;  %12113 = vmatprep.subr.bf16.mxu1 %v16876_v11  ;;  %v16964_v38 = vld [vmem:[%s17519_s10 + $0x2fa4] ss:$16 sps:$4 sm:$0xff]   ;;  %v16967_v11 = vld [vmem:[%s17519_s10 + $0x2fac] ss:$16 sps:$4 sm:$0xff]  }
 0x64b   : > { %11089 = vmatpush1.bf16.msra.mxu0 %v16871_v12  ;;  %12114 = vmatpush1.bf16.msra.mxu1 %v16874_v59  ;;  %v16962_v12 = vld [vmem:[%s17519_s10 + $0x2fa0] ss:$16 sps:$4 sm:$0xff]   ;;  %v16965_v59 = vld [vmem:[%s17519_s10 + $0x2fa8] ss:$16 sps:$4 sm:$0xff]  }
 0x64c   : > { %11090 = vmatprep.subr.bf16.mxu0 %v16879_v14  ;;  %12115 = vmatprep.subr.bf16.mxu1 %v16882_v63  ;;  %v16970_v14 = vld [vmem:[%s17519_s10 + $0x2fc4] ss:$16 sps:$4 sm:$0xff]   ;;  %v16973_v63 = vld [vmem:[%s17519_s10 + $0x2fcc] ss:$16 sps:$4 sm:$0xff]  }
 0x64f   : > { %11091 = vmatpush1.bf16.msra.mxu0 %v16877_v16  ;;  %12116 = vmatpush1.bf16.msra.mxu1 %v16880_v5  ;;  %v16968_v16 = vld [vmem:[%s17519_s10 + $0x2fc0] ss:$16 sps:$4 sm:$0xff]   ;;  %v16971_v5 = vld [vmem:[%s17519_s10 + $0x2fc8] ss:$16 sps:$4 sm:$0xff]  }
 0x650   : > { %11101 = vmatprep.subr.bf16.mxu0 %v16886_v52  ;;  %12126 = vmatprep.subr.bf16.mxu1 %v16889_v17  ;;  %v16976_v52 = vld [vmem:[%s17519_s10 + $0x2fe4] ss:$16 sps:$4 sm:$0xff]   ;;  %v16979_v17 = vld [vmem:[%s17519_s10 + $0x2fec] ss:$16 sps:$4 sm:$0xff]  }
 0x652   : > { %11093 = vmatmul.mubr.bf16.vlgmr.msra.gmra.mrb[0].mxu0 %v19277_v6  ;;  %12118 = vmatmul.mubr.bf16.vlgmr.msra.gmra.mrb[0].mxu1 %v19277_v6 }
 0x653   : > { %11102 = vmatpush1.bf16.msra.mxu0 %v16884_v18  ;;  %12127 = vmatpush1.bf16.msra.mxu1 %v16887_v20  ;;  %v16974_v18 = vld [vmem:[%s17519_s10 + $0x2fe0] ss:$16 sps:$4 sm:$0xff]   ;;  %v16977_v20 = vld [vmem:[%s17519_s10 + $0x2fe8] ss:$16 sps:$4 sm:$0xff]  }
 0x654   : > { %11103 = vmatprep.subr.bf16.mxu0 %v16892_v22  ;;  %12128 = vmatprep.subr.bf16.mxu1 %v16895_v24  ;;  %v16982_v22 = vld [vmem:[%s17519_s10 + $0x3004] ss:$16 sps:$4 sm:$0xff]   ;;  %v16985_v24 = vld [vmem:[%s17519_s10 + $0x300c] ss:$16 sps:$4 sm:$0xff]  }
 0x655   : > { %11133 = vmatprep.mubr.bf16.mxu0 %v2254_v26  ;;  %12158 = vmatprep.mubr.bf16.mxu1 %v2254_v26  ;;  %v2252_v26 = vcombine.high %v19277_v6, %v19277_v6  ;;  %v16989_v6 = vld [vmem:[%s17519_s10 + $0x3028] ss:$16 sps:$4 sm:$0xff]  }
 0x657   : > { %11104 = vmatpush1.bf16.msra.mxu0 %v16890_v10  ;;  %12129 = vmatpush1.bf16.msra.mxu1 %v16893_v60  ;;  %v16980_v10 = vld [vmem:[%s17519_s10 + $0x3000] ss:$16 sps:$4 sm:$0xff]   ;;  %v16983_v60 = vld [vmem:[%s17519_s10 + $0x3008] ss:$16 sps:$4 sm:$0xff]  }
 0x658   : > { %11105 = vmatprep.subr.bf16.mxu0 %v16898_v27  ;;  %12130 = vmatprep.subr.bf16.mxu1 %v16901_v28  ;;  %v16988_v27 = vld [vmem:[%s17519_s10 + $0x3024] ss:$16 sps:$4 sm:$0xff]   ;;  %v16991_v28 = vld [vmem:[%s17519_s10 + $0x302c] ss:$16 sps:$4 sm:$0xff]  }
 0x65b   : > { %11106 = vmatpush1.bf16.msra.mxu0 %v16896_v8  ;;  %12131 = vmatpush1.bf16.msra.mxu1 %v16899_v29  ;;  %v16986_v8 = vld [vmem:[%s17519_s10 + $0x3020] ss:$16 sps:$4 sm:$0xff]   ;;  %v16994_v29 = vld [vmem:[%s17519_s10 + $0x3044] ss:$16 sps:$4 sm:$0xff]  }
 0x65c   : > { %11107 = vmatprep.subr.bf16.mxu0 %v16904_v30  ;;  %12132 = vmatprep.subr.bf16.mxu1 %v16907_v15  ;;  %v16997_v30 = vld [vmem:[%s17519_s10 + $0x304c] ss:$16 sps:$4 sm:$0xff]   ;;  %v17284_v15 = vmov 0  }
 0x65f   : > { %11108 = vmatpush1.bf16.msra.mxu0 %v16902_v31  ;;  %12133 = vmatpush1.bf16.msra.mxu1 %v16905_v33  ;;  %v16992_v31 = vld [vmem:[%s17519_s10 + $0x3040] ss:$16 sps:$4 sm:$0xff]   ;;  %v16995_v33 = vld [vmem:[%s17519_s10 + $0x3048] ss:$16 sps:$4 sm:$0xff]  }
 0x660   : > { %11109 = vmatprep.subr.bf16.mxu0 %v16910_v34  ;;  %12134 = vmatprep.subr.bf16.mxu1 %v16913_v36  ;;  %v17000_v34 = vld [vmem:[%s17519_s10 + $0x3064] ss:$16 sps:$4 sm:$0xff]   ;;  %v17003_v36 = vld [vmem:[%s17519_s10 + $0x306c] ss:$16 sps:$4 sm:$0xff]  }
 0x663   : > { %11110 = vmatpush1.bf16.msra.mxu0 %v16908_v37  ;;  %12135 = vmatpush1.bf16.msra.mxu1 %v16911_v23  ;;  %v16998_v37 = vld [vmem:[%s17519_s10 + $0x3060] ss:$16 sps:$4 sm:$0xff]   ;;  %v17001_v23 = vld [vmem:[%s17519_s10 + $0x3068] ss:$16 sps:$4 sm:$0xff]  }
 0x664   : > { %11111 = vmatprep.subr.bf16.mxu0 %v16916_v39  ;;  %12136 = vmatprep.subr.bf16.mxu1 %v16919_v40  ;;  %v17006_v39 = vld [vmem:[%s17519_s10 + $0x3084] ss:$16 sps:$4 sm:$0xff]   ;;  %v17009_v40 = vld [vmem:[%s17519_s10 + $0x308c] ss:$16 sps:$4 sm:$0xff]  }
 0x667   : > { %11112 = vmatpush1.bf16.msra.mxu0 %v16914_v21  ;;  %12137 = vmatpush1.bf16.msra.mxu1 %v16917_v32  ;;  %v17004_v21 = vld [vmem:[%s17519_s10 + $0x3080] ss:$16 sps:$4 sm:$0xff]   ;;  %v17007_v32 = vld [vmem:[%s17519_s10 + $0x3088] ss:$16 sps:$4 sm:$0xff]  }
 0x668   : > { %11113 = vmatprep.subr.bf16.mxu0 %v16922_v41  ;;  %12138 = vmatprep.subr.bf16.mxu1 %v16925_v43  ;;  %v17012_v41 = vld [vmem:[%s17519_s10 + $0x30a4] ss:$16 sps:$4 sm:$0xff]   ;;  %v17015_v43 = vld [vmem:[%s17519_s10 + $0x30ac] ss:$16 sps:$4 sm:$0xff]  }
 0x66b   : > { %11114 = vmatpush1.bf16.msra.mxu0 %v16920_v13  ;;  %12139 = vmatpush1.bf16.msra.mxu1 %v16923_v46  ;;  %v17010_v13 = vld [vmem:[%s17519_s10 + $0x30a0] ss:$16 sps:$4 sm:$0xff]   ;;  %v17013_v46 = vld [vmem:[%s17519_s10 + $0x30a8] ss:$16 sps:$4 sm:$0xff]  }
 0x66c   : > { %11115 = vmatprep.subr.bf16.mxu0 %v16928_v47  ;;  %12140 = vmatprep.subr.bf16.mxu1 %v16931_v19  ;;  %v17018_v47 = vld [vmem:[%s17519_s10 + $0x30c4] ss:$16 sps:$4 sm:$0xff]   ;;  %v17021_v19 = vld [vmem:[%s17519_s10 + $0x30cc] ss:$16 sps:$4 sm:$0xff]  }
 0x66f   : > { %11116 = vmatpush1.bf16.msra.mxu0 %v16926_v51  ;;  %12141 = vmatpush1.bf16.msra.mxu1 %v16929_v53  ;;  %v17016_v51 = vld [vmem:[%s17519_s10 + $0x30c0] ss:$16 sps:$4 sm:$0xff]   ;;  %v17019_v53 = vld [vmem:[%s17519_s10 + $0x30c8] ss:$16 sps:$4 sm:$0xff]  }
 0x670   : > { %11117 = vmatprep.subr.bf16.mxu0 %v16934_v25  ;;  %12142 = vmatprep.subr.bf16.mxu1 %v16937_v54  ;;  %v17024_v25 = vld [vmem:[%s17519_s10 + $0x30e4] ss:$16 sps:$4 sm:$0xff]   ;;  %v17027_v54 = vld [vmem:[%s17519_s10 + $0x30ec] ss:$16 sps:$4 sm:$0xff]  }
 0x673   : > { %11118 = vmatpush1.bf16.msra.mxu0 %v16932_v55  ;;  %12143 = vmatpush1.bf16.msra.mxu1 %v16935_v44  ;;  %v17022_v55 = vld [vmem:[%s17519_s10 + $0x30e0] ss:$16 sps:$4 sm:$0xff]   ;;  %v17025_v44 = vld [vmem:[%s17519_s10 + $0x30e8] ss:$16 sps:$4 sm:$0xff]  }
 0x674   : > { %11119 = vmatprep.subr.bf16.mxu0 %v16940_v56  ;;  %12144 = vmatprep.subr.bf16.mxu1 %v16943_v57  ;;  %v12727_v56 = vld.sshfl [vmem:[%s19463_s0 + $0x30] sm:$0x1 pattern:$0x75316420]  ;;  %v17028_v57 = vld [vmem:[%s17532_s14 + $0x40] sm:$0xff]  }
 0x677   : > { %11120 = vmatpush1.bf16.msra.mxu0 %v16938_v48  ;;  %12145 = vmatpush1.bf16.msra.mxu1 %v16941_v61  ;;  %v17029_v48 = vld [vmem:[%s17532_s14 + $0xc0] sm:$0xff]   ;;  %v2268_v61 = vrot.slane %v12727_v56, %v17585_v49  ;;  %v17035_v49 = vld [vmem:[%s17532_s14 + $0x88] sm:$0xff]  }
 0x678   : > { %11121 = vmatprep.subr.bf16.mxu0 %v16946_v62  ;;  %12146 = vmatprep.subr.bf16.mxu1 %v16949_v0  ;;  %v17030_v62 = vld [vmem:[%s17532_s14] sm:$0xff]  }
 0x679   : > { %v17031_v0 = vld [vmem:[%s17532_s14 + $0x80] sm:$0xff]  }
 0x67b   : > { %11122 = vmatpush1.bf16.msra.mxu0 %v16944_v50  ;;  %12147 = vmatpush1.bf16.msra.mxu1 %v16947_v1  ;;  %v17032_v50 = vld [vmem:[%s17532_s14 + $0x48] sm:$0xff]  }
 0x67c   : > { %11123 = vmatprep.subr.bf16.mxu0 %v16952_v35  ;;  %12148 = vmatprep.subr.bf16.mxu1 %v16955_v2  ;;  %v17033_v1 = vld [vmem:[%s17532_s14 + $0xc8] sm:$0xff]   ;;  %v17036_v2 = vld [vmem:[%s17532_s14 + $0x50] sm:$0xff]  }
 0x67d   : > { %v17034_v35 = vld [vmem:[%s17532_s14 + $0x8] sm:$0xff]  }
 0x67f   : > { %11124 = vmatpush1.bf16.msra.mxu0 %v16950_v58  ;;  %12149 = vmatpush1.bf16.msra.mxu1 %v16953_v3  ;;  %v17037_v58 = vld [vmem:[%s17532_s14 + $0xd0] sm:$0xff]  }
 0x680   : > { %11125 = vmatprep.subr.bf16.mxu0 %v16958_v4  ;;  %12150 = vmatprep.subr.bf16.mxu1 %v16961_v45  ;;  %v17038_v3 = vld [vmem:[%s17532_s14 + $0x10] sm:$0xff]   ;;  %v17040_v45 = vld [vmem:[%s17532_s14 + $0x58] sm:$0xff]  }
 0x681   : > { %v17039_v4 = vld [vmem:[%s17532_s14 + $0x90] sm:$0xff]  }
 0x683   : > { %11126 = vmatpush1.bf16.msra.mxu0 %v16956_v7  ;;  %12151 = vmatpush1.bf16.msra.mxu1 %v16959_v9  ;;  %v17041_v7 = vld [vmem:[%s17532_s14 + $0xd8] sm:$0xff]  }
 0x684   : > { %11127 = vmatprep.subr.bf16.mxu0 %v16964_v38  ;;  %12152 = vmatprep.subr.bf16.mxu1 %v16967_v11  ;;  %v17042_v9 = vld [vmem:[%s17532_s14 + $0x18] sm:$0xff]   ;;  %v17044_v11 = vld [vmem:[%s17532_s14 + $0x60] sm:$0xff]  }
 0x685   : > { %v17043_v38 = vld [vmem:[%s17532_s14 + $0x98] sm:$0xff]  }
 0x687   : > { %11128 = vmatpush1.bf16.msra.mxu0 %v16962_v12  ;;  %12153 = vmatpush1.bf16.msra.mxu1 %v16965_v59  ;;  %v17045_v12 = vld [vmem:[%s17532_s14 + $0xe0] sm:$0xff]  }
 0x688   : > { %11129 = vmatprep.subr.bf16.mxu0 %v16970_v14  ;;  %12154 = vmatprep.subr.bf16.mxu1 %v16973_v63  ;;  %v17046_v59 = vld [vmem:[%s17532_s14 + $0x20] sm:$0xff]   ;;  %v17048_v63 = vld [vmem:[%s17532_s14 + $0x68] sm:$0xff]  }
 0x689   : > { %v17047_v14 = vld [vmem:[%s17532_s14 + $0xa0] sm:$0xff]  }
 0x68b   : > { %11130 = vmatpush1.bf16.msra.mxu0 %v16968_v16  ;;  %12155 = vmatpush1.bf16.msra.mxu1 %v16971_v5  ;;  %v17049_v16 = vld [vmem:[%s17532_s14 + $0xe8] sm:$0xff]  }
 0x68c   : > { %11131 = vmatprep.subr.bf16.mxu0 %v16976_v52  ;;  %12156 = vmatprep.subr.bf16.mxu1 %v16979_v17  ;;  %v17050_v5 = vld [vmem:[%s17532_s14 + $0x28] sm:$0xff]   ;;  %v17052_v17 = vld [vmem:[%s17532_s14 + $0x70] sm:$0xff]  }
 0x68d   : > { %v17051_v52 = vld [vmem:[%s17532_s14 + $0xa8] sm:$0xff]  }
 0x68f   : > { %11132 = vmatpush1.bf16.msra.mxu0 %v16974_v18  ;;  %12157 = vmatpush1.bf16.msra.mxu1 %v16977_v20  ;;  %v17053_v18 = vld [vmem:[%s17532_s14 + $0xf0] sm:$0xff]  }
 0x690   : > { %11142 = vmatprep.subr.bf16.mxu0 %v16982_v22  ;;  %12167 = vmatprep.subr.bf16.mxu1 %v16985_v24  ;;  %v17054_v20 = vld [vmem:[%s17532_s14 + $0x30] sm:$0xff]   ;;  %v17056_v24 = vld [vmem:[%s17532_s14 + $0x78] sm:$0xff]  }
 0x691   : > { %v17055_v22 = vld [vmem:[%s17532_s14 + $0xb0] sm:$0xff]  }
 0x692   : > { %11134 = vmatmul.mubr.bf16.vlgmr.msra.gmra.mrb[0].mxu0 %v2252_v26  ;;  %12159 = vmatmul.mubr.bf16.vlgmr.msra.gmra.mrb[0].mxu1 %v2252_v26  ;;  %v17057_v26 = vld [vmem:[%s17532_s14 + $0xf8] sm:$0xff]  }
 0x693   : > { %11143 = vmatpush1.bf16.msra.mxu0 %v16980_v10  ;;  %12168 = vmatpush1.bf16.msra.mxu1 %v16983_v60  ;;  %v17058_v10 = vld [vmem:[%s17532_s14 + $0x38] sm:$0xff]  }
 0x694   : > { %11144 = vmatprep.subr.bf16.mxu0 %v16988_v27  ;;  %12169 = vmatprep.subr.bf16.mxu1 %v16991_v28  ;;  %v17059_v60 = vld [vmem:[%s17532_s14 + $0xb8] sm:$0xff]   ;;  %v1936_v27 = vsub.s32 0, %v17577_v42  ;;  %v1944_v28 = vsub.s32 2, %v17577_v42 }
 0x695   : > { %11174 = vmatprep.mubr.bf16.mxu0 %v17284_v15  ;;  %12199 = vmatprep.mubr.bf16.mxu1 %v17284_v15 }
 0x697   : > { %11145 = vmatpush1.bf16.msra.mxu0 %v16986_v8  ;;  %12170 = vmatpush1.bf16.msra.mxu1 %v16989_v6  ;;  %v1932_v8 = vld [vmem:[%s17526_s8] sm:$0xf]  ;;  %v1940_v6 = vsub.s32 1, %v17577_v42 }
 0x698   : > { %11146 = vmatprep.subr.bf16.mxu0 %v16994_v29  ;;  %12171 = vmatprep.subr.bf16.mxu1 %v16997_v30  ;;  %v1948_v29 = vsub.s32 3, %v17577_v42  ;;  %v1937_v30 = vrot.slane %v1932_v8, %v1936_v27  ;;  %v1945_v15 = vrot.slane %v1932_v8, %v1944_v28 }
 0x69b   : > { %11147 = vmatpush1.bf16.msra.mxu0 %v16992_v31  ;;  %12172 = vmatpush1.bf16.msra.mxu1 %v16995_v33  ;;  %v1941_v31 = vrot.slane %v1932_v8, %v1940_v6  ;;  %v1949_v33 = vrot.slane %v1932_v8, %v1948_v29 }
 0x69c   : > { %11148 = vmatprep.subr.bf16.mxu0 %v17000_v34  ;;  %12173 = vmatprep.subr.bf16.mxu1 %v17003_v36 }
 0x69f   : > { %11149 = vmatpush1.bf16.msra.mxu0 %v16998_v37  ;;  %12174 = vmatpush1.bf16.msra.mxu1 %v17001_v23 }
 0x6a0   : > { %11150 = vmatprep.subr.bf16.mxu0 %v17006_v39  ;;  %12175 = vmatprep.subr.bf16.mxu1 %v17009_v40 }
 0x6a3   : > { %11151 = vmatpush1.bf16.msra.mxu0 %v17004_v21  ;;  %12176 = vmatpush1.bf16.msra.mxu1 %v17007_v32 }
 0x6a4   : > { %11152 = vmatprep.subr.bf16.mxu0 %v17012_v41  ;;  %12177 = vmatprep.subr.bf16.mxu1 %v17015_v43 }
 0x6a7   : > { %11153 = vmatpush1.bf16.msra.mxu0 %v17010_v13  ;;  %12178 = vmatpush1.bf16.msra.mxu1 %v17013_v46 }
 0x6a8   : > { %11154 = vmatprep.subr.bf16.mxu0 %v17018_v47  ;;  %12179 = vmatprep.subr.bf16.mxu1 %v17021_v19 }
 0x6ab   : > { %11155 = vmatpush1.bf16.msra.mxu0 %v17016_v51  ;;  %12180 = vmatpush1.bf16.msra.mxu1 %v17019_v53 }
 0x6ac   : > { %11156 = vmatprep.subr.bf16.mxu0 %v17024_v25  ;;  %12181 = vmatprep.subr.bf16.mxu1 %v17027_v54 }
 0x6af   : > { %11157 = vmatpush1.bf16.msra.mxu0 %v17022_v55  ;;  %12182 = vmatpush1.bf16.msra.mxu1 %v17025_v44 }
 0x6b0   : > { %14338 = vmatprep.subr.bf16.mxu0 %v17028_v57  ;;  %14360 = vmatprep.subr.bf16.mxu1 %v17029_v48 }
 0x6b2   : > { %11175 = vmatmul.mubr.bf16.vlgmr.msra.gmra.mrb[0].mxu0 %v2268_v61  ;;  %12200 = vmatmul.mubr.bf16.vlgmr.msra.gmra.mrb[0].mxu1 %v2268_v61 }
 0x6b3   : > { %14339 = vmatpush3.bf16.msra.mxu0 %v17030_v62  ;;  %14361 = vmatpush3.bf16.msra.mxu1 %v17031_v0 }
 0x6b4   : > { %14340 = vmatprep.subr.bf16.mxu0 %v17032_v50  ;;  %14362 = vmatprep.subr.bf16.mxu1 %v17033_v1 }
 0x6b7   : > { %14341 = vmatpush3.bf16.msra.mxu0 %v17034_v35  ;;  %14363 = vmatpush3.bf16.msra.mxu1 %v17035_v49 }
 0x6b8   : > { %14342 = vmatprep.subr.bf16.mxu0 %v17036_v2  ;;  %14364 = vmatprep.subr.bf16.mxu1 %v17037_v58  ;;  %v14329_v2 = vld [vmem:[#allocation8] ss:$0 sm:$0xff] (!%p14328_p0) }
 0x6bb   : > { %14343 = vmatpush3.bf16.msra.mxu0 %v17038_v3  ;;  %14365 = vmatpush3.bf16.msra.mxu1 %v17039_v4 }
 0x6bc   : > { %14344 = vmatprep.subr.bf16.mxu0 %v17040_v45  ;;  %14366 = vmatprep.subr.bf16.mxu1 %v17041_v7 }
 0x6bf   : > { %14345 = vmatpush3.bf16.msra.mxu0 %v17042_v9  ;;  %14367 = vmatpush3.bf16.msra.mxu1 %v17043_v38 }
 0x6c0   : > { %14346 = vmatprep.subr.bf16.mxu0 %v17044_v11  ;;  %14368 = vmatprep.subr.bf16.mxu1 %v17045_v12 }
 0x6c3   : > { %14347 = vmatpush3.bf16.msra.mxu0 %v17046_v59  ;;  %14369 = vmatpush3.bf16.msra.mxu1 %v17047_v14 }
 0x6c4   : > { %14348 = vmatprep.subr.bf16.mxu0 %v17048_v63  ;;  %14370 = vmatprep.subr.bf16.mxu1 %v17049_v16 }
 0x6c7   : > { %14349 = vmatpush3.bf16.msra.mxu0 %v17050_v5  ;;  %14371 = vmatpush3.bf16.msra.mxu1 %v17051_v52 }
 0x6c8   : > { %14350 = vmatprep.subr.bf16.mxu0 %v17052_v17  ;;  %14372 = vmatprep.subr.bf16.mxu1 %v17053_v18 }
 0x6cb   : > { %14351 = vmatpush3.bf16.msra.mxu0 %v17054_v20  ;;  %14373 = vmatpush3.bf16.msra.mxu1 %v17055_v22 }
 0x6cc   : > { %14352 = vmatprep.subr.bf16.mxu0 %v17056_v24  ;;  %14374 = vmatprep.subr.bf16.mxu1 %v17057_v26 }
 0x6cf   : > { %14353 = vmatpush3.bf16.msra.mxu0 %v17058_v10  ;;  %14375 = vmatpush3.bf16.msra.mxu1 %v17059_v60 }
 0x785   : > { %v11176_v34 = vpop.f32.mrb[0].mxu0  ;;  %v12201_v36 = vpop.f32.mrb[0].mxu1 }
 0x786   : > { %v14382_v37 = vadd.f32 %v11176_v34, %v1937_v30  ;;  %v14384_v23 = vadd.f32 %v12201_v36, %v1945_v15  ;;  %v11178_v39 = vpop.f32.mrb[1].mxu0  ;;  %v12203_v40 = vpop.f32.mrb[1].mxu1 }
 0x787   : > { %v14383_v21 = vadd.f32 %v11178_v39, %v1941_v31  ;;  %v14385_v32 = vadd.f32 %v12203_v40, %v1949_v33  ;;  %v11180_v41 = vpop.f32.mrb[2].mxu0  ;;  %v12205_v43 = vpop.f32.mrb[2].mxu1 }
 0x788   : > { %v12208_v13 = vmax.f32 %v14382_v37, 0.0  ;;  %v12210_v46 = vmax.f32 %v14384_v23, 0.0  ;;  %v11181_v47 = vpop.f32.mrb[3].mxu0  ;;  %v12206_v19 = vpop.f32.mrb[3].mxu1 }
 0x789   : > { %v12209_v51 = vmax.f32 %v14383_v21, 0.0  ;;  %v12211_v42 = vmax.f32 %v14385_v32, 0.0 }
 0x78a   : > { %v12212_v54 = vpack.c.bf16 %v12208_v13, %v12208_v13  ;;  %v12214_v55 = vpack.c.bf16 %v12210_v46, %v12210_v46 }
 0x78b   : > { %v12213_v53 = vpack.c.bf16 %v12209_v51, %v12209_v51  ;;  %v12215_v25 = vpack.c.bf16 %v12211_v42, %v12211_v42 }
 0x78d   : > { %12504 = vmatprep.mubr.bf16.mxu0 %v12213_v53  ;;  %12544 = vmatprep.mubr.bf16.mxu1 %v12215_v25 }
 0x78e   : > { %12505 = vmatmul.mubr.bf16.vlgmr.msra.gmra.mrb[4].mxu0 %v12212_v54  ;;  %12545 = vmatmul.mubr.bf16.vlgmr.msra.gmra.mrb[4].mxu1 %v12214_v55 }
 0x85f   : > { %12555 = sbr.rel (%p14328_p0) target bundleno = 2154 (0x86a), region = 60 }
 0x861   : > { %v14354_v44 = vpop.f32.mrb[4].mxu0  ;;  %v14376_v56 = vpop.f32.mrb[4].mxu1 }
 0x862   : > { %v14355_v57 = vpop.f32.mrb[5].mxu0  ;;  %v14377_v48 = vpop.f32.mrb[5].mxu1 }
 0x863   : > { %v14356_v61 = vadd.f32 %v14355_v57, %v14354_v44  ;;  %v14378_v62 = vadd.f32 %v14377_v48, %v14376_v56  ;;  %v14357_v0 = vpop.f32.mrb[6].mxu0  ;;  %v14379_v50 = vpop.f32.mrb[6].mxu1 }
 0x864   : > { %v14358_v1 = vpop.f32.mrb[7].mxu0  ;;  %v14380_v35 = vpop.f32.mrb[7].mxu1 }
 0x865   : > { %v12547_v49 = vadd.f32 %v14378_v62, %v14356_v61 }
 0x867   : > { %v12563_v58 = vadd.f32 %v14329_v2, %v12547_v49 }
 0x869   : > { %12564 = vst [vmem:[#allocation10] sm:$0x3] %v12563_v58 }
 0x86a PF: > { %p14330_p1 = scmp.eq.s32.totalorder %s17264_s21, 0 }
 0x86c   : > { %12568 = sbr.rel (%p14330_p1) target bundleno = 2164 (0x874), region = 64 }
 0x870   : > { %v12569_v3 = vld [vmem:[#allocation10] sm:$0x3] (!%p14330_p1) }
 0x871   : > { %v12570_v4 = vadd.f32 (!%p14330_p1), %v12569_v3, %v12547_v49 }
 0x873   : > { %12571 = vst [vmem:[#allocation10] sm:$0x3] %v12570_v4 }
 0x874 PF: > { %p14611_p4 = scmp.eq.s32.totalorder %s17409_s16, 1  ;;  %s17285_s10 = smov [#allocation10]  }
 0x875   : > { %s12581_s8 = sshll.u32 %s17285_s10, 4  ;;  %s12582_s8 = int_to_ptr.vmem [resolvable:$true] %s12581_s8 }
 0x876   : > { %s17184_s14 = scalar_lea.vmem %s12582_s8, 32  ;;  %p17191_p8 = scmp.lt.s32.totalorder %s12582_s8, %s12582_s8 }
 0x877   : > { %p17185_p7 = scmp.ne.s32.totalorder %s12582_s8, %s17184_s14  ;;  %p17192_p13 = scmp.lt.s32.totalorder %s17184_s14, %s17184_s14 }
 0x879   : > { %p17186_p11 = pnand %p17185_p7, %p14611_p4  ;;  %p17193_p12 = por %p17192_p13, %p17191_p8 }
 0x87b   : > { %p17187_p6 = pneg %p17186_p11 }
 0x87d   : > { %p17194_p10 = pnand %p17193_p12, %p17187_p6 }
 0x87f   : > { %17197 = shalt.err (!%p17194_p10)
}
 0x880   : > { %s17198_s27 = scalar_lea.hbm %s19468_s5, 32 }
 0x881   : > { %p17199_p9 = scmp.ne.s32.totalorder %s19468_s5, %s17198_s27  ;;  %p17204_p5 = scmp.lt.u32.totalorder %s17198_s27, %s19468_s5 }
 0x883   : > { %p17200_p3 = pnand %p17199_p9, %p14611_p4 }
 0x885   : > { %p17201_p2 = pneg %p17200_p3 }
 0x887   : > { %p17206_p0 = pnand %p17204_p5, %p17201_p2 }
 0x889   : > { %17209 = shalt.err (!%p17206_p0)
}
 0x88a   : > { %14591 = dma.vmem_to_hbm [thread:$0]  (%p14611_p4), %s12582_s8, 32, %s19468_s5, [#allocation4]  }
 0x88b   : > { %17247 = dma.done.wait (%p14611_p4), [#allocation4], 32  }
 0x88c   : > { %17249 = vsyncadd (%p14611_p4), [#allocation4], 4294967264 }
 0x88d PF: > { %s23_s23 = sadd.s32 1, %s17272_s23   ;;  %s19493_s28 = sld [smem:[#allocation16_spill]] }
 0x88e   : > { %p20_p1 = scmp.ge.s32.totalorder %s23_s23, 4   ;;  %s19494_s24 = sld [smem:[#allocation15_spill]] }
 0x88f   : > { %s19495_s18 = smov %s17256_s19  ;;  %s19496_s19 = smov %s17260_s20 }
 0x890   : > { %s19498_s21 = smov %s17268_s22  ;;  %22 = sbr.rel (!%p20_p1) target bundleno = 10 (0xa), region = 117 }
 0x893   : > { %s19497_s20 = smov %s19493_s28 }
 0x894   : > { %s19499_s22 = smov %s19494_s24 }
 0x897   :  { %12594 = vsyncpa [#allocation3], 1 }
 0x898   :  { %12596 = vsyncpa [#allocation3 + $0x1], 1 }
 0x899   :  { %12597 = vsyncpa [#allocation6], 1 }
 0x89a   :  { %12599 = vsyncpa [#allocation6 + $0x1], 1 }
 0x89b   :  { %12600 = vsyncpa [#allocation9], 1 }
 0x89c   :  { %12601 = vsyncpa [#allocation4], 1 }
 0x89d   :  { %12603 = vsyncpa [#allocation4 + $0x1], 1 }

</bundles_post_ra>
